<compile_context>
chip_gen: v7x
topology: tpu7x:2x2x1
jax: 0.10.0
libtpu: 0.0.40
codegen_flags: <defaults>
</compile_context>

<pallas_src>
import functools

import jax
import jax.numpy as jnp
import numpy as np
from jax import lax
from jax.experimental import pallas as pl
from jax.experimental.pallas import tpu as pltpu

_MATMUL_DTYPE = jnp.bfloat16     # MXU operands; VPU math stays f32 (v5e has no bf16 VPU).
_LN_EPS = 1e-5


# ----------------------- VMEM / pipelining helpers -------------------------- #
@functools.lru_cache(maxsize=None)
def _vmem_limit_bytes():
    """Raise the scoped-VMEM limit above the 16-32 MiB default while keeping headroom
    below physical capacity (128 MiB on v5e/v6e, 64 MiB per TensorCore on v7x)."""
    try:
        cap = int(pltpu.get_tpu_info().vmem_capacity_bytes)
    except Exception:
        cap = 64 * 1024 * 1024
    return int(min(cap * 3 // 4, 96 * 1024 * 1024))


_buffered_resident_ok = True


def _run_with_resident_fallback(build_and_call):
    """Resident (constant index_map) operands are requested single-buffered via
    pipeline_mode=pl.Buffered(1), halving their VMEM footprint.  If this JAX build does
    not honor pipeline_mode on pallas_call BlockSpecs, fall back to the default
    double-buffered pipeline so the kernel still runs."""
    global _buffered_resident_ok
    if _buffered_resident_ok:
        try:
            return build_and_call(True)
        except Exception:
            _buffered_resident_ok = False
    return build_and_call(False)


def _res_spec(shape, index_map, buffered):
    """BlockSpec for an operand that is identical for every grid step."""
    if buffered:
        return pl.BlockSpec(shape, index_map, pipeline_mode=pl.Buffered(1))
    return pl.BlockSpec(shape, index_map)


# ----------------------------- tiling helpers ------------------------------- #
def _choose_windows_per_block(num_windows, tokens_per_window, group, target_rows=512):
    """Windows per grid step (TB): multiple of `group` (shift-mask period) dividing the
    total window count.  Prefer the largest tile whose row count stays <= target_rows
    (grids run sequentially per TensorCore, so fewer/bigger steps amortize the ~0.35us
    per-step overhead; ~512 rows reaches ~85% of HBM roofline)."""
    # TODO(synk): branch on chip generation (pltpu.get_tpu_info) - on v7x prefer >=2 grid
    # steps (2 TensorCores) while budgeting the per-step footprint against 64 MiB VMEM.
    assert num_windows % group == 0
    cands = [tb for tb in range(group, num_windows + 1, group) if num_windows % tb == 0]

    def key(tb):
        rows = tb * tokens_per_window
        return (rows <= target_rows, rows if rows <= target_rows else -rows)

    return max(cands, key=key)


def _choose_row_tile(total, target=1024):
    """Row tile for the token-wise (residual + norm2 + MLP) kernel."""
    cands = [t for t in range(8, total + 1, 8) if total % t == 0]
    if not cands:
        return total
    fits = [t for t in cands if t <= target]
    return max(fits) if fits else min(cands)


# --------------------- fused norm1 + window attention ----------------------- #
def _window_attn_kernel(x_ref, g1_ref, b1_ref, wq_ref, wk_ref, wv_ref,
                        bq_ref, bk_ref, bv_ref, hmask_ref, bias_ref,
                        projw_ref, projb_ref, o_ref, *,
                        num_heads, windows_per_block, tokens_per_window,
                        mask_group, fuse_ln, eps):
    H = num_heads
    TB, N = windows_per_block, tokens_per_window
    T = TB * N
    C = x_ref.shape[-1]
    R = TB // mask_group
    mm = wq_ref.dtype                                     # bf16 matmul operands

    x = x_ref[...]                                        # (T, C) f32 tokens
    if fuse_ln:                                           # norm1 fused (f32 VPU math)
        mu = jnp.mean(x, axis=-1, keepdims=True)
        xc = x - mu
        var = jnp.mean(xc * xc, axis=-1, keepdims=True)
        x = xc * lax.rsqrt(var + eps) * g1_ref[...] + b1_ref[...]
    xm = x.astype(mm)

    # Three lane-dense MXU matmuls (scale folded into Wq / bq in the wrapper).
    q = jnp.dot(xm, wq_ref[...], preferred_element_type=jnp.float32) + bq_ref[...]
    k = jnp.dot(xm, wk_ref[...], preferred_element_type=jnp.float32) + bk_ref[...]
    v = jnp.dot(xm, wv_ref[...], preferred_element_type=jnp.float32) + bv_ref[...]

    # Row regrouping only (N % 8 == 0): (T, C) -> (TB, N, C); channels stay lane-dense.
    qw = q.reshape(TB, N, C).astype(mm)
    kw = k.reshape(TB, N, C).astype(mm)
    vw = v.reshape(TB, N, C).astype(mm)

    # Per-head attention via channel masking: masking q's channels to head h makes the
    # full-C score contraction equal the head-h score; masking the context output picks
    # head h's channels.  All per-head matmuls share the same (<=128-lane) MXU pass count
    # as hd-wide ones, but the context result stays a lane-dense (T, C) slab.
    o = jnp.zeros((TB, N, C), jnp.float32)
    for h in range(H):                                    # static, unrolled
        hm = hmask_ref[h]                                 # (1, 1, C) 0/1 channel selector
        qh = qw * hm
        s = jnp.einsum("bnc,bmc->bnm", qh, kw,
                       preferred_element_type=jnp.float32)          # (TB, N, N)
        # resident rel-pos bias (+shift mask), broadcast over window groups in-kernel
        s = (s.reshape(R, mask_group, N, N) + bias_ref[h]).reshape(TB, N, N)
        # numerically-stable softmax; denominator via EUP approx reciprocal
        s = s - jnp.max(s, axis=-1, keepdims=True)
        p = jnp.exp(s)
        p = p * pl.reciprocal(jnp.sum(p, axis=-1, keepdims=True), approx=True)
        ctx = jnp.einsum("bnm,bmc->bnc", p.astype(mm), vw,
                         preferred_element_type=jnp.float32)         # (TB, N, C)
        o = o + hm * ctx

    # Single output projection: one (T, C) x (C, C) MXU matmul, lane-dense result.
    y = jnp.dot(o.reshape(T, C).astype(mm), projw_ref[...],
                preferred_element_type=jnp.float32) + projb_ref[...]
    o_ref[...] = y.astype(o_ref.dtype)


def window_attention_pallas(xw, prep, *, shifted, fuse_ln):
    """xw: (B_, N, C) f32 window tokens (un-normalized if fuse_ln) -> (B_, N, C) f32."""
    B_, N, C = xw.shape
    H = prep["num_heads"]
    assert N % 8 == 0, "kernel assumes tokens-per-window is a multiple of 8 (window_size=4 here)"
    bias = prep["bias_shift"] if shifted else prep["bias_noshift"]   # (H, group, N, N)
    group = int(bias.shape[1])

    # NOTE: bias correctness relies on windows being image-major and TB % group == 0.
    TB = _choose_windows_per_block(B_, N, group)
    T = TB * N
    x2 = xw.reshape(B_ * N, C)                            # f32 (LN runs in-kernel)

    kernel = functools.partial(
        _window_attn_kernel, num_heads=H, windows_per_block=TB, tokens_per_window=N,
        mask_group=group, fuse_ln=fuse_ln, eps=_LN_EPS)

    def build_and_call(buffered):
        return pl.pallas_call(
            kernel,
            out_shape=jax.ShapeDtypeStruct((B_ * N, C), jnp.float32),
            grid_spec=pltpu.PrefetchScalarGridSpec(
                num_scalar_prefetch=0,
                grid=(B_ // TB,),
                in_specs=[
                    pl.BlockSpec((T, C), lambda g: (g, 0)),                 # tokens (streamed)
                    _res_spec((1, C), lambda g: (0, 0), buffered),          # norm1 gamma
                    _res_spec((1, C), lambda g: (0, 0), buffered),          # norm1 beta
                    _res_spec((C, C), lambda g: (0, 0), buffered),          # Wq (scale folded)
                    _res_spec((C, C), lambda g: (0, 0), buffered),          # Wk
                    _res_spec((C, C), lambda g: (0, 0), buffered),          # Wv
                    _res_spec((1, C), lambda g: (0, 0), buffered),          # bq (scaled)
                    _res_spec((1, C), lambda g: (0, 0), buffered),          # bk
                    _res_spec((1, C), lambda g: (0, 0), buffered),          # bv
                    _res_spec((H, 1, 1, C), lambda g: (0, 0, 0, 0), buffered),       # head masks
                    _res_spec((H, group, N, N), lambda g: (0, 0, 0, 0), buffered),   # bias(+mask)
                    _res_spec((C, C), lambda g: (0, 0), buffered),          # proj W
                    _res_spec((1, C), lambda g: (0, 0), buffered),          # proj b
                ],
                out_specs=pl.BlockSpec((T, C), lambda g: (g, 0)),
            ),
            compiler_params=pltpu.CompilerParams(
                dimension_semantics=("parallel",),
                vmem_limit_bytes=_vmem_limit_bytes()),
        )(x2, prep["norm1_g2"], prep["norm1_b2"], prep["wq"], prep["wk"], prep["wv"],
          prep["bq"], prep["bk"], prep["bv"], prep["head_mask"], bias,
          prep["proj_w"], prep["proj_b2"])

    out = _run_with_resident_fallback(build_and_call)
    return out.reshape(B_, N, C)


# --------------- fused (shortcut + attn) + norm2 + MLP + residual ----------- #
def _mlp_kernel(short_ref, attn_ref, g_ref, b_ref, w1_ref, b1_ref, w2_ref, b2_ref,
                o_ref, *, eps):
    mm = w1_ref.dtype
    x = short_ref[...] + attn_ref[...]                    # fused first residual (f32)
    mu = jnp.mean(x, axis=-1, keepdims=True)
    xc = x - mu
    var = jnp.mean(xc * xc, axis=-1, keepdims=True)
    ln = xc * lax.rsqrt(var + eps) * g_ref[...] + b_ref[...]
    h = jnp.dot(ln.astype(mm), w1_ref[...],
                preferred_element_type=jnp.float32) + b1_ref[...]           # (TM, hidden)
    # TODO(synk): PyTorch nn.GELU uses the exact erf form; tanh approximation used in-kernel.
    h = jax.nn.gelu(h, approximate=True)
    y = jnp.dot(h.astype(mm), w2_ref[...],
                preferred_element_type=jnp.float32) + b2_ref[...]           # (TM, C)
    o_ref[...] = (x + y).astype(o_ref.dtype)              # fused second residual


def mlp_residual_pallas(shortcut, attn_out, prep):
    """(shortcut + attn_out) + Mlp(LayerNorm(shortcut + attn_out)), fused in one kernel."""
    B, L, C = shortcut.shape
    hidden = prep["fc1_w"].shape[1]
    total = B * L
    TM = _choose_row_tile(total)
    s2 = shortcut.reshape(total, C)
    a2 = attn_out.reshape(total, C)

    def build_and_call(buffered):
        return pl.pallas_call(
            functools.partial(_mlp_kernel, eps=_LN_EPS),
            out_shape=jax.ShapeDtypeStruct((total, C), jnp.float32),
            grid_spec=pltpu.PrefetchScalarGridSpec(
                num_scalar_prefetch=0,
                grid=(total // TM,),
                in_specs=[
                    pl.BlockSpec((TM, C), lambda g: (g, 0)),                # shortcut
                    pl.BlockSpec((TM, C), lambda g: (g, 0)),                # attention output
                    _res_spec((1, C), lambda g: (0, 0), buffered),          # norm2 gamma
                    _res_spec((1, C), lambda g: (0, 0), buffered),          # norm2 beta
                    _res_spec((C, hidden), lambda g: (0, 0), buffered),     # fc1 w
                    _res_spec((1, hidden), lambda g: (0, 0), buffered),     # fc1 b
                    _res_spec((hidden, C), lambda g: (0, 0), buffered),     # fc2 w
                    _res_spec((1, C), lambda g: (0, 0), buffered),          # fc2 b
                ],
                out_specs=pl.BlockSpec((TM, C), lambda g: (g, 0)),
            ),
            compiler_params=pltpu.CompilerParams(
                dimension_semantics=("parallel",),
                vmem_limit_bytes=_vmem_limit_bytes()),
        )(s2, a2, prep["norm2_g2"], prep["norm2_b2"],
          prep["fc1_w"], prep["fc1_b2"], prep["fc2_w"], prep["fc2_b2"])

    out = _run_with_resident_fallback(build_and_call)
    return out.reshape(B, L, C)


# --------------------------- plain-JAX glue ops ------------------------------ #
def _layer_norm(x, g, b, eps=_LN_EPS):
    mu = jnp.mean(x, axis=-1, keepdims=True)
    var = jnp.mean((x - mu) ** 2, axis=-1, keepdims=True)
    return (x - mu) * lax.rsqrt(var + eps) * g + b


def _window_partition(x, ws):
    B, Hp, Wp, C = x.shape
    x = x.reshape(B, Hp // ws, ws, Wp // ws, ws, C)
    return x.transpose(0, 1, 3, 2, 4, 5).reshape(-1, ws, ws, C)


def _window_reverse(w, ws, Hp, Wp):
    C = w.shape[-1]
    B = w.shape[0] // (Hp * Wp // ws // ws)
    x = w.reshape(B, Hp // ws, Wp // ws, ws, ws, C)
    return x.transpose(0, 1, 3, 2, 4, 5).reshape(B, Hp, Wp, C)


def _create_attn_mask(H, W, window_size, shift_size):
    Hp = int(np.ceil(H / window_size)) * window_size
    Wp = int(np.ceil(W / window_size)) * window_size
    img_mask = np.zeros((1, Hp, Wp, 1), dtype=np.float32)
    slices = (slice(0, -window_size), slice(-window_size, -shift_size),
              slice(-shift_size, None))
    cnt = 0
    for hs in slices:
        for ws_ in slices:
            img_mask[:, hs, ws_, :] = cnt
            cnt += 1
    mw = img_mask.reshape(1, Hp // window_size, window_size, Wp // window_size,
                          window_size, 1)
    mw = mw.transpose(0, 1, 3, 2, 4, 5).reshape(-1, window_size * window_size)
    attn_mask = mw[:, None, :] - mw[:, :, None]
    attn_mask = np.where(attn_mask != 0, -100.0, 0.0).astype(np.float32)
    return jnp.asarray(attn_mask)                         # (nW, N, N)


def _relative_position_index(window_size):
    Wh, Ww = window_size
    coords = np.stack(np.meshgrid(np.arange(Wh), np.arange(Ww), indexing="ij"))
    coords = coords.reshape(2, -1)
    rel = coords[:, :, None] - coords[:, None, :]
    rel = rel.transpose(1, 2, 0).astype(np.int32)
    rel[:, :, 0] += Wh - 1
    rel[:, :, 1] += Ww - 1
    rel[:, :, 0] *= 2 * Ww - 1
    return rel.sum(-1)                                    # (N, N)


# ------------------ one-time parameter re-layout (hoisted) ------------------- #
def prepare_block_params(blk, window_size, num_heads, attn_mask):
    C = blk["qkv_w"].shape[0]
    H = num_heads
    assert C % H == 0
    hd = C // H
    N = window_size * window_size
    scale = hd ** (-0.5)

    qkv_w, qkv_b = blk["qkv_w"], blk["qkv_b"]             # (C, 3C), (3C,)
    wq = (qkv_w[:, 0 * C:1 * C] * scale).astype(_MATMUL_DTYPE)
    wk = qkv_w[:, 1 * C:2 * C].astype(_MATMUL_DTYPE)
    wv = qkv_w[:, 2 * C:3 * C].astype(_MATMUL_DTYPE)
    bq = (qkv_b[0 * C:1 * C] * scale).reshape(1, C).astype(jnp.float32)
    bk = qkv_b[1 * C:2 * C].reshape(1, C).astype(jnp.float32)
    bv = qkv_b[2 * C:3 * C].reshape(1, C).astype(jnp.float32)

    # 0/1 channel selector per head (head-major channel ordering matches PyTorch qkv/proj).
    hm = (np.arange(C)[None, :] // hd == np.arange(H)[:, None]).astype(np.float32)
    head_mask = jnp.asarray(hm).reshape(H, 1, 1, C).astype(_MATMUL_DTYPE)

    rel_idx = _relative_position_index((window_size, window_size))      # np (N, N)
    rel = blk["rel_bias_table"][rel_idx.reshape(-1)]
    rel = rel.reshape(N, N, H).transpose(2, 0, 1)                        # (H, N, N)
    bias_noshift = rel[:, None].astype(jnp.float32)                      # (H, 1, N, N)
    bias_shift = (rel[:, None] + attn_mask[None]).astype(jnp.float32)    # (H, nW, N, N)

    hidden = blk["fc1_w"].shape[1]
    return dict(
        num_heads=H,
        norm1_g2=blk["norm1_g"].reshape(1, C), norm1_b2=blk["norm1_b"].reshape(1, C),
        wq=wq, wk=wk, wv=wv, bq=bq, bk=bk, bv=bv,
        head_mask=head_mask, bias_noshift=bias_noshift, bias_shift=bias_shift,
        proj_w=blk["proj_w"].astype(_MATMUL_DTYPE), proj_b2=blk["proj_b"].reshape(1, C),
        norm2_g2=blk["norm2_g"].reshape(1, C), norm2_b2=blk["norm2_b"].reshape(1, C),
        fc1_w=blk["fc1_w"].astype(_MATMUL_DTYPE), fc1_b2=blk["fc1_b"].reshape(1, hidden),
        fc2_w=blk["fc2_w"].astype(_MATMUL_DTYPE), fc2_b2=blk["fc2_b"].reshape(1, C),
    )


def prepare_layer_params(blocks, H, W, *, num_heads, window_size):
    shift = window_size // 2
    attn_mask = _create_attn_mask(H, W, window_size, shift)
    return [prepare_block_params(blk, window_size, num_heads, attn_mask) for blk in blocks]


# ------------------------- block / layer forwards ---------------------------- #
def _swin_block_pallas(x, H, W, prep, *, window_size, shift_size):
    B, L, C = x.shape
    shortcut = x
    pad_r = (window_size - W % window_size) % window_size
    pad_b = (window_size - H % window_size) % window_size
    fuse_ln = (pad_r == 0 and pad_b == 0)                 # LN commutes with shift/partition
    if fuse_ln:
        xs = x.reshape(B, H, W, C)
    else:
        # TODO(synk): with padding, norm1 must run before the zero pad to match PyTorch
        # exactly, so it stays an XLA op on this (rare) path.
        xs = _layer_norm(x, prep["norm1_g2"][0], prep["norm1_b2"][0]).reshape(B, H, W, C)
        xs = jnp.pad(xs, ((0, 0), (0, pad_b), (0, pad_r), (0, 0)))
    Hp, Wp = H + pad_b, W + pad_r
    shifted = shift_size > 0
    if shifted:
        xs = jnp.roll(xs, (-shift_size, -shift_size), axis=(1, 2))
    xw = _window_partition(xs, window_size).reshape(-1, window_size * window_size, C)
    aw = window_attention_pallas(xw, prep, shifted=shifted, fuse_ln=fuse_ln)
    aw = aw.reshape(-1, window_size, window_size, C)
    xs = _window_reverse(aw, window_size, Hp, Wp)
    if shifted:
        xs = jnp.roll(xs, (shift_size, shift_size), axis=(1, 2))
    if pad_r or pad_b:
        xs = xs[:, :H, :W, :]
    attn_out = xs.reshape(B, H * W, C)
    # (shortcut + attn) + MLP(norm2(shortcut + attn)) fused in the second Pallas kernel.
    return mlp_residual_pallas(shortcut, attn_out, prep)


def basic_layer_forward_pallas(x, H, W, prepared, *, window_size):
    shift_size = window_size // 2
    for i, prep in enumerate(prepared):
        shift = 0 if i % 2 == 0 else shift_size
        x = _swin_block_pallas(x, H, W, prep, window_size=window_size, shift_size=shift)
    return x, H, W                                        # downsample=None


# ---------------------------- pure-JAX reference ----------------------------- #
def _window_attention_ref(x, blk, window_size, num_heads, mask=None):
    B_, N, C = x.shape
    H = num_heads
    hd = C // H
    scale = hd ** (-0.5)
    qkv = x @ blk["qkv_w"] + blk["qkv_b"]
    qkv = qkv.reshape(B_, N, 3, H, hd).transpose(2, 0, 3, 1, 4)
    q, k, v = qkv[0] * scale, qkv[1], qkv[2]
    attn = jnp.einsum("bhnd,bhmd->bhnm", q, k)
    rel_idx = _relative_position_index(window_size)
    rel = blk["rel_bias_table"][rel_idx.reshape(-1)].reshape(N, N, H).transpose(2, 0, 1)
    attn = attn + rel[None]
    if mask is not None:
        nW = mask.shape[0]
        attn = attn.reshape(B_ // nW, nW, H, N, N) + mask[None, :, None]
        attn = attn.reshape(-1, H, N, N)
    attn = jax.nn.softmax(attn, axis=-1)
    out = jnp.einsum("bhnm,bhmd->bhnd", attn, v).transpose(0, 2, 1, 3).reshape(B_, N, C)
    return out @ blk["proj_w"] + blk["proj_b"]


def _mlp_residual_ref(x, blk):
    xn = _layer_norm(x, blk["norm2_g"], blk["norm2_b"])
    h = jax.nn.gelu(xn @ blk["fc1_w"] + blk["fc1_b"], approximate=False)
    return x + (h @ blk["fc2_w"] + blk["fc2_b"])


def _swin_block_ref(x, H, W, blk, *, num_heads, window_size, shift_size, attn_mask):
    B, L, C = x.shape
    shortcut = x
    xn = _layer_norm(x, blk["norm1_g"], blk["norm1_b"]).reshape(B, H, W, C)
    pad_r = (window_size - W % window_size) % window_size
    pad_b = (window_size - H % window_size) % window_size
    if pad_r or pad_b:
        xn = jnp.pad(xn, ((0, 0), (0, pad_b), (0, pad_r), (0, 0)))
    Hp, Wp = H + pad_b, W + pad_r
    if shift_size > 0:
        xn = jnp.roll(xn, (-shift_size, -shift_size), axis=(1, 2))
        mask = attn_mask
    else:
        mask = None
    xw = _window_partition(xn, window_size).reshape(-1, window_size * window_size, C)
    aw = _window_attention_ref(xw, blk, (window_size, window_size), num_heads, mask)
    aw = aw.reshape(-1, window_size, window_size, C)
    xn = _window_reverse(aw, window_size, Hp, Wp)
    if shift_size > 0:
        xn = jnp.roll(xn, (shift_size, shift_size), axis=(1, 2))
    if pad_r or pad_b:
        xn = xn[:, :H, :W, :]
    x = shortcut + xn.reshape(B, H * W, C)
    return _mlp_residual_ref(x, blk)


def basic_layer_forward_ref(x, H, W, blocks, *, num_heads, window_size):
    shift_size = window_size // 2
    attn_mask = _create_attn_mask(H, W, window_size, shift_size)
    for i, blk in enumerate(blocks):
        shift = 0 if i % 2 == 0 else shift_size
        x = _swin_block_ref(x, H, W, blk, num_heads=num_heads, window_size=window_size,
                            shift_size=shift, attn_mask=attn_mask)
    return x, H, W


# --------------------------------- params ------------------------------------ #
def init_params(key, dim, depth, num_heads, window_size, mlp_ratio):
    hidden = int(dim * mlp_ratio)
    num_rel = (2 * window_size - 1) ** 2
    blocks = []
    for i in range(depth):
        ks = jax.random.split(jax.random.fold_in(key, i), 13)
        # TODO(synk): PyTorch uses trunc_normal_(std=0.02); plain normal used here.
        blocks.append(dict(
            norm1_g=1.0 + 0.1 * jax.random.normal(ks[0], (dim,), jnp.float32),
            norm1_b=0.05 * jax.random.normal(ks[1], (dim,), jnp.float32),
            rel_bias_table=0.02 * jax.random.normal(ks[2], (num_rel, num_heads), jnp.float32),
            qkv_w=0.05 * jax.random.normal(ks[3], (dim, 3 * dim), jnp.float32),
            qkv_b=0.02 * jax.random.normal(ks[4], (3 * dim,), jnp.float32),
            proj_w=0.05 * jax.random.normal(ks[5], (dim, dim), jnp.float32),
            proj_b=0.02 * jax.random.normal(ks[6], (dim,), jnp.float32),
            norm2_g=1.0 + 0.1 * jax.random.normal(ks[7], (dim,), jnp.float32),
            norm2_b=0.05 * jax.random.normal(ks[8], (dim,), jnp.float32),
            fc1_w=0.05 * jax.random.normal(ks[9], (dim, hidden), jnp.float32),
            fc1_b=0.02 * jax.random.normal(ks[10], (hidden,), jnp.float32),
            fc2_w=0.05 * jax.random.normal(ks[11], (hidden, dim), jnp.float32),
            fc2_b=0.02 * jax.random.normal(ks[12], (dim,), jnp.float32),
        ))
    return blocks


# ---------------------------------- main -------------------------------------- #
if __name__ == "__main__":
    dim, depth, num_heads, window_size = 32, 2, 4, 4
    mlp_ratio = 4.0
    B, H, W = 2, 8, 8                     # -> N=16 tokens/window, 4 windows/img, B_=8

    key = jax.random.PRNGKey(0)
    blocks = init_params(key, dim, depth, num_heads, window_size, mlp_ratio)
    x = jax.random.normal(jax.random.fold_in(key, 1234), (B, H * W, dim), jnp.float32)

    # One-time parameter re-layout (hoisted out of the forward, per perf review).
    prepared = prepare_layer_params(blocks, H, W, num_heads=num_heads,
                                    window_size=window_size)

    out, Ho, Wo = basic_layer_forward_pallas(x, H, W, prepared, window_size=window_size)
    out = jax.block_until_ready(out)

    ref, _, _ = basic_layer_forward_ref(x, H, W, blocks, num_heads=num_heads,
                                        window_size=window_size)
    ref = jax.block_until_ready(ref)

    assert out.shape == (B, H * W, dim) and (Ho, Wo) == (H, W)
    max_err = float(jnp.max(jnp.abs(out - ref)))
    # bf16 MXU operands + approx reciprocal + tanh-GELU vs the f32 / exact-erf reference.
    assert np.allclose(np.asarray(out), np.asarray(ref), atol=4e-2, rtol=4e-2), \
        f"Pallas output mismatch vs reference (max abs err {max_err})"
    print("KERNEL_OK")
</pallas_src>

<mosaic_0001>
module attributes {stable_mosaic.version = 11 : i64} {
  func.func @_window_attn_kernel(%arg0: i32, %arg1: memref<128x32xf32, #tpu.memory_space<vmem>>, %arg2: memref<1x32xf32, #tpu.memory_space<vmem>>, %arg3: memref<1x32xf32, #tpu.memory_space<vmem>>, %arg4: memref<32x32xbf16, #tpu.memory_space<vmem>>, %arg5: memref<32x32xbf16, #tpu.memory_space<vmem>>, %arg6: memref<32x32xbf16, #tpu.memory_space<vmem>>, %arg7: memref<1x32xf32, #tpu.memory_space<vmem>>, %arg8: memref<1x32xf32, #tpu.memory_space<vmem>>, %arg9: memref<1x32xf32, #tpu.memory_space<vmem>>, %arg10: memref<4x1x1x32xbf16, #tpu.memory_space<vmem>>, %arg11: memref<4x1x16x16xf32, #tpu.memory_space<vmem>>, %arg12: memref<32x32xbf16, #tpu.memory_space<vmem>>, %arg13: memref<1x32xf32, #tpu.memory_space<vmem>>, %arg14: memref<128x32xf32, #tpu.memory_space<vmem>>) attributes {dimension_semantics = [#tpu.dimension_semantics<parallel>], iteration_bounds = array<i64: 1>, scalar_prefetch = 0 : i64, scratch_operands = 0 : i64, tpu.core_type = #tpu.core_type<tc>, window_params = [{transform_indices = @transform_0, window_bounds = array<i64: 128, 32>}, {pipeline_mode = #tpu.pipeline_mode<synchronous>, transform_indices = @transform_1, window_bounds = array<i64: 1, 32>}, {pipeline_mode = #tpu.pipeline_mode<synchronous>, transform_indices = @transform_2, window_bounds = array<i64: 1, 32>}, {pipeline_mode = #tpu.pipeline_mode<synchronous>, transform_indices = @transform_3, window_bounds = array<i64: 32, 32>}, {pipeline_mode = #tpu.pipeline_mode<synchronous>, transform_indices = @transform_4, window_bounds = array<i64: 32, 32>}, {pipeline_mode = #tpu.pipeline_mode<synchronous>, transform_indices = @transform_5, window_bounds = array<i64: 32, 32>}, {pipeline_mode = #tpu.pipeline_mode<synchronous>, transform_indices = @transform_6, window_bounds = array<i64: 1, 32>}, {pipeline_mode = #tpu.pipeline_mode<synchronous>, transform_indices = @transform_7, window_bounds = array<i64: 1, 32>}, {pipeline_mode = #tpu.pipeline_mode<synchronous>, transform_indices = @transform_8, window_bounds = array<i64: 1, 32>}, {pipeline_mode = #tpu.pipeline_mode<synchronous>, transform_indices = @transform_9, window_bounds = array<i64: 4, 1, 1, 32>}, {pipeline_mode = #tpu.pipeline_mode<synchronous>, transform_indices = @transform_10, window_bounds = array<i64: 4, 1, 16, 16>}, {pipeline_mode = #tpu.pipeline_mode<synchronous>, transform_indices = @transform_11, window_bounds = array<i64: 32, 32>}, {pipeline_mode = #tpu.pipeline_mode<synchronous>, transform_indices = @transform_12, window_bounds = array<i64: 1, 32>}, {transform_indices = @transform_13, window_bounds = array<i64: 128, 32>}]} {
    %c0 = arith.constant 0 : index
    %c0_0 = arith.constant 0 : index
    %0 = vector.load %arg1[%c0, %c0_0] : memref<128x32xf32, #tpu.memory_space<vmem>>, vector<128x32xf32>
    %cst = arith.constant dense<0.000000e+00> : vector<128xf32>
    %1 = vector.multi_reduction <add>, %0, %cst [1] : vector<128x32xf32> to vector<128xf32>
    %2 = vector.shape_cast %1 : vector<128xf32> to vector<128x1xf32>
    %cst_1 = arith.constant 3.200000e+01 : f32
    %3 = vector.broadcast %cst_1 : f32 to vector<128x1xf32>
    %4 = arith.divf %2, %3 : vector<128x1xf32>
    %5 = vector.broadcast %4 : vector<128x1xf32> to vector<128x32xf32>
    %6 = arith.subf %0, %5 : vector<128x32xf32>
    %7 = arith.mulf %6, %6 : vector<128x32xf32>
    %cst_2 = arith.constant dense<0.000000e+00> : vector<128xf32>
    %8 = vector.multi_reduction <add>, %7, %cst_2 [1] : vector<128x32xf32> to vector<128xf32>
    %9 = vector.shape_cast %8 : vector<128xf32> to vector<128x1xf32>
    %cst_3 = arith.constant 3.200000e+01 : f32
    %10 = vector.broadcast %cst_3 : f32 to vector<128x1xf32>
    %11 = arith.divf %9, %10 : vector<128x1xf32>
    %cst_4 = arith.constant 9.99999974E-6 : f32
    %12 = vector.broadcast %cst_4 : f32 to vector<128x1xf32>
    %13 = arith.addf %11, %12 : vector<128x1xf32>
    %14 = math.rsqrt %13 : vector<128x1xf32>
    %15 = vector.broadcast %14 : vector<128x1xf32> to vector<128x32xf32>
    %16 = arith.mulf %6, %15 : vector<128x32xf32>
    %c0_5 = arith.constant 0 : index
    %c0_6 = arith.constant 0 : index
    %17 = vector.load %arg2[%c0_5, %c0_6] : memref<1x32xf32, #tpu.memory_space<vmem>>, vector<1x32xf32>
    %18 = vector.broadcast %17 : vector<1x32xf32> to vector<128x32xf32>
    %19 = arith.mulf %16, %18 : vector<128x32xf32>
    %c0_7 = arith.constant 0 : index
    %c0_8 = arith.constant 0 : index
    %20 = vector.load %arg3[%c0_7, %c0_8] : memref<1x32xf32, #tpu.memory_space<vmem>>, vector<1x32xf32>
    %21 = vector.broadcast %20 : vector<1x32xf32> to vector<128x32xf32>
    %22 = arith.addf %19, %21 : vector<128x32xf32>
    %23 = arith.truncf %22 : vector<128x32xf32> to vector<128x32xbf16>
    %c0_9 = arith.constant 0 : index
    %c0_10 = arith.constant 0 : index
    %24 = vector.load %arg4[%c0_9, %c0_10] : memref<32x32xbf16, #tpu.memory_space<vmem>>, vector<32x32xbf16>
    %cst_11 = arith.constant dense<0.000000e+00> : vector<128x32xf32>
    %25 = tpu.matmul %23, %24, %cst_11 {dimension_numbers = #tpu.dot_dimension_numbers<[1], [0], [0], [1], [0, 0, 1, 1], [], []>} : vector<128x32xbf16>, vector<32x32xbf16>, vector<128x32xf32> -> vector<128x32xf32>
    %c0_12 = arith.constant 0 : index
    %c0_13 = arith.constant 0 : index
    %26 = vector.load %arg7[%c0_12, %c0_13] : memref<1x32xf32, #tpu.memory_space<vmem>>, vector<1x32xf32>
    %27 = vector.broadcast %26 : vector<1x32xf32> to vector<128x32xf32>
    %28 = arith.addf %25, %27 : vector<128x32xf32>
    %c0_14 = arith.constant 0 : index
    %c0_15 = arith.constant 0 : index
    %29 = vector.load %arg5[%c0_14, %c0_15] : memref<32x32xbf16, #tpu.memory_space<vmem>>, vector<32x32xbf16>
    %cst_16 = arith.constant dense<0.000000e+00> : vector<128x32xf32>
    %30 = tpu.matmul %23, %29, %cst_16 {dimension_numbers = #tpu.dot_dimension_numbers<[1], [0], [0], [1], [0, 0, 1, 1], [], []>} : vector<128x32xbf16>, vector<32x32xbf16>, vector<128x32xf32> -> vector<128x32xf32>
    %c0_17 = arith.constant 0 : index
    %c0_18 = arith.constant 0 : index
    %31 = vector.load %arg8[%c0_17, %c0_18] : memref<1x32xf32, #tpu.memory_space<vmem>>, vector<1x32xf32>
    %32 = vector.broadcast %31 : vector<1x32xf32> to vector<128x32xf32>
    %33 = arith.addf %30, %32 : vector<128x32xf32>
    %c0_19 = arith.constant 0 : index
    %c0_20 = arith.constant 0 : index
    %34 = vector.load %arg6[%c0_19, %c0_20] : memref<32x32xbf16, #tpu.memory_space<vmem>>, vector<32x32xbf16>
    %cst_21 = arith.constant dense<0.000000e+00> : vector<128x32xf32>
    %35 = tpu.matmul %23, %34, %cst_21 {dimension_numbers = #tpu.dot_dimension_numbers<[1], [0], [0], [1], [0, 0, 1, 1], [], []>} : vector<128x32xbf16>, vector<32x32xbf16>, vector<128x32xf32> -> vector<128x32xf32>
    %c0_22 = arith.constant 0 : index
    %c0_23 = arith.constant 0 : index
    %36 = vector.load %arg9[%c0_22, %c0_23] : memref<1x32xf32, #tpu.memory_space<vmem>>, vector<1x32xf32>
    %37 = vector.broadcast %36 : vector<1x32xf32> to vector<128x32xf32>
    %38 = arith.addf %35, %37 : vector<128x32xf32>
    %39 = vector.shape_cast %28 : vector<128x32xf32> to vector<8x16x32xf32>
    %40 = arith.truncf %39 : vector<8x16x32xf32> to vector<8x16x32xbf16>
    %41 = vector.shape_cast %33 : vector<128x32xf32> to vector<8x16x32xf32>
    %42 = arith.truncf %41 : vector<8x16x32xf32> to vector<8x16x32xbf16>
    %43 = vector.shape_cast %38 : vector<128x32xf32> to vector<8x16x32xf32>
    %44 = arith.truncf %43 : vector<8x16x32xf32> to vector<8x16x32xbf16>
    %cst_24 = arith.constant 0.000000e+00 : f32
    %45 = vector.broadcast %cst_24 : f32 to vector<8x16x32xf32>
    %c0_25 = arith.constant 0 : index
    %c0_26 = arith.constant 0 : index
    %c0_27 = arith.constant 0 : index
    %c0_28 = arith.constant 0 : index
    %46 = vector.load %arg10[%c0_25, %c0_26, %c0_27, %c0_28] : memref<4x1x1x32xbf16, #tpu.memory_space<vmem>>, vector<1x1x1x32xbf16>
    %47 = vector.shape_cast %46 : vector<1x1x1x32xbf16> to vector<1x1x32xbf16>
    %48 = vector.broadcast %47 : vector<1x1x32xbf16> to vector<8x16x32xbf16>
    %49 = arith.mulf %40, %48 : vector<8x16x32xbf16>
    "tpu.trace_start"() <{level = 10 : i32, message = "bnc,bmc->bnm"}> : () -> ()
    %cst_29 = arith.constant dense<0.000000e+00> : vector<8x16x16xf32>
    %50 = tpu.matmul %49, %42, %cst_29 {dimension_numbers = #tpu.dot_dimension_numbers<[2], [2], [1], [1], [0, 0, 0, 1, 1, 1], [0], [0]>} : vector<8x16x32xbf16>, vector<8x16x32xbf16>, vector<8x16x16xf32> -> vector<8x16x16xf32>
    "tpu.trace_stop"() : () -> ()
    %51 = vector.shape_cast %50 : vector<8x16x16xf32> to vector<8x1x16x16xf32>
    %c0_30 = arith.constant 0 : index
    %c0_31 = arith.constant 0 : index
    %c0_32 = arith.constant 0 : index
    %c0_33 = arith.constant 0 : index
    %52 = vector.load %arg11[%c0_30, %c0_31, %c0_32, %c0_33] : memref<4x1x16x16xf32, #tpu.memory_space<vmem>>, vector<1x1x16x16xf32>
    %53 = vector.shape_cast %52 : vector<1x1x16x16xf32> to vector<1x16x16xf32>
    %54 = vector.shape_cast %53 : vector<1x16x16xf32> to vector<1x1x16x16xf32>
    %55 = vector.broadcast %54 : vector<1x1x16x16xf32> to vector<8x1x16x16xf32>
    %56 = arith.addf %51, %55 : vector<8x1x16x16xf32>
    %57 = vector.shape_cast %56 : vector<8x1x16x16xf32> to vector<8x16x16xf32>
    %cst_34 = arith.constant dense<0xFF800000> : vector<8x16xf32>
    %58 = vector.multi_reduction <maximumf>, %57, %cst_34 [2] : vector<8x16x16xf32> to vector<8x16xf32>
    %59 = vector.shape_cast %58 : vector<8x16xf32> to vector<8x16x1xf32>
    %60 = vector.broadcast %59 : vector<8x16x1xf32> to vector<8x16x16xf32>
    %61 = arith.subf %57, %60 : vector<8x16x16xf32>
    %62 = math.exp %61 : vector<8x16x16xf32>
    %cst_35 = arith.constant dense<0.000000e+00> : vector<8x16xf32>
    %63 = vector.multi_reduction <add>, %62, %cst_35 [2] : vector<8x16x16xf32> to vector<8x16xf32>
    %64 = vector.shape_cast %63 : vector<8x16xf32> to vector<8x16x1xf32>
    %65 = tpu.reciprocal %64 {approx = true} : vector<8x16x1xf32> -> vector<8x16x1xf32>
    %66 = vector.broadcast %65 : vector<8x16x1xf32> to vector<8x16x16xf32>
    %67 = arith.mulf %62, %66 : vector<8x16x16xf32>
    %68 = arith.truncf %67 : vector<8x16x16xf32> to vector<8x16x16xbf16>
    "tpu.trace_start"() <{level = 10 : i32, message = "bnm,bmc->bnc"}> : () -> ()
    %cst_36 = arith.constant dense<0.000000e+00> : vector<8x16x32xf32>
    %69 = tpu.matmul %68, %44, %cst_36 {dimension_numbers = #tpu.dot_dimension_numbers<[2], [1], [1], [2], [0, 0, 0, 1, 1, 2], [0], [0]>} : vector<8x16x16xbf16>, vector<8x16x32xbf16>, vector<8x16x32xf32> -> vector<8x16x32xf32>
    "tpu.trace_stop"() : () -> ()
    %70 = arith.extf %47 : vector<1x1x32xbf16> to vector<1x1x32xf32>
    %71 = vector.broadcast %70 : vector<1x1x32xf32> to vector<8x16x32xf32>
    %72 = arith.mulf %71, %69 : vector<8x16x32xf32>
    %73 = arith.addf %45, %72 : vector<8x16x32xf32>
    %c1 = arith.constant 1 : index
    %c0_37 = arith.constant 0 : index
    %c0_38 = arith.constant 0 : index
    %c0_39 = arith.constant 0 : index
    %74 = vector.load %arg10[%c1, %c0_37, %c0_38, %c0_39] : memref<4x1x1x32xbf16, #tpu.memory_space<vmem>>, vector<1x1x1x32xbf16>
    %75 = vector.shape_cast %74 : vector<1x1x1x32xbf16> to vector<1x1x32xbf16>
    %76 = vector.broadcast %75 : vector<1x1x32xbf16> to vector<8x16x32xbf16>
    %77 = arith.mulf %40, %76 : vector<8x16x32xbf16>
    "tpu.trace_start"() <{level = 10 : i32, message = "bnc,bmc->bnm"}> : () -> ()
    %cst_40 = arith.constant dense<0.000000e+00> : vector<8x16x16xf32>
    %78 = tpu.matmul %77, %42, %cst_40 {dimension_numbers = #tpu.dot_dimension_numbers<[2], [2], [1], [1], [0, 0, 0, 1, 1, 1], [0], [0]>} : vector<8x16x32xbf16>, vector<8x16x32xbf16>, vector<8x16x16xf32> -> vector<8x16x16xf32>
    "tpu.trace_stop"() : () -> ()
    %79 = vector.shape_cast %78 : vector<8x16x16xf32> to vector<8x1x16x16xf32>
    %c1_41 = arith.constant 1 : index
    %c0_42 = arith.constant 0 : index
    %c0_43 = arith.constant 0 : index
    %c0_44 = arith.constant 0 : index
    %80 = vector.load %arg11[%c1_41, %c0_42, %c0_43, %c0_44] : memref<4x1x16x16xf32, #tpu.memory_space<vmem>>, vector<1x1x16x16xf32>
    %81 = vector.shape_cast %80 : vector<1x1x16x16xf32> to vector<1x16x16xf32>
    %82 = vector.shape_cast %81 : vector<1x16x16xf32> to vector<1x1x16x16xf32>
    %83 = vector.broadcast %82 : vector<1x1x16x16xf32> to vector<8x1x16x16xf32>
    %84 = arith.addf %79, %83 : vector<8x1x16x16xf32>
    %85 = vector.shape_cast %84 : vector<8x1x16x16xf32> to vector<8x16x16xf32>
    %cst_45 = arith.constant dense<0xFF800000> : vector<8x16xf32>
    %86 = vector.multi_reduction <maximumf>, %85, %cst_45 [2] : vector<8x16x16xf32> to vector<8x16xf32>
    %87 = vector.shape_cast %86 : vector<8x16xf32> to vector<8x16x1xf32>
    %88 = vector.broadcast %87 : vector<8x16x1xf32> to vector<8x16x16xf32>
    %89 = arith.subf %85, %88 : vector<8x16x16xf32>
    %90 = math.exp %89 : vector<8x16x16xf32>
    %cst_46 = arith.constant dense<0.000000e+00> : vector<8x16xf32>
    %91 = vector.multi_reduction <add>, %90, %cst_46 [2] : vector<8x16x16xf32> to vector<8x16xf32>
    %92 = vector.shape_cast %91 : vector<8x16xf32> to vector<8x16x1xf32>
    %93 = tpu.reciprocal %92 {approx = true} : vector<8x16x1xf32> -> vector<8x16x1xf32>
    %94 = vector.broadcast %93 : vector<8x16x1xf32> to vector<8x16x16xf32>
    %95 = arith.mulf %90, %94 : vector<8x16x16xf32>
    %96 = arith.truncf %95 : vector<8x16x16xf32> to vector<8x16x16xbf16>
    "tpu.trace_start"() <{level = 10 : i32, message = "bnm,bmc->bnc"}> : () -> ()
    %cst_47 = arith.constant dense<0.000000e+00> : vector<8x16x32xf32>
    %97 = tpu.matmul %96, %44, %cst_47 {dimension_numbers = #tpu.dot_dimension_numbers<[2], [1], [1], [2], [0, 0, 0, 1, 1, 2], [0], [0]>} : vector<8x16x16xbf16>, vector<8x16x32xbf16>, vector<8x16x32xf32> -> vector<8x16x32xf32>
    "tpu.trace_stop"() : () -> ()
    %98 = arith.extf %75 : vector<1x1x32xbf16> to vector<1x1x32xf32>
    %99 = vector.broadcast %98 : vector<1x1x32xf32> to vector<8x16x32xf32>
    %100 = arith.mulf %99, %97 : vector<8x16x32xf32>
    %101 = arith.addf %73, %100 : vector<8x16x32xf32>
    %c2 = arith.constant 2 : index
    %c0_48 = arith.constant 0 : index
    %c0_49 = arith.constant 0 : index
    %c0_50 = arith.constant 0 : index
    %102 = vector.load %arg10[%c2, %c0_48, %c0_49, %c0_50] : memref<4x1x1x32xbf16, #tpu.memory_space<vmem>>, vector<1x1x1x32xbf16>
    %103 = vector.shape_cast %102 : vector<1x1x1x32xbf16> to vector<1x1x32xbf16>
    %104 = vector.broadcast %103 : vector<1x1x32xbf16> to vector<8x16x32xbf16>
    %105 = arith.mulf %40, %104 : vector<8x16x32xbf16>
    "tpu.trace_start"() <{level = 10 : i32, message = "bnc,bmc->bnm"}> : () -> ()
    %cst_51 = arith.constant dense<0.000000e+00> : vector<8x16x16xf32>
    %106 = tpu.matmul %105, %42, %cst_51 {dimension_numbers = #tpu.dot_dimension_numbers<[2], [2], [1], [1], [0, 0, 0, 1, 1, 1], [0], [0]>} : vector<8x16x32xbf16>, vector<8x16x32xbf16>, vector<8x16x16xf32> -> vector<8x16x16xf32>
    "tpu.trace_stop"() : () -> ()
    %107 = vector.shape_cast %106 : vector<8x16x16xf32> to vector<8x1x16x16xf32>
    %c2_52 = arith.constant 2 : index
    %c0_53 = arith.constant 0 : index
    %c0_54 = arith.constant 0 : index
    %c0_55 = arith.constant 0 : index
    %108 = vector.load %arg11[%c2_52, %c0_53, %c0_54, %c0_55] : memref<4x1x16x16xf32, #tpu.memory_space<vmem>>, vector<1x1x16x16xf32>
    %109 = vector.shape_cast %108 : vector<1x1x16x16xf32> to vector<1x16x16xf32>
    %110 = vector.shape_cast %109 : vector<1x16x16xf32> to vector<1x1x16x16xf32>
    %111 = vector.broadcast %110 : vector<1x1x16x16xf32> to vector<8x1x16x16xf32>
    %112 = arith.addf %107, %111 : vector<8x1x16x16xf32>
    %113 = vector.shape_cast %112 : vector<8x1x16x16xf32> to vector<8x16x16xf32>
    %cst_56 = arith.constant dense<0xFF800000> : vector<8x16xf32>
    %114 = vector.multi_reduction <maximumf>, %113, %cst_56 [2] : vector<8x16x16xf32> to vector<8x16xf32>
    %115 = vector.shape_cast %114 : vector<8x16xf32> to vector<8x16x1xf32>
    %116 = vector.broadcast %115 : vector<8x16x1xf32> to vector<8x16x16xf32>
    %117 = arith.subf %113, %116 : vector<8x16x16xf32>
    %118 = math.exp %117 : vector<8x16x16xf32>
    %cst_57 = arith.constant dense<0.000000e+00> : vector<8x16xf32>
    %119 = vector.multi_reduction <add>, %118, %cst_57 [2] : vector<8x16x16xf32> to vector<8x16xf32>
    %120 = vector.shape_cast %119 : vector<8x16xf32> to vector<8x16x1xf32>
    %121 = tpu.reciprocal %120 {approx = true} : vector<8x16x1xf32> -> vector<8x16x1xf32>
    %122 = vector.broadcast %121 : vector<8x16x1xf32> to vector<8x16x16xf32>
    %123 = arith.mulf %118, %122 : vector<8x16x16xf32>
    %124 = arith.truncf %123 : vector<8x16x16xf32> to vector<8x16x16xbf16>
    "tpu.trace_start"() <{level = 10 : i32, message = "bnm,bmc->bnc"}> : () -> ()
    %cst_58 = arith.constant dense<0.000000e+00> : vector<8x16x32xf32>
    %125 = tpu.matmul %124, %44, %cst_58 {dimension_numbers = #tpu.dot_dimension_numbers<[2], [1], [1], [2], [0, 0, 0, 1, 1, 2], [0], [0]>} : vector<8x16x16xbf16>, vector<8x16x32xbf16>, vector<8x16x32xf32> -> vector<8x16x32xf32>
    "tpu.trace_stop"() : () -> ()
    %126 = arith.extf %103 : vector<1x1x32xbf16> to vector<1x1x32xf32>
    %127 = vector.broadcast %126 : vector<1x1x32xf32> to vector<8x16x32xf32>
    %128 = arith.mulf %127, %125 : vector<8x16x32xf32>
    %129 = arith.addf %101, %128 : vector<8x16x32xf32>
    %c3 = arith.constant 3 : index
    %c0_59 = arith.constant 0 : index
    %c0_60 = arith.constant 0 : index
    %c0_61 = arith.constant 0 : index
    %130 = vector.load %arg10[%c3, %c0_59, %c0_60, %c0_61] : memref<4x1x1x32xbf16, #tpu.memory_space<vmem>>, vector<1x1x1x32xbf16>
    %131 = vector.shape_cast %130 : vector<1x1x1x32xbf16> to vector<1x1x32xbf16>
    %132 = vector.broadcast %131 : vector<1x1x32xbf16> to vector<8x16x32xbf16>
    %133 = arith.mulf %40, %132 : vector<8x16x32xbf16>
    "tpu.trace_start"() <{level = 10 : i32, message = "bnc,bmc->bnm"}> : () -> ()
    %cst_62 = arith.constant dense<0.000000e+00> : vector<8x16x16xf32>
    %134 = tpu.matmul %133, %42, %cst_62 {dimension_numbers = #tpu.dot_dimension_numbers<[2], [2], [1], [1], [0, 0, 0, 1, 1, 1], [0], [0]>} : vector<8x16x32xbf16>, vector<8x16x32xbf16>, vector<8x16x16xf32> -> vector<8x16x16xf32>
    "tpu.trace_stop"() : () -> ()
    %135 = vector.shape_cast %134 : vector<8x16x16xf32> to vector<8x1x16x16xf32>
    %c3_63 = arith.constant 3 : index
    %c0_64 = arith.constant 0 : index
    %c0_65 = arith.constant 0 : index
    %c0_66 = arith.constant 0 : index
    %136 = vector.load %arg11[%c3_63, %c0_64, %c0_65, %c0_66] : memref<4x1x16x16xf32, #tpu.memory_space<vmem>>, vector<1x1x16x16xf32>
    %137 = vector.shape_cast %136 : vector<1x1x16x16xf32> to vector<1x16x16xf32>
    %138 = vector.shape_cast %137 : vector<1x16x16xf32> to vector<1x1x16x16xf32>
    %139 = vector.broadcast %138 : vector<1x1x16x16xf32> to vector<8x1x16x16xf32>
    %140 = arith.addf %135, %139 : vector<8x1x16x16xf32>
    %141 = vector.shape_cast %140 : vector<8x1x16x16xf32> to vector<8x16x16xf32>
    %cst_67 = arith.constant dense<0xFF800000> : vector<8x16xf32>
    %142 = vector.multi_reduction <maximumf>, %141, %cst_67 [2] : vector<8x16x16xf32> to vector<8x16xf32>
    %143 = vector.shape_cast %142 : vector<8x16xf32> to vector<8x16x1xf32>
    %144 = vector.broadcast %143 : vector<8x16x1xf32> to vector<8x16x16xf32>
    %145 = arith.subf %141, %144 : vector<8x16x16xf32>
    %146 = math.exp %145 : vector<8x16x16xf32>
    %cst_68 = arith.constant dense<0.000000e+00> : vector<8x16xf32>
    %147 = vector.multi_reduction <add>, %146, %cst_68 [2] : vector<8x16x16xf32> to vector<8x16xf32>
    %148 = vector.shape_cast %147 : vector<8x16xf32> to vector<8x16x1xf32>
    %149 = tpu.reciprocal %148 {approx = true} : vector<8x16x1xf32> -> vector<8x16x1xf32>
    %150 = vector.broadcast %149 : vector<8x16x1xf32> to vector<8x16x16xf32>
    %151 = arith.mulf %146, %150 : vector<8x16x16xf32>
    %152 = arith.truncf %151 : vector<8x16x16xf32> to vector<8x16x16xbf16>
    "tpu.trace_start"() <{level = 10 : i32, message = "bnm,bmc->bnc"}> : () -> ()
    %cst_69 = arith.constant dense<0.000000e+00> : vector<8x16x32xf32>
    %153 = tpu.matmul %152, %44, %cst_69 {dimension_numbers = #tpu.dot_dimension_numbers<[2], [1], [1], [2], [0, 0, 0, 1, 1, 2], [0], [0]>} : vector<8x16x16xbf16>, vector<8x16x32xbf16>, vector<8x16x32xf32> -> vector<8x16x32xf32>
    "tpu.trace_stop"() : () -> ()
    %154 = arith.extf %131 : vector<1x1x32xbf16> to vector<1x1x32xf32>
    %155 = vector.broadcast %154 : vector<1x1x32xf32> to vector<8x16x32xf32>
    %156 = arith.mulf %155, %153 : vector<8x16x32xf32>
    %157 = arith.addf %129, %156 : vector<8x16x32xf32>
    %158 = vector.shape_cast %157 : vector<8x16x32xf32> to vector<128x32xf32>
    %159 = arith.truncf %158 : vector<128x32xf32> to vector<128x32xbf16>
    %c0_70 = arith.constant 0 : index
    %c0_71 = arith.constant 0 : index
    %160 = vector.load %arg12[%c0_70, %c0_71] : memref<32x32xbf16, #tpu.memory_space<vmem>>, vector<32x32xbf16>
    %cst_72 = arith.constant dense<0.000000e+00> : vector<128x32xf32>
    %161 = tpu.matmul %159, %160, %cst_72 {dimension_numbers = #tpu.dot_dimension_numbers<[1], [0], [0], [1], [0, 0, 1, 1], [], []>} : vector<128x32xbf16>, vector<32x32xbf16>, vector<128x32xf32> -> vector<128x32xf32>
    %c0_73 = arith.constant 0 : index
    %c0_74 = arith.constant 0 : index
    %162 = vector.load %arg13[%c0_73, %c0_74] : memref<1x32xf32, #tpu.memory_space<vmem>>, vector<1x32xf32>
    %163 = vector.broadcast %162 : vector<1x32xf32> to vector<128x32xf32>
    %164 = arith.addf %161, %163 : vector<128x32xf32>
    %c0_75 = arith.constant 0 : index
    %c0_76 = arith.constant 0 : index
    %165 = vector.load %arg14[%c0_75, %c0_76] : memref<128x32xf32, #tpu.memory_space<vmem>>, vector<128x32xf32>
    tpu.vector_store %arg14[%c0_75, %c0_76], %164 {strides = array<i32>} : memref<128x32xf32, #tpu.memory_space<vmem>>, vector<128x32xf32>,
    return
  }
  func.func @transform_0(%arg0: i32) -> (i32, i32) {
    %c0_i32 = arith.constant 0 : i32
    %c0_i32_0 = arith.constant 0 : i32
    return %arg0, %c0_i32 : i32, i32
  }
  func.func @transform_1(%arg0: i32) -> (i32, i32) {
    %c0_i32 = arith.constant 0 : i32
    %c0_i32_0 = arith.constant 0 : i32
    %c0_i32_1 = arith.constant 0 : i32
    return %c0_i32, %c0_i32_0 : i32, i32
  }
  func.func @transform_2(%arg0: i32) -> (i32, i32) {
    %c0_i32 = arith.constant 0 : i32
    %c0_i32_0 = arith.constant 0 : i32
    %c0_i32_1 = arith.constant 0 : i32
    return %c0_i32, %c0_i32_0 : i32, i32
  }
  func.func @transform_3(%arg0: i32) -> (i32, i32) {
    %c0_i32 = arith.constant 0 : i32
    %c0_i32_0 = arith.constant 0 : i32
    %c0_i32_1 = arith.constant 0 : i32
    return %c0_i32, %c0_i32_0 : i32, i32
  }
  func.func @transform_4(%arg0: i32) -> (i32, i32) {
    %c0_i32 = arith.constant 0 : i32
    %c0_i32_0 = arith.constant 0 : i32
    %c0_i32_1 = arith.constant 0 : i32
    return %c0_i32, %c0_i32_0 : i32, i32
  }
  func.func @transform_5(%arg0: i32) -> (i32, i32) {
    %c0_i32 = arith.constant 0 : i32
    %c0_i32_0 = arith.constant 0 : i32
    %c0_i32_1 = arith.constant 0 : i32
    return %c0_i32, %c0_i32_0 : i32, i32
  }
  func.func @transform_6(%arg0: i32) -> (i32, i32) {
    %c0_i32 = arith.constant 0 : i32
    %c0_i32_0 = arith.constant 0 : i32
    %c0_i32_1 = arith.constant 0 : i32
    return %c0_i32, %c0_i32_0 : i32, i32
  }
  func.func @transform_7(%arg0: i32) -> (i32, i32) {
    %c0_i32 = arith.constant 0 : i32
    %c0_i32_0 = arith.constant 0 : i32
    %c0_i32_1 = arith.constant 0 : i32
    return %c0_i32, %c0_i32_0 : i32, i32
  }
  func.func @transform_8(%arg0: i32) -> (i32, i32) {
    %c0_i32 = arith.constant 0 : i32
    %c0_i32_0 = arith.constant 0 : i32
    %c0_i32_1 = arith.constant 0 : i32
    return %c0_i32, %c0_i32_0 : i32, i32
  }
  func.func @transform_9(%arg0: i32) -> (i32, i32, i32, i32) {
    %c0_i32 = arith.constant 0 : i32
    %c0_i32_0 = arith.constant 0 : i32
    %c0_i32_1 = arith.constant 0 : i32
    %c0_i32_2 = arith.constant 0 : i32
    %c0_i32_3 = arith.constant 0 : i32
    return %c0_i32, %c0_i32_0, %c0_i32_1, %c0_i32_2 : i32, i32, i32, i32
  }
  func.func @transform_10(%arg0: i32) -> (i32, i32, i32, i32) {
    %c0_i32 = arith.constant 0 : i32
    %c0_i32_0 = arith.constant 0 : i32
    %c0_i32_1 = arith.constant 0 : i32
    %c0_i32_2 = arith.constant 0 : i32
    %c0_i32_3 = arith.constant 0 : i32
    return %c0_i32, %c0_i32_0, %c0_i32_1, %c0_i32_2 : i32, i32, i32, i32
  }
  func.func @transform_11(%arg0: i32) -> (i32, i32) {
    %c0_i32 = arith.constant 0 : i32
    %c0_i32_0 = arith.constant 0 : i32
    %c0_i32_1 = arith.constant 0 : i32
    return %c0_i32, %c0_i32_0 : i32, i32
  }
  func.func @transform_12(%arg0: i32) -> (i32, i32) {
    %c0_i32 = arith.constant 0 : i32
    %c0_i32_0 = arith.constant 0 : i32
    %c0_i32_1 = arith.constant 0 : i32
    return %c0_i32, %c0_i32_0 : i32, i32
  }
  func.func @transform_13(%arg0: i32) -> (i32, i32) {
    %c0_i32 = arith.constant 0 : i32
    %c0_i32_0 = arith.constant 0 : i32
    return %arg0, %c0_i32 : i32, i32
  }
}

module attributes {stable_mosaic.version = 11 : i64} {
  func.func @_window_attn_kernel(%arg0: i32, %arg1: memref<128x32xf32, #tpu.memory_space<vmem>>, %arg2: memref<1x32xf32, #tpu.memory_space<vmem>>, %arg3: memref<1x32xf32, #tpu.memory_space<vmem>>, %arg4: memref<32x32xbf16, #tpu.memory_space<vmem>>, %arg5: memref<32x32xbf16, #tpu.memory_space<vmem>>, %arg6: memref<32x32xbf16, #tpu.memory_space<vmem>>, %arg7: memref<1x32xf32, #tpu.memory_space<vmem>>, %arg8: memref<1x32xf32, #tpu.memory_space<vmem>>, %arg9: memref<1x32xf32, #tpu.memory_space<vmem>>, %arg10: memref<4x1x1x32xbf16, #tpu.memory_space<vmem>>, %arg11: memref<4x1x16x16xf32, #tpu.memory_space<vmem>>, %arg12: memref<32x32xbf16, #tpu.memory_space<vmem>>, %arg13: memref<1x32xf32, #tpu.memory_space<vmem>>, %arg14: memref<128x32xf32, #tpu.memory_space<vmem>>) attributes {dimension_semantics = [#tpu.dimension_semantics<parallel>], iteration_bounds = array<i64: 1>, scalar_prefetch = 0 : i64, scratch_operands = 0 : i64, tpu.core_type = #tpu.core_type<tc>, window_params = [{transform_indices = @transform_0, window_bounds = array<i64: 128, 32>}, {pipeline_mode = #tpu.pipeline_mode<synchronous>, transform_indices = @transform_1, window_bounds = array<i64: 1, 32>}, {pipeline_mode = #tpu.pipeline_mode<synchronous>, transform_indices = @transform_2, window_bounds = array<i64: 1, 32>}, {pipeline_mode = #tpu.pipeline_mode<synchronous>, transform_indices = @transform_3, window_bounds = array<i64: 32, 32>}, {pipeline_mode = #tpu.pipeline_mode<synchronous>, transform_indices = @transform_4, window_bounds = array<i64: 32, 32>}, {pipeline_mode = #tpu.pipeline_mode<synchronous>, transform_indices = @transform_5, window_bounds = array<i64: 32, 32>}, {pipeline_mode = #tpu.pipeline_mode<synchronous>, transform_indices = @transform_6, window_bounds = array<i64: 1, 32>}, {pipeline_mode = #tpu.pipeline_mode<synchronous>, transform_indices = @transform_7, window_bounds = array<i64: 1, 32>}, {pipeline_mode = #tpu.pipeline_mode<synchronous>, transform_indices = @transform_8, window_bounds = array<i64: 1, 32>}, {pipeline_mode = #tpu.pipeline_mode<synchronous>, transform_indices = @transform_9, window_bounds = array<i64: 4, 1, 1, 32>}, {pipeline_mode = #tpu.pipeline_mode<synchronous>, transform_indices = @transform_10, window_bounds = array<i64: 4, 1, 16, 16>}, {pipeline_mode = #tpu.pipeline_mode<synchronous>, transform_indices = @transform_11, window_bounds = array<i64: 32, 32>}, {pipeline_mode = #tpu.pipeline_mode<synchronous>, transform_indices = @transform_12, window_bounds = array<i64: 1, 32>}, {transform_indices = @transform_13, window_bounds = array<i64: 128, 32>}]} {
    %c0 = arith.constant 0 : index
    %c0_0 = arith.constant 0 : index
    %0 = vector.load %arg1[%c0, %c0_0] : memref<128x32xf32, #tpu.memory_space<vmem>>, vector<128x32xf32>
    %cst = arith.constant dense<0.000000e+00> : vector<128xf32>
    %1 = vector.multi_reduction <add>, %0, %cst [1] : vector<128x32xf32> to vector<128xf32>
    %2 = vector.shape_cast %1 : vector<128xf32> to vector<128x1xf32>
    %cst_1 = arith.constant 3.200000e+01 : f32
    %3 = vector.broadcast %cst_1 : f32 to vector<128x1xf32>
    %4 = arith.divf %2, %3 : vector<128x1xf32>
    %5 = vector.broadcast %4 : vector<128x1xf32> to vector<128x32xf32>
    %6 = arith.subf %0, %5 : vector<128x32xf32>
    %7 = arith.mulf %6, %6 : vector<128x32xf32>
    %cst_2 = arith.constant dense<0.000000e+00> : vector<128xf32>
    %8 = vector.multi_reduction <add>, %7, %cst_2 [1] : vector<128x32xf32> to vector<128xf32>
    %9 = vector.shape_cast %8 : vector<128xf32> to vector<128x1xf32>
    %cst_3 = arith.constant 3.200000e+01 : f32
    %10 = vector.broadcast %cst_3 : f32 to vector<128x1xf32>
    %11 = arith.divf %9, %10 : vector<128x1xf32>
    %cst_4 = arith.constant 9.99999974E-6 : f32
    %12 = vector.broadcast %cst_4 : f32 to vector<128x1xf32>
    %13 = arith.addf %11, %12 : vector<128x1xf32>
    %14 = math.rsqrt %13 : vector<128x1xf32>
    %15 = vector.broadcast %14 : vector<128x1xf32> to vector<128x32xf32>
    %16 = arith.mulf %6, %15 : vector<128x32xf32>
    %c0_5 = arith.constant 0 : index
    %c0_6 = arith.constant 0 : index
    %17 = vector.load %arg2[%c0_5, %c0_6] : memref<1x32xf32, #tpu.memory_space<vmem>>, vector<1x32xf32>
    %18 = vector.broadcast %17 : vector<1x32xf32> to vector<128x32xf32>
    %19 = arith.mulf %16, %18 : vector<128x32xf32>
    %c0_7 = arith.constant 0 : index
    %c0_8 = arith.constant 0 : index
    %20 = vector.load %arg3[%c0_7, %c0_8] : memref<1x32xf32, #tpu.memory_space<vmem>>, vector<1x32xf32>
    %21 = vector.broadcast %20 : vector<1x32xf32> to vector<128x32xf32>
    %22 = arith.addf %19, %21 : vector<128x32xf32>
    %23 = arith.truncf %22 : vector<128x32xf32> to vector<128x32xbf16>
    %c0_9 = arith.constant 0 : index
    %c0_10 = arith.constant 0 : index
    %24 = vector.load %arg4[%c0_9, %c0_10] : memref<32x32xbf16, #tpu.memory_space<vmem>>, vector<32x32xbf16>
    %cst_11 = arith.constant dense<0.000000e+00> : vector<128x32xf32>
    %25 = tpu.matmul %23, %24, %cst_11 {dimension_numbers = #tpu.dot_dimension_numbers<[1], [0], [0], [1], [0, 0, 1, 1], [], []>} : vector<128x32xbf16>, vector<32x32xbf16>, vector<128x32xf32> -> vector<128x32xf32>
    %c0_12 = arith.constant 0 : index
    %c0_13 = arith.constant 0 : index
    %26 = vector.load %arg7[%c0_12, %c0_13] : memref<1x32xf32, #tpu.memory_space<vmem>>, vector<1x32xf32>
    %27 = vector.broadcast %26 : vector<1x32xf32> to vector<128x32xf32>
    %28 = arith.addf %25, %27 : vector<128x32xf32>
    %c0_14 = arith.constant 0 : index
    %c0_15 = arith.constant 0 : index
    %29 = vector.load %arg5[%c0_14, %c0_15] : memref<32x32xbf16, #tpu.memory_space<vmem>>, vector<32x32xbf16>
    %cst_16 = arith.constant dense<0.000000e+00> : vector<128x32xf32>
    %30 = tpu.matmul %23, %29, %cst_16 {dimension_numbers = #tpu.dot_dimension_numbers<[1], [0], [0], [1], [0, 0, 1, 1], [], []>} : vector<128x32xbf16>, vector<32x32xbf16>, vector<128x32xf32> -> vector<128x32xf32>
    %c0_17 = arith.constant 0 : index
    %c0_18 = arith.constant 0 : index
    %31 = vector.load %arg8[%c0_17, %c0_18] : memref<1x32xf32, #tpu.memory_space<vmem>>, vector<1x32xf32>
    %32 = vector.broadcast %31 : vector<1x32xf32> to vector<128x32xf32>
    %33 = arith.addf %30, %32 : vector<128x32xf32>
    %c0_19 = arith.constant 0 : index
    %c0_20 = arith.constant 0 : index
    %34 = vector.load %arg6[%c0_19, %c0_20] : memref<32x32xbf16, #tpu.memory_space<vmem>>, vector<32x32xbf16>
    %cst_21 = arith.constant dense<0.000000e+00> : vector<128x32xf32>
    %35 = tpu.matmul %23, %34, %cst_21 {dimension_numbers = #tpu.dot_dimension_numbers<[1], [0], [0], [1], [0, 0, 1, 1], [], []>} : vector<128x32xbf16>, vector<32x32xbf16>, vector<128x32xf32> -> vector<128x32xf32>
    %c0_22 = arith.constant 0 : index
    %c0_23 = arith.constant 0 : index
    %36 = vector.load %arg9[%c0_22, %c0_23] : memref<1x32xf32, #tpu.memory_space<vmem>>, vector<1x32xf32>
    %37 = vector.broadcast %36 : vector<1x32xf32> to vector<128x32xf32>
    %38 = arith.addf %35, %37 : vector<128x32xf32>
    %39 = vector.shape_cast %28 : vector<128x32xf32> to vector<8x16x32xf32>
    %40 = arith.truncf %39 : vector<8x16x32xf32> to vector<8x16x32xbf16>
    %41 = vector.shape_cast %33 : vector<128x32xf32> to vector<8x16x32xf32>
    %42 = arith.truncf %41 : vector<8x16x32xf32> to vector<8x16x32xbf16>
    %43 = vector.shape_cast %38 : vector<128x32xf32> to vector<8x16x32xf32>
    %44 = arith.truncf %43 : vector<8x16x32xf32> to vector<8x16x32xbf16>
    %cst_24 = arith.constant 0.000000e+00 : f32
    %45 = vector.broadcast %cst_24 : f32 to vector<8x16x32xf32>
    %c0_25 = arith.constant 0 : index
    %c0_26 = arith.constant 0 : index
    %c0_27 = arith.constant 0 : index
    %c0_28 = arith.constant 0 : index
    %46 = vector.load %arg10[%c0_25, %c0_26, %c0_27, %c0_28] : memref<4x1x1x32xbf16, #tpu.memory_space<vmem>>, vector<1x1x1x32xbf16>
    %47 = vector.shape_cast %46 : vector<1x1x1x32xbf16> to vector<1x1x32xbf16>
    %48 = vector.broadcast %47 : vector<1x1x32xbf16> to vector<8x16x32xbf16>
    %49 = arith.mulf %40, %48 : vector<8x16x32xbf16>
    "tpu.trace_start"() <{level = 10 : i32, message = "bnc,bmc->bnm"}> : () -> ()
    %cst_29 = arith.constant dense<0.000000e+00> : vector<8x16x16xf32>
    %50 = tpu.matmul %49, %42, %cst_29 {dimension_numbers = #tpu.dot_dimension_numbers<[2], [2], [1], [1], [0, 0, 0, 1, 1, 1], [0], [0]>} : vector<8x16x32xbf16>, vector<8x16x32xbf16>, vector<8x16x16xf32> -> vector<8x16x16xf32>
    "tpu.trace_stop"() : () -> ()
    %51 = vector.shape_cast %50 : vector<8x16x16xf32> to vector<8x1x16x16xf32>
    %c0_30 = arith.constant 0 : index
    %c0_31 = arith.constant 0 : index
    %c0_32 = arith.constant 0 : index
    %c0_33 = arith.constant 0 : index
    %52 = vector.load %arg11[%c0_30, %c0_31, %c0_32, %c0_33] : memref<4x1x16x16xf32, #tpu.memory_space<vmem>>, vector<1x1x16x16xf32>
    %53 = vector.shape_cast %52 : vector<1x1x16x16xf32> to vector<1x16x16xf32>
    %54 = vector.shape_cast %53 : vector<1x16x16xf32> to vector<1x1x16x16xf32>
    %55 = vector.broadcast %54 : vector<1x1x16x16xf32> to vector<8x1x16x16xf32>
    %56 = arith.addf %51, %55 : vector<8x1x16x16xf32>
    %57 = vector.shape_cast %56 : vector<8x1x16x16xf32> to vector<8x16x16xf32>
    %cst_34 = arith.constant dense<0xFF800000> : vector<8x16xf32>
    %58 = vector.multi_reduction <maximumf>, %57, %cst_34 [2] : vector<8x16x16xf32> to vector<8x16xf32>
    %59 = vector.shape_cast %58 : vector<8x16xf32> to vector<8x16x1xf32>
    %60 = vector.broadcast %59 : vector<8x16x1xf32> to vector<8x16x16xf32>
    %61 = arith.subf %57, %60 : vector<8x16x16xf32>
    %62 = math.exp %61 : vector<8x16x16xf32>
    %cst_35 = arith.constant dense<0.000000e+00> : vector<8x16xf32>
    %63 = vector.multi_reduction <add>, %62, %cst_35 [2] : vector<8x16x16xf32> to vector<8x16xf32>
    %64 = vector.shape_cast %63 : vector<8x16xf32> to vector<8x16x1xf32>
    %65 = tpu.reciprocal %64 {approx = true} : vector<8x16x1xf32> -> vector<8x16x1xf32>
    %66 = vector.broadcast %65 : vector<8x16x1xf32> to vector<8x16x16xf32>
    %67 = arith.mulf %62, %66 : vector<8x16x16xf32>
    %68 = arith.truncf %67 : vector<8x16x16xf32> to vector<8x16x16xbf16>
    "tpu.trace_start"() <{level = 10 : i32, message = "bnm,bmc->bnc"}> : () -> ()
    %cst_36 = arith.constant dense<0.000000e+00> : vector<8x16x32xf32>
    %69 = tpu.matmul %68, %44, %cst_36 {dimension_numbers = #tpu.dot_dimension_numbers<[2], [1], [1], [2], [0, 0, 0, 1, 1, 2], [0], [0]>} : vector<8x16x16xbf16>, vector<8x16x32xbf16>, vector<8x16x32xf32> -> vector<8x16x32xf32>
    "tpu.trace_stop"() : () -> ()
    %70 = arith.extf %47 : vector<1x1x32xbf16> to vector<1x1x32xf32>
    %71 = vector.broadcast %70 : vector<1x1x32xf32> to vector<8x16x32xf32>
    %72 = arith.mulf %71, %69 : vector<8x16x32xf32>
    %73 = arith.addf %45, %72 : vector<8x16x32xf32>
    %c1 = arith.constant 1 : index
    %c0_37 = arith.constant 0 : index
    %c0_38 = arith.constant 0 : index
    %c0_39 = arith.constant 0 : index
    %74 = vector.load %arg10[%c1, %c0_37, %c0_38, %c0_39] : memref<4x1x1x32xbf16, #tpu.memory_space<vmem>>, vector<1x1x1x32xbf16>
    %75 = vector.shape_cast %74 : vector<1x1x1x32xbf16> to vector<1x1x32xbf16>
    %76 = vector.broadcast %75 : vector<1x1x32xbf16> to vector<8x16x32xbf16>
    %77 = arith.mulf %40, %76 : vector<8x16x32xbf16>
    "tpu.trace_start"() <{level = 10 : i32, message = "bnc,bmc->bnm"}> : () -> ()
    %cst_40 = arith.constant dense<0.000000e+00> : vector<8x16x16xf32>
    %78 = tpu.matmul %77, %42, %cst_40 {dimension_numbers = #tpu.dot_dimension_numbers<[2], [2], [1], [1], [0, 0, 0, 1, 1, 1], [0], [0]>} : vector<8x16x32xbf16>, vector<8x16x32xbf16>, vector<8x16x16xf32> -> vector<8x16x16xf32>
    "tpu.trace_stop"() : () -> ()
    %79 = vector.shape_cast %78 : vector<8x16x16xf32> to vector<8x1x16x16xf32>
    %c1_41 = arith.constant 1 : index
    %c0_42 = arith.constant 0 : index
    %c0_43 = arith.constant 0 : index
    %c0_44 = arith.constant 0 : index
    %80 = vector.load %arg11[%c1_41, %c0_42, %c0_43, %c0_44] : memref<4x1x16x16xf32, #tpu.memory_space<vmem>>, vector<1x1x16x16xf32>
    %81 = vector.shape_cast %80 : vector<1x1x16x16xf32> to vector<1x16x16xf32>
    %82 = vector.shape_cast %81 : vector<1x16x16xf32> to vector<1x1x16x16xf32>
    %83 = vector.broadcast %82 : vector<1x1x16x16xf32> to vector<8x1x16x16xf32>
    %84 = arith.addf %79, %83 : vector<8x1x16x16xf32>
    %85 = vector.shape_cast %84 : vector<8x1x16x16xf32> to vector<8x16x16xf32>
    %cst_45 = arith.constant dense<0xFF800000> : vector<8x16xf32>
    %86 = vector.multi_reduction <maximumf>, %85, %cst_45 [2] : vector<8x16x16xf32> to vector<8x16xf32>
    %87 = vector.shape_cast %86 : vector<8x16xf32> to vector<8x16x1xf32>
    %88 = vector.broadcast %87 : vector<8x16x1xf32> to vector<8x16x16xf32>
    %89 = arith.subf %85, %88 : vector<8x16x16xf32>
    %90 = math.exp %89 : vector<8x16x16xf32>
    %cst_46 = arith.constant dense<0.000000e+00> : vector<8x16xf32>
    %91 = vector.multi_reduction <add>, %90, %cst_46 [2] : vector<8x16x16xf32> to vector<8x16xf32>
    %92 = vector.shape_cast %91 : vector<8x16xf32> to vector<8x16x1xf32>
    %93 = tpu.reciprocal %92 {approx = true} : vector<8x16x1xf32> -> vector<8x16x1xf32>
    %94 = vector.broadcast %93 : vector<8x16x1xf32> to vector<8x16x16xf32>
    %95 = arith.mulf %90, %94 : vector<8x16x16xf32>
    %96 = arith.truncf %95 : vector<8x16x16xf32> to vector<8x16x16xbf16>
    "tpu.trace_start"() <{level = 10 : i32, message = "bnm,bmc->bnc"}> : () -> ()
    %cst_47 = arith.constant dense<0.000000e+00> : vector<8x16x32xf32>
    %97 = tpu.matmul %96, %44, %cst_47 {dimension_numbers = #tpu.dot_dimension_numbers<[2], [1], [1], [2], [0, 0, 0, 1, 1, 2], [0], [0]>} : vector<8x16x16xbf16>, vector<8x16x32xbf16>, vector<8x16x32xf32> -> vector<8x16x32xf32>
    "tpu.trace_stop"() : () -> ()
    %98 = arith.extf %75 : vector<1x1x32xbf16> to vector<1x1x32xf32>
    %99 = vector.broadcast %98 : vector<1x1x32xf32> to vector<8x16x32xf32>
    %100 = arith.mulf %99, %97 : vector<8x16x32xf32>
    %101 = arith.addf %73, %100 : vector<8x16x32xf32>
    %c2 = arith.constant 2 : index
    %c0_48 = arith.constant 0 : index
    %c0_49 = arith.constant 0 : index
    %c0_50 = arith.constant 0 : index
    %102 = vector.load %arg10[%c2, %c0_48, %c0_49, %c0_50] : memref<4x1x1x32xbf16, #tpu.memory_space<vmem>>, vector<1x1x1x32xbf16>
    %103 = vector.shape_cast %102 : vector<1x1x1x32xbf16> to vector<1x1x32xbf16>
    %104 = vector.broadcast %103 : vector<1x1x32xbf16> to vector<8x16x32xbf16>
    %105 = arith.mulf %40, %104 : vector<8x16x32xbf16>
    "tpu.trace_start"() <{level = 10 : i32, message = "bnc,bmc->bnm"}> : () -> ()
    %cst_51 = arith.constant dense<0.000000e+00> : vector<8x16x16xf32>
    %106 = tpu.matmul %105, %42, %cst_51 {dimension_numbers = #tpu.dot_dimension_numbers<[2], [2], [1], [1], [0, 0, 0, 1, 1, 1], [0], [0]>} : vector<8x16x32xbf16>, vector<8x16x32xbf16>, vector<8x16x16xf32> -> vector<8x16x16xf32>
    "tpu.trace_stop"() : () -> ()
    %107 = vector.shape_cast %106 : vector<8x16x16xf32> to vector<8x1x16x16xf32>
    %c2_52 = arith.constant 2 : index
    %c0_53 = arith.constant 0 : index
    %c0_54 = arith.constant 0 : index
    %c0_55 = arith.constant 0 : index
    %108 = vector.load %arg11[%c2_52, %c0_53, %c0_54, %c0_55] : memref<4x1x16x16xf32, #tpu.memory_space<vmem>>, vector<1x1x16x16xf32>
    %109 = vector.shape_cast %108 : vector<1x1x16x16xf32> to vector<1x16x16xf32>
    %110 = vector.shape_cast %109 : vector<1x16x16xf32> to vector<1x1x16x16xf32>
    %111 = vector.broadcast %110 : vector<1x1x16x16xf32> to vector<8x1x16x16xf32>
    %112 = arith.addf %107, %111 : vector<8x1x16x16xf32>
    %113 = vector.shape_cast %112 : vector<8x1x16x16xf32> to vector<8x16x16xf32>
    %cst_56 = arith.constant dense<0xFF800000> : vector<8x16xf32>
    %114 = vector.multi_reduction <maximumf>, %113, %cst_56 [2] : vector<8x16x16xf32> to vector<8x16xf32>
    %115 = vector.shape_cast %114 : vector<8x16xf32> to vector<8x16x1xf32>
    %116 = vector.broadcast %115 : vector<8x16x1xf32> to vector<8x16x16xf32>
    %117 = arith.subf %113, %116 : vector<8x16x16xf32>
    %118 = math.exp %117 : vector<8x16x16xf32>
    %cst_57 = arith.constant dense<0.000000e+00> : vector<8x16xf32>
    %119 = vector.multi_reduction <add>, %118, %cst_57 [2] : vector<8x16x16xf32> to vector<8x16xf32>
    %120 = vector.shape_cast %119 : vector<8x16xf32> to vector<8x16x1xf32>
    %121 = tpu.reciprocal %120 {approx = true} : vector<8x16x1xf32> -> vector<8x16x1xf32>
    %122 = vector.broadcast %121 : vector<8x16x1xf32> to vector<8x16x16xf32>
    %123 = arith.mulf %118, %122 : vector<8x16x16xf32>
    %124 = arith.truncf %123 : vector<8x16x16xf32> to vector<8x16x16xbf16>
    "tpu.trace_start"() <{level = 10 : i32, message = "bnm,bmc->bnc"}> : () -> ()
    %cst_58 = arith.constant dense<0.000000e+00> : vector<8x16x32xf32>
    %125 = tpu.matmul %124, %44, %cst_58 {dimension_numbers = #tpu.dot_dimension_numbers<[2], [1], [1], [2], [0, 0, 0, 1, 1, 2], [0], [0]>} : vector<8x16x16xbf16>, vector<8x16x32xbf16>, vector<8x16x32xf32> -> vector<8x16x32xf32>
    "tpu.trace_stop"() : () -> ()
    %126 = arith.extf %103 : vector<1x1x32xbf16> to vector<1x1x32xf32>
    %127 = vector.broadcast %126 : vector<1x1x32xf32> to vector<8x16x32xf32>
    %128 = arith.mulf %127, %125 : vector<8x16x32xf32>
    %129 = arith.addf %101, %128 : vector<8x16x32xf32>
    %c3 = arith.constant 3 : index
    %c0_59 = arith.constant 0 : index
    %c0_60 = arith.constant 0 : index
    %c0_61 = arith.constant 0 : index
    %130 = vector.load %arg10[%c3, %c0_59, %c0_60, %c0_61] : memref<4x1x1x32xbf16, #tpu.memory_space<vmem>>, vector<1x1x1x32xbf16>
    %131 = vector.shape_cast %130 : vector<1x1x1x32xbf16> to vector<1x1x32xbf16>
    %132 = vector.broadcast %131 : vector<1x1x32xbf16> to vector<8x16x32xbf16>
    %133 = arith.mulf %40, %132 : vector<8x16x32xbf16>
    "tpu.trace_start"() <{level = 10 : i32, message = "bnc,bmc->bnm"}> : () -> ()
    %cst_62 = arith.constant dense<0.000000e+00> : vector<8x16x16xf32>
    %134 = tpu.matmul %133, %42, %cst_62 {dimension_numbers = #tpu.dot_dimension_numbers<[2], [2], [1], [1], [0, 0, 0, 1, 1, 1], [0], [0]>} : vector<8x16x32xbf16>, vector<8x16x32xbf16>, vector<8x16x16xf32> -> vector<8x16x16xf32>
    "tpu.trace_stop"() : () -> ()
    %135 = vector.shape_cast %134 : vector<8x16x16xf32> to vector<8x1x16x16xf32>
    %c3_63 = arith.constant 3 : index
    %c0_64 = arith.constant 0 : index
    %c0_65 = arith.constant 0 : index
    %c0_66 = arith.constant 0 : index
    %136 = vector.load %arg11[%c3_63, %c0_64, %c0_65, %c0_66] : memref<4x1x16x16xf32, #tpu.memory_space<vmem>>, vector<1x1x16x16xf32>
    %137 = vector.shape_cast %136 : vector<1x1x16x16xf32> to vector<1x16x16xf32>
    %138 = vector.shape_cast %137 : vector<1x16x16xf32> to vector<1x1x16x16xf32>
    %139 = vector.broadcast %138 : vector<1x1x16x16xf32> to vector<8x1x16x16xf32>
    %140 = arith.addf %135, %139 : vector<8x1x16x16xf32>
    %141 = vector.shape_cast %140 : vector<8x1x16x16xf32> to vector<8x16x16xf32>
    %cst_67 = arith.constant dense<0xFF800000> : vector<8x16xf32>
    %142 = vector.multi_reduction <maximumf>, %141, %cst_67 [2] : vector<8x16x16xf32> to vector<8x16xf32>
    %143 = vector.shape_cast %142 : vector<8x16xf32> to vector<8x16x1xf32>
    %144 = vector.broadcast %143 : vector<8x16x1xf32> to vector<8x16x16xf32>
    %145 = arith.subf %141, %144 : vector<8x16x16xf32>
    %146 = math.exp %145 : vector<8x16x16xf32>
    %cst_68 = arith.constant dense<0.000000e+00> : vector<8x16xf32>
    %147 = vector.multi_reduction <add>, %146, %cst_68 [2] : vector<8x16x16xf32> to vector<8x16xf32>
    %148 = vector.shape_cast %147 : vector<8x16xf32> to vector<8x16x1xf32>
    %149 = tpu.reciprocal %148 {approx = true} : vector<8x16x1xf32> -> vector<8x16x1xf32>
    %150 = vector.broadcast %149 : vector<8x16x1xf32> to vector<8x16x16xf32>
    %151 = arith.mulf %146, %150 : vector<8x16x16xf32>
    %152 = arith.truncf %151 : vector<8x16x16xf32> to vector<8x16x16xbf16>
    "tpu.trace_start"() <{level = 10 : i32, message = "bnm,bmc->bnc"}> : () -> ()
    %cst_69 = arith.constant dense<0.000000e+00> : vector<8x16x32xf32>
    %153 = tpu.matmul %152, %44, %cst_69 {dimension_numbers = #tpu.dot_dimension_numbers<[2], [1], [1], [2], [0, 0, 0, 1, 1, 2], [0], [0]>} : vector<8x16x16xbf16>, vector<8x16x32xbf16>, vector<8x16x32xf32> -> vector<8x16x32xf32>
    "tpu.trace_stop"() : () -> ()
    %154 = arith.extf %131 : vector<1x1x32xbf16> to vector<1x1x32xf32>
    %155 = vector.broadcast %154 : vector<1x1x32xf32> to vector<8x16x32xf32>
    %156 = arith.mulf %155, %153 : vector<8x16x32xf32>
    %157 = arith.addf %129, %156 : vector<8x16x32xf32>
    %158 = vector.shape_cast %157 : vector<8x16x32xf32> to vector<128x32xf32>
    %159 = arith.truncf %158 : vector<128x32xf32> to vector<128x32xbf16>
    %c0_70 = arith.constant 0 : index
    %c0_71 = arith.constant 0 : index
    %160 = vector.load %arg12[%c0_70, %c0_71] : memref<32x32xbf16, #tpu.memory_space<vmem>>, vector<32x32xbf16>
    %cst_72 = arith.constant dense<0.000000e+00> : vector<128x32xf32>
    %161 = tpu.matmul %159, %160, %cst_72 {dimension_numbers = #tpu.dot_dimension_numbers<[1], [0], [0], [1], [0, 0, 1, 1], [], []>} : vector<128x32xbf16>, vector<32x32xbf16>, vector<128x32xf32> -> vector<128x32xf32>
    %c0_73 = arith.constant 0 : index
    %c0_74 = arith.constant 0 : index
    %162 = vector.load %arg13[%c0_73, %c0_74] : memref<1x32xf32, #tpu.memory_space<vmem>>, vector<1x32xf32>
    %163 = vector.broadcast %162 : vector<1x32xf32> to vector<128x32xf32>
    %164 = arith.addf %161, %163 : vector<128x32xf32>
    %c0_75 = arith.constant 0 : index
    %c0_76 = arith.constant 0 : index
    %165 = vector.load %arg14[%c0_75, %c0_76] : memref<128x32xf32, #tpu.memory_space<vmem>>, vector<128x32xf32>
    tpu.vector_store %arg14[%c0_75, %c0_76], %164 {strides = array<i32>} : memref<128x32xf32, #tpu.memory_space<vmem>>, vector<128x32xf32>,
    return
  }
  func.func @transform_0(%arg0: i32) -> (i32, i32) {
    %c0_i32 = arith.constant 0 : i32
    %c0_i32_0 = arith.constant 0 : i32
    return %arg0, %c0_i32 : i32, i32
  }
  func.func @transform_1(%arg0: i32) -> (i32, i32) {
    %c0_i32 = arith.constant 0 : i32
    %c0_i32_0 = arith.constant 0 : i32
    %c0_i32_1 = arith.constant 0 : i32
    return %c0_i32, %c0_i32_0 : i32, i32
  }
  func.func @transform_2(%arg0: i32) -> (i32, i32) {
    %c0_i32 = arith.constant 0 : i32
    %c0_i32_0 = arith.constant 0 : i32
    %c0_i32_1 = arith.constant 0 : i32
    return %c0_i32, %c0_i32_0 : i32, i32
  }
  func.func @transform_3(%arg0: i32) -> (i32, i32) {
    %c0_i32 = arith.constant 0 : i32
    %c0_i32_0 = arith.constant 0 : i32
    %c0_i32_1 = arith.constant 0 : i32
    return %c0_i32, %c0_i32_0 : i32, i32
  }
  func.func @transform_4(%arg0: i32) -> (i32, i32) {
    %c0_i32 = arith.constant 0 : i32
    %c0_i32_0 = arith.constant 0 : i32
    %c0_i32_1 = arith.constant 0 : i32
    return %c0_i32, %c0_i32_0 : i32, i32
  }
  func.func @transform_5(%arg0: i32) -> (i32, i32) {
    %c0_i32 = arith.constant 0 : i32
    %c0_i32_0 = arith.constant 0 : i32
    %c0_i32_1 = arith.constant 0 : i32
    return %c0_i32, %c0_i32_0 : i32, i32
  }
  func.func @transform_6(%arg0: i32) -> (i32, i32) {
    %c0_i32 = arith.constant 0 : i32
    %c0_i32_0 = arith.constant 0 : i32
    %c0_i32_1 = arith.constant 0 : i32
    return %c0_i32, %c0_i32_0 : i32, i32
  }
  func.func @transform_7(%arg0: i32) -> (i32, i32) {
    %c0_i32 = arith.constant 0 : i32
    %c0_i32_0 = arith.constant 0 : i32
    %c0_i32_1 = arith.constant 0 : i32
    return %c0_i32, %c0_i32_0 : i32, i32
  }
  func.func @transform_8(%arg0: i32) -> (i32, i32) {
    %c0_i32 = arith.constant 0 : i32
    %c0_i32_0 = arith.constant 0 : i32
    %c0_i32_1 = arith.constant 0 : i32
    return %c0_i32, %c0_i32_0 : i32, i32
  }
  func.func @transform_9(%arg0: i32) -> (i32, i32, i32, i32) {
    %c0_i32 = arith.constant 0 : i32
    %c0_i32_0 = arith.constant 0 : i32
    %c0_i32_1 = arith.constant 0 : i32
    %c0_i32_2 = arith.constant 0 : i32
    %c0_i32_3 = arith.constant 0 : i32
    return %c0_i32, %c0_i32_0, %c0_i32_1, %c0_i32_2 : i32, i32, i32, i32
  }
  func.func @transform_10(%arg0: i32) -> (i32, i32, i32, i32) {
    %c0_i32 = arith.constant 0 : i32
    %c0_i32_0 = arith.constant 0 : i32
    %c0_i32_1 = arith.constant 0 : i32
    %c0_i32_2 = arith.constant 0 : i32
    %c0_i32_3 = arith.constant 0 : i32
    return %c0_i32, %c0_i32_0, %c0_i32_1, %c0_i32_2 : i32, i32, i32, i32
  }
  func.func @transform_11(%arg0: i32) -> (i32, i32) {
    %c0_i32 = arith.constant 0 : i32
    %c0_i32_0 = arith.constant 0 : i32
    %c0_i32_1 = arith.constant 0 : i32
    return %c0_i32, %c0_i32_0 : i32, i32
  }
  func.func @transform_12(%arg0: i32) -> (i32, i32) {
    %c0_i32 = arith.constant 0 : i32
    %c0_i32_0 = arith.constant 0 : i32
    %c0_i32_1 = arith.constant 0 : i32
    return %c0_i32, %c0_i32_0 : i32, i32
  }
  func.func @transform_13(%arg0: i32) -> (i32, i32) {
    %c0_i32 = arith.constant 0 : i32
    %c0_i32_0 = arith.constant 0 : i32
    return %arg0, %c0_i32 : i32, i32
  }
}

</mosaic_0001>

<bundles_post_ra>
// kernel: tpu_custom_call.1
= control target key start
LH: loop header
LB: loop body
LE: loop exit
PB: predicated region body
PF: predicated region fallthrough
CT: control target
= control target key end

     0   :  { %vm61_vm0 = vcmask 261120   ;;  %vm5826_vm1 = vmmov 0   ;;  %vm1143_vm2 = vcmask 130048   ;;  %s7870_s0 = inlined_call_operand.vmem [shape: f32[128,32], index: 0, kind: input, shape index: {}]   ;;  %s7871_s3 = inlined_call_operand.vmem [shape: bf16[32,32], index: 3, kind: input, shape index: {}]   ;;  %s7872_s4 = inlined_call_operand.vmem [shape: bf16[32,32], index: 4, kind: input, shape index: {}]   ;;  %s7873_s5 = inlined_call_operand.vmem [shape: bf16[32,32], index: 5, kind: input, shape index: {}]   ;;  %s7874_s1 = inlined_call_operand.vmem [shape: f32[1,32], index: 1, kind: input, shape index: {}]   ;;  %s7875_s2 = inlined_call_operand.vmem [shape: f32[1,32], index: 2, kind: input, shape index: {}]   ;;  %s7876_s9 = inlined_call_operand.vmem [shape: bf16[4,1,1,32], index: 9, kind: input, shape index: {}]   ;;  %s7877_s6 = inlined_call_operand.vmem [shape: f32[1,32], index: 6, kind: input, shape index: {}]   ;;  %s7878_s7 = inlined_call_operand.vmem [shape: f32[1,32], index: 7, kind: input, shape index: {}]   ;;  %s7879_s8 = inlined_call_operand.vmem [shape: f32[1,32], index: 8, kind: input, shape index: {}]   ;;  %s7880_s10 = inlined_call_operand.vmem [shape: f32[4,1,16,16], index: 10, kind: input, shape index: {}]   ;;  %s7881_s11 = inlined_call_operand.vmem [shape: bf16[32,32], index: 11, kind: input, shape index: {}]   ;;  %s7882_s12 = inlined_call_operand.vmem [shape: f32[1,32], index: 12, kind: input, shape index: {}]   ;;  %s7883_s13 = inlined_call_operand.vmem [shape: f32[128,32], index: 13, kind: output, shape index: {}]  }
   0x1   :  { %v53_v0 = vld [vmem:[%s7870_s0 + $0x40] sm:$0xff]  ;;  %v55_v1 = vld [vmem:[%s7870_s0 + $0x50] sm:$0xff]  ;;  %v54_v2 = vld [vmem:[%s7870_s0 + $0x48] sm:$0xff] }
   0x2   :  { %v86_v3 = vsel %vm61_vm0, %v53_v0, 0.0  ;;  %v92_v4 = vsel %vm61_vm0, %v55_v1, 0.0  ;;  %v56_v5 = vld [vmem:[%s7870_s0 + $0x58] sm:$0xff]  ;;  %v89_v6 = vsel %vm61_vm0, %v54_v2, 0.0  ;;  %v57_v8 = vld [vmem:[%s7870_s0 + $0x60] sm:$0xff]  ;;  %v58_v9 = vld [vmem:[%s7870_s0 + $0x68] sm:$0xff] }
   0x3   :  { %87 = vadd.xlane.f32.xlu0 %v86_v3  ;;  %93 = vadd.xlane.f32.xlu1 %v92_v4  ;;  %v95_v7 = vsel %vm61_vm0, %v56_v5, 0.0  ;;  %v98_v10 = vsel %vm61_vm0, %v57_v8, 0.0  ;;  %v101_v11 = vsel %vm61_vm0, %v58_v9, 0.0  ;;  %v5924_v12 = vld [vmem:[%s7870_s0 + $0x70] sm:$0xff]  ;;  %v5929_v13 = vld [vmem:[%s7870_s0 + $0x78] sm:$0xff]  ;;  %v5938_v16 = vld [vmem:[%s7870_s0] sm:$0xff] }
   0x4   :  { %v104_v14 = vsel %vm61_vm0, %v5924_v12, 0.0  ;;  %v107_v15 = vsel %vm61_vm0, %v5929_v13, 0.0  ;;  %v5943_v17 = vld [vmem:[%s7870_s0 + $0x8] sm:$0xff]  ;;  %v62_v18 = vsel %vm61_vm0, %v5938_v16, 0.0  ;;  %v5952_v20 = vld [vmem:[%s7870_s0 + $0x10] sm:$0xff]  ;;  %v5957_v21 = vld [vmem:[%s7870_s0 + $0x18] sm:$0xff] }
   0x5   :  { %v65_v19 = vsel %vm61_vm0, %v5943_v17, 0.0  ;;  %v68_v22 = vsel %vm61_vm0, %v5952_v20, 0.0  ;;  %v71_v23 = vsel %vm61_vm0, %v5957_v21, 0.0  ;;  %v5966_v24 = vld [vmem:[%s7870_s0 + $0x20] sm:$0xff]  ;;  %v5971_v25 = vld [vmem:[%s7870_s0 + $0x28] sm:$0xff]  ;;  %v5980_v28 = vld [vmem:[%s7870_s0 + $0x30] sm:$0xff] }
   0x6   :  { %v74_v26 = vsel %vm61_vm0, %v5966_v24, 0.0  ;;  %v77_v27 = vsel %vm61_vm0, %v5971_v25, 0.0  ;;  %v5985_v29 = vld [vmem:[%s7870_s0 + $0x38] sm:$0xff]  ;;  %v80_v30 = vsel %vm61_vm0, %v5980_v28, 0.0 }
   0x7   :  { %90 = vadd.xlane.f32.xlu0 %v89_v6  ;;  %96 = vadd.xlane.f32.xlu1 %v95_v7  ;;  %v83_v31 = vsel %vm61_vm0, %v5985_v29, 0.0 }
   0xb   :  { %99 = vadd.xlane.f32.xlu0 %v98_v10  ;;  %102 = vadd.xlane.f32.xlu1 %v101_v11 }
   0xf   :  { %105 = vadd.xlane.f32.xlu0 %v104_v14  ;;  %108 = vadd.xlane.f32.xlu1 %v107_v15 }
  0x13   :  { %63 = vadd.xlane.f32.xlu0 %v62_v18  ;;  %66 = vadd.xlane.f32.xlu1 %v65_v19 }
  0x17   :  { %69 = vadd.xlane.f32.xlu0 %v68_v22  ;;  %72 = vadd.xlane.f32.xlu1 %v71_v23 }
  0x1b   :  { %75 = vadd.xlane.f32.xlu0 %v74_v26  ;;  %78 = vadd.xlane.f32.xlu1 %v77_v27 }
  0x1f   :  { %81 = vadd.xlane.f32.xlu0 %v80_v30  ;;  %84 = vadd.xlane.f32.xlu1 %v83_v31 }
  0x90   :  { %v88_v32 = vpop.xlane.xlu0 %87  ;;  %v94_v33 = vpop.xlane.xlu1 %93 }
  0x91   :  { %v119_v34 = vmul.f32 0.03125, %v88_v32  ;;  %v121_v35 = vmul.f32 0.03125, %v94_v33 }
  0x93   :  { %v5991_v36 = vsub.f32 %v53_v0, %v119_v34  ;;  %v5993_v37 = vsub.f32 %v55_v1, %v121_v35 }
  0x94   :  { %v91_v38 = vpop.xlane.xlu0 %90  ;;  %v97_v39 = vpop.xlane.xlu1 %96 }
  0x95   :  { %v120_v40 = vmul.f32 0.03125, %v91_v38  ;;  %v122_v41 = vmul.f32 0.03125, %v97_v39  ;;  %v151_v42 = vmul.f32 %v5991_v36, %v5991_v36  ;;  %v153_v43 = vmul.f32 %v5993_v37, %v5993_v37 }
  0x97   :  { %v5999_v44 = vsub.f32 %v54_v2, %v120_v40  ;;  %v6001_v45 = vsub.f32 %v56_v5, %v122_v41  ;;  %v183_v46 = vsel %vm61_vm0, %v151_v42, 0.0  ;;  %v189_v49 = vsel %vm61_vm0, %v153_v43, 0.0 }
  0x98   :  { %v100_v47 = vpop.xlane.xlu0 %99  ;;  %184 = vadd.xlane.f32.xlu0 %v183_v46  ;;  %v103_v48 = vpop.xlane.xlu1 %102 }
  0x99   :  { %v123_v50 = vmul.f32 0.03125, %v100_v47  ;;  %v124_v51 = vmul.f32 0.03125, %v103_v48  ;;  %v152_v52 = vmul.f32 %v5999_v44, %v5999_v44  ;;  %v154_v53 = vmul.f32 %v6001_v45, %v6001_v45 }
  0x9b   :  { %v6009_v54 = vsub.f32 %v57_v8, %v123_v50  ;;  %v6011_v55 = vsub.f32 %v58_v9, %v124_v51  ;;  %v186_v56 = vsel %vm61_vm0, %v152_v52, 0.0  ;;  %v192_v59 = vsel %vm61_vm0, %v154_v53, 0.0  ;;  %v5530_v53 = vld [vmem:[%s7871_s3 + $0x8] sm:$0xff]  }
  0x9c   :  { %v106_v57 = vpop.xlane.xlu0 %105  ;;  %187 = vadd.xlane.f32.xlu1 %v186_v56  ;;  %190 = vadd.xlane.f32.xlu0 %v189_v49  ;;  %v109_v58 = vpop.xlane.xlu1 %108  ;;  %v6090_v56 = vld [vmem:[%s7872_s4] sm:$0xff]  }
  0x9d   :  { %v125_v60 = vmul.f32 0.03125, %v106_v57  ;;  %v126_v61 = vmul.f32 0.03125, %v109_v58  ;;  %v155_v62 = vmul.f32 %v6009_v54, %v6009_v54  ;;  %v156_v63 = vmul.f32 %v6011_v55, %v6011_v55  ;;  %v6096_v57 = vld [vmem:[%s7873_s5] sm:$0xff]  }
  0x9f   :  { %v6020_v0 = vsub.f32 %v5924_v12, %v125_v60  ;;  %v6023_v1 = vsub.f32 %v5929_v13, %v126_v61  ;;  %v195_v2 = vsel %vm61_vm0, %v155_v62, 0.0  ;;  %v198_v4 = vsel %vm61_vm0, %v156_v63, 0.0 }
  0xa0   :  { %193 = vadd.xlane.f32.xlu1 %v192_v59  ;;  %196 = vadd.xlane.f32.xlu0 %v195_v2  ;;  %v64_v3 = vpop.xlane.xlu0 %63  ;;  %v67_v5 = vpop.xlane.xlu1 %66 }
  0xa1   :  { %v111_v6 = vmul.f32 0.03125, %v64_v3  ;;  %v112_v7 = vmul.f32 0.03125, %v67_v5  ;;  %v157_v8 = vmul.f32 %v6020_v0, %v6020_v0  ;;  %v158_v9 = vmul.f32 %v6023_v1, %v6023_v1 }
  0xa3   :  { %v6032_v10 = vsub.f32 %v5938_v16, %v111_v6  ;;  %v6035_v11 = vsub.f32 %v5943_v17, %v112_v7  ;;  %v201_v12 = vsel %vm61_vm0, %v157_v8, 0.0  ;;  %v204_v14 = vsel %vm61_vm0, %v158_v9, 0.0 }
  0xa4   :  { %199 = vadd.xlane.f32.xlu1 %v198_v4  ;;  %202 = vadd.xlane.f32.xlu0 %v201_v12  ;;  %v70_v13 = vpop.xlane.xlu0 %69  ;;  %v73_v15 = vpop.xlane.xlu1 %72 }
  0xa5   :  { %v113_v18 = vmul.f32 0.03125, %v70_v13  ;;  %v114_v19 = vmul.f32 0.03125, %v73_v15  ;;  %v143_v22 = vmul.f32 %v6032_v10, %v6032_v10  ;;  %v144_v16 = vmul.f32 %v6035_v11, %v6035_v11 }
  0xa7   :  { %v6044_v23 = vsub.f32 %v5952_v20, %v113_v18  ;;  %v6047_v17 = vsub.f32 %v5957_v21, %v114_v19  ;;  %v159_v26 = vsel %vm61_vm0, %v143_v22, 0.0  ;;  %v162_v30 = vsel %vm61_vm0, %v144_v16, 0.0 }
  0xa8   :  { %205 = vadd.xlane.f32.xlu1 %v204_v14  ;;  %160 = vadd.xlane.f32.xlu0 %v159_v26  ;;  %v76_v27 = vpop.xlane.xlu0 %75  ;;  %v79_v31 = vpop.xlane.xlu1 %78 }
  0xa9   :  { %v115_v32 = vmul.f32 0.03125, %v76_v27  ;;  %v116_v33 = vmul.f32 0.03125, %v79_v31  ;;  %v145_v34 = vmul.f32 %v6044_v23, %v6044_v23  ;;  %v146_v20 = vmul.f32 %v6047_v17, %v6047_v17 }
  0xab   :  { %v6056_v35 = vsub.f32 %v5966_v24, %v115_v32  ;;  %v6059_v21 = vsub.f32 %v5971_v25, %v116_v33  ;;  %v165_v38 = vsel %vm61_vm0, %v145_v34, 0.0  ;;  %v168_v40 = vsel %vm61_vm0, %v146_v20, 0.0  ;;  %v6103_v33 = vld [vmem:[%s7874_s1] ss:$0 sm:$0xff] }
  0xac   :  { %163 = vadd.xlane.f32.xlu1 %v162_v30  ;;  %166 = vadd.xlane.f32.xlu0 %v165_v38  ;;  %v82_v39 = vpop.xlane.xlu0 %81  ;;  %v85_v41 = vpop.xlane.xlu1 %84 }
  0xad   :  { %v117_v42 = vmul.f32 0.03125, %v82_v39  ;;  %v118_v43 = vmul.f32 0.03125, %v85_v41  ;;  %v147_v46 = vmul.f32 %v6056_v35, %v6056_v35  ;;  %v148_v24 = vmul.f32 %v6059_v21, %v6059_v21 }
  0xaf   :  { %v6068_v47 = vsub.f32 %v5980_v28, %v117_v42  ;;  %v6071_v25 = vsub.f32 %v5985_v29, %v118_v43  ;;  %v171_v48 = vsel %vm61_vm0, %v147_v46, 0.0  ;;  %v174_v49 = vsel %vm61_vm0, %v148_v24, 0.0  ;;  %v5529_v29 = vld [vmem:[%s7871_s3] sm:$0xff]  }
  0xb0   :  { %169 = vadd.xlane.f32.xlu1 %v168_v40  ;;  %172 = vadd.xlane.f32.xlu0 %v171_v48  ;;  %v6110_v24 = vld [vmem:[%s7875_s2] ss:$0 sm:$0xff] }
  0xb1   :  { %v149_v50 = vmul.f32 %v6068_v47, %v6068_v47  ;;  %v150_v51 = vmul.f32 %v6071_v25, %v6071_v25  ;;  %5523 = vmatprep.subr.bf16.mxu1 %v5529_v29  ;;  %5059 = vmatprep.subr.bf16.mxu0 %v5529_v29 }
  0xb2   :  { %5525 = vmatpush3.bf16.msra.mxu1 %v5529_v29  ;;  %5060 = vmatpush3.bf16.msra.mxu0 %v5529_v29 }
  0xb3   :  { %v177_v52 = vsel %vm61_vm0, %v149_v50, 0.0  ;;  %v180_v28 = vsel %vm61_vm0, %v150_v51, 0.0  ;;  %5524 = vmatprep.subr.bf16.mxu1 %v5530_v53  ;;  %5061 = vmatprep.subr.bf16.mxu0 %v5530_v53 }
  0xb4   :  { %175 = vadd.xlane.f32.xlu1 %v174_v49  ;;  %178 = vadd.xlane.f32.xlu0 %v177_v52 }
  0xb6   :  { %5526 = vmatpush3.bf16.msra.mxu1 %v5530_v53  ;;  %5062 = vmatpush3.bf16.msra.mxu0 %v5530_v53 }
  0xb7   :  { %5079 = vmatprep.subr.bf16.mxu1 %v6090_v56  ;;  %5099 = vmatprep.subr.bf16.mxu0 %v6096_v57 }
  0xb8   :  { %181 = vadd.xlane.f32.xlu1 %v180_v28 }
 0x125   :  { %v185_v58 = vpop.xlane.xlu0 %184 }
 0x126   :  { %v215_v59 = vmul.f32 0.03125, %v185_v58 }
 0x128   :  { %v231_v60 = vadd.f32 1e-05, %v215_v59 }
 0x129   :  { %v188_v61 = vpop.xlane.xlu1 %187  ;;  %v191_v62 = vpop.xlane.xlu0 %190 }
 0x12a   :  { %5537 = vrsqrt.f32 %v231_v60  ;;  %v216_v63 = vmul.f32 0.03125, %v188_v61  ;;  %v217_v2 = vmul.f32 0.03125, %v191_v62 }
 0x12c   :  { %v232_v3 = vadd.f32 1e-05, %v216_v63  ;;  %v233_v4 = vadd.f32 1e-05, %v217_v2 }
 0x12d   :  { %v194_v5 = vpop.xlane.xlu1 %193  ;;  %v197_v6 = vpop.xlane.xlu0 %196 }
 0x12e   :  { %5539 = vrsqrt.f32 %v232_v3  ;;  %v218_v7 = vmul.f32 0.03125, %v194_v5  ;;  %v219_v8 = vmul.f32 0.03125, %v197_v6 }
 0x12f   :  { %5541 = vrsqrt.f32 %v233_v4 }
 0x130   :  { %v234_v9 = vadd.f32 1e-05, %v218_v7  ;;  %v235_v12 = vadd.f32 1e-05, %v219_v8 }
 0x131   :  { %v200_v13 = vpop.xlane.xlu1 %199  ;;  %v203_v14 = vpop.xlane.xlu0 %202 }
 0x132   :  { %5543 = vrsqrt.f32 %v234_v9  ;;  %v220_v15 = vmul.f32 0.03125, %v200_v13  ;;  %v221_v18 = vmul.f32 0.03125, %v203_v14 }
 0x133   :  { %5545 = vrsqrt.f32 %v235_v12 }
 0x134   :  { %v5538_v19 = vpop.eup %5537  ;;  %v236_v22 = vadd.f32 1e-05, %v220_v15  ;;  %v237_v16 = vadd.f32 1e-05, %v221_v18 }
 0x135   :  { %v206_v26 = vpop.xlane.xlu1 %205  ;;  %v161_v27 = vpop.xlane.xlu0 %160  ;;  %v263_v30 = vmul.f32 %v5538_v19, %v5991_v36 }
 0x136   :  { %5547 = vrsqrt.f32 %v236_v22  ;;  %v222_v31 = vmul.f32 0.03125, %v206_v26  ;;  %v207_v32 = vmul.f32 0.03125, %v161_v27  ;;  %v5532_v22 = vld [vmem:[%s7872_s4 + $0x8] sm:$0xff]  }
 0x137   :  { %5549 = vrsqrt.f32 %v237_v16  ;;  %v286_v43 = vmul.f32 %v6103_v33, %v263_v30 }
 0x138   :  { %v5540_v34 = vpop.eup %5539  ;;  %v238_v20 = vadd.f32 1e-05, %v222_v31  ;;  %v223_v38 = vadd.f32 1e-05, %v207_v32 }
 0x139   :  { %v5542_v39 = vpop.eup %5541  ;;  %v164_v40 = vpop.xlane.xlu1 %163  ;;  %v264_v42 = vmul.f32 %v5540_v34, %v5999_v44  ;;  %v309_v53 = vadd.f32 %v6110_v24, %v286_v43 }
 0x13a   :  { %v167_v41 = vpop.xlane.xlu0 %166  ;;  %5551 = vrsqrt.f32 %v238_v20  ;;  %v208_v36 = vmul.f32 0.03125, %v164_v40  ;;  %v265_v48 = vmul.f32 %v5542_v39, %v5993_v37 }
 0x13b   :  { %v209_v46 = vmul.f32 0.03125, %v167_v41  ;;  %5553 = vrsqrt.f32 %v223_v38  ;;  %v287_v49 = vmul.f32 %v6103_v33, %v264_v42 }
 0x13c   :  { %v5544_v50 = vpop.eup %5543  ;;  %v224_v51 = vadd.f32 1e-05, %v208_v36  ;;  %v288_v60 = vmul.f32 %v6103_v33, %v265_v48 }
 0x13d   :  { %v225_v52 = vadd.f32 1e-05, %v209_v46  ;;  %v5546_v28 = vpop.eup %5545  ;;  %v170_v44 = vpop.xlane.xlu1 %169  ;;  %v310_v58 = vadd.f32 %v6110_v24, %v287_v49  ;;  %v266_v59 = vmul.f32 %v5544_v50, %v6001_v45 }
 0x13e   :  { %v173_v29 = vpop.xlane.xlu0 %172  ;;  %5555 = vrsqrt.f32 %v224_v51  ;;  %v210_v61 = vmul.f32 0.03125, %v170_v44  ;;  %v267_v2 = vmul.f32 %v5546_v28, %v6009_v54  ;;  %v311_v8 = vadd.f32 %v6110_v24, %v288_v60 }
 0x13f   :  { %v211_v37 = vmul.f32 0.03125, %v173_v29  ;;  %5557 = vrsqrt.f32 %v225_v52  ;;  %v6118_v62 = vpack.c.bf16 %v310_v58, %v309_v53  ;;  %v289_v63 = vmul.f32 %v6103_v33, %v266_v59 }
 0x140   :  { %v5548_v3 = vpop.eup %5547  ;;  %v226_v4 = vadd.f32 1e-05, %v210_v61  ;;  %v290_v13 = vmul.f32 %v6103_v33, %v267_v2 }
 0x141   :  { %v227_v5 = vadd.f32 1e-05, %v211_v37  ;;  %v5550_v6 = vpop.eup %5549  ;;  %v176_v7 = vpop.xlane.xlu1 %175  ;;  %5071 = vmatprep.mubr.msk.bf16.mxu1 %vm61_vm0, %v6118_v62  ;;  %v312_v9 = vadd.f32 %v6110_v24, %v289_v63  ;;  %v268_v12 = vmul.f32 %v5548_v3, %v6011_v55  ;;  %v5534_v3 = vld [vmem:[%s7873_s5 + $0x8] sm:$0xff]  }
 0x142   :  { %v179_v45 = vpop.xlane.xlu0 %178  ;;  %5559 = vrsqrt.f32 %v226_v4  ;;  %v212_v14 = vmul.f32 0.03125, %v176_v7  ;;  %v269_v15 = vmul.f32 %v5550_v6, %v6020_v0  ;;  %v313_v31 = vadd.f32 %v6110_v24, %v290_v13 }
 0x143   :  { %v213_v54 = vmul.f32 0.03125, %v179_v45  ;;  %5561 = vrsqrt.f32 %v227_v5  ;;  %v6129_v18 = vpack.c.bf16 %v312_v9, %v311_v8  ;;  %v291_v19 = vmul.f32 %v6103_v33, %v268_v12 }
 0x144   :  { %v5552_v16 = vpop.eup %5551  ;;  %v228_v26 = vadd.f32 1e-05, %v212_v14  ;;  %v292_v34 = vmul.f32 %v6103_v33, %v269_v15  ;;  %v6218_v15 = vld [vmem:[%s7876_s9] sm:$0x1] }
 0x145   :  { %v229_v27 = vadd.f32 1e-05, %v213_v54  ;;  %v5554_v55 = vpop.eup %5553  ;;  %v182_v30 = vpop.xlane.xlu1 %181  ;;  %5072 = vmatmul.mubr.msk.bf16.vlgmr.msra.gmra.mrb[0].mxu1 %vm61_vm0, %v6129_v18  ;;  %v314_v0 = vadd.f32 %v6110_v24, %v291_v19  ;;  %v270_v32 = vmul.f32 %v5552_v16, %v6023_v1  ;;  %v4861_v54 = vld [vmem:[%s7876_s9 + $0x3] sm:$0x1]  ;;  %v1680_v19 = vunpack.c.l.bf16 %v6218_v15 }
 0x146   :  { %5563 = vrsqrt.f32 %v228_v26  ;;  %v214_v20 = vmul.f32 0.03125, %v182_v30  ;;  %5080 = vmatpush3.bf16.msra.mxu1 %v6090_v56  ;;  %v255_v38 = vmul.f32 %v5554_v55, %v6032_v10  ;;  %v315_v1 = vadd.f32 %v6110_v24, %v292_v34 }
 0x147   :  { %5565 = vrsqrt.f32 %v229_v27  ;;  %v6143_v39 = vpack.c.bf16 %v314_v0, %v313_v31  ;;  %v293_v40 = vmul.f32 %v6103_v33, %v270_v32  ;;  %5081 = vmatprep.subr.bf16.mxu1 %v5532_v22  ;;  %v4563_v30 = vunpack.c.l.bf16 %v4861_v54 }
 0x148   :  { %v5556_v41 = vpop.eup %5555  ;;  %v230_v42 = vadd.f32 1e-05, %v214_v20  ;;  %v278_v10 = vmul.f32 %v6103_v33, %v255_v38  ;;  %v7884_v20 = vmov 0.0   ;;  %v6251_v38 = vld [vmem:[%s7877_s6] ss:$0 sm:$0xff] }
 0x149   :  { %v5558_v43 = vpop.eup %5557  ;;  %5075 = vmatprep.mubr.msk.bf16.mxu1 %vm61_vm0, %v6143_v39  ;;  %v316_v36 = vadd.f32 %v6110_v24, %v293_v40  ;;  %v256_v56 = vmul.f32 %v5556_v41, %v6035_v11 }
 0x14a   :  { %5567 = vrsqrt.f32 %v230_v42  ;;  %5082 = vmatpush3.bf16.msra.mxu1 %v5532_v22  ;;  %v257_v46 = vmul.f32 %v5558_v43, %v6044_v23  ;;  %v301_v52 = vadd.f32 %v6110_v24, %v278_v10 }
 0x14b   :  { %v324_v48 = vpack.c.bf16 %v316_v36, %v315_v1  ;;  %v279_v49 = vmul.f32 %v6103_v33, %v256_v56  ;;  %5119 = vmatprep.subr.bf16.mxu1 %v7884_v20 }
 0x14c   :  { %v5560_v50 = vpop.eup %5559  ;;  %v280_v11 = vmul.f32 %v6103_v33, %v257_v46 }
 0x14d   :  { %v5562_v51 = vpop.eup %5561  ;;  %5076 = vmatmul.mubr.msk.bf16.gmra.mrb[4].mxu1 %vm61_vm0, %v324_v48  ;;  %v302_v28 = vadd.f32 %v6110_v24, %v279_v49  ;;  %v258_v44 = vmul.f32 %v5560_v50, %v6047_v17 }
 0x14e   :  { %v259_v29 = vmul.f32 %v5562_v51, %v6056_v35  ;;  %v303_v61 = vadd.f32 %v6110_v24, %v280_v11 }
 0x14f   :  { %v317_v53 = vpack.c.bf16 %v302_v28, %v301_v52  ;;  %v281_v23 = vmul.f32 %v6103_v33, %v258_v44 }
 0x150   :  { %v5564_v58 = vpop.eup %5563  ;;  %v282_v59 = vmul.f32 %v6103_v33, %v259_v29 }
 0x151   :  { %v5566_v60 = vpop.eup %5565  ;;  %5063 = vmatprep.mubr.msk.bf16.mxu0 %vm61_vm0, %v317_v53  ;;  %5083 = vmatprep.mubr.msk.bf16.mxu1 %vm61_vm0, %v317_v53  ;;  %v304_v37 = vadd.f32 %v6110_v24, %v281_v23  ;;  %v260_v17 = vmul.f32 %v5564_v58, %v6059_v21 }
 0x152   :  { %v261_v63 = vmul.f32 %v5566_v60, %v6068_v47  ;;  %v305_v5 = vadd.f32 %v6110_v24, %v282_v59 }
 0x153   :  { %v318_v35 = vpack.c.bf16 %v304_v37, %v303_v61  ;;  %v283_v2 = vmul.f32 %v6103_v33, %v260_v17 }
 0x154   :  { %v5568_v4 = vpop.eup %5567  ;;  %v284_v47 = vmul.f32 %v6103_v33, %v261_v63 }
 0x155   :  { %5064 = vmatmul.mubr.msk.bf16.vlgmr.msra.gmra.mrb[0].mxu0 %vm61_vm0, %v318_v35  ;;  %5084 = vmatmul.mubr.msk.bf16.vlgmr.msra.gmra.mrb[8].mxu1 %vm61_vm0, %v318_v35  ;;  %v306_v6 = vadd.f32 %v6110_v24, %v283_v2  ;;  %v262_v21 = vmul.f32 %v5568_v4, %v6071_v25  ;;  %v737_v25 = vlaneseq }
 0x156   :  { %5100 = vmatpush3.bf16.msra.mxu0 %v6096_v57  ;;  %v307_v8 = vadd.f32 %v6110_v24, %v284_v47 }
 0x157   :  { %v319_v7 = vpack.c.bf16 %v306_v6, %v305_v5  ;;  %v285_v45 = vmul.f32 %v6103_v33, %v262_v21  ;;  %5101 = vmatprep.subr.bf16.mxu0 %v5534_v3  ;;  %v738_v57 = vshrl.u32 %v737_v25, 7  ;;  %v4823_v33 = vld [vmem:[%s7876_s9 + $0x1] sm:$0x1]  ;;  %v6296_v21 = vld [vmem:[%s7878_s7] ss:$0 sm:$0xff] }
 0x158   :  { %v2641_v16 = vunpack.c.l.bf16 %v4823_v33 }
 0x159   :  { %5067 = vmatprep.mubr.msk.bf16.mxu0 %vm61_vm0, %v319_v7  ;;  %5087 = vmatprep.mubr.msk.bf16.mxu1 %vm61_vm0, %v319_v7  ;;  %v308_v9 = vadd.f32 %v6110_v24, %v285_v45  ;;  %v4842_v24 = vld [vmem:[%s7876_s9 + $0x2] sm:$0x1]  ;;  %v6210_v13 = vsub.s32 0, %v738_v57 }
 0x15a   :  { %5102 = vmatpush3.bf16.msra.mxu0 %v5534_v3  ;;  %v2681_v14 = vpack.i.b16 %v4842_v24, %v4842_v24  ;;  %v3602_v27 = vunpack.c.l.bf16 %v4842_v24 }
 0x15b   :  { %v320_v12 = vpack.c.bf16 %v308_v9, %v307_v8  ;;  %v6231_v31 = vrot.slane %v1680_v19, %v6210_v13  ;;  %v6234_v0 = vrot.slane %v2641_v16, %v6210_v13  ;;  %v6240_v34 = vrot.slane %v4563_v30, %v6210_v13  ;;  %5143 = vmatprep.subr.bf16.mxu0 %v7884_v20 }
 0x15c   :  { %v6225_v26 = vrot.slane %v2681_v14, %v6210_v13  ;;  %v6237_v32 = vrot.slane %v3602_v27, %v6210_v13 }
 0x15d   :  { %5068 = vmatmul.mubr.msk.bf16.gmra.mrb[4].mxu0 %vm61_vm0, %v320_v12  ;;  %5088 = vmatmul.mubr.msk.bf16.gmra.mrb[12].mxu1 %vm61_vm0, %v320_v12  ;;  %7892 = vst [vmem:[#allocation4_spill] sm:$0xff] %v6240_v34 }
 0x15e   :  { %5091 = vmatprep.mubr.msk.bf16.mxu1 %vm61_vm0, %v6118_v62  ;;  %5103 = vmatprep.mubr.msk.bf16.mxu0 %vm61_vm0, %v317_v53  ;;  %7891 = vst [vmem:[#allocation3_spill] sm:$0xff] %v6237_v32 }
 0x165   :  { %5092 = vmatmul.mubr.msk.bf16.gmra.mrb[16].mxu1 %vm61_vm0, %v6129_v18  ;;  %5104 = vmatmul.mubr.msk.bf16.vlgmr.msra.gmra.mrb[8].mxu0 %vm61_vm0, %v318_v35 }
 0x166   :  { %5095 = vmatprep.mubr.msk.bf16.mxu1 %vm61_vm0, %v6143_v39  ;;  %5107 = vmatprep.mubr.msk.bf16.mxu0 %vm61_vm0, %v319_v7 }
 0x16d   :  { %5096 = vmatmul.mubr.msk.bf16.gmra.mrb[20].mxu1 %vm61_vm0, %v324_v48  ;;  %5108 = vmatmul.mubr.msk.bf16.gmra.mrb[12].mxu0 %vm61_vm0, %v320_v12 }
 0x16e   :  { %5111 = vmatprep.mubr.msk.bf16.mxu0 %vm61_vm0, %v6118_v62  ;;  %v1720_v62 = vpack.i.b16 %v4823_v33, %v4823_v33  ;;  %5121 = vmatprep.mubr.msk.bf16.mxu1 %vm5826_vm1, %v7884_v20 }
 0x170   :  { %v6222_v22 = vrot.slane %v1720_v62, %v6210_v13 }
 0x175   :  { %5112 = vmatmul.mubr.msk.bf16.gmra.mrb[16].mxu0 %vm61_vm0, %v6129_v18  ;;  %v3642_v18 = vpack.i.b16 %v4861_v54, %v4861_v54 }
 0x176   :  { %5115 = vmatprep.mubr.msk.bf16.mxu0 %vm61_vm0, %v6143_v39 }
 0x177   :  { %v6228_v55 = vrot.slane %v3642_v18, %v6210_v13 }
 0x179   :  { %7890 = vst [vmem:[#allocation2_spill] sm:$0xff] %v6228_v55 }
 0x17d   :  { %5116 = vmatmul.mubr.msk.bf16.gmra.mrb[20].mxu0 %vm61_vm0, %v324_v48 }
 0x17e   :  { %5145 = vmatprep.mubr.msk.bf16.mxu0 %vm5826_vm1, %v7884_v20 }
 0x218   :  { %v5073_v39 = vpop.f32.mrb[0].mxu1 }
 0x219   :  { %v438_v40 = vpop.f32.mrb[1].mxu1  ;;  %v447_v42 = vadd.f32 %v5073_v39, %v6251_v38 }
 0x21a   :  { %v5074_v41 = vpop.f32.mrb[2].mxu1  ;;  %v439_v36 = vadd.f32 %v6251_v38, %v438_v40 }
 0x21b   :  { %v450_v43 = vadd.f32 %v5074_v41, %v6251_v38  ;;  %v441_v1 = vpop.f32.mrb[3].mxu1 }
 0x21c   :  { %v442_v56 = vadd.f32 %v6251_v38, %v441_v1 }
 0x21d   :  { %v6257_v10 = vpack.c.bf16 %v450_v43, %v447_v42 }
 0x21e   :  { %v6259_v46 = vpack.c.bf16 %v442_v56, %v439_v36 }
 0x220   :  { %v5077_v44 = vpop.f32.mrb[4].mxu1 }
 0x221   :  { %v454_v11 = vpop.f32.mrb[5].mxu1  ;;  %v463_v53 = vadd.f32 %v5077_v44, %v6251_v38  ;;  %v735_v44 = vpack.i.b16 %v6218_v15, %v6218_v15 }
 0x222   :  { %v5078_v29 = vpop.f32.mrb[6].mxu1  ;;  %v455_v59 = vadd.f32 %v6251_v38, %v454_v11 }
 0x223   :  { %v466_v23 = vadd.f32 %v5078_v29, %v6251_v38  ;;  %v457_v58 = vpop.f32.mrb[7].mxu1 }
 0x224   :  { %v458_v60 = vadd.f32 %v6251_v38, %v457_v58 }
 0x225   :  { %v6277_v61 = vpack.c.bf16 %v466_v23, %v463_v53 }
 0x226   :  { %v6279_v37 = vpack.c.bf16 %v458_v60, %v455_v59 }
 0x228   :  { %v5065_v5 = vpop.f32.mrb[0].mxu0  ;;  %v5085_v6 = vpop.f32.mrb[8].mxu1 }
 0x229   :  { %v406_v47 = vpop.f32.mrb[1].mxu0  ;;  %v526_v7 = vpop.f32.mrb[9].mxu1  ;;  %v415_v9 = vadd.f32 %v5065_v5, %v6251_v38  ;;  %v535_v12 = vadd.f32 %v5085_v6, %v6296_v21 }
 0x22a   :  { %v5066_v45 = vpop.f32.mrb[2].mxu0  ;;  %v5086_v8 = vpop.f32.mrb[10].mxu1  ;;  %v407_v62 = vadd.f32 %v6251_v38, %v406_v47  ;;  %v527_v14 = vadd.f32 %v6296_v21, %v526_v7 }
 0x22b   :  { %v418_v25 = vadd.f32 %v5066_v45, %v6251_v38  ;;  %v538_v57 = vadd.f32 %v5086_v8, %v6296_v21  ;;  %v409_v33 = vpop.f32.mrb[3].mxu0  ;;  %v529_v24 = vpop.f32.mrb[11].mxu1 }
 0x22c   :  { %v410_v54 = vadd.f32 %v6251_v38, %v409_v33  ;;  %v530_v18 = vadd.f32 %v6296_v21, %v529_v24 }
 0x22d   :  { %v6306_v19 = vpack.c.bf16 %v418_v25, %v415_v9  ;;  %v718_v16 = vpack.c.bf16 %v538_v57, %v535_v12  ;;  %v6342_v12 = vrot.slane %v735_v44, %v6210_v13  ;;  %v6367_v44 = vld [vmem:[%s7879_s8] ss:$0 sm:$0xff] }
 0x22e   :  { %v6308_v27 = vpack.c.bf16 %v410_v54, %v407_v62  ;;  %v717_v30 = vpack.c.bf16 %v530_v18, %v527_v14 }
 0x22f   :  { %v1727_v39 = vmul.bf16 %v6222_v22, %v6306_v19 }
 0x230   :  { %v1726_v42 = vmul.bf16 %v6222_v22, %v6308_v27  ;;  %v5069_v36 = vpop.f32.mrb[4].mxu0  ;;  %v5089_v56 = vpop.f32.mrb[12].mxu1  ;;  %v6325_v53 = vsel %vm61_vm0, %v717_v30, 0  ;;  %v741_v62 = vmul.bf16 %v6342_v12, %v6308_v27 }
 0x231   :  { %v422_v11 = vpop.f32.mrb[5].mxu0  ;;  %v542_v29 = vpop.f32.mrb[13].mxu1  ;;  %5120 = vmatpush3.bf16.xpose.msra.mxu1 %v6325_v53  ;;  %v431_v59 = vadd.f32 %v5069_v36, %v6251_v38  ;;  %v6330_v60 = vadd.f32 %v5089_v56, %v6296_v21 }
 0x232   :  { %v5070_v23 = vpop.f32.mrb[6].mxu0  ;;  %v5090_v58 = vpop.f32.mrb[14].mxu1  ;;  %5125 = vmatprep.subr.bf16.mxu1 %v7884_v20  ;;  %v423_v7 = vadd.f32 %v6251_v38, %v422_v11  ;;  %v543_v45 = vadd.f32 %v6296_v21, %v542_v29 }
 0x233   :  { %v434_v5 = vadd.f32 %v5070_v23, %v6251_v38  ;;  %v6334_v6 = vadd.f32 %v5090_v58, %v6296_v21  ;;  %v425_v15 = vpop.f32.mrb[7].mxu0  ;;  %v545_v47 = vpop.f32.mrb[15].mxu1  ;;  %v6371_v23 = vsel %vm61_vm0, %v718_v16, 0 }
 0x234   :  { %v426_v8 = vadd.f32 %v6251_v38, %v425_v15  ;;  %v546_v9 = vadd.f32 %v6296_v21, %v545_v47 }
 0x235   :  { %v6344_v25 = vpack.c.bf16 %v434_v5, %v431_v59  ;;  %v720_v57 = vpack.c.bf16 %v6334_v6, %v6330_v60 }
 0x236   :  { %v6348_v33 = vpack.c.bf16 %v426_v8, %v423_v7  ;;  %v719_v24 = vpack.c.bf16 %v546_v9, %v543_v45 }
 0x238   :  { %v1728_v54 = vmul.bf16 %v6222_v22, %v6348_v33  ;;  %v5093_v36 = vpop.f32.mrb[16].mxu1  ;;  %v5105_v56 = vpop.f32.mrb[8].mxu0  ;;  %5122 = vmatmul.mubr.msk.bf16.vlgmr.msra.gmra.mrb[24].mxu1 %vm61_vm0, %v741_v62  ;;  %v743_v30 = vmul.bf16 %v6342_v12, %v6348_v33 }
 0x239   :  { %v558_v11 = vpop.f32.mrb[17].mxu1  ;;  %v646_v29 = vpop.f32.mrb[9].mxu0  ;;  %5126 = vmatpush3.bf16.xpose.msra.mxu1 %v6371_v23  ;;  %5127 = vmatprep.mubr.msk.bf16.mxu1 %vm5826_vm1, %v7884_v20  ;;  %v6377_v5 = vadd.f32 %v5093_v36, %v6296_v21  ;;  %v655_v15 = vadd.f32 %v5105_v56, %v6367_v44 }
 0x23a   :  { %v5094_v58 = vpop.f32.mrb[18].mxu1  ;;  %v5106_v59 = vpop.f32.mrb[10].mxu0  ;;  %5131 = vmatprep.subr.bf16.mxu1 %v7884_v20  ;;  %v559_v8 = vadd.f32 %v6296_v21, %v558_v11  ;;  %v647_v9 = vadd.f32 %v6367_v44, %v646_v29 }
 0x23b   :  { %v6381_v47 = vadd.f32 %v5094_v58, %v6296_v21  ;;  %v658_v7 = vadd.f32 %v5106_v59, %v6367_v44  ;;  %v561_v45 = vpop.f32.mrb[19].mxu1  ;;  %v649_v16 = vpop.f32.mrb[11].mxu0  ;;  %v742_v59 = vmul.bf16 %v6342_v12, %v6306_v19 }
 0x23c   :  { %v562_v62 = vadd.f32 %v6296_v21, %v561_v45  ;;  %v650_v36 = vadd.f32 %v6367_v44, %v649_v16 }
 0x23d   :  { %v722_v56 = vpack.c.bf16 %v6381_v47, %v6377_v5  ;;  %v6391_v35 = vpack.c.bf16 %v658_v7, %v655_v15  ;;  %v6403_v5 = vsel %vm61_vm0, %v719_v24, 0 }
 0x23e   :  { %v721_v58 = vpack.c.bf16 %v562_v62, %v559_v8  ;;  %v6393_v4 = vpack.c.bf16 %v650_v36, %v647_v9 }
 0x240   :  { %v5097_v50 = vpop.f32.mrb[20].mxu1  ;;  %v5109_v28 = vpop.f32.mrb[12].mxu0  ;;  %v6398_v11 = vsel %vm61_vm0, %v721_v58, 0  ;;  %5128 = vmatmul.mubr.msk.bf16.vlgmr.msra.gmra.mrb[28].mxu1 %vm61_vm0, %v742_v59 }
 0x241   :  { %v671_v29 = vadd.f32 %v5109_v28, %v6367_v44  ;;  %v574_v45 = vpop.f32.mrb[21].mxu1  ;;  %v662_v16 = vpop.f32.mrb[13].mxu0  ;;  %5144 = vmatpush3.bf16.xpose.msra.mxu0 %v6398_v11  ;;  %5132 = vmatpush3.bf16.xpose.msra.mxu1 %v6403_v5  ;;  %v583_v28 = vadd.f32 %v5097_v50, %v6296_v21  ;;  %v745_v50 = vmul.bf16 %v6342_v12, %v6259_v46 }
 0x242   :  { %v663_v15 = vadd.f32 %v6367_v44, %v662_v16  ;;  %v5098_v47 = vpop.f32.mrb[22].mxu1  ;;  %v5110_v7 = vpop.f32.mrb[14].mxu0  ;;  %5133 = vmatprep.mubr.msk.bf16.mxu1 %vm5826_vm1, %v7884_v20  ;;  %5137 = vmatprep.subr.bf16.mxu1 %v7884_v20  ;;  %v575_v36 = vadd.f32 %v6296_v21, %v574_v45 }
 0x243   :  { %v586_v8 = vadd.f32 %v5098_v47, %v6296_v21  ;;  %v674_v9 = vadd.f32 %v5110_v7, %v6367_v44  ;;  %v577_v62 = vpop.f32.mrb[23].mxu1  ;;  %v665_v24 = vpop.f32.mrb[15].mxu0  ;;  %5155 = vmatprep.subr.bf16.mxu0 %v7884_v20 }
 0x244   :  { %v578_v58 = vadd.f32 %v6296_v21, %v577_v62  ;;  %v666_v59 = vadd.f32 %v6367_v44, %v665_v24  ;;  %v744_v62 = vmul.bf16 %v6342_v12, %v6344_v25 }
 0x245   :  { %v724_v16 = vpack.c.bf16 %v586_v8, %v583_v28  ;;  %v6418_v13 = vpack.c.bf16 %v674_v9, %v671_v29 }
 0x246   :  { %v723_v47 = vpack.c.bf16 %v578_v58, %v575_v36  ;;  %v6422_v7 = vpack.c.bf16 %v666_v59, %v663_v15  ;;  %v6436_v15 = vsel %vm61_vm0, %v720_v57, 0  ;;  %v747_v57 = vmul.bf16 %v6342_v12, %v6279_v37 }
 0x247   :  { %v6461_v59 = vsel %vm61_vm0, %v722_v56, 0 }
 0x248   :  { %v5113_v41 = vpop.f32.mrb[16].mxu0  ;;  %5146 = vmatmul.mubr.msk.bf16.vlgmr.msra.gmra.mrb[24].mxu0 %vm61_vm0, %v745_v50  ;;  %v6428_v45 = vsel %vm61_vm0, %v723_v47, 0  ;;  %5134 = vmatmul.mubr.msk.bf16.vlgmr.msra.gmra.mrb[32].mxu1 %vm61_vm0, %v743_v30 }
 0x249   :  { %v687_v21 = vadd.f32 %v5113_v41, %v6367_v44  ;;  %v678_v29 = vpop.f32.mrb[17].mxu0  ;;  %5156 = vmatpush3.bf16.xpose.msra.mxu0 %v6428_v45  ;;  %5138 = vmatpush3.bf16.xpose.msra.mxu1 %v6436_v15 }
 0x24a   :  { %v679_v28 = vadd.f32 %v6367_v44, %v678_v29  ;;  %v5114_v8 = vpop.f32.mrb[18].mxu0  ;;  %5139 = vmatprep.mubr.msk.bf16.mxu1 %vm5826_vm1, %v7884_v20  ;;  %5157 = vmatprep.mubr.msk.bf16.mxu0 %vm5826_vm1, %v7884_v20 }
 0x24b   :  { %v690_v41 = vadd.f32 %v5114_v8, %v6367_v44  ;;  %v681_v30 = vpop.f32.mrb[19].mxu0  ;;  %5149 = vmatprep.subr.bf16.mxu1 %v7884_v20  ;;  %5167 = vmatprep.subr.bf16.mxu0 %v7884_v20 }
 0x24c   :  { %v682_v60 = vadd.f32 %v6367_v44, %v681_v30  ;;  %v6482_v30 = vsel %vm61_vm0, %v724_v16, 0  ;;  %v6498_v16 = vld [vmem:[%s7880_s10] sm:$0xff] }
 0x24d   :  { %v6449_v6 = vpack.c.bf16 %v690_v41, %v687_v21  ;;  %v746_v41 = vmul.bf16 %v6342_v12, %v6257_v10 }
 0x24e   :  { %v6453_v9 = vpack.c.bf16 %v682_v60, %v679_v28 }
 0x250   :  { %v5117_v24 = vpop.f32.mrb[20].mxu0  ;;  %5158 = vmatmul.mubr.msk.bf16.vlgmr.msra.gmra.mrb[28].mxu0 %vm61_vm0, %v747_v57  ;;  %5140 = vmatmul.mubr.msk.bf16.vlgmr.msra.gmra.mrb[36].mxu1 %vm61_vm0, %v744_v62  ;;  %v6503_v57 = vld [vmem:[%s7880_s10 + $0x8] sm:$0xff] }
 0x251   :  { %v703_v36 = vadd.f32 %v5117_v24, %v6367_v44  ;;  %v694_v58 = vpop.f32.mrb[21].mxu0  ;;  %5168 = vmatpush3.bf16.msra.mxu0 %v6393_v4  ;;  %5150 = vmatpush3.bf16.xpose.msra.mxu1 %v6461_v59 }
 0x252   :  { %v695_v50 = vadd.f32 %v6367_v44, %v694_v58  ;;  %v5118_v47 = vpop.f32.mrb[22].mxu0  ;;  %5151 = vmatprep.mubr.msk.bf16.mxu1 %vm5826_vm1, %v7884_v20  ;;  %5161 = vmatprep.subr.bf16.mxu1 %v7884_v20 }
 0x253   :  { %v706_v21 = vadd.f32 %v5118_v47, %v6367_v44  ;;  %v697_v29 = vpop.f32.mrb[23].mxu0  ;;  %5169 = vmatprep.mubr.msk.bf16.mxu0 %vm5826_vm1, %v7884_v20  ;;  %5179 = vmatprep.subr.bf16.mxu0 %v7884_v20 }
 0x254   :  { %v698_v56 = vadd.f32 %v6367_v44, %v697_v29  ;;  %v748_v44 = vmul.bf16 %v6342_v12, %v6277_v61 }
 0x255   :  { %v6474_v28 = vpack.c.bf16 %v706_v21, %v703_v36 }
 0x256   :  { %v6476_v8 = vpack.c.bf16 %v698_v56, %v695_v50 }
 0x258   :  { %5152 = vmatmul.mubr.msk.bf16.vlgmr.msra.gmra.mrb[40].mxu1 %vm61_vm0, %v746_v41 }
 0x259   :  { %5162 = vmatpush3.bf16.xpose.msra.mxu1 %v6482_v30  ;;  %5163 = vmatprep.mubr.msk.bf16.mxu1 %vm5826_vm1, %v7884_v20 }
 0x25a   :  { %5173 = vmatprep.subr.bf16.mxu1 %v7884_v20 }
 0x260   :  { %5164 = vmatmul.mubr.msk.bf16.vlgmr.msra.gmra.mrb[44].mxu1 %vm61_vm0, %v748_v44 }
 0x261   :  { %5174 = vmatpush3.bf16.msra.mxu1 %v6391_v35  ;;  %5175 = vmatprep.mubr.msk.bf16.mxu1 %vm5826_vm1, %v7884_v20 }
 0x262   :  { %5185 = vmatprep.subr.bf16.mxu1 %v7884_v20 }
 0x30b   :  { %v789_v60 = vpop.f32.mrb[24].mxu1 }
 0x30c   :  { %v6506_v12 = vadd.f32 %v6498_v16, %v789_v60  ;;  %v5123_v62 = vpop.f32.mrb[25].mxu1 }
 0x30d   :  { %v792_v24 = vpop.f32.mrb[26].mxu1 }
 0x30e   :  { %v6509_v36 = vadd.f32 %v6503_v57, %v792_v24  ;;  %v5124_v58 = vpop.f32.mrb[27].mxu1  ;;  %v1144_v50 = vsel %vm1143_vm2, %v6506_v12, -inf }
 0x30f   :  { %1145 = vmax.xlane.f32.xlu0 %v1144_v50 }
 0x310   :  { %v1147_v47 = vsel %vm1143_vm2, %v6509_v36, -inf }
 0x311   :  { %1148 = vmax.xlane.f32.xlu1 %v1147_v47 }
 0x313   :  { %v836_v21 = vpop.f32.mrb[28].mxu1 }
 0x314   :  { %v6516_v29 = vadd.f32 %v6498_v16, %v836_v21  ;;  %v5129_v56 = vpop.f32.mrb[29].mxu1 }
 0x315   :  { %v839_v41 = vpop.f32.mrb[30].mxu1 }
 0x316   :  { %v6519_v44 = vadd.f32 %v6503_v57, %v839_v41  ;;  %v5130_v60 = vpop.f32.mrb[31].mxu1  ;;  %v1150_v62 = vsel %vm1143_vm2, %v6516_v29, -inf }
 0x317   :  { %1151 = vmax.xlane.f32.xlu0 %v1150_v62 }
 0x318   :  { %v1153_v24 = vsel %vm1143_vm2, %v6519_v44, -inf }
 0x319   :  { %1154 = vmax.xlane.f32.xlu1 %v1153_v24 }
 0x31b   :  { %v977_v58 = vpop.f32.mrb[24].mxu0  ;;  %v883_v50 = vpop.f32.mrb[32].mxu1 }
 0x31c   :  { %v5147_v47 = vpop.f32.mrb[25].mxu0  ;;  %v6526_v21 = vadd.f32 %v6498_v16, %v883_v50  ;;  %v5135_v56 = vpop.f32.mrb[33].mxu1 }
 0x31d   :  { %v980_v1 = vpop.f32.mrb[26].mxu0  ;;  %v886_v63 = vpop.f32.mrb[34].mxu1 }
 0x31e   :  { %v5148_v41 = vpop.f32.mrb[27].mxu0  ;;  %v6529_v60 = vadd.f32 %v6503_v57, %v886_v63  ;;  %v5136_v3 = vpop.f32.mrb[35].mxu1  ;;  %v1156_v62 = vsel %vm1143_vm2, %v6526_v21, -inf }
 0x31f   :  { %1157 = vmax.xlane.f32.xlu0 %v1156_v62  ;;  %v6539_v3 = vadd.f32 %v6498_v16, %v977_v58 }
 0x320   :  { %v1159_v24 = vsel %vm1143_vm2, %v6529_v60, -inf }
 0x321   :  { %1160 = vmax.xlane.f32.xlu1 %v1159_v24 }
 0x323   :  { %v1071_v47 = vpop.f32.mrb[28].mxu0  ;;  %v930_v49 = vpop.f32.mrb[36].mxu1 }
 0x324   :  { %v5159_v50 = vpop.f32.mrb[29].mxu0  ;;  %v6536_v56 = vadd.f32 %v6498_v16, %v930_v49  ;;  %v5141_v52 = vpop.f32.mrb[37].mxu1 }
 0x325   :  { %v1074_v41 = vpop.f32.mrb[30].mxu0  ;;  %v933_v38 = vpop.f32.mrb[38].mxu1  ;;  %v6547_v50 = vadd.f32 %v6503_v57, %v980_v1  ;;  %v1168_v52 = vsel %vm1143_vm2, %v6539_v3, -inf  ;;  %v6559_v1 = vadd.f32 %v6498_v16, %v1071_v47 }
 0x326   :  { %v5160_v63 = vpop.f32.mrb[31].mxu0  ;;  %v6542_v18 = vadd.f32 %v6503_v57, %v933_v38  ;;  %v5142_v62 = vpop.f32.mrb[39].mxu1  ;;  %v1162_v24 = vsel %vm1143_vm2, %v6536_v56, -inf }
 0x327   :  { %1163 = vmax.xlane.f32.xlu0 %v1162_v24  ;;  %v1171_v62 = vsel %vm1143_vm2, %v6547_v50, -inf }
 0x328   :  { %v1165_v49 = vsel %vm1143_vm2, %v6542_v18, -inf }
 0x329   :  { %1166 = vmax.xlane.f32.xlu1 %v1165_v49 }
 0x32b   :  { %1169 = vmax.xlane.f32.xlu0 %v1168_v52  ;;  %v1024_v58 = vpop.f32.mrb[40].mxu1 }
 0x32c   :  { %v6554_v38 = vadd.f32 %v6498_v16, %v1024_v58  ;;  %v5153_v63 = vpop.f32.mrb[41].mxu1  ;;  %v6567_v58 = vadd.f32 %v6503_v57, %v1074_v41 }
 0x32d   :  { %1172 = vmax.xlane.f32.xlu1 %v1171_v62  ;;  %v1027_v24 = vpop.f32.mrb[42].mxu1  ;;  %v1180_v62 = vsel %vm1143_vm2, %v6559_v1, -inf }
 0x32e   :  { %v6562_v40 = vadd.f32 %v6503_v57, %v1027_v24  ;;  %v5154_v49 = vpop.f32.mrb[43].mxu1  ;;  %v1174_v52 = vsel %vm1143_vm2, %v6554_v38, -inf  ;;  %v1183_v43 = vsel %vm1143_vm2, %v6567_v58, -inf }
 0x32f   :  { %1175 = vmax.xlane.f32.xlu0 %v1174_v52 }
 0x330   :  { %v1177_v63 = vsel %vm1143_vm2, %v6562_v40, -inf }
 0x331   :  { %1178 = vmax.xlane.f32.xlu1 %v1177_v63 }
 0x333   :  { %1181 = vmax.xlane.f32.xlu0 %v1180_v62  ;;  %v1118_v47 = vpop.f32.mrb[44].mxu1 }
 0x334   :  { %v6574_v24 = vadd.f32 %v6498_v16, %v1118_v47  ;;  %v5165_v49 = vpop.f32.mrb[45].mxu1 }
 0x335   :  { %1184 = vmax.xlane.f32.xlu1 %v1183_v43  ;;  %v1121_v52 = vpop.f32.mrb[46].mxu1 }
 0x336   :  { %v6579_v41 = vadd.f32 %v6503_v57, %v1121_v52  ;;  %v5166_v17 = vpop.f32.mrb[47].mxu1  ;;  %v1186_v63 = vsel %vm1143_vm2, %v6574_v24, -inf }
 0x337   :  { %1187 = vmax.xlane.f32.xlu0 %v1186_v63 }
 0x338   :  { %v1189_v62 = vsel %vm1143_vm2, %v6579_v41, -inf }
 0x339   :  { %1190 = vmax.xlane.f32.xlu1 %v1189_v62 }
 0x39c   :  { %v1146_v16 = vpop.xlane.xlu0 %1145 }
 0x39d   :  { %v1192_v47 = vsub.f32 %v6506_v12, %v1146_v16 }
 0x39e   :  { %v1149_v49 = vpop.xlane.xlu1 %1148 }
 0x39f   :  { %v1208_v2 = vmul.f32 1.442695, %v1192_v47  ;;  %v1193_v43 = vsub.f32 %v6509_v36, %v1149_v49 }
 0x3a1   :  { %5569 = vpow2.f32 %v1208_v2  ;;  %v1210_v48 = vmul.f32 1.442695, %v1193_v43 }
 0x3a3   :  { %5571 = vpow2.f32 %v1210_v48 }
 0x3a4   :  { %v1152_v57 = vpop.xlane.xlu0 %1151 }
 0x3a5   :  { %v1194_v17 = vsub.f32 %v6516_v29, %v1152_v57 }
 0x3a6   :  { %v1155_v52 = vpop.xlane.xlu1 %1154 }
 0x3a7   :  { %v1212_v51 = vmul.f32 1.442695, %v1194_v17  ;;  %v1195_v63 = vsub.f32 %v6519_v44, %v1155_v52 }
 0x3a9   :  { %5573 = vpow2.f32 %v1212_v51  ;;  %v1214_v14 = vmul.f32 1.442695, %v1195_v63 }
 0x3ab   :  { %v6589_v62 = vpop.eup %5569  ;;  %5575 = vpow2.f32 %v1214_v14 }
 0x3ac   :  { %v1158_v12 = vpop.xlane.xlu0 %1157  ;;  %v1240_v16 = vsel %vm1143_vm2, %v6589_v62, 0.0 }
 0x3ad   :  { %v6593_v36 = vpop.eup %5571  ;;  %v1196_v48 = vsub.f32 %v6526_v21, %v1158_v12  ;;  %1241 = vadd.xlane.f32.xlu0 %v1240_v16 }
 0x3ae   :  { %v1161_v2 = vpop.xlane.xlu1 %1160  ;;  %v1243_v29 = vsel %vm1143_vm2, %v6593_v36, 0.0 }
 0x3af   :  { %v1216_v47 = vmul.f32 1.442695, %v1196_v48  ;;  %v1197_v51 = vsub.f32 %v6529_v60, %v1161_v2  ;;  %1244 = vadd.xlane.f32.xlu1 %v1243_v29 }
 0x3b1   :  { %5577 = vpow2.f32 %v1216_v47  ;;  %v1218_v44 = vmul.f32 1.442695, %v1197_v51 }
 0x3b3   :  { %v6599_v14 = vpop.eup %5573  ;;  %5579 = vpow2.f32 %v1218_v44 }
 0x3b4   :  { %v1164_v49 = vpop.xlane.xlu0 %1163  ;;  %v1246_v43 = vsel %vm1143_vm2, %v6599_v14, 0.0 }
 0x3b5   :  { %v6603_v57 = vpop.eup %5575  ;;  %v1198_v21 = vsub.f32 %v6536_v56, %v1164_v49  ;;  %1247 = vadd.xlane.f32.xlu0 %v1246_v43 }
 0x3b6   :  { %v1167_v17 = vpop.xlane.xlu1 %1166  ;;  %v1249_v52 = vsel %vm1143_vm2, %v6603_v57, 0.0 }
 0x3b7   :  { %v1220_v60 = vmul.f32 1.442695, %v1198_v21  ;;  %v1199_v63 = vsub.f32 %v6542_v18, %v1167_v17  ;;  %1250 = vadd.xlane.f32.xlu1 %v1249_v52 }
 0x3b8   :  { %v1170_v12 = vpop.xlane.xlu0 %1169 }
 0x3b9   :  { %5581 = vpow2.f32 %v1220_v60  ;;  %v1222_v16 = vmul.f32 1.442695, %v1199_v63  ;;  %v1200_v48 = vsub.f32 %v6539_v3, %v1170_v12 }
 0x3ba   :  { %v1173_v2 = vpop.xlane.xlu1 %1172 }
 0x3bb   :  { %v6610_v29 = vpop.eup %5577  ;;  %5583 = vpow2.f32 %v1222_v16  ;;  %v1224_v47 = vmul.f32 1.442695, %v1200_v48  ;;  %v1201_v56 = vsub.f32 %v6547_v50, %v1173_v2 }
 0x3bc   :  { %v1176_v51 = vpop.xlane.xlu0 %1175  ;;  %v1252_v44 = vsel %vm1143_vm2, %v6610_v29, 0.0 }
 0x3bd   :  { %v6615_v49 = vpop.eup %5579  ;;  %5585 = vpow2.f32 %v1224_v47  ;;  %v1226_v18 = vmul.f32 1.442695, %v1201_v56  ;;  %v1202_v43 = vsub.f32 %v6554_v38, %v1176_v51  ;;  %1253 = vadd.xlane.f32.xlu0 %v1252_v44 }
 0x3be   :  { %v1179_v21 = vpop.xlane.xlu1 %1178  ;;  %v1255_v3 = vsel %vm1143_vm2, %v6615_v49, 0.0 }
 0x3bf   :  { %5587 = vpow2.f32 %v1226_v18  ;;  %v1228_v17 = vmul.f32 1.442695, %v1202_v43  ;;  %v1203_v52 = vsub.f32 %v6562_v40, %v1179_v21  ;;  %1256 = vadd.xlane.f32.xlu1 %v1255_v3 }
 0x3c0   :  { %v1182_v50 = vpop.xlane.xlu0 %1181 }
 0x3c1   :  { %5589 = vpow2.f32 %v1228_v17  ;;  %v1230_v60 = vmul.f32 1.442695, %v1203_v52  ;;  %v1204_v63 = vsub.f32 %v6559_v1, %v1182_v50 }
 0x3c2   :  { %v1185_v12 = vpop.xlane.xlu1 %1184 }
 0x3c3   :  { %v6622_v16 = vpop.eup %5581  ;;  %5591 = vpow2.f32 %v1230_v60  ;;  %v1232_v38 = vmul.f32 1.442695, %v1204_v63  ;;  %v1205_v48 = vsub.f32 %v6567_v58, %v1185_v12 }
 0x3c4   :  { %v1188_v2 = vpop.xlane.xlu0 %1187  ;;  %v1258_v47 = vsel %vm1143_vm2, %v6622_v16, 0.0 }
 0x3c5   :  { %v6627_v56 = vpop.eup %5583  ;;  %5593 = vpow2.f32 %v1232_v38  ;;  %v1234_v40 = vmul.f32 1.442695, %v1205_v48  ;;  %v1206_v51 = vsub.f32 %v6574_v24, %v1188_v2  ;;  %1259 = vadd.xlane.f32.xlu0 %v1258_v47 }
 0x3c6   :  { %v1191_v44 = vpop.xlane.xlu1 %1190  ;;  %v1261_v1 = vsel %vm1143_vm2, %v6627_v56, 0.0 }
 0x3c7   :  { %v6632_v18 = vpop.eup %5585  ;;  %5595 = vpow2.f32 %v1234_v40  ;;  %v1236_v43 = vmul.f32 1.442695, %v1206_v51  ;;  %v1207_v58 = vsub.f32 %v6579_v41, %v1191_v44  ;;  %1262 = vadd.xlane.f32.xlu1 %v1261_v1 }
 0x3c8   :  { %v1264_v21 = vsel %vm1143_vm2, %v6632_v18, 0.0 }
 0x3c9   :  { %v6637_v3 = vpop.eup %5587  ;;  %5597 = vpow2.f32 %v1236_v43  ;;  %v1238_v17 = vmul.f32 1.442695, %v1207_v58  ;;  %1265 = vadd.xlane.f32.xlu0 %v1264_v21 }
 0x3ca   :  { %v1267_v24 = vsel %vm1143_vm2, %v6637_v3, 0.0 }
 0x3cb   :  { %v6641_v52 = vpop.eup %5589  ;;  %5599 = vpow2.f32 %v1238_v17  ;;  %1268 = vadd.xlane.f32.xlu1 %v1267_v24 }
 0x3cc   :  { %v1270_v50 = vsel %vm1143_vm2, %v6641_v52, 0.0 }
 0x3cd   :  { %v6645_v41 = vpop.eup %5591  ;;  %1271 = vadd.xlane.f32.xlu0 %v1270_v50 }
 0x3ce   :  { %v1273_v60 = vsel %vm1143_vm2, %v6645_v41, 0.0 }
 0x3cf   :  { %v6649_v63 = vpop.eup %5593  ;;  %1274 = vadd.xlane.f32.xlu1 %v1273_v60 }
 0x3d0   :  { %v1276_v12 = vsel %vm1143_vm2, %v6649_v63, 0.0 }
 0x3d1   :  { %v6653_v38 = vpop.eup %5595  ;;  %1277 = vadd.xlane.f32.xlu0 %v1276_v12 }
 0x3d2   :  { %v1279_v48 = vsel %vm1143_vm2, %v6653_v38, 0.0 }
 0x3d3   :  { %v6657_v2 = vpop.eup %5597  ;;  %1280 = vadd.xlane.f32.xlu1 %v1279_v48 }
 0x3d4   :  { %v1282_v47 = vsel %vm1143_vm2, %v6657_v2, 0.0 }
 0x3d5   :  { %v6661_v40 = vpop.eup %5599  ;;  %1283 = vadd.xlane.f32.xlu0 %v1282_v47 }
 0x3d6   :  { %v1285_v51 = vsel %vm1143_vm2, %v6661_v40, 0.0 }
 0x3d7   :  { %1286 = vadd.xlane.f32.xlu1 %v1285_v51 }
 0x43a   :  { %v1242_v44 = vpop.xlane.xlu0 %1241 }
 0x43b   :  { %5601 = vrcp.f32 %v1242_v44 }
 0x43c   :  { %v1245_v1 = vpop.xlane.xlu1 %1244 }
 0x43d   :  { %5603 = vrcp.f32 %v1245_v1 }
 0x442   :  { %v1248_v43 = vpop.xlane.xlu0 %1247 }
 0x443   :  { %5605 = vrcp.f32 %v1248_v43 }
 0x444   :  { %v1251_v58 = vpop.xlane.xlu1 %1250 }
 0x445   :  { %v5602_v21 = vpop.eup %5601  ;;  %5607 = vrcp.f32 %v1251_v58 }
 0x446   :  { %v1304_v24 = vmul.f32 %v5602_v21, %v6589_v62 }
 0x447   :  { %v5604_v17 = vpop.eup %5603 }
 0x448   :  { %v1305_v50 = vmul.f32 %v5604_v17, %v6593_v36 }
 0x44a   :  { %v1254_v60 = vpop.xlane.xlu0 %1253  ;;  %v1320_v12 = vpack.c.bf16 %v1305_v50, %v1304_v24 }
 0x44b   :  { %5609 = vrcp.f32 %v1254_v60 }
 0x44c   :  { %5170 = vmatmul.mubr.msk.bf16.vlgmr.msra.gmra.mrb[32].mxu0 %vm1143_vm2, %v1320_v12  ;;  %v1257_v48 = vpop.xlane.xlu1 %1256 }
 0x44d   :  { %v5606_v47 = vpop.eup %5605  ;;  %5180 = vmatpush3.bf16.msra.mxu0 %v6422_v7  ;;  %5611 = vrcp.f32 %v1257_v48  ;;  %5181 = vmatprep.mubr.msk.bf16.mxu0 %vm5826_vm1, %v7884_v20 }
 0x44e   :  { %5191 = vmatprep.subr.bf16.mxu0 %v7884_v20  ;;  %v1306_v62 = vmul.f32 %v5606_v47, %v6599_v14 }
 0x44f   :  { %v5608_v51 = vpop.eup %5607 }
 0x450   :  { %v1307_v36 = vmul.f32 %v5608_v51, %v6603_v57 }
 0x452   :  { %v1260_v44 = vpop.xlane.xlu0 %1259  ;;  %v1321_v1 = vpack.c.bf16 %v1307_v36, %v1306_v62 }
 0x453   :  { %5613 = vrcp.f32 %v1260_v44 }
 0x454   :  { %5176 = vmatmul.mubr.msk.bf16.vlgmr.msra.gmra.mrb[48].mxu1 %vm1143_vm2, %v1321_v1  ;;  %v1263_v43 = vpop.xlane.xlu1 %1262 }
 0x455   :  { %v5610_v58 = vpop.eup %5609  ;;  %5186 = vmatpush3.bf16.msra.mxu1 %v6418_v13  ;;  %5615 = vrcp.f32 %v1263_v43  ;;  %5187 = vmatprep.mubr.msk.bf16.mxu1 %vm5826_vm1, %v7884_v20 }
 0x456   :  { %v1266_v21 = vpop.xlane.xlu0 %1265  ;;  %5197 = vmatprep.subr.bf16.mxu1 %v7884_v20  ;;  %v1308_v14 = vmul.f32 %v5610_v58, %v6610_v29 }
 0x457   :  { %v5612_v17 = vpop.eup %5611  ;;  %5617 = vrcp.f32 %v1266_v21 }
 0x458   :  { %v1309_v57 = vmul.f32 %v5612_v17, %v6615_v49  ;;  %v1269_v24 = vpop.xlane.xlu1 %1268 }
 0x459   :  { %5619 = vrcp.f32 %v1269_v24 }
 0x45a   :  { %v1272_v50 = vpop.xlane.xlu0 %1271  ;;  %v1322_v60 = vpack.c.bf16 %v1309_v57, %v1308_v14 }
 0x45b   :  { %5621 = vrcp.f32 %v1272_v50 }
 0x45c   :  { %5182 = vmatmul.mubr.msk.bf16.vlgmr.msra.gmra.mrb[36].mxu0 %vm1143_vm2, %v1322_v60  ;;  %v1275_v12 = vpop.xlane.xlu1 %1274 }
 0x45d   :  { %v5614_v48 = vpop.eup %5613  ;;  %5192 = vmatpush3.bf16.msra.mxu0 %v6453_v9  ;;  %5623 = vrcp.f32 %v1275_v12  ;;  %5193 = vmatprep.mubr.msk.bf16.mxu0 %vm5826_vm1, %v7884_v20 }
 0x45e   :  { %v1278_v47 = vpop.xlane.xlu0 %1277  ;;  %5203 = vmatprep.subr.bf16.mxu0 %v7884_v20  ;;  %v1310_v49 = vmul.f32 %v5614_v48, %v6622_v16 }
 0x45f   :  { %v5616_v29 = vpop.eup %5615  ;;  %5625 = vrcp.f32 %v1278_v47 }
 0x460   :  { %v1311_v51 = vmul.f32 %v5616_v29, %v6627_v56  ;;  %v1281_v62 = vpop.xlane.xlu1 %1280 }
 0x461   :  { %v5618_v36 = vpop.eup %5617  ;;  %5627 = vrcp.f32 %v1281_v62 }
 0x462   :  { %v1284_v44 = vpop.xlane.xlu0 %1283  ;;  %v1323_v1 = vpack.c.bf16 %v1311_v51, %v1310_v49  ;;  %v1312_v58 = vmul.f32 %v5618_v36, %v6632_v18 }
 0x463   :  { %v5620_v43 = vpop.eup %5619  ;;  %5629 = vrcp.f32 %v1284_v44 }
 0x464   :  { %v1313_v21 = vmul.f32 %v5620_v43, %v6637_v3  ;;  %5188 = vmatmul.mubr.msk.bf16.vlgmr.msra.gmra.mrb[52].mxu1 %vm1143_vm2, %v1323_v1  ;;  %v1287_v17 = vpop.xlane.xlu1 %1286 }
 0x465   :  { %v5622_v14 = vpop.eup %5621  ;;  %5198 = vmatpush3.bf16.msra.mxu1 %v6449_v6  ;;  %5631 = vrcp.f32 %v1287_v17  ;;  %5199 = vmatprep.mubr.msk.bf16.mxu1 %vm5826_vm1, %v7884_v20 }
 0x466   :  { %v1324_v16 = vpack.c.bf16 %v1313_v21, %v1312_v58  ;;  %5209 = vmatprep.subr.bf16.mxu1 %v7884_v20  ;;  %v1314_v57 = vmul.f32 %v5622_v14, %v6641_v52 }
 0x467   :  { %v5624_v56 = vpop.eup %5623 }
 0x468   :  { %v1315_v18 = vmul.f32 %v5624_v56, %v6645_v41  ;;  %5194 = vmatmul.mubr.msk.bf16.vlgmr.msra.gmra.mrb[40].mxu0 %vm1143_vm2, %v1324_v16 }
 0x469   :  { %v5626_v3 = vpop.eup %5625  ;;  %5204 = vmatpush3.bf16.msra.mxu0 %v6476_v8  ;;  %5205 = vmatprep.mubr.msk.bf16.mxu0 %vm5826_vm1, %v7884_v20 }
 0x46a   :  { %v1325_v24 = vpack.c.bf16 %v1315_v18, %v1314_v57  ;;  %5215 = vmatprep.subr.bf16.mxu0 %v7884_v20  ;;  %v1316_v60 = vmul.f32 %v5626_v3, %v6649_v63 }
 0x46b   :  { %v5628_v50 = vpop.eup %5627 }
 0x46c   :  { %v1317_v12 = vmul.f32 %v5628_v50, %v6653_v38  ;;  %5200 = vmatmul.mubr.msk.bf16.vlgmr.msra.gmra.mrb[56].mxu1 %vm1143_vm2, %v1325_v24  ;;  %v7896_v38 = vmul.bf16 %v6222_v22, %v6279_v37 }
 0x46d   :  { %v5630_v52 = vpop.eup %5629  ;;  %5210 = vmatpush3.bf16.msra.mxu1 %v6474_v28  ;;  %5211 = vmatprep.mubr.msk.bf16.mxu1 %vm5826_vm1, %v7884_v20 }
 0x46e   :  { %v1326_v41 = vpack.c.bf16 %v1317_v12, %v1316_v60  ;;  %5221 = vmatprep.subr.bf16.mxu1 %v7884_v20  ;;  %v1318_v47 = vmul.f32 %v5630_v52, %v6657_v2  ;;  %v7897_v2 = vmul.bf16 %v6222_v22, %v6277_v61 }
 0x46f   :  { %v5632_v48 = vpop.eup %5631 }
 0x470   :  { %v1319_v29 = vmul.f32 %v5632_v48, %v6661_v40  ;;  %5206 = vmatmul.mubr.msk.bf16.vlgmr.msra.gmra.mrb[44].mxu0 %vm1143_vm2, %v1326_v41 }
 0x471   :  { %5217 = vmatprep.mubr.msk.bf16.mxu0 %vm5826_vm1, %v7884_v20 }
 0x472   :  { %5216 = vmatpush3.bf16.xpose.msra.mxu0 %v6325_v53  ;;  %v1327_v63 = vpack.c.bf16 %v1319_v29, %v1318_v47 }
 0x473   :  { %5227 = vmatprep.subr.bf16.mxu0 %v7884_v20 }
 0x474   :  { %5212 = vmatmul.mubr.msk.bf16.vlgmr.msra.gmra.mrb[60].mxu1 %vm1143_vm2, %v1327_v63 }
 0x475   :  { %5223 = vmatprep.mubr.msk.bf16.mxu1 %vm5826_vm1, %v7884_v20 }
 0x476   :  { %5222 = vmatpush3.bf16.xpose.msra.mxu1 %v6371_v23 }
 0x477   :  { %5233 = vmatprep.subr.bf16.mxu1 %v7884_v20 }
 0x479   :  { %5218 = vmatmul.mubr.msk.bf16.vlgmr.msra.gmra.mrb[48].mxu0 %vm61_vm0, %v1726_v42  ;;  %v7894_v42 = vmul.bf16 %v6222_v22, %v6259_v46 }
 0x47a   :  { %5228 = vmatpush3.bf16.xpose.msra.mxu0 %v6403_v5  ;;  %5229 = vmatprep.mubr.msk.bf16.mxu0 %vm5826_vm1, %v7884_v20 }
 0x47b   :  { %5239 = vmatprep.subr.bf16.mxu0 %v7884_v20 }
 0x47d   :  { %5224 = vmatmul.mubr.msk.bf16.vlgmr.msra.gmra.mrb[64].mxu1 %vm61_vm0, %v1727_v39  ;;  %v7893_v39 = vmul.bf16 %v6222_v22, %v6344_v25 }
 0x47e   :  { %5234 = vmatpush3.bf16.xpose.msra.mxu1 %v6436_v15  ;;  %5235 = vmatprep.mubr.msk.bf16.mxu1 %vm5826_vm1, %v7884_v20 }
 0x47f   :  { %5245 = vmatprep.subr.bf16.mxu1 %v7884_v20 }
 0x481   :  { %5230 = vmatmul.mubr.msk.bf16.vlgmr.msra.gmra.mrb[52].mxu0 %vm61_vm0, %v1728_v54  ;;  %v7895_v54 = vmul.bf16 %v6222_v22, %v6257_v10 }
 0x482   :  { %5240 = vmatpush3.bf16.xpose.msra.mxu0 %v6398_v11  ;;  %5241 = vmatprep.mubr.msk.bf16.mxu0 %vm5826_vm1, %v7884_v20 }
 0x483   :  { %5251 = vmatprep.subr.bf16.mxu0 %v7884_v20 }
 0x485   :  { %5236 = vmatmul.mubr.msk.bf16.vlgmr.msra.gmra.mrb[68].mxu1 %vm61_vm0, %v7893_v39 }
 0x486   :  { %5246 = vmatpush3.bf16.xpose.msra.mxu1 %v6461_v59  ;;  %5247 = vmatprep.mubr.msk.bf16.mxu1 %vm5826_vm1, %v7884_v20 }
 0x487   :  { %5257 = vmatprep.subr.bf16.mxu1 %v7884_v20 }
 0x489   :  { %5242 = vmatmul.mubr.msk.bf16.vlgmr.msra.gmra.mrb[56].mxu0 %vm61_vm0, %v7894_v42 }
 0x48a   :  { %5252 = vmatpush3.bf16.xpose.msra.mxu0 %v6428_v45  ;;  %5253 = vmatprep.mubr.msk.bf16.mxu0 %vm5826_vm1, %v7884_v20 }
 0x48b   :  { %5263 = vmatprep.subr.bf16.mxu0 %v7884_v20 }
 0x48d   :  { %5248 = vmatmul.mubr.msk.bf16.vlgmr.msra.gmra.mrb[72].mxu1 %vm61_vm0, %v7895_v54 }
 0x48e   :  { %5258 = vmatpush3.bf16.xpose.msra.mxu1 %v6482_v30  ;;  %5259 = vmatprep.mubr.msk.bf16.mxu1 %vm5826_vm1, %v7884_v20 }
 0x48f   :  { %5269 = vmatprep.subr.bf16.mxu1 %v7884_v20 }
 0x491   :  { %5254 = vmatmul.mubr.msk.bf16.vlgmr.msra.gmra.mrb[60].mxu0 %vm61_vm0, %v7896_v38 }
 0x492   :  { %5264 = vmatpush3.bf16.msra.mxu0 %v6393_v4  ;;  %5265 = vmatprep.mubr.msk.bf16.mxu0 %vm5826_vm1, %v7884_v20 }
 0x493   :  { %5275 = vmatprep.subr.bf16.mxu0 %v7884_v20 }
 0x495   :  { %5260 = vmatmul.mubr.msk.bf16.vlgmr.msra.gmra.mrb[76].mxu1 %vm61_vm0, %v7897_v2 }
 0x496   :  { %5270 = vmatpush3.bf16.msra.mxu1 %v6391_v35  ;;  %5271 = vmatprep.mubr.msk.bf16.mxu1 %vm5826_vm1, %v7884_v20 }
 0x497   :  { %5281 = vmatprep.subr.bf16.mxu1 %v7884_v20 }
 0x51f   :  { %v1365_v40 = vpop.f32.mrb[32].mxu0 }
 0x520   :  { %v6786_v49 = vmul.f32 %v6231_v31, %v1365_v40  ;;  %v5171_v51 = vpop.f32.mrb[33].mxu0 }
 0x521   :  { %v1368_v62 = vpop.f32.mrb[34].mxu0 }
 0x522   :  { %v6789_v36 = vmul.f32 %v6231_v31, %v1368_v62  ;;  %v5172_v44 = vpop.f32.mrb[35].mxu0 }
 0x527   :  { %v1409_v22 = vpop.f32.mrb[48].mxu1 }
 0x528   :  { %v6792_v1 = vmul.f32 %v6231_v31, %v1409_v22  ;;  %v5177_v43 = vpop.f32.mrb[49].mxu1 }
 0x529   :  { %v1412_v58 = vpop.f32.mrb[50].mxu1 }
 0x52a   :  { %v6795_v21 = vmul.f32 %v6231_v31, %v1412_v58  ;;  %v5178_v17 = vpop.f32.mrb[51].mxu1 }
 0x52f   :  { %v1453_v14 = vpop.f32.mrb[36].mxu0 }
 0x530   :  { %v6798_v16 = vmul.f32 %v6231_v31, %v1453_v14  ;;  %v5183_v56 = vpop.f32.mrb[37].mxu0 }
 0x531   :  { %v1456_v57 = vpop.f32.mrb[38].mxu0 }
 0x532   :  { %v6801_v18 = vmul.f32 %v6231_v31, %v1456_v57  ;;  %v5184_v3 = vpop.f32.mrb[39].mxu0 }
 0x537   :  { %v1497_v24 = vpop.f32.mrb[52].mxu1 }
 0x538   :  { %v6804_v50 = vmul.f32 %v6231_v31, %v1497_v24  ;;  %v5189_v60 = vpop.f32.mrb[53].mxu1 }
 0x539   :  { %v1500_v12 = vpop.f32.mrb[54].mxu1 }
 0x53a   :  { %v6807_v52 = vmul.f32 %v6231_v31, %v1500_v12  ;;  %v5190_v41 = vpop.f32.mrb[55].mxu1 }
 0x53b   :  { %v1541_v48 = vpop.f32.mrb[40].mxu0  ;;  %v6836_v41 = vld [vmem:[%s7880_s10 + $0x10] sm:$0xff] }
 0x53c   :  { %v6810_v47 = vmul.f32 %v6231_v31, %v1541_v48  ;;  %v5195_v29 = vpop.f32.mrb[41].mxu0 }
 0x53d   :  { %v1544_v63 = vpop.f32.mrb[42].mxu0  ;;  %v6841_v29 = vld [vmem:[%s7880_s10 + $0x18] sm:$0xff] }
 0x53e   :  { %7898 = vst [vmem:[#allocation5_spill] sm:$0xff] %v6810_v47  ;;  %v6813_v39 = vmul.f32 %v6231_v31, %v1544_v63  ;;  %v5196_v42 = vpop.f32.mrb[43].mxu0 }
 0x53f   :  { %v1585_v54 = vpop.f32.mrb[56].mxu1 }
 0x540   :  { %7899 = vst [vmem:[#allocation6_spill] sm:$0xff] %v6813_v39  ;;  %v6816_v38 = vmul.f32 %v6231_v31, %v1585_v54  ;;  %v5201_v2 = vpop.f32.mrb[57].mxu1 }
 0x541   :  { %v1588_v40 = vpop.f32.mrb[58].mxu1 }
 0x542   :  { %7900 = vst [vmem:[#allocation7_spill] sm:$0xff] %v6816_v38  ;;  %v6819_v51 = vmul.f32 %v6231_v31, %v1588_v40  ;;  %v5202_v62 = vpop.f32.mrb[59].mxu1 }
 0x543   :  { %v1629_v44 = vpop.f32.mrb[44].mxu0 }
 0x544   :  { %7901 = vst [vmem:[#allocation8_spill] sm:$0xff] %v6819_v51  ;;  %v6822_v22 = vmul.f32 %v6231_v31, %v1629_v44  ;;  %v5207_v43 = vpop.f32.mrb[45].mxu0 }
 0x545   :  { %v1632_v58 = vpop.f32.mrb[46].mxu0 }
 0x546   :  { %7902 = vst [vmem:[#allocation9_spill] sm:$0xff] %v6822_v22  ;;  %v6825_v17 = vmul.f32 %v6231_v31, %v1632_v58  ;;  %v5208_v14 = vpop.f32.mrb[47].mxu0 }
 0x547   :  { %v1673_v56 = vpop.f32.mrb[60].mxu1 }
 0x548   :  { %7903 = vst [vmem:[#allocation10_spill] sm:$0xff] %v6825_v17  ;;  %v6828_v57 = vmul.f32 %v6231_v31, %v1673_v56  ;;  %v5213_v3 = vpop.f32.mrb[61].mxu1 }
 0x549   :  { %v1676_v24 = vpop.f32.mrb[62].mxu1 }
 0x54a   :  { %7904 = vst [vmem:[#allocation11_spill] sm:$0xff] %v6828_v57  ;;  %v6831_v60 = vmul.f32 %v6231_v31, %v1676_v24  ;;  %v5214_v12 = vpop.f32.mrb[63].mxu1 }
 0x54c   :  { %7905 = vst [vmem:[#allocation12_spill] sm:$0xff] %v6831_v60  ;;  %v1771_v48 = vpop.f32.mrb[48].mxu0 }
 0x54d   :  { %v6844_v63 = vadd.f32 %v6836_v41, %v1771_v48  ;;  %v5219_v42 = vpop.f32.mrb[49].mxu0 }
 0x54e   :  { %v1774_v54 = vpop.f32.mrb[50].mxu0 }
 0x54f   :  { %v6847_v31 = vadd.f32 %v6841_v29, %v1774_v54  ;;  %v5220_v2 = vpop.f32.mrb[51].mxu0  ;;  %v2105_v40 = vsel %vm1143_vm2, %v6844_v63, -inf }
 0x550   :  { %2106 = vmax.xlane.f32.xlu0 %v2105_v40  ;;  %v1815_v62 = vpop.f32.mrb[64].mxu1 }
 0x551   :  { %v6852_v44 = vadd.f32 %v6836_v41, %v1815_v62  ;;  %v5225_v43 = vpop.f32.mrb[65].mxu1  ;;  %v2108_v58 = vsel %vm1143_vm2, %v6847_v31, -inf }
 0x552   :  { %2109 = vmax.xlane.f32.xlu1 %v2108_v58  ;;  %v1818_v14 = vpop.f32.mrb[66].mxu1 }
 0x553   :  { %v6857_v56 = vadd.f32 %v6841_v29, %v1818_v14  ;;  %v5226_v3 = vpop.f32.mrb[67].mxu1  ;;  %v2111_v24 = vsel %vm1143_vm2, %v6852_v44, -inf }
 0x554   :  { %v1859_v12 = vpop.f32.mrb[52].mxu0  ;;  %2112 = vmax.xlane.f32.xlu0 %v2111_v24 }
 0x555   :  { %v6862_v48 = vadd.f32 %v6836_v41, %v1859_v12  ;;  %v5231_v42 = vpop.f32.mrb[53].mxu0  ;;  %v2114_v54 = vsel %vm1143_vm2, %v6857_v56, -inf }
 0x556   :  { %v1862_v2 = vpop.f32.mrb[54].mxu0  ;;  %2115 = vmax.xlane.f32.xlu1 %v2114_v54 }
 0x557   :  { %v6867_v40 = vadd.f32 %v6841_v29, %v1862_v2  ;;  %v5232_v62 = vpop.f32.mrb[55].mxu0  ;;  %v2117_v43 = vsel %vm1143_vm2, %v6862_v48, -inf }
 0x558   :  { %2118 = vmax.xlane.f32.xlu0 %v2117_v43  ;;  %v1903_v58 = vpop.f32.mrb[68].mxu1 }
 0x559   :  { %v6872_v14 = vadd.f32 %v6836_v41, %v1903_v58  ;;  %v5237_v3 = vpop.f32.mrb[69].mxu1  ;;  %v2120_v24 = vsel %vm1143_vm2, %v6867_v40, -inf }
 0x55a   :  { %2121 = vmax.xlane.f32.xlu1 %v2120_v24  ;;  %v1906_v12 = vpop.f32.mrb[70].mxu1 }
 0x55b   :  { %v6877_v42 = vadd.f32 %v6841_v29, %v1906_v12  ;;  %v5238_v54 = vpop.f32.mrb[71].mxu1  ;;  %v2123_v2 = vsel %vm1143_vm2, %v6872_v14, -inf }
 0x55c   :  { %v1947_v62 = vpop.f32.mrb[56].mxu0  ;;  %2124 = vmax.xlane.f32.xlu0 %v2123_v2 }
 0x55d   :  { %v6882_v43 = vadd.f32 %v6836_v41, %v1947_v62  ;;  %v5243_v58 = vpop.f32.mrb[57].mxu0  ;;  %v2126_v3 = vsel %vm1143_vm2, %v6877_v42, -inf }
 0x55e   :  { %v1950_v20 = vpop.f32.mrb[58].mxu0  ;;  %2127 = vmax.xlane.f32.xlu1 %v2126_v3 }
 0x55f   :  { %v6887_v24 = vadd.f32 %v6841_v29, %v1950_v20  ;;  %v5244_v12 = vpop.f32.mrb[59].mxu0  ;;  %v2129_v54 = vsel %vm1143_vm2, %v6882_v43, -inf }
 0x560   :  { %2130 = vmax.xlane.f32.xlu0 %v2129_v54  ;;  %v1991_v34 = vpop.f32.mrb[72].mxu1 }
 0x561   :  { %v6892_v2 = vadd.f32 %v6836_v41, %v1991_v34  ;;  %v5249_v62 = vpop.f32.mrb[73].mxu1  ;;  %v2132_v58 = vsel %vm1143_vm2, %v6887_v24, -inf }
 0x562   :  { %2133 = vmax.xlane.f32.xlu1 %v2132_v58  ;;  %v1994_v32 = vpop.f32.mrb[74].mxu1 }
 0x563   :  { %v6897_v3 = vadd.f32 %v6841_v29, %v1994_v32  ;;  %v5250_v20 = vpop.f32.mrb[75].mxu1  ;;  %v2135_v12 = vsel %vm1143_vm2, %v6892_v2, -inf }
 0x564   :  { %v2035_v55 = vpop.f32.mrb[60].mxu0  ;;  %2136 = vmax.xlane.f32.xlu0 %v2135_v12 }
 0x565   :  { %v6902_v54 = vadd.f32 %v6836_v41, %v2035_v55  ;;  %v5255_v34 = vpop.f32.mrb[61].mxu0  ;;  %v2138_v62 = vsel %vm1143_vm2, %v6897_v3, -inf }
 0x566   :  { %v2038_v60 = vpop.f32.mrb[62].mxu0  ;;  %2139 = vmax.xlane.f32.xlu1 %v2138_v62 }
 0x567   :  { %v6907_v58 = vadd.f32 %v6841_v29, %v2038_v60  ;;  %v5256_v32 = vpop.f32.mrb[63].mxu0  ;;  %v2141_v20 = vsel %vm1143_vm2, %v6902_v54, -inf }
 0x568   :  { %2142 = vmax.xlane.f32.xlu0 %v2141_v20  ;;  %v2079_v57 = vpop.f32.mrb[76].mxu1 }
 0x569   :  { %v6912_v12 = vadd.f32 %v6836_v41, %v2079_v57  ;;  %v5261_v55 = vpop.f32.mrb[77].mxu1  ;;  %v2144_v34 = vsel %vm1143_vm2, %v6907_v58, -inf }
 0x56a   :  { %2145 = vmax.xlane.f32.xlu1 %v2144_v34  ;;  %v2082_v17 = vpop.f32.mrb[78].mxu1 }
 0x56b   :  { %v6917_v62 = vadd.f32 %v6841_v29, %v2082_v17  ;;  %v5262_v60 = vpop.f32.mrb[79].mxu1  ;;  %v2147_v32 = vsel %vm1143_vm2, %v6912_v12, -inf }
 0x56c   :  { %2148 = vmax.xlane.f32.xlu0 %v2147_v32 }
 0x56d   :  { %v2150_v20 = vsel %vm1143_vm2, %v6917_v62, -inf }
 0x56e   :  { %2151 = vmax.xlane.f32.xlu1 %v2150_v20 }
 0x5dd   :  { %v2107_v57 = vpop.xlane.xlu0 %2106 }
 0x5de   :  { %v2153_v41 = vsub.f32 %v6844_v63, %v2107_v57 }
 0x5df   :  { %v2110_v55 = vpop.xlane.xlu1 %2109 }
 0x5e0   :  { %v2169_v22 = vmul.f32 1.442695, %v2153_v41  ;;  %v2154_v34 = vsub.f32 %v6847_v31, %v2110_v55 }
 0x5e1   :  { %v2113_v51 = vpop.xlane.xlu0 %2112 }
 0x5e2   :  { %5633 = vpow2.f32 %v2169_v22  ;;  %v2171_v17 = vmul.f32 1.442695, %v2154_v34  ;;  %v2155_v29 = vsub.f32 %v6852_v44, %v2113_v51 }
 0x5e3   :  { %v2116_v60 = vpop.xlane.xlu1 %2115 }
 0x5e4   :  { %5635 = vpow2.f32 %v2171_v17  ;;  %v2173_v38 = vmul.f32 1.442695, %v2155_v29  ;;  %v2156_v32 = vsub.f32 %v6857_v56, %v2116_v60 }
 0x5e5   :  { %v2119_v39 = vpop.xlane.xlu0 %2118 }
 0x5e6   :  { %5637 = vpow2.f32 %v2173_v38  ;;  %v2175_v20 = vmul.f32 1.442695, %v2156_v32  ;;  %v2157_v47 = vsub.f32 %v6862_v48, %v2119_v39 }
 0x5e7   :  { %v2122_v63 = vpop.xlane.xlu1 %2121 }
 0x5e8   :  { %5639 = vpow2.f32 %v2175_v20  ;;  %v2177_v57 = vmul.f32 1.442695, %v2157_v47  ;;  %v2158_v31 = vsub.f32 %v6867_v40, %v2122_v63 }
 0x5e9   :  { %v2125_v41 = vpop.xlane.xlu0 %2124 }
 0x5ea   :  { %5641 = vpow2.f32 %v2177_v57  ;;  %v2179_v22 = vmul.f32 1.442695, %v2158_v31  ;;  %v2159_v51 = vsub.f32 %v6872_v14, %v2125_v41 }
 0x5eb   :  { %v2128_v44 = vpop.xlane.xlu1 %2127 }
 0x5ec   :  { %v6930_v55 = vpop.eup %5633  ;;  %5643 = vpow2.f32 %v2179_v22  ;;  %v2181_v56 = vmul.f32 1.442695, %v2159_v51  ;;  %v2160_v38 = vsub.f32 %v6877_v42, %v2128_v44 }
 0x5ed   :  { %v2131_v34 = vpop.xlane.xlu0 %2130  ;;  %v2201_v39 = vsel %vm1143_vm2, %v6930_v55, 0.0 }
 0x5ee   :  { %v6935_v48 = vpop.eup %5635  ;;  %5645 = vpow2.f32 %v2181_v56  ;;  %v2183_v47 = vmul.f32 1.442695, %v2160_v38  ;;  %v2161_v40 = vsub.f32 %v6882_v43, %v2131_v34  ;;  %2202 = vadd.xlane.f32.xlu0 %v2201_v39 }
 0x5ef   :  { %v2134_v17 = vpop.xlane.xlu1 %2133  ;;  %v2204_v14 = vsel %vm1143_vm2, %v6935_v48, 0.0 }
 0x5f0   :  { %v6940_v29 = vpop.eup %5637  ;;  %5647 = vpow2.f32 %v2183_v47  ;;  %v2185_v60 = vmul.f32 1.442695, %v2161_v40  ;;  %v2162_v42 = vsub.f32 %v6887_v24, %v2134_v17  ;;  %2205 = vadd.xlane.f32.xlu1 %v2204_v14 }
 0x5f1   :  { %v2137_v32 = vpop.xlane.xlu0 %2136  ;;  %v2207_v20 = vsel %vm1143_vm2, %v6940_v29, 0.0 }
 0x5f2   :  { %v6945_v63 = vpop.eup %5639  ;;  %5649 = vpow2.f32 %v2185_v60  ;;  %v2187_v43 = vmul.f32 1.442695, %v2162_v42  ;;  %v2163_v57 = vsub.f32 %v6892_v2, %v2137_v32  ;;  %2208 = vadd.xlane.f32.xlu0 %v2207_v20 }
 0x5f3   :  { %v2140_v31 = vpop.xlane.xlu1 %2139  ;;  %v2210_v41 = vsel %vm1143_vm2, %v6945_v63, 0.0 }
 0x5f4   :  { %v6950_v22 = vpop.eup %5641  ;;  %5651 = vpow2.f32 %v2187_v43  ;;  %v2189_v24 = vmul.f32 1.442695, %v2163_v57  ;;  %v2164_v51 = vsub.f32 %v6897_v3, %v2140_v31  ;;  %2211 = vadd.xlane.f32.xlu1 %v2210_v41 }
 0x5f5   :  { %v2143_v44 = vpop.xlane.xlu0 %2142  ;;  %v2213_v56 = vsel %vm1143_vm2, %v6950_v22, 0.0 }
 0x5f6   :  { %v6955_v38 = vpop.eup %5643  ;;  %5653 = vpow2.f32 %v2189_v24  ;;  %v2191_v2 = vmul.f32 1.442695, %v2164_v51  ;;  %v2165_v34 = vsub.f32 %v6902_v54, %v2143_v44  ;;  %2214 = vadd.xlane.f32.xlu0 %v2213_v56 }
 0x5f7   :  { %v2146_v39 = vpop.xlane.xlu1 %2145  ;;  %v2216_v47 = vsel %vm1143_vm2, %v6955_v38, 0.0 }
 0x5f8   :  { %v6960_v40 = vpop.eup %5645  ;;  %5655 = vpow2.f32 %v2191_v2  ;;  %v2193_v3 = vmul.f32 1.442695, %v2165_v34  ;;  %v2166_v17 = vsub.f32 %v6907_v58, %v2146_v39  ;;  %2217 = vadd.xlane.f32.xlu1 %v2216_v47 }
 0x5f9   :  { %v2149_v14 = vpop.xlane.xlu0 %2148  ;;  %v2219_v60 = vsel %vm1143_vm2, %v6960_v40, 0.0 }
 0x5fa   :  { %v6965_v42 = vpop.eup %5647  ;;  %5657 = vpow2.f32 %v2193_v3  ;;  %v2195_v54 = vmul.f32 1.442695, %v2166_v17  ;;  %v2167_v32 = vsub.f32 %v6912_v12, %v2149_v14  ;;  %2220 = vadd.xlane.f32.xlu0 %v2219_v60 }
 0x5fb   :  { %v2152_v20 = vpop.xlane.xlu1 %2151  ;;  %v2222_v43 = vsel %vm1143_vm2, %v6965_v42, 0.0 }
 0x5fc   :  { %v6970_v57 = vpop.eup %5649  ;;  %5659 = vpow2.f32 %v2195_v54  ;;  %v2197_v58 = vmul.f32 1.442695, %v2167_v32  ;;  %v2168_v31 = vsub.f32 %v6917_v62, %v2152_v20  ;;  %2223 = vadd.xlane.f32.xlu1 %v2222_v43 }
 0x5fd   :  { %v2225_v41 = vsel %vm1143_vm2, %v6970_v57, 0.0 }
 0x5fe   :  { %v6975_v24 = vpop.eup %5651  ;;  %5661 = vpow2.f32 %v2197_v58  ;;  %v2199_v51 = vmul.f32 1.442695, %v2168_v31  ;;  %2226 = vadd.xlane.f32.xlu0 %v2225_v41 }
 0x5ff   :  { %v2228_v12 = vsel %vm1143_vm2, %v6975_v24, 0.0 }
 0x600   :  { %v6979_v44 = vpop.eup %5653  ;;  %5663 = vpow2.f32 %v2199_v51  ;;  %2229 = vadd.xlane.f32.xlu1 %v2228_v12 }
 0x601   :  { %v2231_v56 = vsel %vm1143_vm2, %v6979_v44, 0.0 }
 0x602   :  { %v6983_v62 = vpop.eup %5655  ;;  %2232 = vadd.xlane.f32.xlu0 %v2231_v56 }
 0x603   :  { %v2234_v2 = vsel %vm1143_vm2, %v6983_v62, 0.0 }
 0x604   :  { %v6987_v34 = vpop.eup %5657  ;;  %2235 = vadd.xlane.f32.xlu1 %v2234_v2 }
 0x605   :  { %v2237_v39 = vsel %vm1143_vm2, %v6987_v34, 0.0 }
 0x606   :  { %v6991_v47 = vpop.eup %5659  ;;  %2238 = vadd.xlane.f32.xlu0 %v2237_v39 }
 0x607   :  { %v2240_v3 = vsel %vm1143_vm2, %v6991_v47, 0.0 }
 0x608   :  { %v6995_v17 = vpop.eup %5661  ;;  %2241 = vadd.xlane.f32.xlu1 %v2240_v3 }
 0x609   :  { %v2243_v14 = vsel %vm1143_vm2, %v6995_v17, 0.0 }
 0x60a   :  { %v6999_v60 = vpop.eup %5663  ;;  %2244 = vadd.xlane.f32.xlu0 %v2243_v14 }
 0x60b   :  { %v2246_v54 = vsel %vm1143_vm2, %v6999_v60, 0.0 }
 0x60c   :  { %2247 = vadd.xlane.f32.xlu1 %v2246_v54 }
 0x67b   :  { %v2203_v32 = vpop.xlane.xlu0 %2202 }
 0x67c   :  { %5665 = vrcp.f32 %v2203_v32 }
 0x67d   :  { %v2206_v20 = vpop.xlane.xlu1 %2205 }
 0x67e   :  { %5667 = vrcp.f32 %v2206_v20 }
 0x67f   :  { %v2209_v43 = vpop.xlane.xlu0 %2208 }
 0x680   :  { %5669 = vrcp.f32 %v2209_v43 }
 0x681   :  { %v2212_v58 = vpop.xlane.xlu1 %2211 }
 0x682   :  { %5671 = vrcp.f32 %v2212_v58 }
 0x683   :  { %v2215_v31 = vpop.xlane.xlu0 %2214 }
 0x684   :  { %5673 = vrcp.f32 %v2215_v31 }
 0x685   :  { %v2218_v41 = vpop.xlane.xlu1 %2217 }
 0x686   :  { %v5666_v51 = vpop.eup %5665  ;;  %5675 = vrcp.f32 %v2218_v41 }
 0x687   :  { %v2221_v12 = vpop.xlane.xlu0 %2220  ;;  %v2265_v2 = vmul.f32 %v5666_v51, %v6930_v55  ;;  %v7906_v55 = vmov 0.0  }
 0x688   :  { %v5668_v56 = vpop.eup %5667  ;;  %5677 = vrcp.f32 %v2221_v12 }
 0x689   :  { %v2266_v39 = vmul.f32 %v5668_v56, %v6935_v48  ;;  %v2224_v3 = vpop.xlane.xlu1 %2223 }
 0x68a   :  { %v5670_v14 = vpop.eup %5669  ;;  %5679 = vrcp.f32 %v2224_v3 }
 0x68b   :  { %v2227_v54 = vpop.xlane.xlu0 %2226  ;;  %v2281_v32 = vpack.c.bf16 %v2266_v39, %v2265_v2  ;;  %v2267_v43 = vmul.f32 %v5670_v14, %v6940_v29 }
 0x68c   :  { %v5672_v20 = vpop.eup %5671  ;;  %5681 = vrcp.f32 %v2227_v54 }
 0x68d   :  { %v2268_v58 = vmul.f32 %v5672_v20, %v6945_v63  ;;  %5266 = vmatmul.mubr.msk.bf16.vlgmr.msra.gmra.mrb[64].mxu0 %vm1143_vm2, %v2281_v32  ;;  %v2230_v31 = vpop.xlane.xlu1 %2229 }
 0x68e   :  { %v5674_v41 = vpop.eup %5673  ;;  %5276 = vmatpush3.bf16.msra.mxu0 %v6422_v7  ;;  %5683 = vrcp.f32 %v2230_v31  ;;  %5277 = vmatprep.mubr.msk.bf16.mxu0 %vm5826_vm1, %v7906_v55 }
 0x68f   :  { %v2233_v48 = vpop.xlane.xlu0 %2232  ;;  %v2282_v51 = vpack.c.bf16 %v2268_v58, %v2267_v43  ;;  %5287 = vmatprep.subr.bf16.mxu0 %v7906_v55  ;;  %v2269_v29 = vmul.f32 %v5674_v41, %v6950_v22 }
 0x690   :  { %v5676_v12 = vpop.eup %5675  ;;  %5685 = vrcp.f32 %v2233_v48 }
 0x691   :  { %v2270_v63 = vmul.f32 %v5676_v12, %v6955_v38  ;;  %5272 = vmatmul.mubr.msk.bf16.vlgmr.msra.gmra.mrb[80].mxu1 %vm1143_vm2, %v2282_v51  ;;  %v2236_v56 = vpop.xlane.xlu1 %2235 }
 0x692   :  { %v5678_v2 = vpop.eup %5677  ;;  %5282 = vmatpush3.bf16.msra.mxu1 %v6418_v13  ;;  %5687 = vrcp.f32 %v2236_v56  ;;  %5283 = vmatprep.mubr.msk.bf16.mxu1 %vm5826_vm1, %v7906_v55 }
 0x693   :  { %v2239_v39 = vpop.xlane.xlu0 %2238  ;;  %v2283_v3 = vpack.c.bf16 %v2270_v63, %v2269_v29  ;;  %5293 = vmatprep.subr.bf16.mxu1 %v7906_v55  ;;  %v2271_v22 = vmul.f32 %v5678_v2, %v6960_v40 }
 0x694   :  { %v5680_v14 = vpop.eup %5679  ;;  %5689 = vrcp.f32 %v2239_v39 }
 0x695   :  { %v2272_v38 = vmul.f32 %v5680_v14, %v6965_v42  ;;  %5278 = vmatmul.mubr.msk.bf16.vlgmr.msra.gmra.mrb[68].mxu0 %vm1143_vm2, %v2283_v3  ;;  %v2242_v54 = vpop.xlane.xlu1 %2241 }
 0x696   :  { %v5682_v32 = vpop.eup %5681  ;;  %5288 = vmatpush3.bf16.msra.mxu0 %v6453_v9  ;;  %5691 = vrcp.f32 %v2242_v54  ;;  %5289 = vmatprep.mubr.msk.bf16.mxu0 %vm5826_vm1, %v7906_v55  ;;  %v7912_v54 = vmul.bf16 %v6225_v26, %v6257_v10 }
 0x697   :  { %v2245_v20 = vpop.xlane.xlu0 %2244  ;;  %v2284_v43 = vpack.c.bf16 %v2272_v38, %v2271_v22  ;;  %5299 = vmatprep.subr.bf16.mxu0 %v7906_v55  ;;  %v2273_v40 = vmul.f32 %v5682_v32, %v6970_v57  ;;  %v7910_v22 = vmul.bf16 %v6225_v26, %v6344_v25  ;;  %v7911_v38 = vmul.bf16 %v6225_v26, %v6259_v46 }
 0x698   :  { %v5684_v58 = vpop.eup %5683  ;;  %5693 = vrcp.f32 %v2245_v20  ;;  %v7913_v32 = vmul.bf16 %v6225_v26, %v6279_v37  ;;  %v7914_v20 = vmul.bf16 %v6225_v26, %v6277_v61 }
 0x699   :  { %v2274_v42 = vmul.f32 %v5684_v58, %v6975_v24  ;;  %5284 = vmatmul.mubr.msk.bf16.vlgmr.msra.gmra.mrb[84].mxu1 %vm1143_vm2, %v2284_v43  ;;  %v2248_v31 = vpop.xlane.xlu1 %2247 }
 0x69a   :  { %v5686_v41 = vpop.eup %5685  ;;  %5294 = vmatpush3.bf16.msra.mxu1 %v6449_v6  ;;  %5695 = vrcp.f32 %v2248_v31  ;;  %5295 = vmatprep.mubr.msk.bf16.mxu1 %vm5826_vm1, %v7906_v55 }
 0x69b   :  { %v2285_v48 = vpack.c.bf16 %v2274_v42, %v2273_v40  ;;  %5305 = vmatprep.subr.bf16.mxu1 %v7906_v55  ;;  %v2275_v12 = vmul.f32 %v5686_v41, %v6979_v44 }
 0x69c   :  { %v5688_v51 = vpop.eup %5687 }
 0x69d   :  { %v2276_v57 = vmul.f32 %v5688_v51, %v6983_v62  ;;  %5290 = vmatmul.mubr.msk.bf16.vlgmr.msra.gmra.mrb[72].mxu0 %vm1143_vm2, %v2285_v48 }
 0x69e   :  { %v5690_v24 = vpop.eup %5689  ;;  %5300 = vmatpush3.bf16.msra.mxu0 %v6476_v8  ;;  %5301 = vmatprep.mubr.msk.bf16.mxu0 %vm5826_vm1, %v7906_v55 }
 0x69f   :  { %v2286_v29 = vpack.c.bf16 %v2276_v57, %v2275_v12  ;;  %5311 = vmatprep.subr.bf16.mxu0 %v7906_v55  ;;  %v2277_v56 = vmul.f32 %v5690_v24, %v6987_v34 }
 0x6a0   :  { %v5692_v63 = vpop.eup %5691 }
 0x6a1   :  { %v2278_v2 = vmul.f32 %v5692_v63, %v6991_v47  ;;  %5296 = vmatmul.mubr.msk.bf16.vlgmr.msra.gmra.mrb[88].mxu1 %vm1143_vm2, %v2286_v29  ;;  %v7907_v47 = vmul.bf16 %v6225_v26, %v6308_v27 }
 0x6a2   :  { %v5694_v44 = vpop.eup %5693  ;;  %5306 = vmatpush3.bf16.msra.mxu1 %v6474_v28  ;;  %5307 = vmatprep.mubr.msk.bf16.mxu1 %vm5826_vm1, %v7906_v55 }
 0x6a3   :  { %v2287_v62 = vpack.c.bf16 %v2278_v2, %v2277_v56  ;;  %5317 = vmatprep.subr.bf16.mxu1 %v7906_v55  ;;  %v2279_v3 = vmul.f32 %v5694_v44, %v6995_v17  ;;  %v7908_v17 = vmul.bf16 %v6225_v26, %v6306_v19 }
 0x6a4   :  { %v5696_v39 = vpop.eup %5695 }
 0x6a5   :  { %v2280_v14 = vmul.f32 %v5696_v39, %v6999_v60  ;;  %5302 = vmatmul.mubr.msk.bf16.vlgmr.msra.gmra.mrb[76].mxu0 %vm1143_vm2, %v2287_v62  ;;  %v7909_v60 = vmul.bf16 %v6225_v26, %v6348_v33 }
 0x6a6   :  { %5313 = vmatprep.mubr.msk.bf16.mxu0 %vm5826_vm1, %v7906_v55 }
 0x6a7   :  { %5312 = vmatpush3.bf16.xpose.msra.mxu0 %v6325_v53  ;;  %v2288_v34 = vpack.c.bf16 %v2280_v14, %v2279_v3 }
 0x6a8   :  { %5323 = vmatprep.subr.bf16.mxu0 %v7906_v55 }
 0x6a9   :  { %5308 = vmatmul.mubr.msk.bf16.vlgmr.msra.gmra.mrb[92].mxu1 %vm1143_vm2, %v2288_v34 }
 0x6aa   :  { %5319 = vmatprep.mubr.msk.bf16.mxu1 %vm5826_vm1, %v7906_v55 }
 0x6ab   :  { %5318 = vmatpush3.bf16.xpose.msra.mxu1 %v6371_v23 }
 0x6ac   :  { %5329 = vmatprep.subr.bf16.mxu1 %v7906_v55 }
 0x6ae   :  { %5314 = vmatmul.mubr.msk.bf16.vlgmr.msra.gmra.mrb[80].mxu0 %vm61_vm0, %v7907_v47 }
 0x6af   :  { %5324 = vmatpush3.bf16.xpose.msra.mxu0 %v6403_v5  ;;  %5325 = vmatprep.mubr.msk.bf16.mxu0 %vm5826_vm1, %v7906_v55 }
 0x6b0   :  { %5335 = vmatprep.subr.bf16.mxu0 %v7906_v55 }
 0x6b2   :  { %5320 = vmatmul.mubr.msk.bf16.vlgmr.msra.gmra.mrb[96].mxu1 %vm61_vm0, %v7908_v17 }
 0x6b3   :  { %5330 = vmatpush3.bf16.xpose.msra.mxu1 %v6436_v15  ;;  %5331 = vmatprep.mubr.msk.bf16.mxu1 %vm5826_vm1, %v7906_v55 }
 0x6b4   :  { %5341 = vmatprep.subr.bf16.mxu1 %v7906_v55 }
 0x6b6   :  { %5326 = vmatmul.mubr.msk.bf16.vlgmr.msra.gmra.mrb[84].mxu0 %vm61_vm0, %v7909_v60 }
 0x6b7   :  { %5336 = vmatpush3.bf16.xpose.msra.mxu0 %v6398_v11  ;;  %5337 = vmatprep.mubr.msk.bf16.mxu0 %vm5826_vm1, %v7906_v55 }
 0x6b8   :  { %5347 = vmatprep.subr.bf16.mxu0 %v7906_v55 }
 0x6ba   :  { %5332 = vmatmul.mubr.msk.bf16.vlgmr.msra.gmra.mrb[100].mxu1 %vm61_vm0, %v7910_v22 }
 0x6bb   :  { %5342 = vmatpush3.bf16.xpose.msra.mxu1 %v6461_v59  ;;  %5343 = vmatprep.mubr.msk.bf16.mxu1 %vm5826_vm1, %v7906_v55 }
 0x6bc   :  { %5353 = vmatprep.subr.bf16.mxu1 %v7906_v55 }
 0x6be   :  { %5338 = vmatmul.mubr.msk.bf16.vlgmr.msra.gmra.mrb[88].mxu0 %vm61_vm0, %v7911_v38 }
 0x6bf   :  { %5348 = vmatpush3.bf16.xpose.msra.mxu0 %v6428_v45  ;;  %5349 = vmatprep.mubr.msk.bf16.mxu0 %vm5826_vm1, %v7906_v55 }
 0x6c0   :  { %5359 = vmatprep.subr.bf16.mxu0 %v7906_v55 }
 0x6c2   :  { %5344 = vmatmul.mubr.msk.bf16.vlgmr.msra.gmra.mrb[104].mxu1 %vm61_vm0, %v7912_v54 }
 0x6c3   :  { %5354 = vmatpush3.bf16.xpose.msra.mxu1 %v6482_v30  ;;  %5355 = vmatprep.mubr.msk.bf16.mxu1 %vm5826_vm1, %v7906_v55 }
 0x6c4   :  { %5365 = vmatprep.subr.bf16.mxu1 %v7906_v55 }
 0x6c6   :  { %5350 = vmatmul.mubr.msk.bf16.vlgmr.msra.gmra.mrb[92].mxu0 %vm61_vm0, %v7913_v32 }
 0x6c7   :  { %5360 = vmatpush3.bf16.msra.mxu0 %v6393_v4  ;;  %5361 = vmatprep.mubr.msk.bf16.mxu0 %vm5826_vm1, %v7906_v55 }
 0x6c8   :  { %5371 = vmatprep.subr.bf16.mxu0 %v7906_v55 }
 0x6ca   :  { %5356 = vmatmul.mubr.msk.bf16.vlgmr.msra.gmra.mrb[108].mxu1 %vm61_vm0, %v7914_v20 }
 0x6cb   :  { %5366 = vmatpush3.bf16.msra.mxu1 %v6391_v35  ;;  %5367 = vmatprep.mubr.msk.bf16.mxu1 %vm5826_vm1, %v7906_v55 }
 0x6cc   :  { %5377 = vmatprep.subr.bf16.mxu1 %v7906_v55 }
 0x760   :  { %v2326_v43 = vpop.f32.mrb[64].mxu0 }
 0x761   :  { %v2646_v58 = vmul.f32 %v6234_v0, %v2326_v43  ;;  %v5267_v40 = vpop.f32.mrb[65].mxu0 }
 0x762   :  { %v2329_v42 = vpop.f32.mrb[66].mxu0 }
 0x763   :  { %v7125_v31 = vadd.f32 %v2646_v58, %v6786_v49  ;;  %v2647_v41 = vmul.f32 %v6234_v0, %v2329_v42  ;;  %v5268_v26 = vpop.f32.mrb[67].mxu0 }
 0x764   :  { %v2370_v48 = vpop.f32.mrb[80].mxu1 }
 0x765   :  { %v7129_v51 = vadd.f32 %v2647_v41, %v6789_v36  ;;  %v2648_v12 = vmul.f32 %v6234_v0, %v2370_v48  ;;  %v5273_v57 = vpop.f32.mrb[81].mxu1 }
 0x766   :  { %v2373_v24 = vpop.f32.mrb[82].mxu1 }
 0x767   :  { %v7133_v29 = vadd.f32 %v2648_v12, %v6792_v1  ;;  %v2649_v63 = vmul.f32 %v6234_v0, %v2373_v24  ;;  %v5274_v56 = vpop.f32.mrb[83].mxu1 }
 0x768   :  { %v2414_v2 = vpop.f32.mrb[68].mxu0 }
 0x769   :  { %v7137_v49 = vadd.f32 %v2649_v63, %v6795_v21  ;;  %v2650_v44 = vmul.f32 %v6234_v0, %v2414_v2  ;;  %v5279_v62 = vpop.f32.mrb[69].mxu0 }
 0x76a   :  { %v2417_v39 = vpop.f32.mrb[70].mxu0 }
 0x76b   :  { %v7141_v36 = vadd.f32 %v2650_v44, %v6798_v16  ;;  %v2651_v3 = vmul.f32 %v6234_v0, %v2417_v39  ;;  %v5280_v14 = vpop.f32.mrb[71].mxu0  ;;  %v7920_v44 = vld [vmem:[#allocation8_spill] sm:$0xff] }
 0x76c   :  { %v2458_v34 = vpop.f32.mrb[84].mxu1 }
 0x76d   :  { %v7145_v1 = vadd.f32 %v2651_v3, %v6801_v18  ;;  %v2652_v47 = vmul.f32 %v6234_v0, %v2458_v34  ;;  %v5285_v17 = vpop.f32.mrb[85].mxu1  ;;  %v7915_v18 = vld [vmem:[#allocation5_spill] sm:$0xff] }
 0x76e   :  { %v2461_v60 = vpop.f32.mrb[86].mxu1  ;;  %v7922_v34 = vld [vmem:[#allocation9_spill] sm:$0xff] }
 0x76f   :  { %v7149_v21 = vadd.f32 %v2652_v47, %v6804_v50  ;;  %v2653_v22 = vmul.f32 %v6234_v0, %v2461_v60  ;;  %v5286_v38 = vpop.f32.mrb[87].mxu1  ;;  %v7916_v50 = vld [vmem:[#allocation6_spill] sm:$0xff] }
 0x770   :  { %v2502_v54 = vpop.f32.mrb[72].mxu0  ;;  %v7924_v38 = vld [vmem:[#allocation10_spill] sm:$0xff] }
 0x771   :  { %v7153_v16 = vadd.f32 %v2653_v22, %v6807_v52  ;;  %v2654_v32 = vmul.f32 %v6234_v0, %v2502_v54  ;;  %v5291_v20 = vpop.f32.mrb[73].mxu0  ;;  %v7918_v52 = vld [vmem:[#allocation7_spill] sm:$0xff] }
 0x772   :  { %v2505_v43 = vpop.f32.mrb[74].mxu0 }
 0x773   :  { %v7157_v58 = vadd.f32 %v2654_v32, %v7915_v18  ;;  %v2655_v40 = vmul.f32 %v6234_v0, %v2505_v43  ;;  %v5292_v42 = vpop.f32.mrb[75].mxu0  ;;  %v7926_v18 = vld [vmem:[#allocation11_spill] sm:$0xff] }
 0x774   :  { %v2546_v41 = vpop.f32.mrb[88].mxu1 }
 0x775   :  { %v7161_v26 = vadd.f32 %v2655_v40, %v7916_v50  ;;  %v2656_v48 = vmul.f32 %v6234_v0, %v2546_v41  ;;  %v5297_v12 = vpop.f32.mrb[89].mxu1  ;;  %v7187_v50 = vld [vmem:[%s7880_s10 + $0x20] sm:$0xff] }
 0x776   :  { %v2549_v57 = vpop.f32.mrb[90].mxu1 }
 0x777   :  { %7917 = vst [vmem:[#allocation5_spill] sm:$0xff] %v7161_v26  ;;  %v7165_v24 = vadd.f32 %v2656_v48, %v7918_v52  ;;  %v2657_v63 = vmul.f32 %v6234_v0, %v2549_v57  ;;  %v5298_v56 = vpop.f32.mrb[91].mxu1  ;;  %v7928_v48 = vld [vmem:[#allocation12_spill] sm:$0xff]  ;;  %v7195_v52 = vld [vmem:[%s7880_s10 + $0x28] sm:$0xff] }
 0x778   :  { %v2590_v2 = vpop.f32.mrb[76].mxu0 }
 0x779   :  { %7919 = vst [vmem:[#allocation6_spill] sm:$0xff] %v7165_v24  ;;  %v7169_v62 = vadd.f32 %v2657_v63, %v7920_v44  ;;  %v2658_v39 = vmul.f32 %v6234_v0, %v2590_v2  ;;  %v5303_v3 = vpop.f32.mrb[77].mxu0 }
 0x77a   :  { %v2593_v14 = vpop.f32.mrb[78].mxu0 }
 0x77b   :  { %7921 = vst [vmem:[#allocation7_spill] sm:$0xff] %v7169_v62  ;;  %v7173_v47 = vadd.f32 %v2658_v39, %v7922_v34  ;;  %v2659_v17 = vmul.f32 %v6234_v0, %v2593_v14  ;;  %v5304_v60 = vpop.f32.mrb[79].mxu0 }
 0x77c   :  { %v2634_v22 = vpop.f32.mrb[92].mxu1 }
 0x77d   :  { %7923 = vst [vmem:[#allocation8_spill] sm:$0xff] %v7173_v47  ;;  %v7177_v54 = vadd.f32 %v2659_v17, %v7924_v38  ;;  %v2660_v32 = vmul.f32 %v6234_v0, %v2634_v22  ;;  %v5309_v20 = vpop.f32.mrb[93].mxu1 }
 0x77e   :  { %v2637_v43 = vpop.f32.mrb[94].mxu1 }
 0x77f   :  { %7925 = vst [vmem:[#allocation9_spill] sm:$0xff] %v7177_v54  ;;  %v7181_v40 = vadd.f32 %v2660_v32, %v7926_v18  ;;  %v2661_v42 = vmul.f32 %v6234_v0, %v2637_v43  ;;  %v5310_v41 = vpop.f32.mrb[95].mxu1 }
 0x781   :  { %7927 = vst [vmem:[#allocation10_spill] sm:$0xff] %v7181_v40  ;;  %v7190_v12 = vadd.f32 %v2661_v42, %v7928_v48  ;;  %v2732_v57 = vpop.f32.mrb[80].mxu0 }
 0x782   :  { %v7198_v63 = vadd.f32 %v7187_v50, %v2732_v57  ;;  %v5315_v56 = vpop.f32.mrb[81].mxu0 }
 0x783   :  { %7929 = vst [vmem:[#allocation11_spill] sm:$0xff] %v7190_v12  ;;  %v2735_v0 = vpop.f32.mrb[82].mxu0 }
 0x784   :  { %v7201_v2 = vadd.f32 %v7195_v52, %v2735_v0  ;;  %v5316_v44 = vpop.f32.mrb[83].mxu0  ;;  %v3066_v39 = vsel %vm1143_vm2, %v7198_v63, -inf }
 0x785   :  { %3067 = vmax.xlane.f32.xlu0 %v3066_v39  ;;  %v2776_v3 = vpop.f32.mrb[96].mxu1 }
 0x786   :  { %v7206_v14 = vadd.f32 %v7187_v50, %v2776_v3  ;;  %v5321_v34 = vpop.f32.mrb[97].mxu1  ;;  %v3069_v17 = vsel %vm1143_vm2, %v7201_v2, -inf }
 0x787   :  { %3070 = vmax.xlane.f32.xlu1 %v3069_v17  ;;  %v2779_v60 = vpop.f32.mrb[98].mxu1 }
 0x788   :  { %v7211_v22 = vadd.f32 %v7195_v52, %v2779_v60  ;;  %v5322_v38 = vpop.f32.mrb[99].mxu1  ;;  %v3072_v32 = vsel %vm1143_vm2, %v7206_v14, -inf }
 0x789   :  { %v2820_v20 = vpop.f32.mrb[84].mxu0  ;;  %3073 = vmax.xlane.f32.xlu0 %v3072_v32 }
 0x78a   :  { %v7216_v43 = vadd.f32 %v7187_v50, %v2820_v20  ;;  %v5327_v18 = vpop.f32.mrb[85].mxu0  ;;  %v3075_v42 = vsel %vm1143_vm2, %v7211_v22, -inf }
 0x78b   :  { %v2823_v41 = vpop.f32.mrb[86].mxu0  ;;  %3076 = vmax.xlane.f32.xlu1 %v3075_v42 }
 0x78c   :  { %v7221_v48 = vadd.f32 %v7195_v52, %v2823_v41  ;;  %v5328_v57 = vpop.f32.mrb[87].mxu0  ;;  %v3078_v56 = vsel %vm1143_vm2, %v7216_v43, -inf }
 0x78d   :  { %3079 = vmax.xlane.f32.xlu0 %v3078_v56  ;;  %v2864_v0 = vpop.f32.mrb[100].mxu1 }
 0x78e   :  { %v7226_v44 = vadd.f32 %v7187_v50, %v2864_v0  ;;  %v5333_v39 = vpop.f32.mrb[101].mxu1  ;;  %v3081_v3 = vsel %vm1143_vm2, %v7221_v48, -inf }
 0x78f   :  { %3082 = vmax.xlane.f32.xlu1 %v3081_v3  ;;  %v2867_v34 = vpop.f32.mrb[102].mxu1 }
 0x790   :  { %v7231_v17 = vadd.f32 %v7195_v52, %v2867_v34  ;;  %v5334_v60 = vpop.f32.mrb[103].mxu1  ;;  %v3084_v38 = vsel %vm1143_vm2, %v7226_v44, -inf }
 0x791   :  { %v2908_v32 = vpop.f32.mrb[88].mxu0  ;;  %3085 = vmax.xlane.f32.xlu0 %v3084_v38 }
 0x792   :  { %v7236_v20 = vadd.f32 %v7187_v50, %v2908_v32  ;;  %v5339_v18 = vpop.f32.mrb[89].mxu0  ;;  %v3087_v42 = vsel %vm1143_vm2, %v7231_v17, -inf }
 0x793   :  { %v2911_v41 = vpop.f32.mrb[90].mxu0  ;;  %3088 = vmax.xlane.f32.xlu1 %v3087_v42 }
 0x794   :  { %v7241_v57 = vadd.f32 %v7195_v52, %v2911_v41  ;;  %v5340_v56 = vpop.f32.mrb[91].mxu0  ;;  %v3090_v0 = vsel %vm1143_vm2, %v7236_v20, -inf }
 0x795   :  { %3091 = vmax.xlane.f32.xlu0 %v3090_v0  ;;  %v2952_v39 = vpop.f32.mrb[104].mxu1 }
 0x796   :  { %v7246_v3 = vadd.f32 %v7187_v50, %v2952_v39  ;;  %v5345_v34 = vpop.f32.mrb[105].mxu1  ;;  %v3093_v60 = vsel %vm1143_vm2, %v7241_v57, -inf }
 0x797   :  { %3094 = vmax.xlane.f32.xlu1 %v3093_v60  ;;  %v2955_v38 = vpop.f32.mrb[106].mxu1 }
 0x798   :  { %v7251_v32 = vadd.f32 %v7195_v52, %v2955_v38  ;;  %v5346_v18 = vpop.f32.mrb[107].mxu1  ;;  %v3096_v42 = vsel %vm1143_vm2, %v7246_v3, -inf }
 0x799   :  { %v2996_v41 = vpop.f32.mrb[92].mxu0  ;;  %3097 = vmax.xlane.f32.xlu0 %v3096_v42 }
 0x79a   :  { %v7256_v56 = vadd.f32 %v7187_v50, %v2996_v41  ;;  %v5351_v0 = vpop.f32.mrb[93].mxu0  ;;  %v3099_v39 = vsel %vm1143_vm2, %v7251_v32, -inf }
 0x79b   :  { %v2999_v34 = vpop.f32.mrb[94].mxu0  ;;  %3100 = vmax.xlane.f32.xlu1 %v3099_v39 }
 0x79c   :  { %v7261_v60 = vadd.f32 %v7195_v52, %v2999_v34  ;;  %v5352_v38 = vpop.f32.mrb[95].mxu0  ;;  %v3102_v18 = vsel %vm1143_vm2, %v7256_v56, -inf }
 0x79d   :  { %3103 = vmax.xlane.f32.xlu0 %v3102_v18  ;;  %v3040_v12 = vpop.f32.mrb[108].mxu1 }
 0x79e   :  { %v7266_v42 = vadd.f32 %v7187_v50, %v3040_v12  ;;  %v5357_v41 = vpop.f32.mrb[109].mxu1  ;;  %v3105_v0 = vsel %vm1143_vm2, %v7261_v60, -inf }
 0x79f   :  { %3106 = vmax.xlane.f32.xlu1 %v3105_v0  ;;  %v3043_v40 = vpop.f32.mrb[110].mxu1 }
 0x7a0   :  { %v7271_v39 = vadd.f32 %v7195_v52, %v3043_v40  ;;  %v5358_v34 = vpop.f32.mrb[111].mxu1  ;;  %v3108_v38 = vsel %vm1143_vm2, %v7266_v42, -inf }
 0x7a1   :  { %3109 = vmax.xlane.f32.xlu0 %v3108_v38 }
 0x7a2   :  { %v3111_v18 = vsel %vm1143_vm2, %v7271_v39, -inf }
 0x7a3   :  { %3112 = vmax.xlane.f32.xlu1 %v3111_v18 }
 0x812   :  { %v3068_v50 = vpop.xlane.xlu0 %3067 }
 0x813   :  { %v3114_v12 = vsub.f32 %v7198_v63, %v3068_v50 }
 0x814   :  { %v3071_v41 = vpop.xlane.xlu1 %3070 }
 0x815   :  { %v3130_v54 = vmul.f32 1.442695, %v3114_v12  ;;  %v3115_v0 = vsub.f32 %v7201_v2, %v3071_v41 }
 0x816   :  { %v3074_v47 = vpop.xlane.xlu0 %3073 }
 0x817   :  { %5697 = vpow2.f32 %v3130_v54  ;;  %v3132_v40 = vmul.f32 1.442695, %v3115_v0  ;;  %v3116_v52 = vsub.f32 %v7206_v14, %v3074_v47 }
 0x818   :  { %v3077_v34 = vpop.xlane.xlu1 %3076 }
 0x819   :  { %5699 = vpow2.f32 %v3132_v40  ;;  %v3134_v62 = vmul.f32 1.442695, %v3116_v52  ;;  %v3117_v38 = vsub.f32 %v7211_v22, %v3077_v34 }
 0x81a   :  { %v3080_v24 = vpop.xlane.xlu0 %3079 }
 0x81b   :  { %5701 = vpow2.f32 %v3134_v62  ;;  %v3136_v18 = vmul.f32 1.442695, %v3117_v38  ;;  %v3118_v26 = vsub.f32 %v7216_v43, %v3080_v24 }
 0x81c   :  { %v3083_v63 = vpop.xlane.xlu1 %3082 }
 0x81d   :  { %5703 = vpow2.f32 %v3136_v18  ;;  %v3138_v50 = vmul.f32 1.442695, %v3118_v26  ;;  %v3119_v2 = vsub.f32 %v7221_v48, %v3083_v63 }
 0x81e   :  { %v3086_v12 = vpop.xlane.xlu0 %3085 }
 0x81f   :  { %5705 = vpow2.f32 %v3138_v50  ;;  %v3140_v54 = vmul.f32 1.442695, %v3119_v2  ;;  %v3120_v47 = vsub.f32 %v7226_v44, %v3086_v12 }
 0x820   :  { %v3089_v14 = vpop.xlane.xlu1 %3088 }
 0x821   :  { %v7284_v41 = vpop.eup %5697  ;;  %5707 = vpow2.f32 %v3140_v54  ;;  %v3142_v22 = vmul.f32 1.442695, %v3120_v47  ;;  %v3121_v62 = vsub.f32 %v7231_v17, %v3089_v14 }
 0x822   :  { %v3092_v0 = vpop.xlane.xlu0 %3091  ;;  %v3162_v24 = vsel %vm1143_vm2, %v7284_v41, 0.0 }
 0x823   :  { %v7289_v43 = vpop.eup %5699  ;;  %5709 = vpow2.f32 %v3142_v22  ;;  %v3144_v26 = vmul.f32 1.442695, %v3121_v62  ;;  %v3122_v48 = vsub.f32 %v7236_v20, %v3092_v0  ;;  %3163 = vadd.xlane.f32.xlu0 %v3162_v24 }
 0x824   :  { %v3095_v40 = vpop.xlane.xlu1 %3094  ;;  %v3165_v44 = vsel %vm1143_vm2, %v7289_v43, 0.0 }
 0x825   :  { %v7294_v52 = vpop.eup %5701  ;;  %5711 = vpow2.f32 %v3144_v26  ;;  %v3146_v34 = vmul.f32 1.442695, %v3122_v48  ;;  %v3123_v17 = vsub.f32 %v7241_v57, %v3095_v40  ;;  %3166 = vadd.xlane.f32.xlu1 %v3165_v44 }
 0x826   :  { %v3098_v38 = vpop.xlane.xlu0 %3097  ;;  %v3168_v18 = vsel %vm1143_vm2, %v7294_v52, 0.0 }
 0x827   :  { %v7299_v63 = vpop.eup %5703  ;;  %5713 = vpow2.f32 %v3146_v34  ;;  %v3148_v20 = vmul.f32 1.442695, %v3123_v17  ;;  %v3124_v50 = vsub.f32 %v7246_v3, %v3098_v38  ;;  %3169 = vadd.xlane.f32.xlu0 %v3168_v18 }
 0x828   :  { %v3101_v2 = vpop.xlane.xlu1 %3100  ;;  %v3171_v12 = vsel %vm1143_vm2, %v7299_v63, 0.0 }
 0x829   :  { %v7304_v54 = vpop.eup %5705  ;;  %5715 = vpow2.f32 %v3148_v20  ;;  %v3150_v57 = vmul.f32 1.442695, %v3124_v50  ;;  %v3125_v47 = vsub.f32 %v7251_v32, %v3101_v2  ;;  %3172 = vadd.xlane.f32.xlu1 %v3171_v12 }
 0x82a   :  { %v3104_v14 = vpop.xlane.xlu0 %3103  ;;  %v3174_v22 = vsel %vm1143_vm2, %v7304_v54, 0.0 }
 0x82b   :  { %v7309_v62 = vpop.eup %5707  ;;  %5717 = vpow2.f32 %v3150_v57  ;;  %v3152_v3 = vmul.f32 1.442695, %v3125_v47  ;;  %v3126_v0 = vsub.f32 %v7256_v56, %v3104_v14  ;;  %3175 = vadd.xlane.f32.xlu0 %v3174_v22 }
 0x82c   :  { %v3107_v24 = vpop.xlane.xlu1 %3106  ;;  %v3177_v26 = vsel %vm1143_vm2, %v7309_v62, 0.0 }
 0x82d   :  { %v7314_v48 = vpop.eup %5709  ;;  %5719 = vpow2.f32 %v3152_v3  ;;  %v3154_v32 = vmul.f32 1.442695, %v3126_v0  ;;  %v3127_v40 = vsub.f32 %v7261_v60, %v3107_v24  ;;  %3178 = vadd.xlane.f32.xlu1 %v3177_v26 }
 0x82e   :  { %v3110_v44 = vpop.xlane.xlu0 %3109  ;;  %v3180_v34 = vsel %vm1143_vm2, %v7314_v48, 0.0 }
 0x82f   :  { %v7319_v17 = vpop.eup %5711  ;;  %5721 = vpow2.f32 %v3154_v32  ;;  %v3156_v56 = vmul.f32 1.442695, %v3127_v40  ;;  %v3128_v38 = vsub.f32 %v7266_v42, %v3110_v44  ;;  %3181 = vadd.xlane.f32.xlu0 %v3180_v34 }
 0x830   :  { %v3113_v18 = vpop.xlane.xlu1 %3112  ;;  %v3183_v20 = vsel %vm1143_vm2, %v7319_v17, 0.0 }
 0x831   :  { %v7324_v50 = vpop.eup %5713  ;;  %5723 = vpow2.f32 %v3156_v56  ;;  %v3158_v60 = vmul.f32 1.442695, %v3128_v38  ;;  %v3129_v2 = vsub.f32 %v7271_v39, %v3113_v18  ;;  %3184 = vadd.xlane.f32.xlu1 %v3183_v20 }
 0x832   :  { %v3186_v12 = vsel %vm1143_vm2, %v7324_v50, 0.0 }
 0x833   :  { %v7329_v57 = vpop.eup %5715  ;;  %5725 = vpow2.f32 %v3158_v60  ;;  %v3160_v47 = vmul.f32 1.442695, %v3129_v2  ;;  %3187 = vadd.xlane.f32.xlu0 %v3186_v12 }
 0x834   :  { %v3189_v42 = vsel %vm1143_vm2, %v7329_v57, 0.0 }
 0x835   :  { %v7333_v14 = vpop.eup %5717  ;;  %5727 = vpow2.f32 %v3160_v47  ;;  %3190 = vadd.xlane.f32.xlu1 %v3189_v42 }
 0x836   :  { %v3192_v22 = vsel %vm1143_vm2, %v7333_v14, 0.0 }
 0x837   :  { %v7337_v39 = vpop.eup %5719  ;;  %3193 = vadd.xlane.f32.xlu0 %v3192_v22 }
 0x838   :  { %v3195_v3 = vsel %vm1143_vm2, %v7337_v39, 0.0 }
 0x839   :  { %v7341_v0 = vpop.eup %5721  ;;  %3196 = vadd.xlane.f32.xlu1 %v3195_v3 }
 0x83a   :  { %v3198_v24 = vsel %vm1143_vm2, %v7341_v0, 0.0 }
 0x83b   :  { %v7345_v26 = vpop.eup %5723  ;;  %3199 = vadd.xlane.f32.xlu0 %v3198_v24 }
 0x83c   :  { %v3201_v32 = vsel %vm1143_vm2, %v7345_v26, 0.0 }
 0x83d   :  { %v7349_v40 = vpop.eup %5725  ;;  %3202 = vadd.xlane.f32.xlu1 %v3201_v32 }
 0x83e   :  { %v3204_v44 = vsel %vm1143_vm2, %v7349_v40, 0.0 }
 0x83f   :  { %v7353_v34 = vpop.eup %5727  ;;  %3205 = vadd.xlane.f32.xlu0 %v3204_v44 }
 0x840   :  { %v3207_v56 = vsel %vm1143_vm2, %v7353_v34, 0.0 }
 0x841   :  { %3208 = vadd.xlane.f32.xlu1 %v3207_v56 }
 0x8b0   :  { %v3164_v38 = vpop.xlane.xlu0 %3163 }
 0x8b1   :  { %5729 = vrcp.f32 %v3164_v38 }
 0x8b2   :  { %v3167_v18 = vpop.xlane.xlu1 %3166 }
 0x8b3   :  { %5731 = vrcp.f32 %v3167_v18 }
 0x8b4   :  { %v3170_v20 = vpop.xlane.xlu0 %3169 }
 0x8b5   :  { %5733 = vrcp.f32 %v3170_v20 }
 0x8b6   :  { %v3173_v60 = vpop.xlane.xlu1 %3172 }
 0x8b7   :  { %5735 = vrcp.f32 %v3173_v60 }
 0x8b8   :  { %v3176_v2 = vpop.xlane.xlu0 %3175 }
 0x8b9   :  { %5737 = vrcp.f32 %v3176_v2 }
 0x8ba   :  { %v3179_v12 = vpop.xlane.xlu1 %3178 }
 0x8bb   :  { %v5730_v47 = vpop.eup %5729  ;;  %5739 = vrcp.f32 %v3179_v12 }
 0x8bc   :  { %v3182_v42 = vpop.xlane.xlu0 %3181  ;;  %v3226_v3 = vmul.f32 %v5730_v47, %v7284_v41 }
 0x8bd   :  { %v5732_v22 = vpop.eup %5731  ;;  %5741 = vrcp.f32 %v3182_v42 }
 0x8be   :  { %v3227_v24 = vmul.f32 %v5732_v22, %v7289_v43  ;;  %v3185_v32 = vpop.xlane.xlu1 %3184 }
 0x8bf   :  { %v5734_v44 = vpop.eup %5733  ;;  %5743 = vrcp.f32 %v3185_v32 }
 0x8c0   :  { %v3188_v56 = vpop.xlane.xlu0 %3187  ;;  %v3242_v38 = vpack.c.bf16 %v3227_v24, %v3226_v3  ;;  %v3228_v20 = vmul.f32 %v5734_v44, %v7294_v52 }
 0x8c1   :  { %v5736_v18 = vpop.eup %5735  ;;  %5745 = vrcp.f32 %v3188_v56 }
 0x8c2   :  { %v3229_v60 = vmul.f32 %v5736_v18, %v7299_v63  ;;  %5362 = vmatmul.mubr.msk.bf16.vlgmr.msra.gmra.mrb[96].mxu0 %vm1143_vm2, %v3242_v38  ;;  %v3191_v2 = vpop.xlane.xlu1 %3190 }
 0x8c3   :  { %v5738_v12 = vpop.eup %5737  ;;  %5372 = vmatpush3.bf16.msra.mxu0 %v6422_v7  ;;  %5747 = vrcp.f32 %v3191_v2  ;;  %5373 = vmatprep.mubr.msk.bf16.mxu0 %vm5826_vm1, %v7906_v55 }
 0x8c4   :  { %v3194_v41 = vpop.xlane.xlu0 %3193  ;;  %v3243_v43 = vpack.c.bf16 %v3229_v60, %v3228_v20  ;;  %5383 = vmatprep.subr.bf16.mxu0 %v7906_v55  ;;  %v3230_v52 = vmul.f32 %v5738_v12, %v7304_v54 }
 0x8c5   :  { %v5740_v47 = vpop.eup %5739  ;;  %5749 = vrcp.f32 %v3194_v41 }
 0x8c6   :  { %v3231_v63 = vmul.f32 %v5740_v47, %v7309_v62  ;;  %5368 = vmatmul.mubr.msk.bf16.vlgmr.msra.gmra.mrb[112].mxu1 %vm1143_vm2, %v3243_v43  ;;  %v3197_v42 = vpop.xlane.xlu1 %3196 }
 0x8c7   :  { %v5742_v22 = vpop.eup %5741  ;;  %5378 = vmatpush3.bf16.msra.mxu1 %v6418_v13  ;;  %5751 = vrcp.f32 %v3197_v42  ;;  %5379 = vmatprep.mubr.msk.bf16.mxu1 %vm5826_vm1, %v7906_v55 }
 0x8c8   :  { %v3200_v3 = vpop.xlane.xlu0 %3199  ;;  %v3244_v24 = vpack.c.bf16 %v3231_v63, %v3230_v52  ;;  %5389 = vmatprep.subr.bf16.mxu1 %v7906_v55  ;;  %v3232_v54 = vmul.f32 %v5742_v22, %v7314_v48 }
 0x8c9   :  { %v5744_v32 = vpop.eup %5743  ;;  %5753 = vrcp.f32 %v3200_v3 }
 0x8ca   :  { %v3233_v62 = vmul.f32 %v5744_v32, %v7319_v17  ;;  %5374 = vmatmul.mubr.msk.bf16.vlgmr.msra.gmra.mrb[100].mxu0 %vm1143_vm2, %v3244_v24  ;;  %v3203_v44 = vpop.xlane.xlu1 %3202 }
 0x8cb   :  { %v5746_v56 = vpop.eup %5745  ;;  %5384 = vmatpush3.bf16.msra.mxu0 %v6453_v9  ;;  %5755 = vrcp.f32 %v3203_v44  ;;  %5385 = vmatprep.mubr.msk.bf16.mxu0 %vm5826_vm1, %v7906_v55 }
 0x8cc   :  { %v3206_v38 = vpop.xlane.xlu0 %3205  ;;  %v3245_v18 = vpack.c.bf16 %v3233_v62, %v3232_v54  ;;  %5395 = vmatprep.subr.bf16.mxu0 %v7906_v55  ;;  %v3234_v48 = vmul.f32 %v5746_v56, %v7324_v50 }
 0x8cd   :  { %v5748_v20 = vpop.eup %5747  ;;  %5757 = vrcp.f32 %v3206_v38 }
 0x8ce   :  { %v3235_v17 = vmul.f32 %v5748_v20, %v7329_v57  ;;  %5380 = vmatmul.mubr.msk.bf16.vlgmr.msra.gmra.mrb[116].mxu1 %vm1143_vm2, %v3245_v18  ;;  %v3209_v60 = vpop.xlane.xlu1 %3208 }
 0x8cf   :  { %v5750_v2 = vpop.eup %5749  ;;  %5390 = vmatpush3.bf16.msra.mxu1 %v6449_v6  ;;  %5759 = vrcp.f32 %v3209_v60  ;;  %5391 = vmatprep.mubr.msk.bf16.mxu1 %vm5826_vm1, %v7906_v55 }
 0x8d0   :  { %v3246_v12 = vpack.c.bf16 %v3235_v17, %v3234_v48  ;;  %5401 = vmatprep.subr.bf16.mxu1 %v7906_v55  ;;  %v3236_v43 = vmul.f32 %v5750_v2, %v7333_v14 }
 0x8d1   :  { %v5752_v41 = vpop.eup %5751 }
 0x8d2   :  { %v3237_v50 = vmul.f32 %v5752_v41, %v7337_v39  ;;  %5386 = vmatmul.mubr.msk.bf16.vlgmr.msra.gmra.mrb[104].mxu0 %vm1143_vm2, %v3246_v12 }
 0x8d3   :  { %v5754_v57 = vpop.eup %5753  ;;  %5396 = vmatpush3.bf16.msra.mxu0 %v6476_v8  ;;  %5397 = vmatprep.mubr.msk.bf16.mxu0 %vm5826_vm1, %v7906_v55 }
 0x8d4   :  { %v3247_v47 = vpack.c.bf16 %v3237_v50, %v3236_v43  ;;  %5407 = vmatprep.subr.bf16.mxu0 %v7906_v55  ;;  %v3238_v63 = vmul.f32 %v5754_v57, %v7341_v0 }
 0x8d5   :  { %v5756_v52 = vpop.eup %5755 }
 0x8d6   :  { %v3239_v42 = vmul.f32 %v5756_v52, %v7345_v26  ;;  %5392 = vmatmul.mubr.msk.bf16.vlgmr.msra.gmra.mrb[120].mxu1 %vm1143_vm2, %v3247_v47  ;;  %v7930_v26 = vld [vmem:[#allocation2_spill] sm:$0xff] }
 0x8d7   :  { %v5758_v14 = vpop.eup %5757  ;;  %5402 = vmatpush3.bf16.msra.mxu1 %v6474_v28  ;;  %5403 = vmatprep.mubr.msk.bf16.mxu1 %vm5826_vm1, %v7906_v55 }
 0x8d8   :  { %v3248_v39 = vpack.c.bf16 %v3239_v42, %v3238_v63  ;;  %5413 = vmatprep.subr.bf16.mxu1 %v7906_v55  ;;  %v3240_v3 = vmul.f32 %v5758_v14, %v7349_v40  ;;  %v7931_v40 = vmul.bf16 %v7930_v26, %v6308_v27  ;;  %v7933_v27 = vmul.bf16 %v7930_v26, %v6348_v33 }
 0x8d9   :  { %v5760_v22 = vpop.eup %5759  ;;  %v7935_v33 = vmul.bf16 %v7930_v26, %v6259_v46  ;;  %v7937_v46 = vmul.bf16 %v7930_v26, %v6279_v37 }
 0x8da   :  { %v3241_v24 = vmul.f32 %v5760_v22, %v7353_v34  ;;  %5398 = vmatmul.mubr.msk.bf16.vlgmr.msra.gmra.mrb[108].mxu0 %vm1143_vm2, %v3248_v39 }
 0x8db   :  { %5409 = vmatprep.mubr.msk.bf16.mxu0 %vm5826_vm1, %v7906_v55 }
 0x8dc   :  { %5408 = vmatpush3.bf16.xpose.msra.mxu0 %v6325_v53  ;;  %v3249_v0 = vpack.c.bf16 %v3241_v24, %v3240_v3  ;;  %v7932_v53 = vmul.bf16 %v7930_v26, %v6306_v19  ;;  %v7934_v19 = vmul.bf16 %v7930_v26, %v6344_v25  ;;  %v7936_v25 = vmul.bf16 %v7930_v26, %v6257_v10 }
 0x8dd   :  { %5419 = vmatprep.subr.bf16.mxu0 %v7906_v55  ;;  %v7938_v10 = vmul.bf16 %v7930_v26, %v6277_v61 }
 0x8de   :  { %5404 = vmatmul.mubr.msk.bf16.vlgmr.msra.gmra.mrb[124].mxu1 %vm1143_vm2, %v3249_v0 }
 0x8df   :  { %5415 = vmatprep.mubr.msk.bf16.mxu1 %vm5826_vm1, %v7906_v55 }
 0x8e0   :  { %5414 = vmatpush3.bf16.xpose.msra.mxu1 %v6371_v23  ;;  %v7939_v23 = vld [vmem:[#allocation3_spill] sm:$0xff] }
 0x8e1   :  { %5425 = vmatprep.subr.bf16.mxu1 %v7906_v55 }
 0x8e3   :  { %5410 = vmatmul.mubr.msk.bf16.vlgmr.msra.gmra.mrb[112].mxu0 %vm61_vm0, %v7931_v40 }
 0x8e4   :  { %5420 = vmatpush3.bf16.xpose.msra.mxu0 %v6403_v5  ;;  %5421 = vmatprep.mubr.msk.bf16.mxu0 %vm5826_vm1, %v7906_v55 }
 0x8e5   :  { %5431 = vmatprep.subr.bf16.mxu0 %v7906_v55 }
 0x8e7   :  { %5416 = vmatmul.mubr.msk.bf16.vlgmr.msra.gmra.mrb[128].mxu1 %vm61_vm0, %v7932_v53 }
 0x8e8   :  { %5426 = vmatpush3.bf16.xpose.msra.mxu1 %v6436_v15  ;;  %5427 = vmatprep.mubr.msk.bf16.mxu1 %vm5826_vm1, %v7906_v55 }
 0x8e9   :  { %5437 = vmatprep.subr.bf16.mxu1 %v7906_v55 }
 0x8eb   :  { %5422 = vmatmul.mubr.msk.bf16.vlgmr.msra.gmra.mrb[116].mxu0 %vm61_vm0, %v7933_v27 }
 0x8ec   :  { %5432 = vmatpush3.bf16.xpose.msra.mxu0 %v6398_v11  ;;  %5433 = vmatprep.mubr.msk.bf16.mxu0 %vm5826_vm1, %v7906_v55 }
 0x8ed   :  { %5443 = vmatprep.subr.bf16.mxu0 %v7906_v55 }
 0x8ef   :  { %5428 = vmatmul.mubr.msk.bf16.vlgmr.msra.gmra.mrb[132].mxu1 %vm61_vm0, %v7934_v19 }
 0x8f0   :  { %5438 = vmatpush3.bf16.xpose.msra.mxu1 %v6461_v59  ;;  %5439 = vmatprep.mubr.msk.bf16.mxu1 %vm5826_vm1, %v7906_v55 }
 0x8f1   :  { %5449 = vmatprep.subr.bf16.mxu1 %v7906_v55 }
 0x8f3   :  { %5434 = vmatmul.mubr.msk.bf16.vlgmr.msra.gmra.mrb[120].mxu0 %vm61_vm0, %v7935_v33 }
 0x8f4   :  { %5444 = vmatpush3.bf16.xpose.msra.mxu0 %v6428_v45  ;;  %5445 = vmatprep.mubr.msk.bf16.mxu0 %vm5826_vm1, %v7906_v55 }
 0x8f5   :  { %5455 = vmatprep.subr.bf16.mxu0 %v7906_v55 }
 0x8f7   :  { %5440 = vmatmul.mubr.msk.bf16.vlgmr.msra.gmra.mrb[136].mxu1 %vm61_vm0, %v7936_v25 }
 0x8f8   :  { %5450 = vmatpush3.bf16.xpose.msra.mxu1 %v6482_v30  ;;  %5451 = vmatprep.mubr.msk.bf16.mxu1 %vm5826_vm1, %v7906_v55 }
 0x8f9   :  { %5461 = vmatprep.subr.bf16.mxu1 %v7906_v55 }
 0x8fb   :  { %5446 = vmatmul.mubr.msk.bf16.vlgmr.msra.gmra.mrb[124].mxu0 %vm61_vm0, %v7937_v46 }
 0x8fc   :  { %5456 = vmatpush3.bf16.msra.mxu0 %v6393_v4  ;;  %5457 = vmatprep.mubr.msk.bf16.mxu0 %vm5826_vm1, %v7906_v55 }
 0x8fd   :  { %5467 = vmatprep.subr.bf16.mxu0 %v7906_v55 }
 0x8ff   :  { %5452 = vmatmul.mubr.msk.bf16.vlgmr.msra.gmra.mrb[140].mxu1 %vm61_vm0, %v7938_v10  ;;  %v7943_v10 = vld [vmem:[#allocation8_spill] sm:$0xff] }
 0x900   :  { %5462 = vmatpush3.bf16.msra.mxu1 %v6391_v35  ;;  %5463 = vmatprep.mubr.msk.bf16.mxu1 %vm5826_vm1, %v7906_v55 }
 0x901   :  { %5473 = vmatprep.subr.bf16.mxu1 %v7906_v55 }
 0x995   :  { %v3287_v37 = vpop.f32.mrb[96].mxu0 }
 0x996   :  { %v3607_v4 = vmul.f32 %v7939_v23, %v3287_v37  ;;  %v5363_v11 = vpop.f32.mrb[97].mxu0 }
 0x997   :  { %v3290_v5 = vpop.f32.mrb[98].mxu0 }
 0x998   :  { %v7479_v45 = vadd.f32 %v3607_v4, %v7125_v31  ;;  %v3608_v15 = vmul.f32 %v7939_v23, %v3290_v5  ;;  %v5364_v61 = vpop.f32.mrb[99].mxu0 }
 0x999   :  { %v3331_v59 = vpop.f32.mrb[112].mxu1 }
 0x99a   :  { %v7483_v30 = vadd.f32 %v3608_v15, %v7129_v51  ;;  %v3609_v35 = vmul.f32 %v7939_v23, %v3331_v59  ;;  %v5369_v34 = vpop.f32.mrb[113].mxu1  ;;  %v7944_v15 = vld [vmem:[#allocation9_spill] sm:$0xff] }
 0x99b   :  { %v3334_v32 = vpop.f32.mrb[114].mxu1 }
 0x99c   :  { %v7487_v54 = vadd.f32 %v3609_v35, %v7133_v29  ;;  %v3610_v62 = vmul.f32 %v7939_v23, %v3334_v32  ;;  %v5370_v44 = vpop.f32.mrb[115].mxu1  ;;  %v7945_v32 = vld [vmem:[#allocation10_spill] sm:$0xff] }
 0x99d   :  { %v3375_v56 = vpop.f32.mrb[100].mxu0 }
 0x99e   :  { %v7491_v31 = vadd.f32 %v3610_v62, %v7137_v49  ;;  %v3611_v38 = vmul.f32 %v7939_v23, %v3375_v56  ;;  %v5375_v18 = vpop.f32.mrb[101].mxu0 }
 0x99f   :  { %v3378_v20 = vpop.f32.mrb[102].mxu0  ;;  %v7946_v18 = vld [vmem:[#allocation11_spill] sm:$0xff] }
 0x9a0   :  { %v7495_v51 = vadd.f32 %v3611_v38, %v7141_v36  ;;  %v3612_v48 = vmul.f32 %v7939_v23, %v3378_v20  ;;  %v5376_v17 = vpop.f32.mrb[103].mxu0  ;;  %v7541_v38 = vld [vmem:[%s7880_s10 + $0x30] sm:$0xff] }
 0x9a1   :  { %v3419_v60 = vpop.f32.mrb[116].mxu1  ;;  %v7549_v17 = vld [vmem:[%s7880_s10 + $0x38] sm:$0xff] }
 0x9a2   :  { %v7499_v29 = vadd.f32 %v3612_v48, %v7145_v1  ;;  %v3613_v2 = vmul.f32 %v7939_v23, %v3419_v60  ;;  %v5381_v12 = vpop.f32.mrb[117].mxu1 }
 0x9a3   :  { %v3422_v41 = vpop.f32.mrb[118].mxu1 }
 0x9a4   :  { %v7503_v49 = vadd.f32 %v3613_v2, %v7149_v21  ;;  %v3614_v43 = vmul.f32 %v7939_v23, %v3422_v41  ;;  %v5382_v50 = vpop.f32.mrb[119].mxu1  ;;  %v7940_v21 = vld [vmem:[#allocation5_spill] sm:$0xff] }
 0x9a5   :  { %v3463_v57 = vpop.f32.mrb[104].mxu0 }
 0x9a6   :  { %v7507_v36 = vadd.f32 %v3614_v43, %v7153_v16  ;;  %v3615_v47 = vmul.f32 %v7939_v23, %v3463_v57  ;;  %v5387_v52 = vpop.f32.mrb[105].mxu0  ;;  %v7941_v16 = vld [vmem:[#allocation6_spill] sm:$0xff] }
 0x9a7   :  { %v3466_v63 = vpop.f32.mrb[106].mxu0 }
 0x9a8   :  { %v7511_v1 = vadd.f32 %v3615_v47, %v7157_v58  ;;  %v3616_v42 = vmul.f32 %v7939_v23, %v3466_v63  ;;  %v5388_v14 = vpop.f32.mrb[107].mxu0  ;;  %v7942_v58 = vld [vmem:[#allocation7_spill] sm:$0xff] }
 0x9a9   :  { %v3507_v39 = vpop.f32.mrb[120].mxu1 }
 0x9aa   :  { %v7515_v22 = vadd.f32 %v3616_v42, %v7940_v21  ;;  %v3617_v3 = vmul.f32 %v7939_v23, %v3507_v39  ;;  %v5393_v24 = vpop.f32.mrb[121].mxu1 }
 0x9ab   :  { %v3510_v0 = vpop.f32.mrb[122].mxu1 }
 0x9ac   :  { %v7519_v26 = vadd.f32 %v3617_v3, %v7941_v16  ;;  %v3618_v40 = vmul.f32 %v7939_v23, %v3510_v0  ;;  %v5394_v53 = vpop.f32.mrb[123].mxu1 }
 0x9ad   :  { %v3551_v27 = vpop.f32.mrb[108].mxu0 }
 0x9ae   :  { %v7523_v19 = vadd.f32 %v3618_v40, %v7942_v58  ;;  %v3619_v33 = vmul.f32 %v7939_v23, %v3551_v27  ;;  %v5399_v25 = vpop.f32.mrb[109].mxu0 }
 0x9af   :  { %v3554_v46 = vpop.f32.mrb[110].mxu0 }
 0x9b0   :  { %v7527_v37 = vadd.f32 %v3619_v33, %v7943_v10  ;;  %v3620_v4 = vmul.f32 %v7939_v23, %v3554_v46  ;;  %v5400_v11 = vpop.f32.mrb[111].mxu0 }
 0x9b1   :  { %v3595_v5 = vpop.f32.mrb[124].mxu1 }
 0x9b2   :  { %v7531_v61 = vadd.f32 %v3620_v4, %v7944_v15  ;;  %v3621_v59 = vmul.f32 %v7939_v23, %v3595_v5  ;;  %v5405_v35 = vpop.f32.mrb[125].mxu1 }
 0x9b3   :  { %v3598_v34 = vpop.f32.mrb[126].mxu1 }
 0x9b4   :  { %v7535_v62 = vadd.f32 %v3621_v59, %v7945_v32  ;;  %v3622_v44 = vmul.f32 %v7939_v23, %v3598_v34  ;;  %v5406_v56 = vpop.f32.mrb[127].mxu1 }
 0x9b6   :  { %v7544_v20 = vadd.f32 %v3622_v44, %v7946_v18  ;;  %v3693_v48 = vpop.f32.mrb[112].mxu0 }
 0x9b7   :  { %v7552_v60 = vadd.f32 %v7541_v38, %v3693_v48  ;;  %v5411_v2 = vpop.f32.mrb[113].mxu0 }
 0x9b8   :  { %v3696_v23 = vpop.f32.mrb[114].mxu0 }
 0x9b9   :  { %v7555_v12 = vadd.f32 %v7549_v17, %v3696_v23  ;;  %v5412_v41 = vpop.f32.mrb[115].mxu0  ;;  %v4027_v43 = vsel %vm1143_vm2, %v7552_v60, -inf }
 0x9ba   :  { %4028 = vmax.xlane.f32.xlu0 %v4027_v43  ;;  %v3737_v50 = vpop.f32.mrb[128].mxu1 }
 0x9bb   :  { %v7560_v57 = vadd.f32 %v7541_v38, %v3737_v50  ;;  %v5417_v47 = vpop.f32.mrb[129].mxu1  ;;  %v4030_v52 = vsel %vm1143_vm2, %v7555_v12, -inf }
 0x9bc   :  { %4031 = vmax.xlane.f32.xlu1 %v4030_v52  ;;  %v3740_v63 = vpop.f32.mrb[130].mxu1 }
 0x9bd   :  { %v7565_v42 = vadd.f32 %v7549_v17, %v3740_v63  ;;  %v5418_v14 = vpop.f32.mrb[131].mxu1  ;;  %v4033_v39 = vsel %vm1143_vm2, %v7560_v57, -inf }
 0x9be   :  { %v3781_v21 = vpop.f32.mrb[116].mxu0  ;;  %4034 = vmax.xlane.f32.xlu0 %v4033_v39 }
 0x9bf   :  { %v7570_v3 = vadd.f32 %v7541_v38, %v3781_v21  ;;  %v5423_v24 = vpop.f32.mrb[117].mxu0  ;;  %v4036_v0 = vsel %vm1143_vm2, %v7565_v42, -inf }
 0x9c0   :  { %v3784_v16 = vpop.f32.mrb[118].mxu0  ;;  %4037 = vmax.xlane.f32.xlu1 %v4036_v0 }
 0x9c1   :  { %v7575_v40 = vadd.f32 %v7549_v17, %v3784_v16  ;;  %v5424_v53 = vpop.f32.mrb[119].mxu0  ;;  %v4039_v27 = vsel %vm1143_vm2, %v7570_v3, -inf }
 0x9c2   :  { %4040 = vmax.xlane.f32.xlu0 %v4039_v27  ;;  %v3825_v58 = vpop.f32.mrb[132].mxu1 }
 0x9c3   :  { %v7580_v33 = vadd.f32 %v7541_v38, %v3825_v58  ;;  %v5429_v25 = vpop.f32.mrb[133].mxu1  ;;  %v4042_v46 = vsel %vm1143_vm2, %v7575_v40, -inf }
 0x9c4   :  { %4043 = vmax.xlane.f32.xlu1 %v4042_v46  ;;  %v3828_v10 = vpop.f32.mrb[134].mxu1 }
 0x9c5   :  { %v7585_v4 = vadd.f32 %v7549_v17, %v3828_v10  ;;  %v5430_v11 = vpop.f32.mrb[135].mxu1  ;;  %v4045_v5 = vsel %vm1143_vm2, %v7580_v33, -inf }
 0x9c6   :  { %v3869_v15 = vpop.f32.mrb[120].mxu0  ;;  %4046 = vmax.xlane.f32.xlu0 %v4045_v5 }
 0x9c7   :  { %v7590_v59 = vadd.f32 %v7541_v38, %v3869_v15  ;;  %v5435_v35 = vpop.f32.mrb[121].mxu0  ;;  %v4048_v34 = vsel %vm1143_vm2, %v7585_v4, -inf }
 0x9c8   :  { %v3872_v32 = vpop.f32.mrb[122].mxu0  ;;  %4049 = vmax.xlane.f32.xlu1 %v4048_v34 }
 0x9c9   :  { %v7595_v44 = vadd.f32 %v7549_v17, %v3872_v32  ;;  %v5436_v56 = vpop.f32.mrb[123].mxu0  ;;  %v4051_v18 = vsel %vm1143_vm2, %v7590_v59, -inf }
 0x9ca   :  { %4052 = vmax.xlane.f32.xlu0 %v4051_v18  ;;  %v3913_v48 = vpop.f32.mrb[136].mxu1 }
 0x9cb   :  { %v7600_v2 = vadd.f32 %v7541_v38, %v3913_v48  ;;  %v5441_v23 = vpop.f32.mrb[137].mxu1  ;;  %v4054_v41 = vsel %vm1143_vm2, %v7595_v44, -inf }
 0x9cc   :  { %4055 = vmax.xlane.f32.xlu1 %v4054_v41  ;;  %v3916_v43 = vpop.f32.mrb[138].mxu1 }
 0x9cd   :  { %v7605_v50 = vadd.f32 %v7549_v17, %v3916_v43  ;;  %v5442_v47 = vpop.f32.mrb[139].mxu1  ;;  %v4057_v52 = vsel %vm1143_vm2, %v7600_v2, -inf }
 0x9ce   :  { %v3957_v63 = vpop.f32.mrb[124].mxu0  ;;  %4058 = vmax.xlane.f32.xlu0 %v4057_v52 }
 0x9cf   :  { %v7610_v14 = vadd.f32 %v7541_v38, %v3957_v63  ;;  %v5447_v39 = vpop.f32.mrb[125].mxu0  ;;  %v4060_v21 = vsel %vm1143_vm2, %v7605_v50, -inf }
 0x9d0   :  { %v3960_v24 = vpop.f32.mrb[126].mxu0  ;;  %4061 = vmax.xlane.f32.xlu1 %v4060_v21 }
 0x9d1   :  { %v7615_v0 = vadd.f32 %v7549_v17, %v3960_v24  ;;  %v5448_v16 = vpop.f32.mrb[127].mxu0  ;;  %v4063_v53 = vsel %vm1143_vm2, %v7610_v14, -inf }
 0x9d2   :  { %4064 = vmax.xlane.f32.xlu0 %v4063_v53  ;;  %v4001_v27 = vpop.f32.mrb[140].mxu1 }
 0x9d3   :  { %v7620_v58 = vadd.f32 %v7541_v38, %v4001_v27  ;;  %v5453_v25 = vpop.f32.mrb[141].mxu1  ;;  %v4066_v46 = vsel %vm1143_vm2, %v7615_v0, -inf }
 0x9d4   :  { %4067 = vmax.xlane.f32.xlu1 %v4066_v46  ;;  %v4004_v10 = vpop.f32.mrb[142].mxu1 }
 0x9d5   :  { %v7625_v11 = vadd.f32 %v7549_v17, %v4004_v10  ;;  %v5454_v5 = vpop.f32.mrb[143].mxu1  ;;  %v4069_v15 = vsel %vm1143_vm2, %v7620_v58, -inf }
 0x9d6   :  { %4070 = vmax.xlane.f32.xlu0 %v4069_v15 }
 0x9d7   :  { %v4072_v35 = vsel %vm1143_vm2, %v7625_v11, -inf }
 0x9d8   :  { %4073 = vmax.xlane.f32.xlu1 %v4072_v35 }
 0xa47   :  { %v4029_v38 = vpop.xlane.xlu0 %4028 }
 0xa48   :  { %v4075_v34 = vsub.f32 %v7552_v60, %v4029_v38 }
 0xa49   :  { %v4032_v32 = vpop.xlane.xlu1 %4031 }
 0xa4a   :  { %v4091_v56 = vmul.f32 1.442695, %v4075_v34  ;;  %v4076_v18 = vsub.f32 %v7555_v12, %v4032_v32 }
 0xa4b   :  { %v4035_v48 = vpop.xlane.xlu0 %4034 }
 0xa4c   :  { %5761 = vpow2.f32 %v4091_v56  ;;  %v4093_v17 = vmul.f32 1.442695, %v4076_v18  ;;  %v4077_v23 = vsub.f32 %v7560_v57, %v4035_v48 }
 0xa4d   :  { %v4038_v41 = vpop.xlane.xlu1 %4037 }
 0xa4e   :  { %5763 = vpow2.f32 %v4093_v17  ;;  %v4095_v43 = vmul.f32 1.442695, %v4077_v23  ;;  %v4078_v47 = vsub.f32 %v7565_v42, %v4038_v41 }
 0xa4f   :  { %v4041_v52 = vpop.xlane.xlu0 %4040 }
 0xa50   :  { %5765 = vpow2.f32 %v4095_v43  ;;  %v4097_v63 = vmul.f32 1.442695, %v4078_v47  ;;  %v4079_v39 = vsub.f32 %v7570_v3, %v4041_v52 }
 0xa51   :  { %v4044_v60 = vpop.xlane.xlu1 %4043 }
 0xa52   :  { %5767 = vpow2.f32 %v4097_v63  ;;  %v4099_v21 = vmul.f32 1.442695, %v4079_v39  ;;  %v4080_v12 = vsub.f32 %v7575_v40, %v4044_v60 }
 0xa53   :  { %v4047_v24 = vpop.xlane.xlu0 %4046 }
 0xa54   :  { %5769 = vpow2.f32 %v4099_v21  ;;  %v4101_v16 = vmul.f32 1.442695, %v4080_v12  ;;  %v4081_v57 = vsub.f32 %v7580_v33, %v4047_v24 }
 0xa55   :  { %v4050_v53 = vpop.xlane.xlu1 %4049 }
 0xa56   :  { %v7638_v27 = vpop.eup %5761  ;;  %5771 = vpow2.f32 %v4101_v16  ;;  %v4103_v42 = vmul.f32 1.442695, %v4081_v57  ;;  %v4082_v25 = vsub.f32 %v7585_v4, %v4050_v53 }
 0xa57   :  { %v4053_v46 = vpop.xlane.xlu0 %4052  ;;  %v4123_v3 = vsel %vm1143_vm2, %v7638_v27, 0.0 }
 0xa58   :  { %v7643_v10 = vpop.eup %5763  ;;  %5773 = vpow2.f32 %v4103_v42  ;;  %v4105_v40 = vmul.f32 1.442695, %v4082_v25  ;;  %v4083_v5 = vsub.f32 %v7590_v59, %v4053_v46  ;;  %4124 = vadd.xlane.f32.xlu0 %v4123_v3 }
 0xa59   :  { %v4056_v15 = vpop.xlane.xlu1 %4055  ;;  %v4126_v33 = vsel %vm1143_vm2, %v7643_v10, 0.0 }
 0xa5a   :  { %v7648_v35 = vpop.eup %5765  ;;  %5775 = vpow2.f32 %v4105_v40  ;;  %v4107_v38 = vmul.f32 1.442695, %v4083_v5  ;;  %v4084_v4 = vsub.f32 %v7595_v44, %v4056_v15  ;;  %4127 = vadd.xlane.f32.xlu1 %v4126_v33 }
 0xa5b   :  { %v4059_v34 = vpop.xlane.xlu0 %4058  ;;  %v4129_v32 = vsel %vm1143_vm2, %v7648_v35, 0.0 }
 0xa5c   :  { %v7653_v56 = vpop.eup %5767  ;;  %5777 = vpow2.f32 %v4107_v38  ;;  %v4109_v59 = vmul.f32 1.442695, %v4084_v4  ;;  %v4085_v18 = vsub.f32 %v7600_v2, %v4059_v34  ;;  %4130 = vadd.xlane.f32.xlu0 %v4129_v32 }
 0xa5d   :  { %v4062_v48 = vpop.xlane.xlu1 %4061  ;;  %v4132_v17 = vsel %vm1143_vm2, %v7653_v56, 0.0 }
 0xa5e   :  { %v7658_v23 = vpop.eup %5769  ;;  %5779 = vpow2.f32 %v4109_v59  ;;  %v4111_v44 = vmul.f32 1.442695, %v4085_v18  ;;  %v4086_v41 = vsub.f32 %v7605_v50, %v4062_v48  ;;  %4133 = vadd.xlane.f32.xlu1 %v4132_v17 }
 0xa5f   :  { %v4065_v43 = vpop.xlane.xlu0 %4064  ;;  %v4135_v47 = vsel %vm1143_vm2, %v7658_v23, 0.0 }
 0xa60   :  { %v7663_v52 = vpop.eup %5771  ;;  %5781 = vpow2.f32 %v4111_v44  ;;  %v4113_v2 = vmul.f32 1.442695, %v4086_v41  ;;  %v4087_v63 = vsub.f32 %v7610_v14, %v4065_v43  ;;  %4136 = vadd.xlane.f32.xlu0 %v4135_v47 }
 0xa61   :  { %v4068_v39 = vpop.xlane.xlu1 %4067  ;;  %v4138_v60 = vsel %vm1143_vm2, %v7663_v52, 0.0 }
 0xa62   :  { %v7668_v21 = vpop.eup %5773  ;;  %5783 = vpow2.f32 %v4113_v2  ;;  %v4115_v50 = vmul.f32 1.442695, %v4087_v63  ;;  %v4088_v12 = vsub.f32 %v7615_v0, %v4068_v39  ;;  %4139 = vadd.xlane.f32.xlu1 %v4138_v60 }
 0xa63   :  { %v4071_v24 = vpop.xlane.xlu0 %4070  ;;  %v4141_v16 = vsel %vm1143_vm2, %v7668_v21, 0.0 }
 0xa64   :  { %v7673_v57 = vpop.eup %5775  ;;  %5785 = vpow2.f32 %v4115_v50  ;;  %v4117_v14 = vmul.f32 1.442695, %v4088_v12  ;;  %v4089_v53 = vsub.f32 %v7620_v58, %v4071_v24  ;;  %4142 = vadd.xlane.f32.xlu0 %v4141_v16 }
 0xa65   :  { %v4074_v42 = vpop.xlane.xlu1 %4073  ;;  %v4144_v25 = vsel %vm1143_vm2, %v7673_v57, 0.0 }
 0xa66   :  { %v7678_v46 = vpop.eup %5777  ;;  %5787 = vpow2.f32 %v4117_v14  ;;  %v4119_v0 = vmul.f32 1.442695, %v4089_v53  ;;  %v4090_v3 = vsub.f32 %v7625_v11, %v4074_v42  ;;  %4145 = vadd.xlane.f32.xlu1 %v4144_v25 }
 0xa67   :  { %v4147_v40 = vsel %vm1143_vm2, %v7678_v46, 0.0 }
 0xa68   :  { %v7683_v5 = vpop.eup %5779  ;;  %5789 = vpow2.f32 %v4119_v0  ;;  %v4121_v15 = vmul.f32 1.442695, %v4090_v3  ;;  %4148 = vadd.xlane.f32.xlu0 %v4147_v40 }
 0xa69   :  { %v4150_v58 = vsel %vm1143_vm2, %v7683_v5, 0.0 }
 0xa6a   :  { %v7687_v33 = vpop.eup %5781  ;;  %5791 = vpow2.f32 %v4121_v15  ;;  %4151 = vadd.xlane.f32.xlu1 %v4150_v58 }
 0xa6b   :  { %v4153_v38 = vsel %vm1143_vm2, %v7687_v33, 0.0 }
 0xa6c   :  { %v7691_v11 = vpop.eup %5783  ;;  %4154 = vadd.xlane.f32.xlu0 %v4153_v38 }
 0xa6d   :  { %v4156_v4 = vsel %vm1143_vm2, %v7691_v11, 0.0 }
 0xa6e   :  { %v7695_v34 = vpop.eup %5785  ;;  %4157 = vadd.xlane.f32.xlu1 %v4156_v4 }
 0xa6f   :  { %v4159_v32 = vsel %vm1143_vm2, %v7695_v34, 0.0 }
 0xa70   :  { %v7699_v59 = vpop.eup %5787  ;;  %4160 = vadd.xlane.f32.xlu0 %v4159_v32 }
 0xa71   :  { %v4162_v18 = vsel %vm1143_vm2, %v7699_v59, 0.0 }
 0xa72   :  { %v7703_v48 = vpop.eup %5789  ;;  %4163 = vadd.xlane.f32.xlu1 %v4162_v18 }
 0xa73   :  { %v4165_v17 = vsel %vm1143_vm2, %v7703_v48, 0.0 }
 0xa74   :  { %v7707_v44 = vpop.eup %5791  ;;  %4166 = vadd.xlane.f32.xlu0 %v4165_v17 }
 0xa75   :  { %v4168_v41 = vsel %vm1143_vm2, %v7707_v44, 0.0 }
 0xa76   :  { %4169 = vadd.xlane.f32.xlu1 %v4168_v41 }
 0xae5   :  { %v4125_v43 = vpop.xlane.xlu0 %4124 }
 0xae6   :  { %5793 = vrcp.f32 %v4125_v43 }
 0xae7   :  { %v4128_v47 = vpop.xlane.xlu1 %4127 }
 0xae8   :  { %5795 = vrcp.f32 %v4128_v47 }
 0xae9   :  { %v4131_v2 = vpop.xlane.xlu0 %4130 }
 0xaea   :  { %5797 = vrcp.f32 %v4131_v2 }
 0xaeb   :  { %v4134_v63 = vpop.xlane.xlu1 %4133 }
 0xaec   :  { %5799 = vrcp.f32 %v4134_v63 }
 0xaed   :  { %v4137_v39 = vpop.xlane.xlu0 %4136 }
 0xaee   :  { %5801 = vrcp.f32 %v4137_v39 }
 0xaef   :  { %v4140_v60 = vpop.xlane.xlu1 %4139 }
 0xaf0   :  { %v5794_v50 = vpop.eup %5793  ;;  %5803 = vrcp.f32 %v4140_v60 }
 0xaf1   :  { %v4143_v12 = vpop.xlane.xlu0 %4142  ;;  %v4187_v16 = vmul.f32 %v5794_v50, %v7638_v27 }
 0xaf2   :  { %v5796_v24 = vpop.eup %5795  ;;  %5805 = vrcp.f32 %v4143_v12 }
 0xaf3   :  { %v4188_v14 = vmul.f32 %v5796_v24, %v7643_v10  ;;  %v4146_v53 = vpop.xlane.xlu1 %4145 }
 0xaf4   :  { %v5798_v42 = vpop.eup %5797  ;;  %5807 = vrcp.f32 %v4146_v53 }
 0xaf5   :  { %v4149_v25 = vpop.xlane.xlu0 %4148  ;;  %v4203_v0 = vpack.c.bf16 %v4188_v14, %v4187_v16  ;;  %v4189_v40 = vmul.f32 %v5798_v42, %v7648_v35 }
 0xaf6   :  { %v5800_v3 = vpop.eup %5799  ;;  %5809 = vrcp.f32 %v4149_v25 }
 0xaf7   :  { %v4190_v15 = vmul.f32 %v5800_v3, %v7653_v56  ;;  %5458 = vmatmul.mubr.msk.bf16.vlgmr.msra.gmra.mrb[128].mxu0 %vm1143_vm2, %v4203_v0  ;;  %v4152_v58 = vpop.xlane.xlu1 %4151 }
 0xaf8   :  { %v5802_v38 = vpop.eup %5801  ;;  %5468 = vmatpush3.bf16.msra.mxu0 %v6422_v7  ;;  %5811 = vrcp.f32 %v4152_v58  ;;  %5469 = vmatprep.mubr.msk.bf16.mxu0 %vm5826_vm1, %v7906_v55 }
 0xaf9   :  { %v4155_v27 = vpop.xlane.xlu0 %4154  ;;  %v4204_v10 = vpack.c.bf16 %v4190_v15, %v4189_v40  ;;  %5479 = vmatprep.subr.bf16.mxu0 %v7906_v55  ;;  %v4191_v35 = vmul.f32 %v5802_v38, %v7658_v23 }
 0xafa   :  { %v5804_v4 = vpop.eup %5803  ;;  %5813 = vrcp.f32 %v4155_v27 }
 0xafb   :  { %v4192_v56 = vmul.f32 %v5804_v4, %v7663_v52  ;;  %5464 = vmatmul.mubr.msk.bf16.vlgmr.msra.gmra.mrb[144].mxu1 %vm1143_vm2, %v4204_v10  ;;  %v4158_v32 = vpop.xlane.xlu1 %4157 }
 0xafc   :  { %v5806_v18 = vpop.eup %5805  ;;  %5474 = vmatpush3.bf16.msra.mxu1 %v6418_v13  ;;  %5815 = vrcp.f32 %v4158_v32  ;;  %5475 = vmatprep.mubr.msk.bf16.mxu1 %vm5826_vm1, %v7906_v55 }
 0xafd   :  { %v4161_v7 = vpop.xlane.xlu0 %4160  ;;  %v4205_v17 = vpack.c.bf16 %v4192_v56, %v4191_v35  ;;  %5485 = vmatprep.subr.bf16.mxu1 %v7906_v55  ;;  %v4193_v23 = vmul.f32 %v5806_v18, %v7668_v21 }
 0xafe   :  { %v5808_v41 = vpop.eup %5807  ;;  %5817 = vrcp.f32 %v4161_v7 }
 0xaff   :  { %v4194_v52 = vmul.f32 %v5808_v41, %v7673_v57  ;;  %5470 = vmatmul.mubr.msk.bf16.vlgmr.msra.gmra.mrb[132].mxu0 %vm1143_vm2, %v4205_v17  ;;  %v4164_v43 = vpop.xlane.xlu1 %4163 }
 0xb00   :  { %v5810_v47 = vpop.eup %5809  ;;  %5480 = vmatpush3.bf16.msra.mxu0 %v6453_v9  ;;  %5819 = vrcp.f32 %v4164_v43  ;;  %5481 = vmatprep.mubr.msk.bf16.mxu0 %vm5826_vm1, %v7906_v55 }
 0xb01   :  { %v4167_v13 = vpop.xlane.xlu0 %4166  ;;  %v4206_v2 = vpack.c.bf16 %v4194_v52, %v4193_v23  ;;  %5491 = vmatprep.subr.bf16.mxu0 %v7906_v55  ;;  %v4195_v21 = vmul.f32 %v5810_v47, %v7678_v46 }
 0xb02   :  { %v5812_v63 = vpop.eup %5811  ;;  %5821 = vrcp.f32 %v4167_v13 }
 0xb03   :  { %v4196_v57 = vmul.f32 %v5812_v63, %v7683_v5  ;;  %5476 = vmatmul.mubr.msk.bf16.vlgmr.msra.gmra.mrb[148].mxu1 %vm1143_vm2, %v4206_v2  ;;  %v4170_v39 = vpop.xlane.xlu1 %4169 }
 0xb04   :  { %v5814_v60 = vpop.eup %5813  ;;  %5486 = vmatpush3.bf16.msra.mxu1 %v6449_v6  ;;  %5823 = vrcp.f32 %v4170_v39  ;;  %5487 = vmatprep.mubr.msk.bf16.mxu1 %vm5826_vm1, %v7906_v55 }
 0xb05   :  { %v4207_v9 = vpack.c.bf16 %v4196_v57, %v4195_v21  ;;  %5497 = vmatprep.subr.bf16.mxu1 %v7906_v55  ;;  %v4197_v12 = vmul.f32 %v5814_v60, %v7687_v33 }
 0xb06   :  { %v5816_v50 = vpop.eup %5815 }
 0xb07   :  { %v4198_v46 = vmul.f32 %v5816_v50, %v7691_v11  ;;  %5482 = vmatmul.mubr.msk.bf16.vlgmr.msra.gmra.mrb[136].mxu0 %vm1143_vm2, %v4207_v9 }
 0xb08   :  { %v5818_v5 = vpop.eup %5817  ;;  %5492 = vmatpush3.bf16.msra.mxu0 %v6476_v8  ;;  %5493 = vmatprep.mubr.msk.bf16.mxu0 %vm5826_vm1, %v7906_v55 }
 0xb09   :  { %v4208_v6 = vpack.c.bf16 %v4198_v46, %v4197_v12  ;;  %v4199_v16 = vmul.f32 %v5818_v5, %v7695_v34  ;;  %v5535_v34 = vld [vmem:[%s7881_s11] sm:$0xff]  }
 0xb0a   :  { %v5820_v24 = vpop.eup %5819  ;;  %5503 = vmatprep.subr.bf16.mxu0 %v5535_v34 }
 0xb0b   :  { %v4200_v14 = vmul.f32 %v5820_v24, %v7699_v59  ;;  %5488 = vmatmul.mubr.msk.bf16.vlgmr.msra.gmra.mrb[152].mxu1 %vm1143_vm2, %v4208_v6  ;;  %v7947_v59 = vld [vmem:[#allocation4_spill] sm:$0xff] }
 0xb0c   :  { %v5822_v53 = vpop.eup %5821  ;;  %5498 = vmatpush3.bf16.msra.mxu1 %v6474_v28  ;;  %5499 = vmatprep.mubr.msk.bf16.mxu1 %vm5826_vm1, %v7906_v55  ;;  %v5536_v28 = vld [vmem:[%s7881_s11 + $0x8] sm:$0xff]  }
 0xb0d   :  { %v4209_v33 = vpack.c.bf16 %v4200_v14, %v4199_v16  ;;  %v4201_v8 = vmul.f32 %v5822_v53, %v7703_v48 }
 0xb0e   :  { %v5824_v11 = vpop.eup %5823 }
 0xb0f   :  { %v4202_v42 = vmul.f32 %v5824_v11, %v7707_v44  ;;  %5494 = vmatmul.mubr.msk.bf16.vlgmr.msra.gmra.mrb[140].mxu0 %vm1143_vm2, %v4209_v33 }
 0xb10   :  { %5504 = vmatpush3.bf16.msra.mxu0 %v5535_v34 }
 0xb11   :  { %v4210_v25 = vpack.c.bf16 %v4202_v42, %v4201_v8  ;;  %5505 = vmatprep.subr.bf16.mxu0 %v5536_v28 }
 0xb13   :  { %5500 = vmatmul.mubr.msk.bf16.vlgmr.msra.gmra.mrb[156].mxu1 %vm1143_vm2, %v4210_v25 }
 0xb14   :  { %5506 = vmatpush3.bf16.msra.mxu0 %v5536_v28 }
 0xbca   :  { %v4248_v55 = vpop.f32.mrb[128].mxu0 }
 0xbcb   :  { %v4568_v48 = vmul.f32 %v7947_v59, %v4248_v55  ;;  %v5459_v44 = vpop.f32.mrb[129].mxu0 }
 0xbcc   :  { %v4251_v0 = vpop.f32.mrb[130].mxu0 }
 0xbcd   :  { %v4584_v3 = vadd.f32 %v4568_v48, %v7479_v45  ;;  %v4569_v40 = vmul.f32 %v7947_v59, %v4251_v0  ;;  %v5460_v15 = vpop.f32.mrb[131].mxu0 }
 0xbce   :  { %v4292_v58 = vpop.f32.mrb[144].mxu1 }
 0xbcf   :  { %v4585_v38 = vadd.f32 %v4569_v40, %v7483_v30  ;;  %v4570_v27 = vmul.f32 %v7947_v59, %v4292_v58  ;;  %v5465_v10 = vpop.f32.mrb[145].mxu1 }
 0xbd0   :  { %v4295_v4 = vpop.f32.mrb[146].mxu1 }
 0xbd1   :  { %v4600_v35 = vpack.c.bf16 %v4585_v38, %v4584_v3  ;;  %v4586_v56 = vadd.f32 %v4570_v27, %v7487_v54  ;;  %v4571_v32 = vmul.f32 %v7947_v59, %v4295_v4  ;;  %v5466_v18 = vpop.f32.mrb[147].mxu1 }
 0xbd2   :  { %v4336_v7 = vpop.f32.mrb[132].mxu0 }
 0xbd3   :  { %v4587_v17 = vadd.f32 %v4571_v32, %v7491_v31  ;;  %v4572_v45 = vmul.f32 %v7947_v59, %v4336_v7  ;;  %v5471_v41 = vpop.f32.mrb[133].mxu0  ;;  %5507 = vmatprep.mubr.msk.bf16.mxu0 %vm61_vm0, %v4600_v35 }
 0xbd4   :  { %v4339_v23 = vpop.f32.mrb[134].mxu0 }
 0xbd5   :  { %v4601_v30 = vpack.c.bf16 %v4587_v17, %v4586_v56  ;;  %v4588_v52 = vadd.f32 %v4572_v45, %v7495_v51  ;;  %v4573_v43 = vmul.f32 %v7947_v59, %v4339_v23  ;;  %v5472_v47 = vpop.f32.mrb[135].mxu0 }
 0xbd6   :  { %v4380_v13 = vpop.f32.mrb[148].mxu1 }
 0xbd7   :  { %v4589_v54 = vadd.f32 %v4573_v43, %v7499_v29  ;;  %v4574_v2 = vmul.f32 %v7947_v59, %v4380_v13  ;;  %v5477_v63 = vpop.f32.mrb[149].mxu1  ;;  %5508 = vmatmul.mubr.msk.bf16.vlgmr.msra.gmra.mrb[144].mxu0 %vm61_vm0, %v4601_v30 }
 0xbd8   :  { %v4383_v31 = vpop.f32.mrb[150].mxu1 }
 0xbd9   :  { %v4602_v21 = vpack.c.bf16 %v4589_v54, %v4588_v52  ;;  %v4590_v57 = vadd.f32 %v4574_v2, %v7503_v49  ;;  %v4575_v39 = vmul.f32 %v7947_v59, %v4383_v31  ;;  %v5478_v60 = vpop.f32.mrb[151].mxu1 }
 0xbda   :  { %v4424_v9 = vpop.f32.mrb[136].mxu0 }
 0xbdb   :  { %v4591_v51 = vadd.f32 %v4575_v39, %v7507_v36  ;;  %v4576_v50 = vmul.f32 %v7947_v59, %v4424_v9  ;;  %v5483_v12 = vpop.f32.mrb[137].mxu0  ;;  %5511 = vmatprep.mubr.msk.bf16.mxu0 %vm61_vm0, %v4602_v21 }
 0xbdc   :  { %v4427_v29 = vpop.f32.mrb[138].mxu0 }
 0xbdd   :  { %v4603_v46 = vpack.c.bf16 %v4591_v51, %v4590_v57  ;;  %v4592_v5 = vadd.f32 %v4576_v50, %v7511_v1  ;;  %v4577_v6 = vmul.f32 %v7947_v59, %v4427_v29  ;;  %v5484_v24 = vpop.f32.mrb[139].mxu0 }
 0xbde   :  { %v4468_v16 = vpop.f32.mrb[152].mxu1 }
 0xbdf   :  { %v4593_v49 = vadd.f32 %v4577_v6, %v7515_v22  ;;  %v4578_v14 = vmul.f32 %v7947_v59, %v4468_v16  ;;  %v5489_v53 = vpop.f32.mrb[153].mxu1  ;;  %5512 = vmatmul.mubr.msk.bf16.gmra.mrb[148].mxu0 %vm61_vm0, %v4603_v46 }
 0xbe0   :  { %v4471_v36 = vpop.f32.mrb[154].mxu1 }
 0xbe1   :  { %v4604_v33 = vpack.c.bf16 %v4593_v49, %v4592_v5  ;;  %v4594_v11 = vadd.f32 %v4578_v14, %v7519_v26  ;;  %v4579_v8 = vmul.f32 %v7947_v59, %v4471_v36  ;;  %v5490_v42 = vpop.f32.mrb[155].mxu1 }
 0xbe2   :  { %v4512_v25 = vpop.f32.mrb[140].mxu0 }
 0xbe3   :  { %v4595_v1 = vadd.f32 %v4579_v8, %v7523_v19  ;;  %v4580_v34 = vmul.f32 %v7947_v59, %v4512_v25  ;;  %v5495_v28 = vpop.f32.mrb[141].mxu0  ;;  %5515 = vmatprep.mubr.msk.bf16.mxu0 %vm61_vm0, %v4604_v33 }
 0xbe4   :  { %v4515_v22 = vpop.f32.mrb[142].mxu0 }
 0xbe5   :  { %v4605_v55 = vpack.c.bf16 %v4595_v1, %v4594_v11  ;;  %v4596_v48 = vadd.f32 %v4580_v34, %v7527_v37  ;;  %v4581_v44 = vmul.f32 %v7947_v59, %v4515_v22  ;;  %v5496_v0 = vpop.f32.mrb[143].mxu0 }
 0xbe6   :  { %v4556_v3 = vpop.f32.mrb[156].mxu1 }
 0xbe7   :  { %v4597_v26 = vadd.f32 %v4581_v44, %v7531_v61  ;;  %v4582_v40 = vmul.f32 %v7947_v59, %v4556_v3  ;;  %v5501_v15 = vpop.f32.mrb[157].mxu1  ;;  %5516 = vmatmul.mubr.msk.bf16.gmra.mrb[152].mxu0 %vm61_vm0, %v4605_v55  ;;  %v4880_v61 = vld [vmem:[%s7882_s12] ss:$0 sm:$0xff] }
 0xbe8   :  { %v4559_v19 = vpop.f32.mrb[158].mxu1 }
 0xbe9   :  { %v4606_v58 = vpack.c.bf16 %v4597_v26, %v4596_v48  ;;  %v4598_v38 = vadd.f32 %v4582_v40, %v7535_v62  ;;  %v4583_v27 = vmul.f32 %v7947_v59, %v4559_v19  ;;  %v5502_v10 = vpop.f32.mrb[159].mxu1 }
 0xbeb   :  { %v4599_v37 = vadd.f32 %v4583_v27, %v7544_v20  ;;  %5519 = vmatprep.mubr.msk.bf16.mxu0 %vm61_vm0, %v4606_v58 }
 0xbed   :  { %v4607_v4 = vpack.c.bf16 %v4599_v37, %v4598_v38 }
 0xbef   :  { %5520 = vmatmul.mubr.msk.bf16.gmra.mrb[156].mxu0 %vm61_vm0, %v4607_v4 }
 0xcaa   :  { %v5509_v35 = vpop.f32.mrb[144].mxu0 }
 0xcab   :  { %v4698_v56 = vadd.f32 %v5509_v35, %v4880_v61  ;;  %v4689_v32 = vpop.f32.mrb[145].mxu0 }
 0xcac   :  { %v4690_v18 = vadd.f32 %v4880_v61, %v4689_v32  ;;  %v5510_v7 = vpop.f32.mrb[146].mxu0 }
 0xcad   :  { %4754 = vst.msk [vmem:[%s7883_s13 + $0x10] sm:$0xff] %vm61_vm0, %v4698_v56  ;;  %v4701_v62 = vadd.f32 %v5510_v7, %v4880_v61  ;;  %v4692_v20 = vpop.f32.mrb[147].mxu0 }
 0xcae   :  { %4752 = vst.msk [vmem:[%s7883_s13] sm:$0xff] %vm61_vm0, %v4690_v18  ;;  %v4693_v59 = vadd.f32 %v4880_v61, %v4692_v20 }
 0xcaf   :  { %4755 = vst.msk [vmem:[%s7883_s13 + $0x18] sm:$0xff] %vm61_vm0, %v4701_v62 }
 0xcb0   :  { %4753 = vst.msk [vmem:[%s7883_s13 + $0x8] sm:$0xff] %vm61_vm0, %v4693_v59 }
 0xcb2   :  { %v5513_v17 = vpop.f32.mrb[148].mxu0 }
 0xcb3   :  { %v4714_v45 = vadd.f32 %v5513_v17, %v4880_v61  ;;  %v4705_v41 = vpop.f32.mrb[149].mxu0 }
 0xcb4   :  { %v4706_v23 = vadd.f32 %v4880_v61, %v4705_v41  ;;  %v5514_v30 = vpop.f32.mrb[150].mxu0 }
 0xcb5   :  { %4758 = vst.msk [vmem:[%s7883_s13 + $0x30] sm:$0xff] %vm61_vm0, %v4714_v45  ;;  %v4717_v52 = vadd.f32 %v5514_v30, %v4880_v61  ;;  %v4708_v43 = vpop.f32.mrb[151].mxu0 }
 0xcb6   :  { %4756 = vst.msk [vmem:[%s7883_s13 + $0x20] sm:$0xff] %vm61_vm0, %v4706_v23  ;;  %v4709_v47 = vadd.f32 %v4880_v61, %v4708_v43 }
 0xcb7   :  { %4759 = vst.msk [vmem:[%s7883_s13 + $0x38] sm:$0xff] %vm61_vm0, %v4717_v52 }
 0xcb8   :  { %4757 = vst.msk [vmem:[%s7883_s13 + $0x28] sm:$0xff] %vm61_vm0, %v4709_v47 }
 0xcba   :  { %v5517_v13 = vpop.f32.mrb[152].mxu0 }
 0xcbb   :  { %v4730_v54 = vadd.f32 %v5517_v13, %v4880_v61  ;;  %v4721_v2 = vpop.f32.mrb[153].mxu0 }
 0xcbc   :  { %v4722_v63 = vadd.f32 %v4880_v61, %v4721_v2  ;;  %v5518_v31 = vpop.f32.mrb[154].mxu0 }
 0xcbd   :  { %4762 = vst.msk [vmem:[%s7883_s13 + $0x50] sm:$0xff] %vm61_vm0, %v4730_v54  ;;  %v4733_v21 = vadd.f32 %v5518_v31, %v4880_v61  ;;  %v4724_v57 = vpop.f32.mrb[155].mxu0 }
 0xcbe   :  { %4760 = vst.msk [vmem:[%s7883_s13 + $0x40] sm:$0xff] %vm61_vm0, %v4722_v63  ;;  %v4725_v39 = vadd.f32 %v4880_v61, %v4724_v57 }
 0xcbf   :  { %4763 = vst.msk [vmem:[%s7883_s13 + $0x58] sm:$0xff] %vm61_vm0, %v4733_v21 }
 0xcc0   :  { %4761 = vst.msk [vmem:[%s7883_s13 + $0x48] sm:$0xff] %vm61_vm0, %v4725_v39 }
 0xcc2   :  { %v5521_v60 = vpop.f32.mrb[156].mxu0 }
 0xcc3   :  { %v4746_v9 = vadd.f32 %v5521_v60, %v4880_v61  ;;  %v4737_v51 = vpop.f32.mrb[157].mxu0 }
 0xcc4   :  { %v4738_v50 = vadd.f32 %v4880_v61, %v4737_v51  ;;  %v5522_v12 = vpop.f32.mrb[158].mxu0 }
 0xcc5   :  { %4766 = vst.msk [vmem:[%s7883_s13 + $0x70] sm:$0xff] %vm61_vm0, %v4746_v9  ;;  %v4749_v29 = vadd.f32 %v5522_v12, %v4880_v61  ;;  %v4740_v46 = vpop.f32.mrb[159].mxu0 }
 0xcc6   :  { %4764 = vst.msk [vmem:[%s7883_s13 + $0x60] sm:$0xff] %vm61_vm0, %v4738_v50  ;;  %v4741_v5 = vadd.f32 %v4880_v61, %v4740_v46 }
 0xcc7   :  { %4767 = vst.msk [vmem:[%s7883_s13 + $0x78] sm:$0xff] %vm61_vm0, %v4749_v29 }
 0xcc8   :  { %4765 = vst.msk [vmem:[%s7883_s13 + $0x68] sm:$0xff] %vm61_vm0, %v4741_v5 }

// kernel: tpu_custom_call.1
= control target key start
LH: loop header
LB: loop body
LE: loop exit
PB: predicated region body
PF: predicated region fallthrough
CT: control target
= control target key end

     0   :  { %vm61_vm0 = vcmask 261120   ;;  %vm5826_vm1 = vmmov 0   ;;  %vm1143_vm2 = vcmask 130048   ;;  %s7870_s0 = inlined_call_operand.vmem [shape: f32[128,32], index: 0, kind: input, shape index: {}]   ;;  %s7871_s3 = inlined_call_operand.vmem [shape: bf16[32,32], index: 3, kind: input, shape index: {}]   ;;  %s7872_s4 = inlined_call_operand.vmem [shape: bf16[32,32], index: 4, kind: input, shape index: {}]   ;;  %s7873_s5 = inlined_call_operand.vmem [shape: bf16[32,32], index: 5, kind: input, shape index: {}]   ;;  %s7874_s1 = inlined_call_operand.vmem [shape: f32[1,32], index: 1, kind: input, shape index: {}]   ;;  %s7875_s2 = inlined_call_operand.vmem [shape: f32[1,32], index: 2, kind: input, shape index: {}]   ;;  %s7876_s9 = inlined_call_operand.vmem [shape: bf16[4,1,1,32], index: 9, kind: input, shape index: {}]   ;;  %s7877_s6 = inlined_call_operand.vmem [shape: f32[1,32], index: 6, kind: input, shape index: {}]   ;;  %s7878_s7 = inlined_call_operand.vmem [shape: f32[1,32], index: 7, kind: input, shape index: {}]   ;;  %s7879_s8 = inlined_call_operand.vmem [shape: f32[1,32], index: 8, kind: input, shape index: {}]   ;;  %s7880_s10 = inlined_call_operand.vmem [shape: f32[4,1,16,16], index: 10, kind: input, shape index: {}]   ;;  %s7881_s11 = inlined_call_operand.vmem [shape: bf16[32,32], index: 11, kind: input, shape index: {}]   ;;  %s7882_s12 = inlined_call_operand.vmem [shape: f32[1,32], index: 12, kind: input, shape index: {}]   ;;  %s7883_s13 = inlined_call_operand.vmem [shape: f32[128,32], index: 13, kind: output, shape index: {}]  }
   0x1   :  { %v53_v0 = vld [vmem:[%s7870_s0 + $0x40] sm:$0xff]  ;;  %v55_v1 = vld [vmem:[%s7870_s0 + $0x50] sm:$0xff]  ;;  %v54_v2 = vld [vmem:[%s7870_s0 + $0x48] sm:$0xff] }
   0x2   :  { %v86_v3 = vsel %vm61_vm0, %v53_v0, 0.0  ;;  %v92_v4 = vsel %vm61_vm0, %v55_v1, 0.0  ;;  %v56_v5 = vld [vmem:[%s7870_s0 + $0x58] sm:$0xff]  ;;  %v89_v6 = vsel %vm61_vm0, %v54_v2, 0.0  ;;  %v57_v8 = vld [vmem:[%s7870_s0 + $0x60] sm:$0xff]  ;;  %v58_v9 = vld [vmem:[%s7870_s0 + $0x68] sm:$0xff] }
   0x3   :  { %87 = vadd.xlane.f32.xlu0 %v86_v3  ;;  %93 = vadd.xlane.f32.xlu1 %v92_v4  ;;  %v95_v7 = vsel %vm61_vm0, %v56_v5, 0.0  ;;  %v98_v10 = vsel %vm61_vm0, %v57_v8, 0.0  ;;  %v101_v11 = vsel %vm61_vm0, %v58_v9, 0.0  ;;  %v5924_v12 = vld [vmem:[%s7870_s0 + $0x70] sm:$0xff]  ;;  %v5929_v13 = vld [vmem:[%s7870_s0 + $0x78] sm:$0xff]  ;;  %v5938_v16 = vld [vmem:[%s7870_s0] sm:$0xff] }
   0x4   :  { %v104_v14 = vsel %vm61_vm0, %v5924_v12, 0.0  ;;  %v107_v15 = vsel %vm61_vm0, %v5929_v13, 0.0  ;;  %v5943_v17 = vld [vmem:[%s7870_s0 + $0x8] sm:$0xff]  ;;  %v62_v18 = vsel %vm61_vm0, %v5938_v16, 0.0  ;;  %v5952_v20 = vld [vmem:[%s7870_s0 + $0x10] sm:$0xff]  ;;  %v5957_v21 = vld [vmem:[%s7870_s0 + $0x18] sm:$0xff] }
   0x5   :  { %v65_v19 = vsel %vm61_vm0, %v5943_v17, 0.0  ;;  %v68_v22 = vsel %vm61_vm0, %v5952_v20, 0.0  ;;  %v71_v23 = vsel %vm61_vm0, %v5957_v21, 0.0  ;;  %v5966_v24 = vld [vmem:[%s7870_s0 + $0x20] sm:$0xff]  ;;  %v5971_v25 = vld [vmem:[%s7870_s0 + $0x28] sm:$0xff]  ;;  %v5980_v28 = vld [vmem:[%s7870_s0 + $0x30] sm:$0xff] }
   0x6   :  { %v74_v26 = vsel %vm61_vm0, %v5966_v24, 0.0  ;;  %v77_v27 = vsel %vm61_vm0, %v5971_v25, 0.0  ;;  %v5985_v29 = vld [vmem:[%s7870_s0 + $0x38] sm:$0xff]  ;;  %v80_v30 = vsel %vm61_vm0, %v5980_v28, 0.0 }
   0x7   :  { %90 = vadd.xlane.f32.xlu0 %v89_v6  ;;  %96 = vadd.xlane.f32.xlu1 %v95_v7  ;;  %v83_v31 = vsel %vm61_vm0, %v5985_v29, 0.0 }
   0xb   :  { %99 = vadd.xlane.f32.xlu0 %v98_v10  ;;  %102 = vadd.xlane.f32.xlu1 %v101_v11 }
   0xf   :  { %105 = vadd.xlane.f32.xlu0 %v104_v14  ;;  %108 = vadd.xlane.f32.xlu1 %v107_v15 }
  0x13   :  { %63 = vadd.xlane.f32.xlu0 %v62_v18  ;;  %66 = vadd.xlane.f32.xlu1 %v65_v19 }
  0x17   :  { %69 = vadd.xlane.f32.xlu0 %v68_v22  ;;  %72 = vadd.xlane.f32.xlu1 %v71_v23 }
  0x1b   :  { %75 = vadd.xlane.f32.xlu0 %v74_v26  ;;  %78 = vadd.xlane.f32.xlu1 %v77_v27 }
  0x1f   :  { %81 = vadd.xlane.f32.xlu0 %v80_v30  ;;  %84 = vadd.xlane.f32.xlu1 %v83_v31 }
  0x90   :  { %v88_v32 = vpop.xlane.xlu0 %87  ;;  %v94_v33 = vpop.xlane.xlu1 %93 }
  0x91   :  { %v119_v34 = vmul.f32 0.03125, %v88_v32  ;;  %v121_v35 = vmul.f32 0.03125, %v94_v33 }
  0x93   :  { %v5991_v36 = vsub.f32 %v53_v0, %v119_v34  ;;  %v5993_v37 = vsub.f32 %v55_v1, %v121_v35 }
  0x94   :  { %v91_v38 = vpop.xlane.xlu0 %90  ;;  %v97_v39 = vpop.xlane.xlu1 %96 }
  0x95   :  { %v120_v40 = vmul.f32 0.03125, %v91_v38  ;;  %v122_v41 = vmul.f32 0.03125, %v97_v39  ;;  %v151_v42 = vmul.f32 %v5991_v36, %v5991_v36  ;;  %v153_v43 = vmul.f32 %v5993_v37, %v5993_v37 }
  0x97   :  { %v5999_v44 = vsub.f32 %v54_v2, %v120_v40  ;;  %v6001_v45 = vsub.f32 %v56_v5, %v122_v41  ;;  %v183_v46 = vsel %vm61_vm0, %v151_v42, 0.0  ;;  %v189_v49 = vsel %vm61_vm0, %v153_v43, 0.0 }
  0x98   :  { %v100_v47 = vpop.xlane.xlu0 %99  ;;  %184 = vadd.xlane.f32.xlu0 %v183_v46  ;;  %v103_v48 = vpop.xlane.xlu1 %102 }
  0x99   :  { %v123_v50 = vmul.f32 0.03125, %v100_v47  ;;  %v124_v51 = vmul.f32 0.03125, %v103_v48  ;;  %v152_v52 = vmul.f32 %v5999_v44, %v5999_v44  ;;  %v154_v53 = vmul.f32 %v6001_v45, %v6001_v45 }
  0x9b   :  { %v6009_v54 = vsub.f32 %v57_v8, %v123_v50  ;;  %v6011_v55 = vsub.f32 %v58_v9, %v124_v51  ;;  %v186_v56 = vsel %vm61_vm0, %v152_v52, 0.0  ;;  %v192_v59 = vsel %vm61_vm0, %v154_v53, 0.0  ;;  %v5530_v53 = vld [vmem:[%s7871_s3 + $0x8] sm:$0xff]  }
  0x9c   :  { %v106_v57 = vpop.xlane.xlu0 %105  ;;  %187 = vadd.xlane.f32.xlu1 %v186_v56  ;;  %190 = vadd.xlane.f32.xlu0 %v189_v49  ;;  %v109_v58 = vpop.xlane.xlu1 %108  ;;  %v6090_v56 = vld [vmem:[%s7872_s4] sm:$0xff]  }
  0x9d   :  { %v125_v60 = vmul.f32 0.03125, %v106_v57  ;;  %v126_v61 = vmul.f32 0.03125, %v109_v58  ;;  %v155_v62 = vmul.f32 %v6009_v54, %v6009_v54  ;;  %v156_v63 = vmul.f32 %v6011_v55, %v6011_v55  ;;  %v6096_v57 = vld [vmem:[%s7873_s5] sm:$0xff]  }
  0x9f   :  { %v6020_v0 = vsub.f32 %v5924_v12, %v125_v60  ;;  %v6023_v1 = vsub.f32 %v5929_v13, %v126_v61  ;;  %v195_v2 = vsel %vm61_vm0, %v155_v62, 0.0  ;;  %v198_v4 = vsel %vm61_vm0, %v156_v63, 0.0 }
  0xa0   :  { %193 = vadd.xlane.f32.xlu1 %v192_v59  ;;  %196 = vadd.xlane.f32.xlu0 %v195_v2  ;;  %v64_v3 = vpop.xlane.xlu0 %63  ;;  %v67_v5 = vpop.xlane.xlu1 %66 }
  0xa1   :  { %v111_v6 = vmul.f32 0.03125, %v64_v3  ;;  %v112_v7 = vmul.f32 0.03125, %v67_v5  ;;  %v157_v8 = vmul.f32 %v6020_v0, %v6020_v0  ;;  %v158_v9 = vmul.f32 %v6023_v1, %v6023_v1 }
  0xa3   :  { %v6032_v10 = vsub.f32 %v5938_v16, %v111_v6  ;;  %v6035_v11 = vsub.f32 %v5943_v17, %v112_v7  ;;  %v201_v12 = vsel %vm61_vm0, %v157_v8, 0.0  ;;  %v204_v14 = vsel %vm61_vm0, %v158_v9, 0.0 }
  0xa4   :  { %199 = vadd.xlane.f32.xlu1 %v198_v4  ;;  %202 = vadd.xlane.f32.xlu0 %v201_v12  ;;  %v70_v13 = vpop.xlane.xlu0 %69  ;;  %v73_v15 = vpop.xlane.xlu1 %72 }
  0xa5   :  { %v113_v18 = vmul.f32 0.03125, %v70_v13  ;;  %v114_v19 = vmul.f32 0.03125, %v73_v15  ;;  %v143_v22 = vmul.f32 %v6032_v10, %v6032_v10  ;;  %v144_v16 = vmul.f32 %v6035_v11, %v6035_v11 }
  0xa7   :  { %v6044_v23 = vsub.f32 %v5952_v20, %v113_v18  ;;  %v6047_v17 = vsub.f32 %v5957_v21, %v114_v19  ;;  %v159_v26 = vsel %vm61_vm0, %v143_v22, 0.0  ;;  %v162_v30 = vsel %vm61_vm0, %v144_v16, 0.0 }
  0xa8   :  { %205 = vadd.xlane.f32.xlu1 %v204_v14  ;;  %160 = vadd.xlane.f32.xlu0 %v159_v26  ;;  %v76_v27 = vpop.xlane.xlu0 %75  ;;  %v79_v31 = vpop.xlane.xlu1 %78 }
  0xa9   :  { %v115_v32 = vmul.f32 0.03125, %v76_v27  ;;  %v116_v33 = vmul.f32 0.03125, %v79_v31  ;;  %v145_v34 = vmul.f32 %v6044_v23, %v6044_v23  ;;  %v146_v20 = vmul.f32 %v6047_v17, %v6047_v17 }
  0xab   :  { %v6056_v35 = vsub.f32 %v5966_v24, %v115_v32  ;;  %v6059_v21 = vsub.f32 %v5971_v25, %v116_v33  ;;  %v165_v38 = vsel %vm61_vm0, %v145_v34, 0.0  ;;  %v168_v40 = vsel %vm61_vm0, %v146_v20, 0.0  ;;  %v6103_v33 = vld [vmem:[%s7874_s1] ss:$0 sm:$0xff] }
  0xac   :  { %163 = vadd.xlane.f32.xlu1 %v162_v30  ;;  %166 = vadd.xlane.f32.xlu0 %v165_v38  ;;  %v82_v39 = vpop.xlane.xlu0 %81  ;;  %v85_v41 = vpop.xlane.xlu1 %84 }
  0xad   :  { %v117_v42 = vmul.f32 0.03125, %v82_v39  ;;  %v118_v43 = vmul.f32 0.03125, %v85_v41  ;;  %v147_v46 = vmul.f32 %v6056_v35, %v6056_v35  ;;  %v148_v24 = vmul.f32 %v6059_v21, %v6059_v21 }
  0xaf   :  { %v6068_v47 = vsub.f32 %v5980_v28, %v117_v42  ;;  %v6071_v25 = vsub.f32 %v5985_v29, %v118_v43  ;;  %v171_v48 = vsel %vm61_vm0, %v147_v46, 0.0  ;;  %v174_v49 = vsel %vm61_vm0, %v148_v24, 0.0  ;;  %v5529_v29 = vld [vmem:[%s7871_s3] sm:$0xff]  }
  0xb0   :  { %169 = vadd.xlane.f32.xlu1 %v168_v40  ;;  %172 = vadd.xlane.f32.xlu0 %v171_v48  ;;  %v6110_v24 = vld [vmem:[%s7875_s2] ss:$0 sm:$0xff] }
  0xb1   :  { %v149_v50 = vmul.f32 %v6068_v47, %v6068_v47  ;;  %v150_v51 = vmul.f32 %v6071_v25, %v6071_v25  ;;  %5523 = vmatprep.subr.bf16.mxu1 %v5529_v29  ;;  %5059 = vmatprep.subr.bf16.mxu0 %v5529_v29 }
  0xb2   :  { %5525 = vmatpush3.bf16.msra.mxu1 %v5529_v29  ;;  %5060 = vmatpush3.bf16.msra.mxu0 %v5529_v29 }
  0xb3   :  { %v177_v52 = vsel %vm61_vm0, %v149_v50, 0.0  ;;  %v180_v28 = vsel %vm61_vm0, %v150_v51, 0.0  ;;  %5524 = vmatprep.subr.bf16.mxu1 %v5530_v53  ;;  %5061 = vmatprep.subr.bf16.mxu0 %v5530_v53 }
  0xb4   :  { %175 = vadd.xlane.f32.xlu1 %v174_v49  ;;  %178 = vadd.xlane.f32.xlu0 %v177_v52 }
  0xb6   :  { %5526 = vmatpush3.bf16.msra.mxu1 %v5530_v53  ;;  %5062 = vmatpush3.bf16.msra.mxu0 %v5530_v53 }
  0xb7   :  { %5079 = vmatprep.subr.bf16.mxu1 %v6090_v56  ;;  %5099 = vmatprep.subr.bf16.mxu0 %v6096_v57 }
  0xb8   :  { %181 = vadd.xlane.f32.xlu1 %v180_v28 }
 0x125   :  { %v185_v58 = vpop.xlane.xlu0 %184 }
 0x126   :  { %v215_v59 = vmul.f32 0.03125, %v185_v58 }
 0x128   :  { %v231_v60 = vadd.f32 1e-05, %v215_v59 }
 0x129   :  { %v188_v61 = vpop.xlane.xlu1 %187  ;;  %v191_v62 = vpop.xlane.xlu0 %190 }
 0x12a   :  { %5537 = vrsqrt.f32 %v231_v60  ;;  %v216_v63 = vmul.f32 0.03125, %v188_v61  ;;  %v217_v2 = vmul.f32 0.03125, %v191_v62 }
 0x12c   :  { %v232_v3 = vadd.f32 1e-05, %v216_v63  ;;  %v233_v4 = vadd.f32 1e-05, %v217_v2 }
 0x12d   :  { %v194_v5 = vpop.xlane.xlu1 %193  ;;  %v197_v6 = vpop.xlane.xlu0 %196 }
 0x12e   :  { %5539 = vrsqrt.f32 %v232_v3  ;;  %v218_v7 = vmul.f32 0.03125, %v194_v5  ;;  %v219_v8 = vmul.f32 0.03125, %v197_v6 }
 0x12f   :  { %5541 = vrsqrt.f32 %v233_v4 }
 0x130   :  { %v234_v9 = vadd.f32 1e-05, %v218_v7  ;;  %v235_v12 = vadd.f32 1e-05, %v219_v8 }
 0x131   :  { %v200_v13 = vpop.xlane.xlu1 %199  ;;  %v203_v14 = vpop.xlane.xlu0 %202 }
 0x132   :  { %5543 = vrsqrt.f32 %v234_v9  ;;  %v220_v15 = vmul.f32 0.03125, %v200_v13  ;;  %v221_v18 = vmul.f32 0.03125, %v203_v14 }
 0x133   :  { %5545 = vrsqrt.f32 %v235_v12 }
 0x134   :  { %v5538_v19 = vpop.eup %5537  ;;  %v236_v22 = vadd.f32 1e-05, %v220_v15  ;;  %v237_v16 = vadd.f32 1e-05, %v221_v18 }
 0x135   :  { %v206_v26 = vpop.xlane.xlu1 %205  ;;  %v161_v27 = vpop.xlane.xlu0 %160  ;;  %v263_v30 = vmul.f32 %v5538_v19, %v5991_v36 }
 0x136   :  { %5547 = vrsqrt.f32 %v236_v22  ;;  %v222_v31 = vmul.f32 0.03125, %v206_v26  ;;  %v207_v32 = vmul.f32 0.03125, %v161_v27  ;;  %v5532_v22 = vld [vmem:[%s7872_s4 + $0x8] sm:$0xff]  }
 0x137   :  { %5549 = vrsqrt.f32 %v237_v16  ;;  %v286_v43 = vmul.f32 %v6103_v33, %v263_v30 }
 0x138   :  { %v5540_v34 = vpop.eup %5539  ;;  %v238_v20 = vadd.f32 1e-05, %v222_v31  ;;  %v223_v38 = vadd.f32 1e-05, %v207_v32 }
 0x139   :  { %v5542_v39 = vpop.eup %5541  ;;  %v164_v40 = vpop.xlane.xlu1 %163  ;;  %v264_v42 = vmul.f32 %v5540_v34, %v5999_v44  ;;  %v309_v53 = vadd.f32 %v6110_v24, %v286_v43 }
 0x13a   :  { %v167_v41 = vpop.xlane.xlu0 %166  ;;  %5551 = vrsqrt.f32 %v238_v20  ;;  %v208_v36 = vmul.f32 0.03125, %v164_v40  ;;  %v265_v48 = vmul.f32 %v5542_v39, %v5993_v37 }
 0x13b   :  { %v209_v46 = vmul.f32 0.03125, %v167_v41  ;;  %5553 = vrsqrt.f32 %v223_v38  ;;  %v287_v49 = vmul.f32 %v6103_v33, %v264_v42 }
 0x13c   :  { %v5544_v50 = vpop.eup %5543  ;;  %v224_v51 = vadd.f32 1e-05, %v208_v36  ;;  %v288_v60 = vmul.f32 %v6103_v33, %v265_v48 }
 0x13d   :  { %v225_v52 = vadd.f32 1e-05, %v209_v46  ;;  %v5546_v28 = vpop.eup %5545  ;;  %v170_v44 = vpop.xlane.xlu1 %169  ;;  %v310_v58 = vadd.f32 %v6110_v24, %v287_v49  ;;  %v266_v59 = vmul.f32 %v5544_v50, %v6001_v45 }
 0x13e   :  { %v173_v29 = vpop.xlane.xlu0 %172  ;;  %5555 = vrsqrt.f32 %v224_v51  ;;  %v210_v61 = vmul.f32 0.03125, %v170_v44  ;;  %v267_v2 = vmul.f32 %v5546_v28, %v6009_v54  ;;  %v311_v8 = vadd.f32 %v6110_v24, %v288_v60 }
 0x13f   :  { %v211_v37 = vmul.f32 0.03125, %v173_v29  ;;  %5557 = vrsqrt.f32 %v225_v52  ;;  %v6118_v62 = vpack.c.bf16 %v310_v58, %v309_v53  ;;  %v289_v63 = vmul.f32 %v6103_v33, %v266_v59 }
 0x140   :  { %v5548_v3 = vpop.eup %5547  ;;  %v226_v4 = vadd.f32 1e-05, %v210_v61  ;;  %v290_v13 = vmul.f32 %v6103_v33, %v267_v2 }
 0x141   :  { %v227_v5 = vadd.f32 1e-05, %v211_v37  ;;  %v5550_v6 = vpop.eup %5549  ;;  %v176_v7 = vpop.xlane.xlu1 %175  ;;  %5071 = vmatprep.mubr.msk.bf16.mxu1 %vm61_vm0, %v6118_v62  ;;  %v312_v9 = vadd.f32 %v6110_v24, %v289_v63  ;;  %v268_v12 = vmul.f32 %v5548_v3, %v6011_v55  ;;  %v5534_v3 = vld [vmem:[%s7873_s5 + $0x8] sm:$0xff]  }
 0x142   :  { %v179_v45 = vpop.xlane.xlu0 %178  ;;  %5559 = vrsqrt.f32 %v226_v4  ;;  %v212_v14 = vmul.f32 0.03125, %v176_v7  ;;  %v269_v15 = vmul.f32 %v5550_v6, %v6020_v0  ;;  %v313_v31 = vadd.f32 %v6110_v24, %v290_v13 }
 0x143   :  { %v213_v54 = vmul.f32 0.03125, %v179_v45  ;;  %5561 = vrsqrt.f32 %v227_v5  ;;  %v6129_v18 = vpack.c.bf16 %v312_v9, %v311_v8  ;;  %v291_v19 = vmul.f32 %v6103_v33, %v268_v12 }
 0x144   :  { %v5552_v16 = vpop.eup %5551  ;;  %v228_v26 = vadd.f32 1e-05, %v212_v14  ;;  %v292_v34 = vmul.f32 %v6103_v33, %v269_v15  ;;  %v6218_v15 = vld [vmem:[%s7876_s9] sm:$0x1] }
 0x145   :  { %v229_v27 = vadd.f32 1e-05, %v213_v54  ;;  %v5554_v55 = vpop.eup %5553  ;;  %v182_v30 = vpop.xlane.xlu1 %181  ;;  %5072 = vmatmul.mubr.msk.bf16.vlgmr.msra.gmra.mrb[0].mxu1 %vm61_vm0, %v6129_v18  ;;  %v314_v0 = vadd.f32 %v6110_v24, %v291_v19  ;;  %v270_v32 = vmul.f32 %v5552_v16, %v6023_v1  ;;  %v4861_v54 = vld [vmem:[%s7876_s9 + $0x3] sm:$0x1]  ;;  %v1680_v19 = vunpack.c.l.bf16 %v6218_v15 }
 0x146   :  { %5563 = vrsqrt.f32 %v228_v26  ;;  %v214_v20 = vmul.f32 0.03125, %v182_v30  ;;  %5080 = vmatpush3.bf16.msra.mxu1 %v6090_v56  ;;  %v255_v38 = vmul.f32 %v5554_v55, %v6032_v10  ;;  %v315_v1 = vadd.f32 %v6110_v24, %v292_v34 }
 0x147   :  { %5565 = vrsqrt.f32 %v229_v27  ;;  %v6143_v39 = vpack.c.bf16 %v314_v0, %v313_v31  ;;  %v293_v40 = vmul.f32 %v6103_v33, %v270_v32  ;;  %5081 = vmatprep.subr.bf16.mxu1 %v5532_v22  ;;  %v4563_v30 = vunpack.c.l.bf16 %v4861_v54 }
 0x148   :  { %v5556_v41 = vpop.eup %5555  ;;  %v230_v42 = vadd.f32 1e-05, %v214_v20  ;;  %v278_v10 = vmul.f32 %v6103_v33, %v255_v38  ;;  %v7884_v20 = vmov 0.0   ;;  %v6251_v38 = vld [vmem:[%s7877_s6] ss:$0 sm:$0xff] }
 0x149   :  { %v5558_v43 = vpop.eup %5557  ;;  %5075 = vmatprep.mubr.msk.bf16.mxu1 %vm61_vm0, %v6143_v39  ;;  %v316_v36 = vadd.f32 %v6110_v24, %v293_v40  ;;  %v256_v56 = vmul.f32 %v5556_v41, %v6035_v11 }
 0x14a   :  { %5567 = vrsqrt.f32 %v230_v42  ;;  %5082 = vmatpush3.bf16.msra.mxu1 %v5532_v22  ;;  %v257_v46 = vmul.f32 %v5558_v43, %v6044_v23  ;;  %v301_v52 = vadd.f32 %v6110_v24, %v278_v10 }
 0x14b   :  { %v324_v48 = vpack.c.bf16 %v316_v36, %v315_v1  ;;  %v279_v49 = vmul.f32 %v6103_v33, %v256_v56  ;;  %5119 = vmatprep.subr.bf16.mxu1 %v7884_v20 }
 0x14c   :  { %v5560_v50 = vpop.eup %5559  ;;  %v280_v11 = vmul.f32 %v6103_v33, %v257_v46 }
 0x14d   :  { %v5562_v51 = vpop.eup %5561  ;;  %5076 = vmatmul.mubr.msk.bf16.gmra.mrb[4].mxu1 %vm61_vm0, %v324_v48  ;;  %v302_v28 = vadd.f32 %v6110_v24, %v279_v49  ;;  %v258_v44 = vmul.f32 %v5560_v50, %v6047_v17 }
 0x14e   :  { %v259_v29 = vmul.f32 %v5562_v51, %v6056_v35  ;;  %v303_v61 = vadd.f32 %v6110_v24, %v280_v11 }
 0x14f   :  { %v317_v53 = vpack.c.bf16 %v302_v28, %v301_v52  ;;  %v281_v23 = vmul.f32 %v6103_v33, %v258_v44 }
 0x150   :  { %v5564_v58 = vpop.eup %5563  ;;  %v282_v59 = vmul.f32 %v6103_v33, %v259_v29 }
 0x151   :  { %v5566_v60 = vpop.eup %5565  ;;  %5063 = vmatprep.mubr.msk.bf16.mxu0 %vm61_vm0, %v317_v53  ;;  %5083 = vmatprep.mubr.msk.bf16.mxu1 %vm61_vm0, %v317_v53  ;;  %v304_v37 = vadd.f32 %v6110_v24, %v281_v23  ;;  %v260_v17 = vmul.f32 %v5564_v58, %v6059_v21 }
 0x152   :  { %v261_v63 = vmul.f32 %v5566_v60, %v6068_v47  ;;  %v305_v5 = vadd.f32 %v6110_v24, %v282_v59 }
 0x153   :  { %v318_v35 = vpack.c.bf16 %v304_v37, %v303_v61  ;;  %v283_v2 = vmul.f32 %v6103_v33, %v260_v17 }
 0x154   :  { %v5568_v4 = vpop.eup %5567  ;;  %v284_v47 = vmul.f32 %v6103_v33, %v261_v63 }
 0x155   :  { %5064 = vmatmul.mubr.msk.bf16.vlgmr.msra.gmra.mrb[0].mxu0 %vm61_vm0, %v318_v35  ;;  %5084 = vmatmul.mubr.msk.bf16.vlgmr.msra.gmra.mrb[8].mxu1 %vm61_vm0, %v318_v35  ;;  %v306_v6 = vadd.f32 %v6110_v24, %v283_v2  ;;  %v262_v21 = vmul.f32 %v5568_v4, %v6071_v25  ;;  %v737_v25 = vlaneseq }
 0x156   :  { %5100 = vmatpush3.bf16.msra.mxu0 %v6096_v57  ;;  %v307_v8 = vadd.f32 %v6110_v24, %v284_v47 }
 0x157   :  { %v319_v7 = vpack.c.bf16 %v306_v6, %v305_v5  ;;  %v285_v45 = vmul.f32 %v6103_v33, %v262_v21  ;;  %5101 = vmatprep.subr.bf16.mxu0 %v5534_v3  ;;  %v738_v57 = vshrl.u32 %v737_v25, 7  ;;  %v4823_v33 = vld [vmem:[%s7876_s9 + $0x1] sm:$0x1]  ;;  %v6296_v21 = vld [vmem:[%s7878_s7] ss:$0 sm:$0xff] }
 0x158   :  { %v2641_v16 = vunpack.c.l.bf16 %v4823_v33 }
 0x159   :  { %5067 = vmatprep.mubr.msk.bf16.mxu0 %vm61_vm0, %v319_v7  ;;  %5087 = vmatprep.mubr.msk.bf16.mxu1 %vm61_vm0, %v319_v7  ;;  %v308_v9 = vadd.f32 %v6110_v24, %v285_v45  ;;  %v4842_v24 = vld [vmem:[%s7876_s9 + $0x2] sm:$0x1]  ;;  %v6210_v13 = vsub.s32 0, %v738_v57 }
 0x15a   :  { %5102 = vmatpush3.bf16.msra.mxu0 %v5534_v3  ;;  %v2681_v14 = vpack.i.b16 %v4842_v24, %v4842_v24  ;;  %v3602_v27 = vunpack.c.l.bf16 %v4842_v24 }
 0x15b   :  { %v320_v12 = vpack.c.bf16 %v308_v9, %v307_v8  ;;  %v6231_v31 = vrot.slane %v1680_v19, %v6210_v13  ;;  %v6234_v0 = vrot.slane %v2641_v16, %v6210_v13  ;;  %v6240_v34 = vrot.slane %v4563_v30, %v6210_v13  ;;  %5143 = vmatprep.subr.bf16.mxu0 %v7884_v20 }
 0x15c   :  { %v6225_v26 = vrot.slane %v2681_v14, %v6210_v13  ;;  %v6237_v32 = vrot.slane %v3602_v27, %v6210_v13 }
 0x15d   :  { %5068 = vmatmul.mubr.msk.bf16.gmra.mrb[4].mxu0 %vm61_vm0, %v320_v12  ;;  %5088 = vmatmul.mubr.msk.bf16.gmra.mrb[12].mxu1 %vm61_vm0, %v320_v12  ;;  %7892 = vst [vmem:[#allocation4_spill] sm:$0xff] %v6240_v34 }
 0x15e   :  { %5091 = vmatprep.mubr.msk.bf16.mxu1 %vm61_vm0, %v6118_v62  ;;  %5103 = vmatprep.mubr.msk.bf16.mxu0 %vm61_vm0, %v317_v53  ;;  %7891 = vst [vmem:[#allocation3_spill] sm:$0xff] %v6237_v32 }
 0x165   :  { %5092 = vmatmul.mubr.msk.bf16.gmra.mrb[16].mxu1 %vm61_vm0, %v6129_v18  ;;  %5104 = vmatmul.mubr.msk.bf16.vlgmr.msra.gmra.mrb[8].mxu0 %vm61_vm0, %v318_v35 }
 0x166   :  { %5095 = vmatprep.mubr.msk.bf16.mxu1 %vm61_vm0, %v6143_v39  ;;  %5107 = vmatprep.mubr.msk.bf16.mxu0 %vm61_vm0, %v319_v7 }
 0x16d   :  { %5096 = vmatmul.mubr.msk.bf16.gmra.mrb[20].mxu1 %vm61_vm0, %v324_v48  ;;  %5108 = vmatmul.mubr.msk.bf16.gmra.mrb[12].mxu0 %vm61_vm0, %v320_v12 }
 0x16e   :  { %5111 = vmatprep.mubr.msk.bf16.mxu0 %vm61_vm0, %v6118_v62  ;;  %v1720_v62 = vpack.i.b16 %v4823_v33, %v4823_v33  ;;  %5121 = vmatprep.mubr.msk.bf16.mxu1 %vm5826_vm1, %v7884_v20 }
 0x170   :  { %v6222_v22 = vrot.slane %v1720_v62, %v6210_v13 }
 0x175   :  { %5112 = vmatmul.mubr.msk.bf16.gmra.mrb[16].mxu0 %vm61_vm0, %v6129_v18  ;;  %v3642_v18 = vpack.i.b16 %v4861_v54, %v4861_v54 }
 0x176   :  { %5115 = vmatprep.mubr.msk.bf16.mxu0 %vm61_vm0, %v6143_v39 }
 0x177   :  { %v6228_v55 = vrot.slane %v3642_v18, %v6210_v13 }
 0x179   :  { %7890 = vst [vmem:[#allocation2_spill] sm:$0xff] %v6228_v55 }
 0x17d   :  { %5116 = vmatmul.mubr.msk.bf16.gmra.mrb[20].mxu0 %vm61_vm0, %v324_v48 }
 0x17e   :  { %5145 = vmatprep.mubr.msk.bf16.mxu0 %vm5826_vm1, %v7884_v20 }
 0x218   :  { %v5073_v39 = vpop.f32.mrb[0].mxu1 }
 0x219   :  { %v438_v40 = vpop.f32.mrb[1].mxu1  ;;  %v447_v42 = vadd.f32 %v5073_v39, %v6251_v38 }
 0x21a   :  { %v5074_v41 = vpop.f32.mrb[2].mxu1  ;;  %v439_v36 = vadd.f32 %v6251_v38, %v438_v40 }
 0x21b   :  { %v450_v43 = vadd.f32 %v5074_v41, %v6251_v38  ;;  %v441_v1 = vpop.f32.mrb[3].mxu1 }
 0x21c   :  { %v442_v56 = vadd.f32 %v6251_v38, %v441_v1 }
 0x21d   :  { %v6257_v10 = vpack.c.bf16 %v450_v43, %v447_v42 }
 0x21e   :  { %v6259_v46 = vpack.c.bf16 %v442_v56, %v439_v36 }
 0x220   :  { %v5077_v44 = vpop.f32.mrb[4].mxu1 }
 0x221   :  { %v454_v11 = vpop.f32.mrb[5].mxu1  ;;  %v463_v53 = vadd.f32 %v5077_v44, %v6251_v38  ;;  %v735_v44 = vpack.i.b16 %v6218_v15, %v6218_v15 }
 0x222   :  { %v5078_v29 = vpop.f32.mrb[6].mxu1  ;;  %v455_v59 = vadd.f32 %v6251_v38, %v454_v11 }
 0x223   :  { %v466_v23 = vadd.f32 %v5078_v29, %v6251_v38  ;;  %v457_v58 = vpop.f32.mrb[7].mxu1 }
 0x224   :  { %v458_v60 = vadd.f32 %v6251_v38, %v457_v58 }
 0x225   :  { %v6277_v61 = vpack.c.bf16 %v466_v23, %v463_v53 }
 0x226   :  { %v6279_v37 = vpack.c.bf16 %v458_v60, %v455_v59 }
 0x228   :  { %v5065_v5 = vpop.f32.mrb[0].mxu0  ;;  %v5085_v6 = vpop.f32.mrb[8].mxu1 }
 0x229   :  { %v406_v47 = vpop.f32.mrb[1].mxu0  ;;  %v526_v7 = vpop.f32.mrb[9].mxu1  ;;  %v415_v9 = vadd.f32 %v5065_v5, %v6251_v38  ;;  %v535_v12 = vadd.f32 %v5085_v6, %v6296_v21 }
 0x22a   :  { %v5066_v45 = vpop.f32.mrb[2].mxu0  ;;  %v5086_v8 = vpop.f32.mrb[10].mxu1  ;;  %v407_v62 = vadd.f32 %v6251_v38, %v406_v47  ;;  %v527_v14 = vadd.f32 %v6296_v21, %v526_v7 }
 0x22b   :  { %v418_v25 = vadd.f32 %v5066_v45, %v6251_v38  ;;  %v538_v57 = vadd.f32 %v5086_v8, %v6296_v21  ;;  %v409_v33 = vpop.f32.mrb[3].mxu0  ;;  %v529_v24 = vpop.f32.mrb[11].mxu1 }
 0x22c   :  { %v410_v54 = vadd.f32 %v6251_v38, %v409_v33  ;;  %v530_v18 = vadd.f32 %v6296_v21, %v529_v24 }
 0x22d   :  { %v6306_v19 = vpack.c.bf16 %v418_v25, %v415_v9  ;;  %v718_v16 = vpack.c.bf16 %v538_v57, %v535_v12  ;;  %v6342_v12 = vrot.slane %v735_v44, %v6210_v13  ;;  %v6367_v44 = vld [vmem:[%s7879_s8] ss:$0 sm:$0xff] }
 0x22e   :  { %v6308_v27 = vpack.c.bf16 %v410_v54, %v407_v62  ;;  %v717_v30 = vpack.c.bf16 %v530_v18, %v527_v14 }
 0x22f   :  { %v1727_v39 = vmul.bf16 %v6222_v22, %v6306_v19 }
 0x230   :  { %v1726_v42 = vmul.bf16 %v6222_v22, %v6308_v27  ;;  %v5069_v36 = vpop.f32.mrb[4].mxu0  ;;  %v5089_v56 = vpop.f32.mrb[12].mxu1  ;;  %v6325_v53 = vsel %vm61_vm0, %v717_v30, 0  ;;  %v741_v62 = vmul.bf16 %v6342_v12, %v6308_v27 }
 0x231   :  { %v422_v11 = vpop.f32.mrb[5].mxu0  ;;  %v542_v29 = vpop.f32.mrb[13].mxu1  ;;  %5120 = vmatpush3.bf16.xpose.msra.mxu1 %v6325_v53  ;;  %v431_v59 = vadd.f32 %v5069_v36, %v6251_v38  ;;  %v6330_v60 = vadd.f32 %v5089_v56, %v6296_v21 }
 0x232   :  { %v5070_v23 = vpop.f32.mrb[6].mxu0  ;;  %v5090_v58 = vpop.f32.mrb[14].mxu1  ;;  %5125 = vmatprep.subr.bf16.mxu1 %v7884_v20  ;;  %v423_v7 = vadd.f32 %v6251_v38, %v422_v11  ;;  %v543_v45 = vadd.f32 %v6296_v21, %v542_v29 }
 0x233   :  { %v434_v5 = vadd.f32 %v5070_v23, %v6251_v38  ;;  %v6334_v6 = vadd.f32 %v5090_v58, %v6296_v21  ;;  %v425_v15 = vpop.f32.mrb[7].mxu0  ;;  %v545_v47 = vpop.f32.mrb[15].mxu1  ;;  %v6371_v23 = vsel %vm61_vm0, %v718_v16, 0 }
 0x234   :  { %v426_v8 = vadd.f32 %v6251_v38, %v425_v15  ;;  %v546_v9 = vadd.f32 %v6296_v21, %v545_v47 }
 0x235   :  { %v6344_v25 = vpack.c.bf16 %v434_v5, %v431_v59  ;;  %v720_v57 = vpack.c.bf16 %v6334_v6, %v6330_v60 }
 0x236   :  { %v6348_v33 = vpack.c.bf16 %v426_v8, %v423_v7  ;;  %v719_v24 = vpack.c.bf16 %v546_v9, %v543_v45 }
 0x238   :  { %v1728_v54 = vmul.bf16 %v6222_v22, %v6348_v33  ;;  %v5093_v36 = vpop.f32.mrb[16].mxu1  ;;  %v5105_v56 = vpop.f32.mrb[8].mxu0  ;;  %5122 = vmatmul.mubr.msk.bf16.vlgmr.msra.gmra.mrb[24].mxu1 %vm61_vm0, %v741_v62  ;;  %v743_v30 = vmul.bf16 %v6342_v12, %v6348_v33 }
 0x239   :  { %v558_v11 = vpop.f32.mrb[17].mxu1  ;;  %v646_v29 = vpop.f32.mrb[9].mxu0  ;;  %5126 = vmatpush3.bf16.xpose.msra.mxu1 %v6371_v23  ;;  %5127 = vmatprep.mubr.msk.bf16.mxu1 %vm5826_vm1, %v7884_v20  ;;  %v6377_v5 = vadd.f32 %v5093_v36, %v6296_v21  ;;  %v655_v15 = vadd.f32 %v5105_v56, %v6367_v44 }
 0x23a   :  { %v5094_v58 = vpop.f32.mrb[18].mxu1  ;;  %v5106_v59 = vpop.f32.mrb[10].mxu0  ;;  %5131 = vmatprep.subr.bf16.mxu1 %v7884_v20  ;;  %v559_v8 = vadd.f32 %v6296_v21, %v558_v11  ;;  %v647_v9 = vadd.f32 %v6367_v44, %v646_v29 }
 0x23b   :  { %v6381_v47 = vadd.f32 %v5094_v58, %v6296_v21  ;;  %v658_v7 = vadd.f32 %v5106_v59, %v6367_v44  ;;  %v561_v45 = vpop.f32.mrb[19].mxu1  ;;  %v649_v16 = vpop.f32.mrb[11].mxu0  ;;  %v742_v59 = vmul.bf16 %v6342_v12, %v6306_v19 }
 0x23c   :  { %v562_v62 = vadd.f32 %v6296_v21, %v561_v45  ;;  %v650_v36 = vadd.f32 %v6367_v44, %v649_v16 }
 0x23d   :  { %v722_v56 = vpack.c.bf16 %v6381_v47, %v6377_v5  ;;  %v6391_v35 = vpack.c.bf16 %v658_v7, %v655_v15  ;;  %v6403_v5 = vsel %vm61_vm0, %v719_v24, 0 }
 0x23e   :  { %v721_v58 = vpack.c.bf16 %v562_v62, %v559_v8  ;;  %v6393_v4 = vpack.c.bf16 %v650_v36, %v647_v9 }
 0x240   :  { %v5097_v50 = vpop.f32.mrb[20].mxu1  ;;  %v5109_v28 = vpop.f32.mrb[12].mxu0  ;;  %v6398_v11 = vsel %vm61_vm0, %v721_v58, 0  ;;  %5128 = vmatmul.mubr.msk.bf16.vlgmr.msra.gmra.mrb[28].mxu1 %vm61_vm0, %v742_v59 }
 0x241   :  { %v671_v29 = vadd.f32 %v5109_v28, %v6367_v44  ;;  %v574_v45 = vpop.f32.mrb[21].mxu1  ;;  %v662_v16 = vpop.f32.mrb[13].mxu0  ;;  %5144 = vmatpush3.bf16.xpose.msra.mxu0 %v6398_v11  ;;  %5132 = vmatpush3.bf16.xpose.msra.mxu1 %v6403_v5  ;;  %v583_v28 = vadd.f32 %v5097_v50, %v6296_v21  ;;  %v745_v50 = vmul.bf16 %v6342_v12, %v6259_v46 }
 0x242   :  { %v663_v15 = vadd.f32 %v6367_v44, %v662_v16  ;;  %v5098_v47 = vpop.f32.mrb[22].mxu1  ;;  %v5110_v7 = vpop.f32.mrb[14].mxu0  ;;  %5133 = vmatprep.mubr.msk.bf16.mxu1 %vm5826_vm1, %v7884_v20  ;;  %5137 = vmatprep.subr.bf16.mxu1 %v7884_v20  ;;  %v575_v36 = vadd.f32 %v6296_v21, %v574_v45 }
 0x243   :  { %v586_v8 = vadd.f32 %v5098_v47, %v6296_v21  ;;  %v674_v9 = vadd.f32 %v5110_v7, %v6367_v44  ;;  %v577_v62 = vpop.f32.mrb[23].mxu1  ;;  %v665_v24 = vpop.f32.mrb[15].mxu0  ;;  %5155 = vmatprep.subr.bf16.mxu0 %v7884_v20 }
 0x244   :  { %v578_v58 = vadd.f32 %v6296_v21, %v577_v62  ;;  %v666_v59 = vadd.f32 %v6367_v44, %v665_v24  ;;  %v744_v62 = vmul.bf16 %v6342_v12, %v6344_v25 }
 0x245   :  { %v724_v16 = vpack.c.bf16 %v586_v8, %v583_v28  ;;  %v6418_v13 = vpack.c.bf16 %v674_v9, %v671_v29 }
 0x246   :  { %v723_v47 = vpack.c.bf16 %v578_v58, %v575_v36  ;;  %v6422_v7 = vpack.c.bf16 %v666_v59, %v663_v15  ;;  %v6436_v15 = vsel %vm61_vm0, %v720_v57, 0  ;;  %v747_v57 = vmul.bf16 %v6342_v12, %v6279_v37 }
 0x247   :  { %v6461_v59 = vsel %vm61_vm0, %v722_v56, 0 }
 0x248   :  { %v5113_v41 = vpop.f32.mrb[16].mxu0  ;;  %5146 = vmatmul.mubr.msk.bf16.vlgmr.msra.gmra.mrb[24].mxu0 %vm61_vm0, %v745_v50  ;;  %v6428_v45 = vsel %vm61_vm0, %v723_v47, 0  ;;  %5134 = vmatmul.mubr.msk.bf16.vlgmr.msra.gmra.mrb[32].mxu1 %vm61_vm0, %v743_v30 }
 0x249   :  { %v687_v21 = vadd.f32 %v5113_v41, %v6367_v44  ;;  %v678_v29 = vpop.f32.mrb[17].mxu0  ;;  %5156 = vmatpush3.bf16.xpose.msra.mxu0 %v6428_v45  ;;  %5138 = vmatpush3.bf16.xpose.msra.mxu1 %v6436_v15 }
 0x24a   :  { %v679_v28 = vadd.f32 %v6367_v44, %v678_v29  ;;  %v5114_v8 = vpop.f32.mrb[18].mxu0  ;;  %5139 = vmatprep.mubr.msk.bf16.mxu1 %vm5826_vm1, %v7884_v20  ;;  %5157 = vmatprep.mubr.msk.bf16.mxu0 %vm5826_vm1, %v7884_v20 }
 0x24b   :  { %v690_v41 = vadd.f32 %v5114_v8, %v6367_v44  ;;  %v681_v30 = vpop.f32.mrb[19].mxu0  ;;  %5149 = vmatprep.subr.bf16.mxu1 %v7884_v20  ;;  %5167 = vmatprep.subr.bf16.mxu0 %v7884_v20 }
 0x24c   :  { %v682_v60 = vadd.f32 %v6367_v44, %v681_v30  ;;  %v6482_v30 = vsel %vm61_vm0, %v724_v16, 0  ;;  %v6498_v16 = vld [vmem:[%s7880_s10] sm:$0xff] }
 0x24d   :  { %v6449_v6 = vpack.c.bf16 %v690_v41, %v687_v21  ;;  %v746_v41 = vmul.bf16 %v6342_v12, %v6257_v10 }
 0x24e   :  { %v6453_v9 = vpack.c.bf16 %v682_v60, %v679_v28 }
 0x250   :  { %v5117_v24 = vpop.f32.mrb[20].mxu0  ;;  %5158 = vmatmul.mubr.msk.bf16.vlgmr.msra.gmra.mrb[28].mxu0 %vm61_vm0, %v747_v57  ;;  %5140 = vmatmul.mubr.msk.bf16.vlgmr.msra.gmra.mrb[36].mxu1 %vm61_vm0, %v744_v62  ;;  %v6503_v57 = vld [vmem:[%s7880_s10 + $0x8] sm:$0xff] }
 0x251   :  { %v703_v36 = vadd.f32 %v5117_v24, %v6367_v44  ;;  %v694_v58 = vpop.f32.mrb[21].mxu0  ;;  %5168 = vmatpush3.bf16.msra.mxu0 %v6393_v4  ;;  %5150 = vmatpush3.bf16.xpose.msra.mxu1 %v6461_v59 }
 0x252   :  { %v695_v50 = vadd.f32 %v6367_v44, %v694_v58  ;;  %v5118_v47 = vpop.f32.mrb[22].mxu0  ;;  %5151 = vmatprep.mubr.msk.bf16.mxu1 %vm5826_vm1, %v7884_v20  ;;  %5161 = vmatprep.subr.bf16.mxu1 %v7884_v20 }
 0x253   :  { %v706_v21 = vadd.f32 %v5118_v47, %v6367_v44  ;;  %v697_v29 = vpop.f32.mrb[23].mxu0  ;;  %5169 = vmatprep.mubr.msk.bf16.mxu0 %vm5826_vm1, %v7884_v20  ;;  %5179 = vmatprep.subr.bf16.mxu0 %v7884_v20 }
 0x254   :  { %v698_v56 = vadd.f32 %v6367_v44, %v697_v29  ;;  %v748_v44 = vmul.bf16 %v6342_v12, %v6277_v61 }
 0x255   :  { %v6474_v28 = vpack.c.bf16 %v706_v21, %v703_v36 }
 0x256   :  { %v6476_v8 = vpack.c.bf16 %v698_v56, %v695_v50 }
 0x258   :  { %5152 = vmatmul.mubr.msk.bf16.vlgmr.msra.gmra.mrb[40].mxu1 %vm61_vm0, %v746_v41 }
 0x259   :  { %5162 = vmatpush3.bf16.xpose.msra.mxu1 %v6482_v30  ;;  %5163 = vmatprep.mubr.msk.bf16.mxu1 %vm5826_vm1, %v7884_v20 }
 0x25a   :  { %5173 = vmatprep.subr.bf16.mxu1 %v7884_v20 }
 0x260   :  { %5164 = vmatmul.mubr.msk.bf16.vlgmr.msra.gmra.mrb[44].mxu1 %vm61_vm0, %v748_v44 }
 0x261   :  { %5174 = vmatpush3.bf16.msra.mxu1 %v6391_v35  ;;  %5175 = vmatprep.mubr.msk.bf16.mxu1 %vm5826_vm1, %v7884_v20 }
 0x262   :  { %5185 = vmatprep.subr.bf16.mxu1 %v7884_v20 }
 0x30b   :  { %v789_v60 = vpop.f32.mrb[24].mxu1 }
 0x30c   :  { %v6506_v12 = vadd.f32 %v6498_v16, %v789_v60  ;;  %v5123_v62 = vpop.f32.mrb[25].mxu1 }
 0x30d   :  { %v792_v24 = vpop.f32.mrb[26].mxu1 }
 0x30e   :  { %v6509_v36 = vadd.f32 %v6503_v57, %v792_v24  ;;  %v5124_v58 = vpop.f32.mrb[27].mxu1  ;;  %v1144_v50 = vsel %vm1143_vm2, %v6506_v12, -inf }
 0x30f   :  { %1145 = vmax.xlane.f32.xlu0 %v1144_v50 }
 0x310   :  { %v1147_v47 = vsel %vm1143_vm2, %v6509_v36, -inf }
 0x311   :  { %1148 = vmax.xlane.f32.xlu1 %v1147_v47 }
 0x313   :  { %v836_v21 = vpop.f32.mrb[28].mxu1 }
 0x314   :  { %v6516_v29 = vadd.f32 %v6498_v16, %v836_v21  ;;  %v5129_v56 = vpop.f32.mrb[29].mxu1 }
 0x315   :  { %v839_v41 = vpop.f32.mrb[30].mxu1 }
 0x316   :  { %v6519_v44 = vadd.f32 %v6503_v57, %v839_v41  ;;  %v5130_v60 = vpop.f32.mrb[31].mxu1  ;;  %v1150_v62 = vsel %vm1143_vm2, %v6516_v29, -inf }
 0x317   :  { %1151 = vmax.xlane.f32.xlu0 %v1150_v62 }
 0x318   :  { %v1153_v24 = vsel %vm1143_vm2, %v6519_v44, -inf }
 0x319   :  { %1154 = vmax.xlane.f32.xlu1 %v1153_v24 }
 0x31b   :  { %v977_v58 = vpop.f32.mrb[24].mxu0  ;;  %v883_v50 = vpop.f32.mrb[32].mxu1 }
 0x31c   :  { %v5147_v47 = vpop.f32.mrb[25].mxu0  ;;  %v6526_v21 = vadd.f32 %v6498_v16, %v883_v50  ;;  %v5135_v56 = vpop.f32.mrb[33].mxu1 }
 0x31d   :  { %v980_v1 = vpop.f32.mrb[26].mxu0  ;;  %v886_v63 = vpop.f32.mrb[34].mxu1 }
 0x31e   :  { %v5148_v41 = vpop.f32.mrb[27].mxu0  ;;  %v6529_v60 = vadd.f32 %v6503_v57, %v886_v63  ;;  %v5136_v3 = vpop.f32.mrb[35].mxu1  ;;  %v1156_v62 = vsel %vm1143_vm2, %v6526_v21, -inf }
 0x31f   :  { %1157 = vmax.xlane.f32.xlu0 %v1156_v62  ;;  %v6539_v3 = vadd.f32 %v6498_v16, %v977_v58 }
 0x320   :  { %v1159_v24 = vsel %vm1143_vm2, %v6529_v60, -inf }
 0x321   :  { %1160 = vmax.xlane.f32.xlu1 %v1159_v24 }
 0x323   :  { %v1071_v47 = vpop.f32.mrb[28].mxu0  ;;  %v930_v49 = vpop.f32.mrb[36].mxu1 }
 0x324   :  { %v5159_v50 = vpop.f32.mrb[29].mxu0  ;;  %v6536_v56 = vadd.f32 %v6498_v16, %v930_v49  ;;  %v5141_v52 = vpop.f32.mrb[37].mxu1 }
 0x325   :  { %v1074_v41 = vpop.f32.mrb[30].mxu0  ;;  %v933_v38 = vpop.f32.mrb[38].mxu1  ;;  %v6547_v50 = vadd.f32 %v6503_v57, %v980_v1  ;;  %v1168_v52 = vsel %vm1143_vm2, %v6539_v3, -inf  ;;  %v6559_v1 = vadd.f32 %v6498_v16, %v1071_v47 }
 0x326   :  { %v5160_v63 = vpop.f32.mrb[31].mxu0  ;;  %v6542_v18 = vadd.f32 %v6503_v57, %v933_v38  ;;  %v5142_v62 = vpop.f32.mrb[39].mxu1  ;;  %v1162_v24 = vsel %vm1143_vm2, %v6536_v56, -inf }
 0x327   :  { %1163 = vmax.xlane.f32.xlu0 %v1162_v24  ;;  %v1171_v62 = vsel %vm1143_vm2, %v6547_v50, -inf }
 0x328   :  { %v1165_v49 = vsel %vm1143_vm2, %v6542_v18, -inf }
 0x329   :  { %1166 = vmax.xlane.f32.xlu1 %v1165_v49 }
 0x32b   :  { %1169 = vmax.xlane.f32.xlu0 %v1168_v52  ;;  %v1024_v58 = vpop.f32.mrb[40].mxu1 }
 0x32c   :  { %v6554_v38 = vadd.f32 %v6498_v16, %v1024_v58  ;;  %v5153_v63 = vpop.f32.mrb[41].mxu1  ;;  %v6567_v58 = vadd.f32 %v6503_v57, %v1074_v41 }
 0x32d   :  { %1172 = vmax.xlane.f32.xlu1 %v1171_v62  ;;  %v1027_v24 = vpop.f32.mrb[42].mxu1  ;;  %v1180_v62 = vsel %vm1143_vm2, %v6559_v1, -inf }
 0x32e   :  { %v6562_v40 = vadd.f32 %v6503_v57, %v1027_v24  ;;  %v5154_v49 = vpop.f32.mrb[43].mxu1  ;;  %v1174_v52 = vsel %vm1143_vm2, %v6554_v38, -inf  ;;  %v1183_v43 = vsel %vm1143_vm2, %v6567_v58, -inf }
 0x32f   :  { %1175 = vmax.xlane.f32.xlu0 %v1174_v52 }
 0x330   :  { %v1177_v63 = vsel %vm1143_vm2, %v6562_v40, -inf }
 0x331   :  { %1178 = vmax.xlane.f32.xlu1 %v1177_v63 }
 0x333   :  { %1181 = vmax.xlane.f32.xlu0 %v1180_v62  ;;  %v1118_v47 = vpop.f32.mrb[44].mxu1 }
 0x334   :  { %v6574_v24 = vadd.f32 %v6498_v16, %v1118_v47  ;;  %v5165_v49 = vpop.f32.mrb[45].mxu1 }
 0x335   :  { %1184 = vmax.xlane.f32.xlu1 %v1183_v43  ;;  %v1121_v52 = vpop.f32.mrb[46].mxu1 }
 0x336   :  { %v6579_v41 = vadd.f32 %v6503_v57, %v1121_v52  ;;  %v5166_v17 = vpop.f32.mrb[47].mxu1  ;;  %v1186_v63 = vsel %vm1143_vm2, %v6574_v24, -inf }
 0x337   :  { %1187 = vmax.xlane.f32.xlu0 %v1186_v63 }
 0x338   :  { %v1189_v62 = vsel %vm1143_vm2, %v6579_v41, -inf }
 0x339   :  { %1190 = vmax.xlane.f32.xlu1 %v1189_v62 }
 0x39c   :  { %v1146_v16 = vpop.xlane.xlu0 %1145 }
 0x39d   :  { %v1192_v47 = vsub.f32 %v6506_v12, %v1146_v16 }
 0x39e   :  { %v1149_v49 = vpop.xlane.xlu1 %1148 }
 0x39f   :  { %v1208_v2 = vmul.f32 1.442695, %v1192_v47  ;;  %v1193_v43 = vsub.f32 %v6509_v36, %v1149_v49 }
 0x3a1   :  { %5569 = vpow2.f32 %v1208_v2  ;;  %v1210_v48 = vmul.f32 1.442695, %v1193_v43 }
 0x3a3   :  { %5571 = vpow2.f32 %v1210_v48 }
 0x3a4   :  { %v1152_v57 = vpop.xlane.xlu0 %1151 }
 0x3a5   :  { %v1194_v17 = vsub.f32 %v6516_v29, %v1152_v57 }
 0x3a6   :  { %v1155_v52 = vpop.xlane.xlu1 %1154 }
 0x3a7   :  { %v1212_v51 = vmul.f32 1.442695, %v1194_v17  ;;  %v1195_v63 = vsub.f32 %v6519_v44, %v1155_v52 }
 0x3a9   :  { %5573 = vpow2.f32 %v1212_v51  ;;  %v1214_v14 = vmul.f32 1.442695, %v1195_v63 }
 0x3ab   :  { %v6589_v62 = vpop.eup %5569  ;;  %5575 = vpow2.f32 %v1214_v14 }
 0x3ac   :  { %v1158_v12 = vpop.xlane.xlu0 %1157  ;;  %v1240_v16 = vsel %vm1143_vm2, %v6589_v62, 0.0 }
 0x3ad   :  { %v6593_v36 = vpop.eup %5571  ;;  %v1196_v48 = vsub.f32 %v6526_v21, %v1158_v12  ;;  %1241 = vadd.xlane.f32.xlu0 %v1240_v16 }
 0x3ae   :  { %v1161_v2 = vpop.xlane.xlu1 %1160  ;;  %v1243_v29 = vsel %vm1143_vm2, %v6593_v36, 0.0 }
 0x3af   :  { %v1216_v47 = vmul.f32 1.442695, %v1196_v48  ;;  %v1197_v51 = vsub.f32 %v6529_v60, %v1161_v2  ;;  %1244 = vadd.xlane.f32.xlu1 %v1243_v29 }
 0x3b1   :  { %5577 = vpow2.f32 %v1216_v47  ;;  %v1218_v44 = vmul.f32 1.442695, %v1197_v51 }
 0x3b3   :  { %v6599_v14 = vpop.eup %5573  ;;  %5579 = vpow2.f32 %v1218_v44 }
 0x3b4   :  { %v1164_v49 = vpop.xlane.xlu0 %1163  ;;  %v1246_v43 = vsel %vm1143_vm2, %v6599_v14, 0.0 }
 0x3b5   :  { %v6603_v57 = vpop.eup %5575  ;;  %v1198_v21 = vsub.f32 %v6536_v56, %v1164_v49  ;;  %1247 = vadd.xlane.f32.xlu0 %v1246_v43 }
 0x3b6   :  { %v1167_v17 = vpop.xlane.xlu1 %1166  ;;  %v1249_v52 = vsel %vm1143_vm2, %v6603_v57, 0.0 }
 0x3b7   :  { %v1220_v60 = vmul.f32 1.442695, %v1198_v21  ;;  %v1199_v63 = vsub.f32 %v6542_v18, %v1167_v17  ;;  %1250 = vadd.xlane.f32.xlu1 %v1249_v52 }
 0x3b8   :  { %v1170_v12 = vpop.xlane.xlu0 %1169 }
 0x3b9   :  { %5581 = vpow2.f32 %v1220_v60  ;;  %v1222_v16 = vmul.f32 1.442695, %v1199_v63  ;;  %v1200_v48 = vsub.f32 %v6539_v3, %v1170_v12 }
 0x3ba   :  { %v1173_v2 = vpop.xlane.xlu1 %1172 }
 0x3bb   :  { %v6610_v29 = vpop.eup %5577  ;;  %5583 = vpow2.f32 %v1222_v16  ;;  %v1224_v47 = vmul.f32 1.442695, %v1200_v48  ;;  %v1201_v56 = vsub.f32 %v6547_v50, %v1173_v2 }
 0x3bc   :  { %v1176_v51 = vpop.xlane.xlu0 %1175  ;;  %v1252_v44 = vsel %vm1143_vm2, %v6610_v29, 0.0 }
 0x3bd   :  { %v6615_v49 = vpop.eup %5579  ;;  %5585 = vpow2.f32 %v1224_v47  ;;  %v1226_v18 = vmul.f32 1.442695, %v1201_v56  ;;  %v1202_v43 = vsub.f32 %v6554_v38, %v1176_v51  ;;  %1253 = vadd.xlane.f32.xlu0 %v1252_v44 }
 0x3be   :  { %v1179_v21 = vpop.xlane.xlu1 %1178  ;;  %v1255_v3 = vsel %vm1143_vm2, %v6615_v49, 0.0 }
 0x3bf   :  { %5587 = vpow2.f32 %v1226_v18  ;;  %v1228_v17 = vmul.f32 1.442695, %v1202_v43  ;;  %v1203_v52 = vsub.f32 %v6562_v40, %v1179_v21  ;;  %1256 = vadd.xlane.f32.xlu1 %v1255_v3 }
 0x3c0   :  { %v1182_v50 = vpop.xlane.xlu0 %1181 }
 0x3c1   :  { %5589 = vpow2.f32 %v1228_v17  ;;  %v1230_v60 = vmul.f32 1.442695, %v1203_v52  ;;  %v1204_v63 = vsub.f32 %v6559_v1, %v1182_v50 }
 0x3c2   :  { %v1185_v12 = vpop.xlane.xlu1 %1184 }
 0x3c3   :  { %v6622_v16 = vpop.eup %5581  ;;  %5591 = vpow2.f32 %v1230_v60  ;;  %v1232_v38 = vmul.f32 1.442695, %v1204_v63  ;;  %v1205_v48 = vsub.f32 %v6567_v58, %v1185_v12 }
 0x3c4   :  { %v1188_v2 = vpop.xlane.xlu0 %1187  ;;  %v1258_v47 = vsel %vm1143_vm2, %v6622_v16, 0.0 }
 0x3c5   :  { %v6627_v56 = vpop.eup %5583  ;;  %5593 = vpow2.f32 %v1232_v38  ;;  %v1234_v40 = vmul.f32 1.442695, %v1205_v48  ;;  %v1206_v51 = vsub.f32 %v6574_v24, %v1188_v2  ;;  %1259 = vadd.xlane.f32.xlu0 %v1258_v47 }
 0x3c6   :  { %v1191_v44 = vpop.xlane.xlu1 %1190  ;;  %v1261_v1 = vsel %vm1143_vm2, %v6627_v56, 0.0 }
 0x3c7   :  { %v6632_v18 = vpop.eup %5585  ;;  %5595 = vpow2.f32 %v1234_v40  ;;  %v1236_v43 = vmul.f32 1.442695, %v1206_v51  ;;  %v1207_v58 = vsub.f32 %v6579_v41, %v1191_v44  ;;  %1262 = vadd.xlane.f32.xlu1 %v1261_v1 }
 0x3c8   :  { %v1264_v21 = vsel %vm1143_vm2, %v6632_v18, 0.0 }
 0x3c9   :  { %v6637_v3 = vpop.eup %5587  ;;  %5597 = vpow2.f32 %v1236_v43  ;;  %v1238_v17 = vmul.f32 1.442695, %v1207_v58  ;;  %1265 = vadd.xlane.f32.xlu0 %v1264_v21 }
 0x3ca   :  { %v1267_v24 = vsel %vm1143_vm2, %v6637_v3, 0.0 }
 0x3cb   :  { %v6641_v52 = vpop.eup %5589  ;;  %5599 = vpow2.f32 %v1238_v17  ;;  %1268 = vadd.xlane.f32.xlu1 %v1267_v24 }
 0x3cc   :  { %v1270_v50 = vsel %vm1143_vm2, %v6641_v52, 0.0 }
 0x3cd   :  { %v6645_v41 = vpop.eup %5591  ;;  %1271 = vadd.xlane.f32.xlu0 %v1270_v50 }
 0x3ce   :  { %v1273_v60 = vsel %vm1143_vm2, %v6645_v41, 0.0 }
 0x3cf   :  { %v6649_v63 = vpop.eup %5593  ;;  %1274 = vadd.xlane.f32.xlu1 %v1273_v60 }
 0x3d0   :  { %v1276_v12 = vsel %vm1143_vm2, %v6649_v63, 0.0 }
 0x3d1   :  { %v6653_v38 = vpop.eup %5595  ;;  %1277 = vadd.xlane.f32.xlu0 %v1276_v12 }
 0x3d2   :  { %v1279_v48 = vsel %vm1143_vm2, %v6653_v38, 0.0 }
 0x3d3   :  { %v6657_v2 = vpop.eup %5597  ;;  %1280 = vadd.xlane.f32.xlu1 %v1279_v48 }
 0x3d4   :  { %v1282_v47 = vsel %vm1143_vm2, %v6657_v2, 0.0 }
 0x3d5   :  { %v6661_v40 = vpop.eup %5599  ;;  %1283 = vadd.xlane.f32.xlu0 %v1282_v47 }
 0x3d6   :  { %v1285_v51 = vsel %vm1143_vm2, %v6661_v40, 0.0 }
 0x3d7   :  { %1286 = vadd.xlane.f32.xlu1 %v1285_v51 }
 0x43a   :  { %v1242_v44 = vpop.xlane.xlu0 %1241 }
 0x43b   :  { %5601 = vrcp.f32 %v1242_v44 }
 0x43c   :  { %v1245_v1 = vpop.xlane.xlu1 %1244 }
 0x43d   :  { %5603 = vrcp.f32 %v1245_v1 }
 0x442   :  { %v1248_v43 = vpop.xlane.xlu0 %1247 }
 0x443   :  { %5605 = vrcp.f32 %v1248_v43 }
 0x444   :  { %v1251_v58 = vpop.xlane.xlu1 %1250 }
 0x445   :  { %v5602_v21 = vpop.eup %5601  ;;  %5607 = vrcp.f32 %v1251_v58 }
 0x446   :  { %v1304_v24 = vmul.f32 %v5602_v21, %v6589_v62 }
 0x447   :  { %v5604_v17 = vpop.eup %5603 }
 0x448   :  { %v1305_v50 = vmul.f32 %v5604_v17, %v6593_v36 }
 0x44a   :  { %v1254_v60 = vpop.xlane.xlu0 %1253  ;;  %v1320_v12 = vpack.c.bf16 %v1305_v50, %v1304_v24 }
 0x44b   :  { %5609 = vrcp.f32 %v1254_v60 }
 0x44c   :  { %5170 = vmatmul.mubr.msk.bf16.vlgmr.msra.gmra.mrb[32].mxu0 %vm1143_vm2, %v1320_v12  ;;  %v1257_v48 = vpop.xlane.xlu1 %1256 }
 0x44d   :  { %v5606_v47 = vpop.eup %5605  ;;  %5180 = vmatpush3.bf16.msra.mxu0 %v6422_v7  ;;  %5611 = vrcp.f32 %v1257_v48  ;;  %5181 = vmatprep.mubr.msk.bf16.mxu0 %vm5826_vm1, %v7884_v20 }
 0x44e   :  { %5191 = vmatprep.subr.bf16.mxu0 %v7884_v20  ;;  %v1306_v62 = vmul.f32 %v5606_v47, %v6599_v14 }
 0x44f   :  { %v5608_v51 = vpop.eup %5607 }
 0x450   :  { %v1307_v36 = vmul.f32 %v5608_v51, %v6603_v57 }
 0x452   :  { %v1260_v44 = vpop.xlane.xlu0 %1259  ;;  %v1321_v1 = vpack.c.bf16 %v1307_v36, %v1306_v62 }
 0x453   :  { %5613 = vrcp.f32 %v1260_v44 }
 0x454   :  { %5176 = vmatmul.mubr.msk.bf16.vlgmr.msra.gmra.mrb[48].mxu1 %vm1143_vm2, %v1321_v1  ;;  %v1263_v43 = vpop.xlane.xlu1 %1262 }
 0x455   :  { %v5610_v58 = vpop.eup %5609  ;;  %5186 = vmatpush3.bf16.msra.mxu1 %v6418_v13  ;;  %5615 = vrcp.f32 %v1263_v43  ;;  %5187 = vmatprep.mubr.msk.bf16.mxu1 %vm5826_vm1, %v7884_v20 }
 0x456   :  { %v1266_v21 = vpop.xlane.xlu0 %1265  ;;  %5197 = vmatprep.subr.bf16.mxu1 %v7884_v20  ;;  %v1308_v14 = vmul.f32 %v5610_v58, %v6610_v29 }
 0x457   :  { %v5612_v17 = vpop.eup %5611  ;;  %5617 = vrcp.f32 %v1266_v21 }
 0x458   :  { %v1309_v57 = vmul.f32 %v5612_v17, %v6615_v49  ;;  %v1269_v24 = vpop.xlane.xlu1 %1268 }
 0x459   :  { %5619 = vrcp.f32 %v1269_v24 }
 0x45a   :  { %v1272_v50 = vpop.xlane.xlu0 %1271  ;;  %v1322_v60 = vpack.c.bf16 %v1309_v57, %v1308_v14 }
 0x45b   :  { %5621 = vrcp.f32 %v1272_v50 }
 0x45c   :  { %5182 = vmatmul.mubr.msk.bf16.vlgmr.msra.gmra.mrb[36].mxu0 %vm1143_vm2, %v1322_v60  ;;  %v1275_v12 = vpop.xlane.xlu1 %1274 }
 0x45d   :  { %v5614_v48 = vpop.eup %5613  ;;  %5192 = vmatpush3.bf16.msra.mxu0 %v6453_v9  ;;  %5623 = vrcp.f32 %v1275_v12  ;;  %5193 = vmatprep.mubr.msk.bf16.mxu0 %vm5826_vm1, %v7884_v20 }
 0x45e   :  { %v1278_v47 = vpop.xlane.xlu0 %1277  ;;  %5203 = vmatprep.subr.bf16.mxu0 %v7884_v20  ;;  %v1310_v49 = vmul.f32 %v5614_v48, %v6622_v16 }
 0x45f   :  { %v5616_v29 = vpop.eup %5615  ;;  %5625 = vrcp.f32 %v1278_v47 }
 0x460   :  { %v1311_v51 = vmul.f32 %v5616_v29, %v6627_v56  ;;  %v1281_v62 = vpop.xlane.xlu1 %1280 }
 0x461   :  { %v5618_v36 = vpop.eup %5617  ;;  %5627 = vrcp.f32 %v1281_v62 }
 0x462   :  { %v1284_v44 = vpop.xlane.xlu0 %1283  ;;  %v1323_v1 = vpack.c.bf16 %v1311_v51, %v1310_v49  ;;  %v1312_v58 = vmul.f32 %v5618_v36, %v6632_v18 }
 0x463   :  { %v5620_v43 = vpop.eup %5619  ;;  %5629 = vrcp.f32 %v1284_v44 }
 0x464   :  { %v1313_v21 = vmul.f32 %v5620_v43, %v6637_v3  ;;  %5188 = vmatmul.mubr.msk.bf16.vlgmr.msra.gmra.mrb[52].mxu1 %vm1143_vm2, %v1323_v1  ;;  %v1287_v17 = vpop.xlane.xlu1 %1286 }
 0x465   :  { %v5622_v14 = vpop.eup %5621  ;;  %5198 = vmatpush3.bf16.msra.mxu1 %v6449_v6  ;;  %5631 = vrcp.f32 %v1287_v17  ;;  %5199 = vmatprep.mubr.msk.bf16.mxu1 %vm5826_vm1, %v7884_v20 }
 0x466   :  { %v1324_v16 = vpack.c.bf16 %v1313_v21, %v1312_v58  ;;  %5209 = vmatprep.subr.bf16.mxu1 %v7884_v20  ;;  %v1314_v57 = vmul.f32 %v5622_v14, %v6641_v52 }
 0x467   :  { %v5624_v56 = vpop.eup %5623 }
 0x468   :  { %v1315_v18 = vmul.f32 %v5624_v56, %v6645_v41  ;;  %5194 = vmatmul.mubr.msk.bf16.vlgmr.msra.gmra.mrb[40].mxu0 %vm1143_vm2, %v1324_v16 }
 0x469   :  { %v5626_v3 = vpop.eup %5625  ;;  %5204 = vmatpush3.bf16.msra.mxu0 %v6476_v8  ;;  %5205 = vmatprep.mubr.msk.bf16.mxu0 %vm5826_vm1, %v7884_v20 }
 0x46a   :  { %v1325_v24 = vpack.c.bf16 %v1315_v18, %v1314_v57  ;;  %5215 = vmatprep.subr.bf16.mxu0 %v7884_v20  ;;  %v1316_v60 = vmul.f32 %v5626_v3, %v6649_v63 }
 0x46b   :  { %v5628_v50 = vpop.eup %5627 }
 0x46c   :  { %v1317_v12 = vmul.f32 %v5628_v50, %v6653_v38  ;;  %5200 = vmatmul.mubr.msk.bf16.vlgmr.msra.gmra.mrb[56].mxu1 %vm1143_vm2, %v1325_v24  ;;  %v7896_v38 = vmul.bf16 %v6222_v22, %v6279_v37 }
 0x46d   :  { %v5630_v52 = vpop.eup %5629  ;;  %5210 = vmatpush3.bf16.msra.mxu1 %v6474_v28  ;;  %5211 = vmatprep.mubr.msk.bf16.mxu1 %vm5826_vm1, %v7884_v20 }
 0x46e   :  { %v1326_v41 = vpack.c.bf16 %v1317_v12, %v1316_v60  ;;  %5221 = vmatprep.subr.bf16.mxu1 %v7884_v20  ;;  %v1318_v47 = vmul.f32 %v5630_v52, %v6657_v2  ;;  %v7897_v2 = vmul.bf16 %v6222_v22, %v6277_v61 }
 0x46f   :  { %v5632_v48 = vpop.eup %5631 }
 0x470   :  { %v1319_v29 = vmul.f32 %v5632_v48, %v6661_v40  ;;  %5206 = vmatmul.mubr.msk.bf16.vlgmr.msra.gmra.mrb[44].mxu0 %vm1143_vm2, %v1326_v41 }
 0x471   :  { %5217 = vmatprep.mubr.msk.bf16.mxu0 %vm5826_vm1, %v7884_v20 }
 0x472   :  { %5216 = vmatpush3.bf16.xpose.msra.mxu0 %v6325_v53  ;;  %v1327_v63 = vpack.c.bf16 %v1319_v29, %v1318_v47 }
 0x473   :  { %5227 = vmatprep.subr.bf16.mxu0 %v7884_v20 }
 0x474   :  { %5212 = vmatmul.mubr.msk.bf16.vlgmr.msra.gmra.mrb[60].mxu1 %vm1143_vm2, %v1327_v63 }
 0x475   :  { %5223 = vmatprep.mubr.msk.bf16.mxu1 %vm5826_vm1, %v7884_v20 }
 0x476   :  { %5222 = vmatpush3.bf16.xpose.msra.mxu1 %v6371_v23 }
 0x477   :  { %5233 = vmatprep.subr.bf16.mxu1 %v7884_v20 }
 0x479   :  { %5218 = vmatmul.mubr.msk.bf16.vlgmr.msra.gmra.mrb[48].mxu0 %vm61_vm0, %v1726_v42  ;;  %v7894_v42 = vmul.bf16 %v6222_v22, %v6259_v46 }
 0x47a   :  { %5228 = vmatpush3.bf16.xpose.msra.mxu0 %v6403_v5  ;;  %5229 = vmatprep.mubr.msk.bf16.mxu0 %vm5826_vm1, %v7884_v20 }
 0x47b   :  { %5239 = vmatprep.subr.bf16.mxu0 %v7884_v20 }
 0x47d   :  { %5224 = vmatmul.mubr.msk.bf16.vlgmr.msra.gmra.mrb[64].mxu1 %vm61_vm0, %v1727_v39  ;;  %v7893_v39 = vmul.bf16 %v6222_v22, %v6344_v25 }
 0x47e   :  { %5234 = vmatpush3.bf16.xpose.msra.mxu1 %v6436_v15  ;;  %5235 = vmatprep.mubr.msk.bf16.mxu1 %vm5826_vm1, %v7884_v20 }
 0x47f   :  { %5245 = vmatprep.subr.bf16.mxu1 %v7884_v20 }
 0x481   :  { %5230 = vmatmul.mubr.msk.bf16.vlgmr.msra.gmra.mrb[52].mxu0 %vm61_vm0, %v1728_v54  ;;  %v7895_v54 = vmul.bf16 %v6222_v22, %v6257_v10 }
 0x482   :  { %5240 = vmatpush3.bf16.xpose.msra.mxu0 %v6398_v11  ;;  %5241 = vmatprep.mubr.msk.bf16.mxu0 %vm5826_vm1, %v7884_v20 }
 0x483   :  { %5251 = vmatprep.subr.bf16.mxu0 %v7884_v20 }
 0x485   :  { %5236 = vmatmul.mubr.msk.bf16.vlgmr.msra.gmra.mrb[68].mxu1 %vm61_vm0, %v7893_v39 }
 0x486   :  { %5246 = vmatpush3.bf16.xpose.msra.mxu1 %v6461_v59  ;;  %5247 = vmatprep.mubr.msk.bf16.mxu1 %vm5826_vm1, %v7884_v20 }
 0x487   :  { %5257 = vmatprep.subr.bf16.mxu1 %v7884_v20 }
 0x489   :  { %5242 = vmatmul.mubr.msk.bf16.vlgmr.msra.gmra.mrb[56].mxu0 %vm61_vm0, %v7894_v42 }
 0x48a   :  { %5252 = vmatpush3.bf16.xpose.msra.mxu0 %v6428_v45  ;;  %5253 = vmatprep.mubr.msk.bf16.mxu0 %vm5826_vm1, %v7884_v20 }
 0x48b   :  { %5263 = vmatprep.subr.bf16.mxu0 %v7884_v20 }
 0x48d   :  { %5248 = vmatmul.mubr.msk.bf16.vlgmr.msra.gmra.mrb[72].mxu1 %vm61_vm0, %v7895_v54 }
 0x48e   :  { %5258 = vmatpush3.bf16.xpose.msra.mxu1 %v6482_v30  ;;  %5259 = vmatprep.mubr.msk.bf16.mxu1 %vm5826_vm1, %v7884_v20 }
 0x48f   :  { %5269 = vmatprep.subr.bf16.mxu1 %v7884_v20 }
 0x491   :  { %5254 = vmatmul.mubr.msk.bf16.vlgmr.msra.gmra.mrb[60].mxu0 %vm61_vm0, %v7896_v38 }
 0x492   :  { %5264 = vmatpush3.bf16.msra.mxu0 %v6393_v4  ;;  %5265 = vmatprep.mubr.msk.bf16.mxu0 %vm5826_vm1, %v7884_v20 }
 0x493   :  { %5275 = vmatprep.subr.bf16.mxu0 %v7884_v20 }
 0x495   :  { %5260 = vmatmul.mubr.msk.bf16.vlgmr.msra.gmra.mrb[76].mxu1 %vm61_vm0, %v7897_v2 }
 0x496   :  { %5270 = vmatpush3.bf16.msra.mxu1 %v6391_v35  ;;  %5271 = vmatprep.mubr.msk.bf16.mxu1 %vm5826_vm1, %v7884_v20 }
 0x497   :  { %5281 = vmatprep.subr.bf16.mxu1 %v7884_v20 }
 0x51f   :  { %v1365_v40 = vpop.f32.mrb[32].mxu0 }
 0x520   :  { %v6786_v49 = vmul.f32 %v6231_v31, %v1365_v40  ;;  %v5171_v51 = vpop.f32.mrb[33].mxu0 }
 0x521   :  { %v1368_v62 = vpop.f32.mrb[34].mxu0 }
 0x522   :  { %v6789_v36 = vmul.f32 %v6231_v31, %v1368_v62  ;;  %v5172_v44 = vpop.f32.mrb[35].mxu0 }
 0x527   :  { %v1409_v22 = vpop.f32.mrb[48].mxu1 }
 0x528   :  { %v6792_v1 = vmul.f32 %v6231_v31, %v1409_v22  ;;  %v5177_v43 = vpop.f32.mrb[49].mxu1 }
 0x529   :  { %v1412_v58 = vpop.f32.mrb[50].mxu1 }
 0x52a   :  { %v6795_v21 = vmul.f32 %v6231_v31, %v1412_v58  ;;  %v5178_v17 = vpop.f32.mrb[51].mxu1 }
 0x52f   :  { %v1453_v14 = vpop.f32.mrb[36].mxu0 }
 0x530   :  { %v6798_v16 = vmul.f32 %v6231_v31, %v1453_v14  ;;  %v5183_v56 = vpop.f32.mrb[37].mxu0 }
 0x531   :  { %v1456_v57 = vpop.f32.mrb[38].mxu0 }
 0x532   :  { %v6801_v18 = vmul.f32 %v6231_v31, %v1456_v57  ;;  %v5184_v3 = vpop.f32.mrb[39].mxu0 }
 0x537   :  { %v1497_v24 = vpop.f32.mrb[52].mxu1 }
 0x538   :  { %v6804_v50 = vmul.f32 %v6231_v31, %v1497_v24  ;;  %v5189_v60 = vpop.f32.mrb[53].mxu1 }
 0x539   :  { %v1500_v12 = vpop.f32.mrb[54].mxu1 }
 0x53a   :  { %v6807_v52 = vmul.f32 %v6231_v31, %v1500_v12  ;;  %v5190_v41 = vpop.f32.mrb[55].mxu1 }
 0x53b   :  { %v1541_v48 = vpop.f32.mrb[40].mxu0  ;;  %v6836_v41 = vld [vmem:[%s7880_s10 + $0x10] sm:$0xff] }
 0x53c   :  { %v6810_v47 = vmul.f32 %v6231_v31, %v1541_v48  ;;  %v5195_v29 = vpop.f32.mrb[41].mxu0 }
 0x53d   :  { %v1544_v63 = vpop.f32.mrb[42].mxu0  ;;  %v6841_v29 = vld [vmem:[%s7880_s10 + $0x18] sm:$0xff] }
 0x53e   :  { %7898 = vst [vmem:[#allocation5_spill] sm:$0xff] %v6810_v47  ;;  %v6813_v39 = vmul.f32 %v6231_v31, %v1544_v63  ;;  %v5196_v42 = vpop.f32.mrb[43].mxu0 }
 0x53f   :  { %v1585_v54 = vpop.f32.mrb[56].mxu1 }
 0x540   :  { %7899 = vst [vmem:[#allocation6_spill] sm:$0xff] %v6813_v39  ;;  %v6816_v38 = vmul.f32 %v6231_v31, %v1585_v54  ;;  %v5201_v2 = vpop.f32.mrb[57].mxu1 }
 0x541   :  { %v1588_v40 = vpop.f32.mrb[58].mxu1 }
 0x542   :  { %7900 = vst [vmem:[#allocation7_spill] sm:$0xff] %v6816_v38  ;;  %v6819_v51 = vmul.f32 %v6231_v31, %v1588_v40  ;;  %v5202_v62 = vpop.f32.mrb[59].mxu1 }
 0x543   :  { %v1629_v44 = vpop.f32.mrb[44].mxu0 }
 0x544   :  { %7901 = vst [vmem:[#allocation8_spill] sm:$0xff] %v6819_v51  ;;  %v6822_v22 = vmul.f32 %v6231_v31, %v1629_v44  ;;  %v5207_v43 = vpop.f32.mrb[45].mxu0 }
 0x545   :  { %v1632_v58 = vpop.f32.mrb[46].mxu0 }
 0x546   :  { %7902 = vst [vmem:[#allocation9_spill] sm:$0xff] %v6822_v22  ;;  %v6825_v17 = vmul.f32 %v6231_v31, %v1632_v58  ;;  %v5208_v14 = vpop.f32.mrb[47].mxu0 }
 0x547   :  { %v1673_v56 = vpop.f32.mrb[60].mxu1 }
 0x548   :  { %7903 = vst [vmem:[#allocation10_spill] sm:$0xff] %v6825_v17  ;;  %v6828_v57 = vmul.f32 %v6231_v31, %v1673_v56  ;;  %v5213_v3 = vpop.f32.mrb[61].mxu1 }
 0x549   :  { %v1676_v24 = vpop.f32.mrb[62].mxu1 }
 0x54a   :  { %7904 = vst [vmem:[#allocation11_spill] sm:$0xff] %v6828_v57  ;;  %v6831_v60 = vmul.f32 %v6231_v31, %v1676_v24  ;;  %v5214_v12 = vpop.f32.mrb[63].mxu1 }
 0x54c   :  { %7905 = vst [vmem:[#allocation12_spill] sm:$0xff] %v6831_v60  ;;  %v1771_v48 = vpop.f32.mrb[48].mxu0 }
 0x54d   :  { %v6844_v63 = vadd.f32 %v6836_v41, %v1771_v48  ;;  %v5219_v42 = vpop.f32.mrb[49].mxu0 }
 0x54e   :  { %v1774_v54 = vpop.f32.mrb[50].mxu0 }
 0x54f   :  { %v6847_v31 = vadd.f32 %v6841_v29, %v1774_v54  ;;  %v5220_v2 = vpop.f32.mrb[51].mxu0  ;;  %v2105_v40 = vsel %vm1143_vm2, %v6844_v63, -inf }
 0x550   :  { %2106 = vmax.xlane.f32.xlu0 %v2105_v40  ;;  %v1815_v62 = vpop.f32.mrb[64].mxu1 }
 0x551   :  { %v6852_v44 = vadd.f32 %v6836_v41, %v1815_v62  ;;  %v5225_v43 = vpop.f32.mrb[65].mxu1  ;;  %v2108_v58 = vsel %vm1143_vm2, %v6847_v31, -inf }
 0x552   :  { %2109 = vmax.xlane.f32.xlu1 %v2108_v58  ;;  %v1818_v14 = vpop.f32.mrb[66].mxu1 }
 0x553   :  { %v6857_v56 = vadd.f32 %v6841_v29, %v1818_v14  ;;  %v5226_v3 = vpop.f32.mrb[67].mxu1  ;;  %v2111_v24 = vsel %vm1143_vm2, %v6852_v44, -inf }
 0x554   :  { %v1859_v12 = vpop.f32.mrb[52].mxu0  ;;  %2112 = vmax.xlane.f32.xlu0 %v2111_v24 }
 0x555   :  { %v6862_v48 = vadd.f32 %v6836_v41, %v1859_v12  ;;  %v5231_v42 = vpop.f32.mrb[53].mxu0  ;;  %v2114_v54 = vsel %vm1143_vm2, %v6857_v56, -inf }
 0x556   :  { %v1862_v2 = vpop.f32.mrb[54].mxu0  ;;  %2115 = vmax.xlane.f32.xlu1 %v2114_v54 }
 0x557   :  { %v6867_v40 = vadd.f32 %v6841_v29, %v1862_v2  ;;  %v5232_v62 = vpop.f32.mrb[55].mxu0  ;;  %v2117_v43 = vsel %vm1143_vm2, %v6862_v48, -inf }
 0x558   :  { %2118 = vmax.xlane.f32.xlu0 %v2117_v43  ;;  %v1903_v58 = vpop.f32.mrb[68].mxu1 }
 0x559   :  { %v6872_v14 = vadd.f32 %v6836_v41, %v1903_v58  ;;  %v5237_v3 = vpop.f32.mrb[69].mxu1  ;;  %v2120_v24 = vsel %vm1143_vm2, %v6867_v40, -inf }
 0x55a   :  { %2121 = vmax.xlane.f32.xlu1 %v2120_v24  ;;  %v1906_v12 = vpop.f32.mrb[70].mxu1 }
 0x55b   :  { %v6877_v42 = vadd.f32 %v6841_v29, %v1906_v12  ;;  %v5238_v54 = vpop.f32.mrb[71].mxu1  ;;  %v2123_v2 = vsel %vm1143_vm2, %v6872_v14, -inf }
 0x55c   :  { %v1947_v62 = vpop.f32.mrb[56].mxu0  ;;  %2124 = vmax.xlane.f32.xlu0 %v2123_v2 }
 0x55d   :  { %v6882_v43 = vadd.f32 %v6836_v41, %v1947_v62  ;;  %v5243_v58 = vpop.f32.mrb[57].mxu0  ;;  %v2126_v3 = vsel %vm1143_vm2, %v6877_v42, -inf }
 0x55e   :  { %v1950_v20 = vpop.f32.mrb[58].mxu0  ;;  %2127 = vmax.xlane.f32.xlu1 %v2126_v3 }
 0x55f   :  { %v6887_v24 = vadd.f32 %v6841_v29, %v1950_v20  ;;  %v5244_v12 = vpop.f32.mrb[59].mxu0  ;;  %v2129_v54 = vsel %vm1143_vm2, %v6882_v43, -inf }
 0x560   :  { %2130 = vmax.xlane.f32.xlu0 %v2129_v54  ;;  %v1991_v34 = vpop.f32.mrb[72].mxu1 }
 0x561   :  { %v6892_v2 = vadd.f32 %v6836_v41, %v1991_v34  ;;  %v5249_v62 = vpop.f32.mrb[73].mxu1  ;;  %v2132_v58 = vsel %vm1143_vm2, %v6887_v24, -inf }
 0x562   :  { %2133 = vmax.xlane.f32.xlu1 %v2132_v58  ;;  %v1994_v32 = vpop.f32.mrb[74].mxu1 }
 0x563   :  { %v6897_v3 = vadd.f32 %v6841_v29, %v1994_v32  ;;  %v5250_v20 = vpop.f32.mrb[75].mxu1  ;;  %v2135_v12 = vsel %vm1143_vm2, %v6892_v2, -inf }
 0x564   :  { %v2035_v55 = vpop.f32.mrb[60].mxu0  ;;  %2136 = vmax.xlane.f32.xlu0 %v2135_v12 }
 0x565   :  { %v6902_v54 = vadd.f32 %v6836_v41, %v2035_v55  ;;  %v5255_v34 = vpop.f32.mrb[61].mxu0  ;;  %v2138_v62 = vsel %vm1143_vm2, %v6897_v3, -inf }
 0x566   :  { %v2038_v60 = vpop.f32.mrb[62].mxu0  ;;  %2139 = vmax.xlane.f32.xlu1 %v2138_v62 }
 0x567   :  { %v6907_v58 = vadd.f32 %v6841_v29, %v2038_v60  ;;  %v5256_v32 = vpop.f32.mrb[63].mxu0  ;;  %v2141_v20 = vsel %vm1143_vm2, %v6902_v54, -inf }
 0x568   :  { %2142 = vmax.xlane.f32.xlu0 %v2141_v20  ;;  %v2079_v57 = vpop.f32.mrb[76].mxu1 }
 0x569   :  { %v6912_v12 = vadd.f32 %v6836_v41, %v2079_v57  ;;  %v5261_v55 = vpop.f32.mrb[77].mxu1  ;;  %v2144_v34 = vsel %vm1143_vm2, %v6907_v58, -inf }
 0x56a   :  { %2145 = vmax.xlane.f32.xlu1 %v2144_v34  ;;  %v2082_v17 = vpop.f32.mrb[78].mxu1 }
 0x56b   :  { %v6917_v62 = vadd.f32 %v6841_v29, %v2082_v17  ;;  %v5262_v60 = vpop.f32.mrb[79].mxu1  ;;  %v2147_v32 = vsel %vm1143_vm2, %v6912_v12, -inf }
 0x56c   :  { %2148 = vmax.xlane.f32.xlu0 %v2147_v32 }
 0x56d   :  { %v2150_v20 = vsel %vm1143_vm2, %v6917_v62, -inf }
 0x56e   :  { %2151 = vmax.xlane.f32.xlu1 %v2150_v20 }
 0x5dd   :  { %v2107_v57 = vpop.xlane.xlu0 %2106 }
 0x5de   :  { %v2153_v41 = vsub.f32 %v6844_v63, %v2107_v57 }
 0x5df   :  { %v2110_v55 = vpop.xlane.xlu1 %2109 }
 0x5e0   :  { %v2169_v22 = vmul.f32 1.442695, %v2153_v41  ;;  %v2154_v34 = vsub.f32 %v6847_v31, %v2110_v55 }
 0x5e1   :  { %v2113_v51 = vpop.xlane.xlu0 %2112 }
 0x5e2   :  { %5633 = vpow2.f32 %v2169_v22  ;;  %v2171_v17 = vmul.f32 1.442695, %v2154_v34  ;;  %v2155_v29 = vsub.f32 %v6852_v44, %v2113_v51 }
 0x5e3   :  { %v2116_v60 = vpop.xlane.xlu1 %2115 }
 0x5e4   :  { %5635 = vpow2.f32 %v2171_v17  ;;  %v2173_v38 = vmul.f32 1.442695, %v2155_v29  ;;  %v2156_v32 = vsub.f32 %v6857_v56, %v2116_v60 }
 0x5e5   :  { %v2119_v39 = vpop.xlane.xlu0 %2118 }
 0x5e6   :  { %5637 = vpow2.f32 %v2173_v38  ;;  %v2175_v20 = vmul.f32 1.442695, %v2156_v32  ;;  %v2157_v47 = vsub.f32 %v6862_v48, %v2119_v39 }
 0x5e7   :  { %v2122_v63 = vpop.xlane.xlu1 %2121 }
 0x5e8   :  { %5639 = vpow2.f32 %v2175_v20  ;;  %v2177_v57 = vmul.f32 1.442695, %v2157_v47  ;;  %v2158_v31 = vsub.f32 %v6867_v40, %v2122_v63 }
 0x5e9   :  { %v2125_v41 = vpop.xlane.xlu0 %2124 }
 0x5ea   :  { %5641 = vpow2.f32 %v2177_v57  ;;  %v2179_v22 = vmul.f32 1.442695, %v2158_v31  ;;  %v2159_v51 = vsub.f32 %v6872_v14, %v2125_v41 }
 0x5eb   :  { %v2128_v44 = vpop.xlane.xlu1 %2127 }
 0x5ec   :  { %v6930_v55 = vpop.eup %5633  ;;  %5643 = vpow2.f32 %v2179_v22  ;;  %v2181_v56 = vmul.f32 1.442695, %v2159_v51  ;;  %v2160_v38 = vsub.f32 %v6877_v42, %v2128_v44 }
 0x5ed   :  { %v2131_v34 = vpop.xlane.xlu0 %2130  ;;  %v2201_v39 = vsel %vm1143_vm2, %v6930_v55, 0.0 }
 0x5ee   :  { %v6935_v48 = vpop.eup %5635  ;;  %5645 = vpow2.f32 %v2181_v56  ;;  %v2183_v47 = vmul.f32 1.442695, %v2160_v38  ;;  %v2161_v40 = vsub.f32 %v6882_v43, %v2131_v34  ;;  %2202 = vadd.xlane.f32.xlu0 %v2201_v39 }
 0x5ef   :  { %v2134_v17 = vpop.xlane.xlu1 %2133  ;;  %v2204_v14 = vsel %vm1143_vm2, %v6935_v48, 0.0 }
 0x5f0   :  { %v6940_v29 = vpop.eup %5637  ;;  %5647 = vpow2.f32 %v2183_v47  ;;  %v2185_v60 = vmul.f32 1.442695, %v2161_v40  ;;  %v2162_v42 = vsub.f32 %v6887_v24, %v2134_v17  ;;  %2205 = vadd.xlane.f32.xlu1 %v2204_v14 }
 0x5f1   :  { %v2137_v32 = vpop.xlane.xlu0 %2136  ;;  %v2207_v20 = vsel %vm1143_vm2, %v6940_v29, 0.0 }
 0x5f2   :  { %v6945_v63 = vpop.eup %5639  ;;  %5649 = vpow2.f32 %v2185_v60  ;;  %v2187_v43 = vmul.f32 1.442695, %v2162_v42  ;;  %v2163_v57 = vsub.f32 %v6892_v2, %v2137_v32  ;;  %2208 = vadd.xlane.f32.xlu0 %v2207_v20 }
 0x5f3   :  { %v2140_v31 = vpop.xlane.xlu1 %2139  ;;  %v2210_v41 = vsel %vm1143_vm2, %v6945_v63, 0.0 }
 0x5f4   :  { %v6950_v22 = vpop.eup %5641  ;;  %5651 = vpow2.f32 %v2187_v43  ;;  %v2189_v24 = vmul.f32 1.442695, %v2163_v57  ;;  %v2164_v51 = vsub.f32 %v6897_v3, %v2140_v31  ;;  %2211 = vadd.xlane.f32.xlu1 %v2210_v41 }
 0x5f5   :  { %v2143_v44 = vpop.xlane.xlu0 %2142  ;;  %v2213_v56 = vsel %vm1143_vm2, %v6950_v22, 0.0 }
 0x5f6   :  { %v6955_v38 = vpop.eup %5643  ;;  %5653 = vpow2.f32 %v2189_v24  ;;  %v2191_v2 = vmul.f32 1.442695, %v2164_v51  ;;  %v2165_v34 = vsub.f32 %v6902_v54, %v2143_v44  ;;  %2214 = vadd.xlane.f32.xlu0 %v2213_v56 }
 0x5f7   :  { %v2146_v39 = vpop.xlane.xlu1 %2145  ;;  %v2216_v47 = vsel %vm1143_vm2, %v6955_v38, 0.0 }
 0x5f8   :  { %v6960_v40 = vpop.eup %5645  ;;  %5655 = vpow2.f32 %v2191_v2  ;;  %v2193_v3 = vmul.f32 1.442695, %v2165_v34  ;;  %v2166_v17 = vsub.f32 %v6907_v58, %v2146_v39  ;;  %2217 = vadd.xlane.f32.xlu1 %v2216_v47 }
 0x5f9   :  { %v2149_v14 = vpop.xlane.xlu0 %2148  ;;  %v2219_v60 = vsel %vm1143_vm2, %v6960_v40, 0.0 }
 0x5fa   :  { %v6965_v42 = vpop.eup %5647  ;;  %5657 = vpow2.f32 %v2193_v3  ;;  %v2195_v54 = vmul.f32 1.442695, %v2166_v17  ;;  %v2167_v32 = vsub.f32 %v6912_v12, %v2149_v14  ;;  %2220 = vadd.xlane.f32.xlu0 %v2219_v60 }
 0x5fb   :  { %v2152_v20 = vpop.xlane.xlu1 %2151  ;;  %v2222_v43 = vsel %vm1143_vm2, %v6965_v42, 0.0 }
 0x5fc   :  { %v6970_v57 = vpop.eup %5649  ;;  %5659 = vpow2.f32 %v2195_v54  ;;  %v2197_v58 = vmul.f32 1.442695, %v2167_v32  ;;  %v2168_v31 = vsub.f32 %v6917_v62, %v2152_v20  ;;  %2223 = vadd.xlane.f32.xlu1 %v2222_v43 }
 0x5fd   :  { %v2225_v41 = vsel %vm1143_vm2, %v6970_v57, 0.0 }
 0x5fe   :  { %v6975_v24 = vpop.eup %5651  ;;  %5661 = vpow2.f32 %v2197_v58  ;;  %v2199_v51 = vmul.f32 1.442695, %v2168_v31  ;;  %2226 = vadd.xlane.f32.xlu0 %v2225_v41 }
 0x5ff   :  { %v2228_v12 = vsel %vm1143_vm2, %v6975_v24, 0.0 }
 0x600   :  { %v6979_v44 = vpop.eup %5653  ;;  %5663 = vpow2.f32 %v2199_v51  ;;  %2229 = vadd.xlane.f32.xlu1 %v2228_v12 }
 0x601   :  { %v2231_v56 = vsel %vm1143_vm2, %v6979_v44, 0.0 }
 0x602   :  { %v6983_v62 = vpop.eup %5655  ;;  %2232 = vadd.xlane.f32.xlu0 %v2231_v56 }
 0x603   :  { %v2234_v2 = vsel %vm1143_vm2, %v6983_v62, 0.0 }
 0x604   :  { %v6987_v34 = vpop.eup %5657  ;;  %2235 = vadd.xlane.f32.xlu1 %v2234_v2 }
 0x605   :  { %v2237_v39 = vsel %vm1143_vm2, %v6987_v34, 0.0 }
 0x606   :  { %v6991_v47 = vpop.eup %5659  ;;  %2238 = vadd.xlane.f32.xlu0 %v2237_v39 }
 0x607   :  { %v2240_v3 = vsel %vm1143_vm2, %v6991_v47, 0.0 }
 0x608   :  { %v6995_v17 = vpop.eup %5661  ;;  %2241 = vadd.xlane.f32.xlu1 %v2240_v3 }
 0x609   :  { %v2243_v14 = vsel %vm1143_vm2, %v6995_v17, 0.0 }
 0x60a   :  { %v6999_v60 = vpop.eup %5663  ;;  %2244 = vadd.xlane.f32.xlu0 %v2243_v14 }
 0x60b   :  { %v2246_v54 = vsel %vm1143_vm2, %v6999_v60, 0.0 }
 0x60c   :  { %2247 = vadd.xlane.f32.xlu1 %v2246_v54 }
 0x67b   :  { %v2203_v32 = vpop.xlane.xlu0 %2202 }
 0x67c   :  { %5665 = vrcp.f32 %v2203_v32 }
 0x67d   :  { %v2206_v20 = vpop.xlane.xlu1 %2205 }
 0x67e   :  { %5667 = vrcp.f32 %v2206_v20 }
 0x67f   :  { %v2209_v43 = vpop.xlane.xlu0 %2208 }
 0x680   :  { %5669 = vrcp.f32 %v2209_v43 }
 0x681   :  { %v2212_v58 = vpop.xlane.xlu1 %2211 }
 0x682   :  { %5671 = vrcp.f32 %v2212_v58 }
 0x683   :  { %v2215_v31 = vpop.xlane.xlu0 %2214 }
 0x684   :  { %5673 = vrcp.f32 %v2215_v31 }
 0x685   :  { %v2218_v41 = vpop.xlane.xlu1 %2217 }
 0x686   :  { %v5666_v51 = vpop.eup %5665  ;;  %5675 = vrcp.f32 %v2218_v41 }
 0x687   :  { %v2221_v12 = vpop.xlane.xlu0 %2220  ;;  %v2265_v2 = vmul.f32 %v5666_v51, %v6930_v55  ;;  %v7906_v55 = vmov 0.0  }
 0x688   :  { %v5668_v56 = vpop.eup %5667  ;;  %5677 = vrcp.f32 %v2221_v12 }
 0x689   :  { %v2266_v39 = vmul.f32 %v5668_v56, %v6935_v48  ;;  %v2224_v3 = vpop.xlane.xlu1 %2223 }
 0x68a   :  { %v5670_v14 = vpop.eup %5669  ;;  %5679 = vrcp.f32 %v2224_v3 }
 0x68b   :  { %v2227_v54 = vpop.xlane.xlu0 %2226  ;;  %v2281_v32 = vpack.c.bf16 %v2266_v39, %v2265_v2  ;;  %v2267_v43 = vmul.f32 %v5670_v14, %v6940_v29 }
 0x68c   :  { %v5672_v20 = vpop.eup %5671  ;;  %5681 = vrcp.f32 %v2227_v54 }
 0x68d   :  { %v2268_v58 = vmul.f32 %v5672_v20, %v6945_v63  ;;  %5266 = vmatmul.mubr.msk.bf16.vlgmr.msra.gmra.mrb[64].mxu0 %vm1143_vm2, %v2281_v32  ;;  %v2230_v31 = vpop.xlane.xlu1 %2229 }
 0x68e   :  { %v5674_v41 = vpop.eup %5673  ;;  %5276 = vmatpush3.bf16.msra.mxu0 %v6422_v7  ;;  %5683 = vrcp.f32 %v2230_v31  ;;  %5277 = vmatprep.mubr.msk.bf16.mxu0 %vm5826_vm1, %v7906_v55 }
 0x68f   :  { %v2233_v48 = vpop.xlane.xlu0 %2232  ;;  %v2282_v51 = vpack.c.bf16 %v2268_v58, %v2267_v43  ;;  %5287 = vmatprep.subr.bf16.mxu0 %v7906_v55  ;;  %v2269_v29 = vmul.f32 %v5674_v41, %v6950_v22 }
 0x690   :  { %v5676_v12 = vpop.eup %5675  ;;  %5685 = vrcp.f32 %v2233_v48 }
 0x691   :  { %v2270_v63 = vmul.f32 %v5676_v12, %v6955_v38  ;;  %5272 = vmatmul.mubr.msk.bf16.vlgmr.msra.gmra.mrb[80].mxu1 %vm1143_vm2, %v2282_v51  ;;  %v2236_v56 = vpop.xlane.xlu1 %2235 }
 0x692   :  { %v5678_v2 = vpop.eup %5677  ;;  %5282 = vmatpush3.bf16.msra.mxu1 %v6418_v13  ;;  %5687 = vrcp.f32 %v2236_v56  ;;  %5283 = vmatprep.mubr.msk.bf16.mxu1 %vm5826_vm1, %v7906_v55 }
 0x693   :  { %v2239_v39 = vpop.xlane.xlu0 %2238  ;;  %v2283_v3 = vpack.c.bf16 %v2270_v63, %v2269_v29  ;;  %5293 = vmatprep.subr.bf16.mxu1 %v7906_v55  ;;  %v2271_v22 = vmul.f32 %v5678_v2, %v6960_v40 }
 0x694   :  { %v5680_v14 = vpop.eup %5679  ;;  %5689 = vrcp.f32 %v2239_v39 }
 0x695   :  { %v2272_v38 = vmul.f32 %v5680_v14, %v6965_v42  ;;  %5278 = vmatmul.mubr.msk.bf16.vlgmr.msra.gmra.mrb[68].mxu0 %vm1143_vm2, %v2283_v3  ;;  %v2242_v54 = vpop.xlane.xlu1 %2241 }
 0x696   :  { %v5682_v32 = vpop.eup %5681  ;;  %5288 = vmatpush3.bf16.msra.mxu0 %v6453_v9  ;;  %5691 = vrcp.f32 %v2242_v54  ;;  %5289 = vmatprep.mubr.msk.bf16.mxu0 %vm5826_vm1, %v7906_v55  ;;  %v7912_v54 = vmul.bf16 %v6225_v26, %v6257_v10 }
 0x697   :  { %v2245_v20 = vpop.xlane.xlu0 %2244  ;;  %v2284_v43 = vpack.c.bf16 %v2272_v38, %v2271_v22  ;;  %5299 = vmatprep.subr.bf16.mxu0 %v7906_v55  ;;  %v2273_v40 = vmul.f32 %v5682_v32, %v6970_v57  ;;  %v7910_v22 = vmul.bf16 %v6225_v26, %v6344_v25  ;;  %v7911_v38 = vmul.bf16 %v6225_v26, %v6259_v46 }
 0x698   :  { %v5684_v58 = vpop.eup %5683  ;;  %5693 = vrcp.f32 %v2245_v20  ;;  %v7913_v32 = vmul.bf16 %v6225_v26, %v6279_v37  ;;  %v7914_v20 = vmul.bf16 %v6225_v26, %v6277_v61 }
 0x699   :  { %v2274_v42 = vmul.f32 %v5684_v58, %v6975_v24  ;;  %5284 = vmatmul.mubr.msk.bf16.vlgmr.msra.gmra.mrb[84].mxu1 %vm1143_vm2, %v2284_v43  ;;  %v2248_v31 = vpop.xlane.xlu1 %2247 }
 0x69a   :  { %v5686_v41 = vpop.eup %5685  ;;  %5294 = vmatpush3.bf16.msra.mxu1 %v6449_v6  ;;  %5695 = vrcp.f32 %v2248_v31  ;;  %5295 = vmatprep.mubr.msk.bf16.mxu1 %vm5826_vm1, %v7906_v55 }
 0x69b   :  { %v2285_v48 = vpack.c.bf16 %v2274_v42, %v2273_v40  ;;  %5305 = vmatprep.subr.bf16.mxu1 %v7906_v55  ;;  %v2275_v12 = vmul.f32 %v5686_v41, %v6979_v44 }
 0x69c   :  { %v5688_v51 = vpop.eup %5687 }
 0x69d   :  { %v2276_v57 = vmul.f32 %v5688_v51, %v6983_v62  ;;  %5290 = vmatmul.mubr.msk.bf16.vlgmr.msra.gmra.mrb[72].mxu0 %vm1143_vm2, %v2285_v48 }
 0x69e   :  { %v5690_v24 = vpop.eup %5689  ;;  %5300 = vmatpush3.bf16.msra.mxu0 %v6476_v8  ;;  %5301 = vmatprep.mubr.msk.bf16.mxu0 %vm5826_vm1, %v7906_v55 }
 0x69f   :  { %v2286_v29 = vpack.c.bf16 %v2276_v57, %v2275_v12  ;;  %5311 = vmatprep.subr.bf16.mxu0 %v7906_v55  ;;  %v2277_v56 = vmul.f32 %v5690_v24, %v6987_v34 }
 0x6a0   :  { %v5692_v63 = vpop.eup %5691 }
 0x6a1   :  { %v2278_v2 = vmul.f32 %v5692_v63, %v6991_v47  ;;  %5296 = vmatmul.mubr.msk.bf16.vlgmr.msra.gmra.mrb[88].mxu1 %vm1143_vm2, %v2286_v29  ;;  %v7907_v47 = vmul.bf16 %v6225_v26, %v6308_v27 }
 0x6a2   :  { %v5694_v44 = vpop.eup %5693  ;;  %5306 = vmatpush3.bf16.msra.mxu1 %v6474_v28  ;;  %5307 = vmatprep.mubr.msk.bf16.mxu1 %vm5826_vm1, %v7906_v55 }
 0x6a3   :  { %v2287_v62 = vpack.c.bf16 %v2278_v2, %v2277_v56  ;;  %5317 = vmatprep.subr.bf16.mxu1 %v7906_v55  ;;  %v2279_v3 = vmul.f32 %v5694_v44, %v6995_v17  ;;  %v7908_v17 = vmul.bf16 %v6225_v26, %v6306_v19 }
 0x6a4   :  { %v5696_v39 = vpop.eup %5695 }
 0x6a5   :  { %v2280_v14 = vmul.f32 %v5696_v39, %v6999_v60  ;;  %5302 = vmatmul.mubr.msk.bf16.vlgmr.msra.gmra.mrb[76].mxu0 %vm1143_vm2, %v2287_v62  ;;  %v7909_v60 = vmul.bf16 %v6225_v26, %v6348_v33 }
 0x6a6   :  { %5313 = vmatprep.mubr.msk.bf16.mxu0 %vm5826_vm1, %v7906_v55 }
 0x6a7   :  { %5312 = vmatpush3.bf16.xpose.msra.mxu0 %v6325_v53  ;;  %v2288_v34 = vpack.c.bf16 %v2280_v14, %v2279_v3 }
 0x6a8   :  { %5323 = vmatprep.subr.bf16.mxu0 %v7906_v55 }
 0x6a9   :  { %5308 = vmatmul.mubr.msk.bf16.vlgmr.msra.gmra.mrb[92].mxu1 %vm1143_vm2, %v2288_v34 }
 0x6aa   :  { %5319 = vmatprep.mubr.msk.bf16.mxu1 %vm5826_vm1, %v7906_v55 }
 0x6ab   :  { %5318 = vmatpush3.bf16.xpose.msra.mxu1 %v6371_v23 }
 0x6ac   :  { %5329 = vmatprep.subr.bf16.mxu1 %v7906_v55 }
 0x6ae   :  { %5314 = vmatmul.mubr.msk.bf16.vlgmr.msra.gmra.mrb[80].mxu0 %vm61_vm0, %v7907_v47 }
 0x6af   :  { %5324 = vmatpush3.bf16.xpose.msra.mxu0 %v6403_v5  ;;  %5325 = vmatprep.mubr.msk.bf16.mxu0 %vm5826_vm1, %v7906_v55 }
 0x6b0   :  { %5335 = vmatprep.subr.bf16.mxu0 %v7906_v55 }
 0x6b2   :  { %5320 = vmatmul.mubr.msk.bf16.vlgmr.msra.gmra.mrb[96].mxu1 %vm61_vm0, %v7908_v17 }
 0x6b3   :  { %5330 = vmatpush3.bf16.xpose.msra.mxu1 %v6436_v15  ;;  %5331 = vmatprep.mubr.msk.bf16.mxu1 %vm5826_vm1, %v7906_v55 }
 0x6b4   :  { %5341 = vmatprep.subr.bf16.mxu1 %v7906_v55 }
 0x6b6   :  { %5326 = vmatmul.mubr.msk.bf16.vlgmr.msra.gmra.mrb[84].mxu0 %vm61_vm0, %v7909_v60 }
 0x6b7   :  { %5336 = vmatpush3.bf16.xpose.msra.mxu0 %v6398_v11  ;;  %5337 = vmatprep.mubr.msk.bf16.mxu0 %vm5826_vm1, %v7906_v55 }
 0x6b8   :  { %5347 = vmatprep.subr.bf16.mxu0 %v7906_v55 }
 0x6ba   :  { %5332 = vmatmul.mubr.msk.bf16.vlgmr.msra.gmra.mrb[100].mxu1 %vm61_vm0, %v7910_v22 }
 0x6bb   :  { %5342 = vmatpush3.bf16.xpose.msra.mxu1 %v6461_v59  ;;  %5343 = vmatprep.mubr.msk.bf16.mxu1 %vm5826_vm1, %v7906_v55 }
 0x6bc   :  { %5353 = vmatprep.subr.bf16.mxu1 %v7906_v55 }
 0x6be   :  { %5338 = vmatmul.mubr.msk.bf16.vlgmr.msra.gmra.mrb[88].mxu0 %vm61_vm0, %v7911_v38 }
 0x6bf   :  { %5348 = vmatpush3.bf16.xpose.msra.mxu0 %v6428_v45  ;;  %5349 = vmatprep.mubr.msk.bf16.mxu0 %vm5826_vm1, %v7906_v55 }
 0x6c0   :  { %5359 = vmatprep.subr.bf16.mxu0 %v7906_v55 }
 0x6c2   :  { %5344 = vmatmul.mubr.msk.bf16.vlgmr.msra.gmra.mrb[104].mxu1 %vm61_vm0, %v7912_v54 }
 0x6c3   :  { %5354 = vmatpush3.bf16.xpose.msra.mxu1 %v6482_v30  ;;  %5355 = vmatprep.mubr.msk.bf16.mxu1 %vm5826_vm1, %v7906_v55 }
 0x6c4   :  { %5365 = vmatprep.subr.bf16.mxu1 %v7906_v55 }
 0x6c6   :  { %5350 = vmatmul.mubr.msk.bf16.vlgmr.msra.gmra.mrb[92].mxu0 %vm61_vm0, %v7913_v32 }
 0x6c7   :  { %5360 = vmatpush3.bf16.msra.mxu0 %v6393_v4  ;;  %5361 = vmatprep.mubr.msk.bf16.mxu0 %vm5826_vm1, %v7906_v55 }
 0x6c8   :  { %5371 = vmatprep.subr.bf16.mxu0 %v7906_v55 }
 0x6ca   :  { %5356 = vmatmul.mubr.msk.bf16.vlgmr.msra.gmra.mrb[108].mxu1 %vm61_vm0, %v7914_v20 }
 0x6cb   :  { %5366 = vmatpush3.bf16.msra.mxu1 %v6391_v35  ;;  %5367 = vmatprep.mubr.msk.bf16.mxu1 %vm5826_vm1, %v7906_v55 }
 0x6cc   :  { %5377 = vmatprep.subr.bf16.mxu1 %v7906_v55 }
 0x760   :  { %v2326_v43 = vpop.f32.mrb[64].mxu0 }
 0x761   :  { %v2646_v58 = vmul.f32 %v6234_v0, %v2326_v43  ;;  %v5267_v40 = vpop.f32.mrb[65].mxu0 }
 0x762   :  { %v2329_v42 = vpop.f32.mrb[66].mxu0 }
 0x763   :  { %v7125_v31 = vadd.f32 %v2646_v58, %v6786_v49  ;;  %v2647_v41 = vmul.f32 %v6234_v0, %v2329_v42  ;;  %v5268_v26 = vpop.f32.mrb[67].mxu0 }
 0x764   :  { %v2370_v48 = vpop.f32.mrb[80].mxu1 }
 0x765   :  { %v7129_v51 = vadd.f32 %v2647_v41, %v6789_v36  ;;  %v2648_v12 = vmul.f32 %v6234_v0, %v2370_v48  ;;  %v5273_v57 = vpop.f32.mrb[81].mxu1 }
 0x766   :  { %v2373_v24 = vpop.f32.mrb[82].mxu1 }
 0x767   :  { %v7133_v29 = vadd.f32 %v2648_v12, %v6792_v1  ;;  %v2649_v63 = vmul.f32 %v6234_v0, %v2373_v24  ;;  %v5274_v56 = vpop.f32.mrb[83].mxu1 }
 0x768   :  { %v2414_v2 = vpop.f32.mrb[68].mxu0 }
 0x769   :  { %v7137_v49 = vadd.f32 %v2649_v63, %v6795_v21  ;;  %v2650_v44 = vmul.f32 %v6234_v0, %v2414_v2  ;;  %v5279_v62 = vpop.f32.mrb[69].mxu0 }
 0x76a   :  { %v2417_v39 = vpop.f32.mrb[70].mxu0 }
 0x76b   :  { %v7141_v36 = vadd.f32 %v2650_v44, %v6798_v16  ;;  %v2651_v3 = vmul.f32 %v6234_v0, %v2417_v39  ;;  %v5280_v14 = vpop.f32.mrb[71].mxu0  ;;  %v7920_v44 = vld [vmem:[#allocation8_spill] sm:$0xff] }
 0x76c   :  { %v2458_v34 = vpop.f32.mrb[84].mxu1 }
 0x76d   :  { %v7145_v1 = vadd.f32 %v2651_v3, %v6801_v18  ;;  %v2652_v47 = vmul.f32 %v6234_v0, %v2458_v34  ;;  %v5285_v17 = vpop.f32.mrb[85].mxu1  ;;  %v7915_v18 = vld [vmem:[#allocation5_spill] sm:$0xff] }
 0x76e   :  { %v2461_v60 = vpop.f32.mrb[86].mxu1  ;;  %v7922_v34 = vld [vmem:[#allocation9_spill] sm:$0xff] }
 0x76f   :  { %v7149_v21 = vadd.f32 %v2652_v47, %v6804_v50  ;;  %v2653_v22 = vmul.f32 %v6234_v0, %v2461_v60  ;;  %v5286_v38 = vpop.f32.mrb[87].mxu1  ;;  %v7916_v50 = vld [vmem:[#allocation6_spill] sm:$0xff] }
 0x770   :  { %v2502_v54 = vpop.f32.mrb[72].mxu0  ;;  %v7924_v38 = vld [vmem:[#allocation10_spill] sm:$0xff] }
 0x771   :  { %v7153_v16 = vadd.f32 %v2653_v22, %v6807_v52  ;;  %v2654_v32 = vmul.f32 %v6234_v0, %v2502_v54  ;;  %v5291_v20 = vpop.f32.mrb[73].mxu0  ;;  %v7918_v52 = vld [vmem:[#allocation7_spill] sm:$0xff] }
 0x772   :  { %v2505_v43 = vpop.f32.mrb[74].mxu0 }
 0x773   :  { %v7157_v58 = vadd.f32 %v2654_v32, %v7915_v18  ;;  %v2655_v40 = vmul.f32 %v6234_v0, %v2505_v43  ;;  %v5292_v42 = vpop.f32.mrb[75].mxu0  ;;  %v7926_v18 = vld [vmem:[#allocation11_spill] sm:$0xff] }
 0x774   :  { %v2546_v41 = vpop.f32.mrb[88].mxu1 }
 0x775   :  { %v7161_v26 = vadd.f32 %v2655_v40, %v7916_v50  ;;  %v2656_v48 = vmul.f32 %v6234_v0, %v2546_v41  ;;  %v5297_v12 = vpop.f32.mrb[89].mxu1  ;;  %v7187_v50 = vld [vmem:[%s7880_s10 + $0x20] sm:$0xff] }
 0x776   :  { %v2549_v57 = vpop.f32.mrb[90].mxu1 }
 0x777   :  { %7917 = vst [vmem:[#allocation5_spill] sm:$0xff] %v7161_v26  ;;  %v7165_v24 = vadd.f32 %v2656_v48, %v7918_v52  ;;  %v2657_v63 = vmul.f32 %v6234_v0, %v2549_v57  ;;  %v5298_v56 = vpop.f32.mrb[91].mxu1  ;;  %v7928_v48 = vld [vmem:[#allocation12_spill] sm:$0xff]  ;;  %v7195_v52 = vld [vmem:[%s7880_s10 + $0x28] sm:$0xff] }
 0x778   :  { %v2590_v2 = vpop.f32.mrb[76].mxu0 }
 0x779   :  { %7919 = vst [vmem:[#allocation6_spill] sm:$0xff] %v7165_v24  ;;  %v7169_v62 = vadd.f32 %v2657_v63, %v7920_v44  ;;  %v2658_v39 = vmul.f32 %v6234_v0, %v2590_v2  ;;  %v5303_v3 = vpop.f32.mrb[77].mxu0 }
 0x77a   :  { %v2593_v14 = vpop.f32.mrb[78].mxu0 }
 0x77b   :  { %7921 = vst [vmem:[#allocation7_spill] sm:$0xff] %v7169_v62  ;;  %v7173_v47 = vadd.f32 %v2658_v39, %v7922_v34  ;;  %v2659_v17 = vmul.f32 %v6234_v0, %v2593_v14  ;;  %v5304_v60 = vpop.f32.mrb[79].mxu0 }
 0x77c   :  { %v2634_v22 = vpop.f32.mrb[92].mxu1 }
 0x77d   :  { %7923 = vst [vmem:[#allocation8_spill] sm:$0xff] %v7173_v47  ;;  %v7177_v54 = vadd.f32 %v2659_v17, %v7924_v38  ;;  %v2660_v32 = vmul.f32 %v6234_v0, %v2634_v22  ;;  %v5309_v20 = vpop.f32.mrb[93].mxu1 }
 0x77e   :  { %v2637_v43 = vpop.f32.mrb[94].mxu1 }
 0x77f   :  { %7925 = vst [vmem:[#allocation9_spill] sm:$0xff] %v7177_v54  ;;  %v7181_v40 = vadd.f32 %v2660_v32, %v7926_v18  ;;  %v2661_v42 = vmul.f32 %v6234_v0, %v2637_v43  ;;  %v5310_v41 = vpop.f32.mrb[95].mxu1 }
 0x781   :  { %7927 = vst [vmem:[#allocation10_spill] sm:$0xff] %v7181_v40  ;;  %v7190_v12 = vadd.f32 %v2661_v42, %v7928_v48  ;;  %v2732_v57 = vpop.f32.mrb[80].mxu0 }
 0x782   :  { %v7198_v63 = vadd.f32 %v7187_v50, %v2732_v57  ;;  %v5315_v56 = vpop.f32.mrb[81].mxu0 }
 0x783   :  { %7929 = vst [vmem:[#allocation11_spill] sm:$0xff] %v7190_v12  ;;  %v2735_v0 = vpop.f32.mrb[82].mxu0 }
 0x784   :  { %v7201_v2 = vadd.f32 %v7195_v52, %v2735_v0  ;;  %v5316_v44 = vpop.f32.mrb[83].mxu0  ;;  %v3066_v39 = vsel %vm1143_vm2, %v7198_v63, -inf }
 0x785   :  { %3067 = vmax.xlane.f32.xlu0 %v3066_v39  ;;  %v2776_v3 = vpop.f32.mrb[96].mxu1 }
 0x786   :  { %v7206_v14 = vadd.f32 %v7187_v50, %v2776_v3  ;;  %v5321_v34 = vpop.f32.mrb[97].mxu1  ;;  %v3069_v17 = vsel %vm1143_vm2, %v7201_v2, -inf }
 0x787   :  { %3070 = vmax.xlane.f32.xlu1 %v3069_v17  ;;  %v2779_v60 = vpop.f32.mrb[98].mxu1 }
 0x788   :  { %v7211_v22 = vadd.f32 %v7195_v52, %v2779_v60  ;;  %v5322_v38 = vpop.f32.mrb[99].mxu1  ;;  %v3072_v32 = vsel %vm1143_vm2, %v7206_v14, -inf }
 0x789   :  { %v2820_v20 = vpop.f32.mrb[84].mxu0  ;;  %3073 = vmax.xlane.f32.xlu0 %v3072_v32 }
 0x78a   :  { %v7216_v43 = vadd.f32 %v7187_v50, %v2820_v20  ;;  %v5327_v18 = vpop.f32.mrb[85].mxu0  ;;  %v3075_v42 = vsel %vm1143_vm2, %v7211_v22, -inf }
 0x78b   :  { %v2823_v41 = vpop.f32.mrb[86].mxu0  ;;  %3076 = vmax.xlane.f32.xlu1 %v3075_v42 }
 0x78c   :  { %v7221_v48 = vadd.f32 %v7195_v52, %v2823_v41  ;;  %v5328_v57 = vpop.f32.mrb[87].mxu0  ;;  %v3078_v56 = vsel %vm1143_vm2, %v7216_v43, -inf }
 0x78d   :  { %3079 = vmax.xlane.f32.xlu0 %v3078_v56  ;;  %v2864_v0 = vpop.f32.mrb[100].mxu1 }
 0x78e   :  { %v7226_v44 = vadd.f32 %v7187_v50, %v2864_v0  ;;  %v5333_v39 = vpop.f32.mrb[101].mxu1  ;;  %v3081_v3 = vsel %vm1143_vm2, %v7221_v48, -inf }
 0x78f   :  { %3082 = vmax.xlane.f32.xlu1 %v3081_v3  ;;  %v2867_v34 = vpop.f32.mrb[102].mxu1 }
 0x790   :  { %v7231_v17 = vadd.f32 %v7195_v52, %v2867_v34  ;;  %v5334_v60 = vpop.f32.mrb[103].mxu1  ;;  %v3084_v38 = vsel %vm1143_vm2, %v7226_v44, -inf }
 0x791   :  { %v2908_v32 = vpop.f32.mrb[88].mxu0  ;;  %3085 = vmax.xlane.f32.xlu0 %v3084_v38 }
 0x792   :  { %v7236_v20 = vadd.f32 %v7187_v50, %v2908_v32  ;;  %v5339_v18 = vpop.f32.mrb[89].mxu0  ;;  %v3087_v42 = vsel %vm1143_vm2, %v7231_v17, -inf }
 0x793   :  { %v2911_v41 = vpop.f32.mrb[90].mxu0  ;;  %3088 = vmax.xlane.f32.xlu1 %v3087_v42 }
 0x794   :  { %v7241_v57 = vadd.f32 %v7195_v52, %v2911_v41  ;;  %v5340_v56 = vpop.f32.mrb[91].mxu0  ;;  %v3090_v0 = vsel %vm1143_vm2, %v7236_v20, -inf }
 0x795   :  { %3091 = vmax.xlane.f32.xlu0 %v3090_v0  ;;  %v2952_v39 = vpop.f32.mrb[104].mxu1 }
 0x796   :  { %v7246_v3 = vadd.f32 %v7187_v50, %v2952_v39  ;;  %v5345_v34 = vpop.f32.mrb[105].mxu1  ;;  %v3093_v60 = vsel %vm1143_vm2, %v7241_v57, -inf }
 0x797   :  { %3094 = vmax.xlane.f32.xlu1 %v3093_v60  ;;  %v2955_v38 = vpop.f32.mrb[106].mxu1 }
 0x798   :  { %v7251_v32 = vadd.f32 %v7195_v52, %v2955_v38  ;;  %v5346_v18 = vpop.f32.mrb[107].mxu1  ;;  %v3096_v42 = vsel %vm1143_vm2, %v7246_v3, -inf }
 0x799   :  { %v2996_v41 = vpop.f32.mrb[92].mxu0  ;;  %3097 = vmax.xlane.f32.xlu0 %v3096_v42 }
 0x79a   :  { %v7256_v56 = vadd.f32 %v7187_v50, %v2996_v41  ;;  %v5351_v0 = vpop.f32.mrb[93].mxu0  ;;  %v3099_v39 = vsel %vm1143_vm2, %v7251_v32, -inf }
 0x79b   :  { %v2999_v34 = vpop.f32.mrb[94].mxu0  ;;  %3100 = vmax.xlane.f32.xlu1 %v3099_v39 }
 0x79c   :  { %v7261_v60 = vadd.f32 %v7195_v52, %v2999_v34  ;;  %v5352_v38 = vpop.f32.mrb[95].mxu0  ;;  %v3102_v18 = vsel %vm1143_vm2, %v7256_v56, -inf }
 0x79d   :  { %3103 = vmax.xlane.f32.xlu0 %v3102_v18  ;;  %v3040_v12 = vpop.f32.mrb[108].mxu1 }
 0x79e   :  { %v7266_v42 = vadd.f32 %v7187_v50, %v3040_v12  ;;  %v5357_v41 = vpop.f32.mrb[109].mxu1  ;;  %v3105_v0 = vsel %vm1143_vm2, %v7261_v60, -inf }
 0x79f   :  { %3106 = vmax.xlane.f32.xlu1 %v3105_v0  ;;  %v3043_v40 = vpop.f32.mrb[110].mxu1 }
 0x7a0   :  { %v7271_v39 = vadd.f32 %v7195_v52, %v3043_v40  ;;  %v5358_v34 = vpop.f32.mrb[111].mxu1  ;;  %v3108_v38 = vsel %vm1143_vm2, %v7266_v42, -inf }
 0x7a1   :  { %3109 = vmax.xlane.f32.xlu0 %v3108_v38 }
 0x7a2   :  { %v3111_v18 = vsel %vm1143_vm2, %v7271_v39, -inf }
 0x7a3   :  { %3112 = vmax.xlane.f32.xlu1 %v3111_v18 }
 0x812   :  { %v3068_v50 = vpop.xlane.xlu0 %3067 }
 0x813   :  { %v3114_v12 = vsub.f32 %v7198_v63, %v3068_v50 }
 0x814   :  { %v3071_v41 = vpop.xlane.xlu1 %3070 }
 0x815   :  { %v3130_v54 = vmul.f32 1.442695, %v3114_v12  ;;  %v3115_v0 = vsub.f32 %v7201_v2, %v3071_v41 }
 0x816   :  { %v3074_v47 = vpop.xlane.xlu0 %3073 }
 0x817   :  { %5697 = vpow2.f32 %v3130_v54  ;;  %v3132_v40 = vmul.f32 1.442695, %v3115_v0  ;;  %v3116_v52 = vsub.f32 %v7206_v14, %v3074_v47 }
 0x818   :  { %v3077_v34 = vpop.xlane.xlu1 %3076 }
 0x819   :  { %5699 = vpow2.f32 %v3132_v40  ;;  %v3134_v62 = vmul.f32 1.442695, %v3116_v52  ;;  %v3117_v38 = vsub.f32 %v7211_v22, %v3077_v34 }
 0x81a   :  { %v3080_v24 = vpop.xlane.xlu0 %3079 }
 0x81b   :  { %5701 = vpow2.f32 %v3134_v62  ;;  %v3136_v18 = vmul.f32 1.442695, %v3117_v38  ;;  %v3118_v26 = vsub.f32 %v7216_v43, %v3080_v24 }
 0x81c   :  { %v3083_v63 = vpop.xlane.xlu1 %3082 }
 0x81d   :  { %5703 = vpow2.f32 %v3136_v18  ;;  %v3138_v50 = vmul.f32 1.442695, %v3118_v26  ;;  %v3119_v2 = vsub.f32 %v7221_v48, %v3083_v63 }
 0x81e   :  { %v3086_v12 = vpop.xlane.xlu0 %3085 }
 0x81f   :  { %5705 = vpow2.f32 %v3138_v50  ;;  %v3140_v54 = vmul.f32 1.442695, %v3119_v2  ;;  %v3120_v47 = vsub.f32 %v7226_v44, %v3086_v12 }
 0x820   :  { %v3089_v14 = vpop.xlane.xlu1 %3088 }
 0x821   :  { %v7284_v41 = vpop.eup %5697  ;;  %5707 = vpow2.f32 %v3140_v54  ;;  %v3142_v22 = vmul.f32 1.442695, %v3120_v47  ;;  %v3121_v62 = vsub.f32 %v7231_v17, %v3089_v14 }
 0x822   :  { %v3092_v0 = vpop.xlane.xlu0 %3091  ;;  %v3162_v24 = vsel %vm1143_vm2, %v7284_v41, 0.0 }
 0x823   :  { %v7289_v43 = vpop.eup %5699  ;;  %5709 = vpow2.f32 %v3142_v22  ;;  %v3144_v26 = vmul.f32 1.442695, %v3121_v62  ;;  %v3122_v48 = vsub.f32 %v7236_v20, %v3092_v0  ;;  %3163 = vadd.xlane.f32.xlu0 %v3162_v24 }
 0x824   :  { %v3095_v40 = vpop.xlane.xlu1 %3094  ;;  %v3165_v44 = vsel %vm1143_vm2, %v7289_v43, 0.0 }
 0x825   :  { %v7294_v52 = vpop.eup %5701  ;;  %5711 = vpow2.f32 %v3144_v26  ;;  %v3146_v34 = vmul.f32 1.442695, %v3122_v48  ;;  %v3123_v17 = vsub.f32 %v7241_v57, %v3095_v40  ;;  %3166 = vadd.xlane.f32.xlu1 %v3165_v44 }
 0x826   :  { %v3098_v38 = vpop.xlane.xlu0 %3097  ;;  %v3168_v18 = vsel %vm1143_vm2, %v7294_v52, 0.0 }
 0x827   :  { %v7299_v63 = vpop.eup %5703  ;;  %5713 = vpow2.f32 %v3146_v34  ;;  %v3148_v20 = vmul.f32 1.442695, %v3123_v17  ;;  %v3124_v50 = vsub.f32 %v7246_v3, %v3098_v38  ;;  %3169 = vadd.xlane.f32.xlu0 %v3168_v18 }
 0x828   :  { %v3101_v2 = vpop.xlane.xlu1 %3100  ;;  %v3171_v12 = vsel %vm1143_vm2, %v7299_v63, 0.0 }
 0x829   :  { %v7304_v54 = vpop.eup %5705  ;;  %5715 = vpow2.f32 %v3148_v20  ;;  %v3150_v57 = vmul.f32 1.442695, %v3124_v50  ;;  %v3125_v47 = vsub.f32 %v7251_v32, %v3101_v2  ;;  %3172 = vadd.xlane.f32.xlu1 %v3171_v12 }
 0x82a   :  { %v3104_v14 = vpop.xlane.xlu0 %3103  ;;  %v3174_v22 = vsel %vm1143_vm2, %v7304_v54, 0.0 }
 0x82b   :  { %v7309_v62 = vpop.eup %5707  ;;  %5717 = vpow2.f32 %v3150_v57  ;;  %v3152_v3 = vmul.f32 1.442695, %v3125_v47  ;;  %v3126_v0 = vsub.f32 %v7256_v56, %v3104_v14  ;;  %3175 = vadd.xlane.f32.xlu0 %v3174_v22 }
 0x82c   :  { %v3107_v24 = vpop.xlane.xlu1 %3106  ;;  %v3177_v26 = vsel %vm1143_vm2, %v7309_v62, 0.0 }
 0x82d   :  { %v7314_v48 = vpop.eup %5709  ;;  %5719 = vpow2.f32 %v3152_v3  ;;  %v3154_v32 = vmul.f32 1.442695, %v3126_v0  ;;  %v3127_v40 = vsub.f32 %v7261_v60, %v3107_v24  ;;  %3178 = vadd.xlane.f32.xlu1 %v3177_v26 }
 0x82e   :  { %v3110_v44 = vpop.xlane.xlu0 %3109  ;;  %v3180_v34 = vsel %vm1143_vm2, %v7314_v48, 0.0 }
 0x82f   :  { %v7319_v17 = vpop.eup %5711  ;;  %5721 = vpow2.f32 %v3154_v32  ;;  %v3156_v56 = vmul.f32 1.442695, %v3127_v40  ;;  %v3128_v38 = vsub.f32 %v7266_v42, %v3110_v44  ;;  %3181 = vadd.xlane.f32.xlu0 %v3180_v34 }
 0x830   :  { %v3113_v18 = vpop.xlane.xlu1 %3112  ;;  %v3183_v20 = vsel %vm1143_vm2, %v7319_v17, 0.0 }
 0x831   :  { %v7324_v50 = vpop.eup %5713  ;;  %5723 = vpow2.f32 %v3156_v56  ;;  %v3158_v60 = vmul.f32 1.442695, %v3128_v38  ;;  %v3129_v2 = vsub.f32 %v7271_v39, %v3113_v18  ;;  %3184 = vadd.xlane.f32.xlu1 %v3183_v20 }
 0x832   :  { %v3186_v12 = vsel %vm1143_vm2, %v7324_v50, 0.0 }
 0x833   :  { %v7329_v57 = vpop.eup %5715  ;;  %5725 = vpow2.f32 %v3158_v60  ;;  %v3160_v47 = vmul.f32 1.442695, %v3129_v2  ;;  %3187 = vadd.xlane.f32.xlu0 %v3186_v12 }
 0x834   :  { %v3189_v42 = vsel %vm1143_vm2, %v7329_v57, 0.0 }
 0x835   :  { %v7333_v14 = vpop.eup %5717  ;;  %5727 = vpow2.f32 %v3160_v47  ;;  %3190 = vadd.xlane.f32.xlu1 %v3189_v42 }
 0x836   :  { %v3192_v22 = vsel %vm1143_vm2, %v7333_v14, 0.0 }
 0x837   :  { %v7337_v39 = vpop.eup %5719  ;;  %3193 = vadd.xlane.f32.xlu0 %v3192_v22 }
 0x838   :  { %v3195_v3 = vsel %vm1143_vm2, %v7337_v39, 0.0 }
 0x839   :  { %v7341_v0 = vpop.eup %5721  ;;  %3196 = vadd.xlane.f32.xlu1 %v3195_v3 }
 0x83a   :  { %v3198_v24 = vsel %vm1143_vm2, %v7341_v0, 0.0 }
 0x83b   :  { %v7345_v26 = vpop.eup %5723  ;;  %3199 = vadd.xlane.f32.xlu0 %v3198_v24 }
 0x83c   :  { %v3201_v32 = vsel %vm1143_vm2, %v7345_v26, 0.0 }
 0x83d   :  { %v7349_v40 = vpop.eup %5725  ;;  %3202 = vadd.xlane.f32.xlu1 %v3201_v32 }
 0x83e   :  { %v3204_v44 = vsel %vm1143_vm2, %v7349_v40, 0.0 }
 0x83f   :  { %v7353_v34 = vpop.eup %5727  ;;  %3205 = vadd.xlane.f32.xlu0 %v3204_v44 }
 0x840   :  { %v3207_v56 = vsel %vm1143_vm2, %v7353_v34, 0.0 }
 0x841   :  { %3208 = vadd.xlane.f32.xlu1 %v3207_v56 }
 0x8b0   :  { %v3164_v38 = vpop.xlane.xlu0 %3163 }
 0x8b1   :  { %5729 = vrcp.f32 %v3164_v38 }
 0x8b2   :  { %v3167_v18 = vpop.xlane.xlu1 %3166 }
 0x8b3   :  { %5731 = vrcp.f32 %v3167_v18 }
 0x8b4   :  { %v3170_v20 = vpop.xlane.xlu0 %3169 }
 0x8b5   :  { %5733 = vrcp.f32 %v3170_v20 }
 0x8b6   :  { %v3173_v60 = vpop.xlane.xlu1 %3172 }
 0x8b7   :  { %5735 = vrcp.f32 %v3173_v60 }
 0x8b8   :  { %v3176_v2 = vpop.xlane.xlu0 %3175 }
 0x8b9   :  { %5737 = vrcp.f32 %v3176_v2 }
 0x8ba   :  { %v3179_v12 = vpop.xlane.xlu1 %3178 }
 0x8bb   :  { %v5730_v47 = vpop.eup %5729  ;;  %5739 = vrcp.f32 %v3179_v12 }
 0x8bc   :  { %v3182_v42 = vpop.xlane.xlu0 %3181  ;;  %v3226_v3 = vmul.f32 %v5730_v47, %v7284_v41 }
 0x8bd   :  { %v5732_v22 = vpop.eup %5731  ;;  %5741 = vrcp.f32 %v3182_v42 }
 0x8be   :  { %v3227_v24 = vmul.f32 %v5732_v22, %v7289_v43  ;;  %v3185_v32 = vpop.xlane.xlu1 %3184 }
 0x8bf   :  { %v5734_v44 = vpop.eup %5733  ;;  %5743 = vrcp.f32 %v3185_v32 }
 0x8c0   :  { %v3188_v56 = vpop.xlane.xlu0 %3187  ;;  %v3242_v38 = vpack.c.bf16 %v3227_v24, %v3226_v3  ;;  %v3228_v20 = vmul.f32 %v5734_v44, %v7294_v52 }
 0x8c1   :  { %v5736_v18 = vpop.eup %5735  ;;  %5745 = vrcp.f32 %v3188_v56 }
 0x8c2   :  { %v3229_v60 = vmul.f32 %v5736_v18, %v7299_v63  ;;  %5362 = vmatmul.mubr.msk.bf16.vlgmr.msra.gmra.mrb[96].mxu0 %vm1143_vm2, %v3242_v38  ;;  %v3191_v2 = vpop.xlane.xlu1 %3190 }
 0x8c3   :  { %v5738_v12 = vpop.eup %5737  ;;  %5372 = vmatpush3.bf16.msra.mxu0 %v6422_v7  ;;  %5747 = vrcp.f32 %v3191_v2  ;;  %5373 = vmatprep.mubr.msk.bf16.mxu0 %vm5826_vm1, %v7906_v55 }
 0x8c4   :  { %v3194_v41 = vpop.xlane.xlu0 %3193  ;;  %v3243_v43 = vpack.c.bf16 %v3229_v60, %v3228_v20  ;;  %5383 = vmatprep.subr.bf16.mxu0 %v7906_v55  ;;  %v3230_v52 = vmul.f32 %v5738_v12, %v7304_v54 }
 0x8c5   :  { %v5740_v47 = vpop.eup %5739  ;;  %5749 = vrcp.f32 %v3194_v41 }
 0x8c6   :  { %v3231_v63 = vmul.f32 %v5740_v47, %v7309_v62  ;;  %5368 = vmatmul.mubr.msk.bf16.vlgmr.msra.gmra.mrb[112].mxu1 %vm1143_vm2, %v3243_v43  ;;  %v3197_v42 = vpop.xlane.xlu1 %3196 }
 0x8c7   :  { %v5742_v22 = vpop.eup %5741  ;;  %5378 = vmatpush3.bf16.msra.mxu1 %v6418_v13  ;;  %5751 = vrcp.f32 %v3197_v42  ;;  %5379 = vmatprep.mubr.msk.bf16.mxu1 %vm5826_vm1, %v7906_v55 }
 0x8c8   :  { %v3200_v3 = vpop.xlane.xlu0 %3199  ;;  %v3244_v24 = vpack.c.bf16 %v3231_v63, %v3230_v52  ;;  %5389 = vmatprep.subr.bf16.mxu1 %v7906_v55  ;;  %v3232_v54 = vmul.f32 %v5742_v22, %v7314_v48 }
 0x8c9   :  { %v5744_v32 = vpop.eup %5743  ;;  %5753 = vrcp.f32 %v3200_v3 }
 0x8ca   :  { %v3233_v62 = vmul.f32 %v5744_v32, %v7319_v17  ;;  %5374 = vmatmul.mubr.msk.bf16.vlgmr.msra.gmra.mrb[100].mxu0 %vm1143_vm2, %v3244_v24  ;;  %v3203_v44 = vpop.xlane.xlu1 %3202 }
 0x8cb   :  { %v5746_v56 = vpop.eup %5745  ;;  %5384 = vmatpush3.bf16.msra.mxu0 %v6453_v9  ;;  %5755 = vrcp.f32 %v3203_v44  ;;  %5385 = vmatprep.mubr.msk.bf16.mxu0 %vm5826_vm1, %v7906_v55 }
 0x8cc   :  { %v3206_v38 = vpop.xlane.xlu0 %3205  ;;  %v3245_v18 = vpack.c.bf16 %v3233_v62, %v3232_v54  ;;  %5395 = vmatprep.subr.bf16.mxu0 %v7906_v55  ;;  %v3234_v48 = vmul.f32 %v5746_v56, %v7324_v50 }
 0x8cd   :  { %v5748_v20 = vpop.eup %5747  ;;  %5757 = vrcp.f32 %v3206_v38 }
 0x8ce   :  { %v3235_v17 = vmul.f32 %v5748_v20, %v7329_v57  ;;  %5380 = vmatmul.mubr.msk.bf16.vlgmr.msra.gmra.mrb[116].mxu1 %vm1143_vm2, %v3245_v18  ;;  %v3209_v60 = vpop.xlane.xlu1 %3208 }
 0x8cf   :  { %v5750_v2 = vpop.eup %5749  ;;  %5390 = vmatpush3.bf16.msra.mxu1 %v6449_v6  ;;  %5759 = vrcp.f32 %v3209_v60  ;;  %5391 = vmatprep.mubr.msk.bf16.mxu1 %vm5826_vm1, %v7906_v55 }
 0x8d0   :  { %v3246_v12 = vpack.c.bf16 %v3235_v17, %v3234_v48  ;;  %5401 = vmatprep.subr.bf16.mxu1 %v7906_v55  ;;  %v3236_v43 = vmul.f32 %v5750_v2, %v7333_v14 }
 0x8d1   :  { %v5752_v41 = vpop.eup %5751 }
 0x8d2   :  { %v3237_v50 = vmul.f32 %v5752_v41, %v7337_v39  ;;  %5386 = vmatmul.mubr.msk.bf16.vlgmr.msra.gmra.mrb[104].mxu0 %vm1143_vm2, %v3246_v12 }
 0x8d3   :  { %v5754_v57 = vpop.eup %5753  ;;  %5396 = vmatpush3.bf16.msra.mxu0 %v6476_v8  ;;  %5397 = vmatprep.mubr.msk.bf16.mxu0 %vm5826_vm1, %v7906_v55 }
 0x8d4   :  { %v3247_v47 = vpack.c.bf16 %v3237_v50, %v3236_v43  ;;  %5407 = vmatprep.subr.bf16.mxu0 %v7906_v55  ;;  %v3238_v63 = vmul.f32 %v5754_v57, %v7341_v0 }
 0x8d5   :  { %v5756_v52 = vpop.eup %5755 }
 0x8d6   :  { %v3239_v42 = vmul.f32 %v5756_v52, %v7345_v26  ;;  %5392 = vmatmul.mubr.msk.bf16.vlgmr.msra.gmra.mrb[120].mxu1 %vm1143_vm2, %v3247_v47  ;;  %v7930_v26 = vld [vmem:[#allocation2_spill] sm:$0xff] }
 0x8d7   :  { %v5758_v14 = vpop.eup %5757  ;;  %5402 = vmatpush3.bf16.msra.mxu1 %v6474_v28  ;;  %5403 = vmatprep.mubr.msk.bf16.mxu1 %vm5826_vm1, %v7906_v55 }
 0x8d8   :  { %v3248_v39 = vpack.c.bf16 %v3239_v42, %v3238_v63  ;;  %5413 = vmatprep.subr.bf16.mxu1 %v7906_v55  ;;  %v3240_v3 = vmul.f32 %v5758_v14, %v7349_v40  ;;  %v7931_v40 = vmul.bf16 %v7930_v26, %v6308_v27  ;;  %v7933_v27 = vmul.bf16 %v7930_v26, %v6348_v33 }
 0x8d9   :  { %v5760_v22 = vpop.eup %5759  ;;  %v7935_v33 = vmul.bf16 %v7930_v26, %v6259_v46  ;;  %v7937_v46 = vmul.bf16 %v7930_v26, %v6279_v37 }
 0x8da   :  { %v3241_v24 = vmul.f32 %v5760_v22, %v7353_v34  ;;  %5398 = vmatmul.mubr.msk.bf16.vlgmr.msra.gmra.mrb[108].mxu0 %vm1143_vm2, %v3248_v39 }
 0x8db   :  { %5409 = vmatprep.mubr.msk.bf16.mxu0 %vm5826_vm1, %v7906_v55 }
 0x8dc   :  { %5408 = vmatpush3.bf16.xpose.msra.mxu0 %v6325_v53  ;;  %v3249_v0 = vpack.c.bf16 %v3241_v24, %v3240_v3  ;;  %v7932_v53 = vmul.bf16 %v7930_v26, %v6306_v19  ;;  %v7934_v19 = vmul.bf16 %v7930_v26, %v6344_v25  ;;  %v7936_v25 = vmul.bf16 %v7930_v26, %v6257_v10 }
 0x8dd   :  { %5419 = vmatprep.subr.bf16.mxu0 %v7906_v55  ;;  %v7938_v10 = vmul.bf16 %v7930_v26, %v6277_v61 }
 0x8de   :  { %5404 = vmatmul.mubr.msk.bf16.vlgmr.msra.gmra.mrb[124].mxu1 %vm1143_vm2, %v3249_v0 }
 0x8df   :  { %5415 = vmatprep.mubr.msk.bf16.mxu1 %vm5826_vm1, %v7906_v55 }
 0x8e0   :  { %5414 = vmatpush3.bf16.xpose.msra.mxu1 %v6371_v23  ;;  %v7939_v23 = vld [vmem:[#allocation3_spill] sm:$0xff] }
 0x8e1   :  { %5425 = vmatprep.subr.bf16.mxu1 %v7906_v55 }
 0x8e3   :  { %5410 = vmatmul.mubr.msk.bf16.vlgmr.msra.gmra.mrb[112].mxu0 %vm61_vm0, %v7931_v40 }
 0x8e4   :  { %5420 = vmatpush3.bf16.xpose.msra.mxu0 %v6403_v5  ;;  %5421 = vmatprep.mubr.msk.bf16.mxu0 %vm5826_vm1, %v7906_v55 }
 0x8e5   :  { %5431 = vmatprep.subr.bf16.mxu0 %v7906_v55 }
 0x8e7   :  { %5416 = vmatmul.mubr.msk.bf16.vlgmr.msra.gmra.mrb[128].mxu1 %vm61_vm0, %v7932_v53 }
 0x8e8   :  { %5426 = vmatpush3.bf16.xpose.msra.mxu1 %v6436_v15  ;;  %5427 = vmatprep.mubr.msk.bf16.mxu1 %vm5826_vm1, %v7906_v55 }
 0x8e9   :  { %5437 = vmatprep.subr.bf16.mxu1 %v7906_v55 }
 0x8eb   :  { %5422 = vmatmul.mubr.msk.bf16.vlgmr.msra.gmra.mrb[116].mxu0 %vm61_vm0, %v7933_v27 }
 0x8ec   :  { %5432 = vmatpush3.bf16.xpose.msra.mxu0 %v6398_v11  ;;  %5433 = vmatprep.mubr.msk.bf16.mxu0 %vm5826_vm1, %v7906_v55 }
 0x8ed   :  { %5443 = vmatprep.subr.bf16.mxu0 %v7906_v55 }
 0x8ef   :  { %5428 = vmatmul.mubr.msk.bf16.vlgmr.msra.gmra.mrb[132].mxu1 %vm61_vm0, %v7934_v19 }
 0x8f0   :  { %5438 = vmatpush3.bf16.xpose.msra.mxu1 %v6461_v59  ;;  %5439 = vmatprep.mubr.msk.bf16.mxu1 %vm5826_vm1, %v7906_v55 }
 0x8f1   :  { %5449 = vmatprep.subr.bf16.mxu1 %v7906_v55 }
 0x8f3   :  { %5434 = vmatmul.mubr.msk.bf16.vlgmr.msra.gmra.mrb[120].mxu0 %vm61_vm0, %v7935_v33 }
 0x8f4   :  { %5444 = vmatpush3.bf16.xpose.msra.mxu0 %v6428_v45  ;;  %5445 = vmatprep.mubr.msk.bf16.mxu0 %vm5826_vm1, %v7906_v55 }
 0x8f5   :  { %5455 = vmatprep.subr.bf16.mxu0 %v7906_v55 }
 0x8f7   :  { %5440 = vmatmul.mubr.msk.bf16.vlgmr.msra.gmra.mrb[136].mxu1 %vm61_vm0, %v7936_v25 }
 0x8f8   :  { %5450 = vmatpush3.bf16.xpose.msra.mxu1 %v6482_v30  ;;  %5451 = vmatprep.mubr.msk.bf16.mxu1 %vm5826_vm1, %v7906_v55 }
 0x8f9   :  { %5461 = vmatprep.subr.bf16.mxu1 %v7906_v55 }
 0x8fb   :  { %5446 = vmatmul.mubr.msk.bf16.vlgmr.msra.gmra.mrb[124].mxu0 %vm61_vm0, %v7937_v46 }
 0x8fc   :  { %5456 = vmatpush3.bf16.msra.mxu0 %v6393_v4  ;;  %5457 = vmatprep.mubr.msk.bf16.mxu0 %vm5826_vm1, %v7906_v55 }
 0x8fd   :  { %5467 = vmatprep.subr.bf16.mxu0 %v7906_v55 }
 0x8ff   :  { %5452 = vmatmul.mubr.msk.bf16.vlgmr.msra.gmra.mrb[140].mxu1 %vm61_vm0, %v7938_v10  ;;  %v7943_v10 = vld [vmem:[#allocation8_spill] sm:$0xff] }
 0x900   :  { %5462 = vmatpush3.bf16.msra.mxu1 %v6391_v35  ;;  %5463 = vmatprep.mubr.msk.bf16.mxu1 %vm5826_vm1, %v7906_v55 }
 0x901   :  { %5473 = vmatprep.subr.bf16.mxu1 %v7906_v55 }
 0x995   :  { %v3287_v37 = vpop.f32.mrb[96].mxu0 }
 0x996   :  { %v3607_v4 = vmul.f32 %v7939_v23, %v3287_v37  ;;  %v5363_v11 = vpop.f32.mrb[97].mxu0 }
 0x997   :  { %v3290_v5 = vpop.f32.mrb[98].mxu0 }
 0x998   :  { %v7479_v45 = vadd.f32 %v3607_v4, %v7125_v31  ;;  %v3608_v15 = vmul.f32 %v7939_v23, %v3290_v5  ;;  %v5364_v61 = vpop.f32.mrb[99].mxu0 }
 0x999   :  { %v3331_v59 = vpop.f32.mrb[112].mxu1 }
 0x99a   :  { %v7483_v30 = vadd.f32 %v3608_v15, %v7129_v51  ;;  %v3609_v35 = vmul.f32 %v7939_v23, %v3331_v59  ;;  %v5369_v34 = vpop.f32.mrb[113].mxu1  ;;  %v7944_v15 = vld [vmem:[#allocation9_spill] sm:$0xff] }
 0x99b   :  { %v3334_v32 = vpop.f32.mrb[114].mxu1 }
 0x99c   :  { %v7487_v54 = vadd.f32 %v3609_v35, %v7133_v29  ;;  %v3610_v62 = vmul.f32 %v7939_v23, %v3334_v32  ;;  %v5370_v44 = vpop.f32.mrb[115].mxu1  ;;  %v7945_v32 = vld [vmem:[#allocation10_spill] sm:$0xff] }
 0x99d   :  { %v3375_v56 = vpop.f32.mrb[100].mxu0 }
 0x99e   :  { %v7491_v31 = vadd.f32 %v3610_v62, %v7137_v49  ;;  %v3611_v38 = vmul.f32 %v7939_v23, %v3375_v56  ;;  %v5375_v18 = vpop.f32.mrb[101].mxu0 }
 0x99f   :  { %v3378_v20 = vpop.f32.mrb[102].mxu0  ;;  %v7946_v18 = vld [vmem:[#allocation11_spill] sm:$0xff] }
 0x9a0   :  { %v7495_v51 = vadd.f32 %v3611_v38, %v7141_v36  ;;  %v3612_v48 = vmul.f32 %v7939_v23, %v3378_v20  ;;  %v5376_v17 = vpop.f32.mrb[103].mxu0  ;;  %v7541_v38 = vld [vmem:[%s7880_s10 + $0x30] sm:$0xff] }
 0x9a1   :  { %v3419_v60 = vpop.f32.mrb[116].mxu1  ;;  %v7549_v17 = vld [vmem:[%s7880_s10 + $0x38] sm:$0xff] }
 0x9a2   :  { %v7499_v29 = vadd.f32 %v3612_v48, %v7145_v1  ;;  %v3613_v2 = vmul.f32 %v7939_v23, %v3419_v60  ;;  %v5381_v12 = vpop.f32.mrb[117].mxu1 }
 0x9a3   :  { %v3422_v41 = vpop.f32.mrb[118].mxu1 }
 0x9a4   :  { %v7503_v49 = vadd.f32 %v3613_v2, %v7149_v21  ;;  %v3614_v43 = vmul.f32 %v7939_v23, %v3422_v41  ;;  %v5382_v50 = vpop.f32.mrb[119].mxu1  ;;  %v7940_v21 = vld [vmem:[#allocation5_spill] sm:$0xff] }
 0x9a5   :  { %v3463_v57 = vpop.f32.mrb[104].mxu0 }
 0x9a6   :  { %v7507_v36 = vadd.f32 %v3614_v43, %v7153_v16  ;;  %v3615_v47 = vmul.f32 %v7939_v23, %v3463_v57  ;;  %v5387_v52 = vpop.f32.mrb[105].mxu0  ;;  %v7941_v16 = vld [vmem:[#allocation6_spill] sm:$0xff] }
 0x9a7   :  { %v3466_v63 = vpop.f32.mrb[106].mxu0 }
 0x9a8   :  { %v7511_v1 = vadd.f32 %v3615_v47, %v7157_v58  ;;  %v3616_v42 = vmul.f32 %v7939_v23, %v3466_v63  ;;  %v5388_v14 = vpop.f32.mrb[107].mxu0  ;;  %v7942_v58 = vld [vmem:[#allocation7_spill] sm:$0xff] }
 0x9a9   :  { %v3507_v39 = vpop.f32.mrb[120].mxu1 }
 0x9aa   :  { %v7515_v22 = vadd.f32 %v3616_v42, %v7940_v21  ;;  %v3617_v3 = vmul.f32 %v7939_v23, %v3507_v39  ;;  %v5393_v24 = vpop.f32.mrb[121].mxu1 }
 0x9ab   :  { %v3510_v0 = vpop.f32.mrb[122].mxu1 }
 0x9ac   :  { %v7519_v26 = vadd.f32 %v3617_v3, %v7941_v16  ;;  %v3618_v40 = vmul.f32 %v7939_v23, %v3510_v0  ;;  %v5394_v53 = vpop.f32.mrb[123].mxu1 }
 0x9ad   :  { %v3551_v27 = vpop.f32.mrb[108].mxu0 }
 0x9ae   :  { %v7523_v19 = vadd.f32 %v3618_v40, %v7942_v58  ;;  %v3619_v33 = vmul.f32 %v7939_v23, %v3551_v27  ;;  %v5399_v25 = vpop.f32.mrb[109].mxu0 }
 0x9af   :  { %v3554_v46 = vpop.f32.mrb[110].mxu0 }
 0x9b0   :  { %v7527_v37 = vadd.f32 %v3619_v33, %v7943_v10  ;;  %v3620_v4 = vmul.f32 %v7939_v23, %v3554_v46  ;;  %v5400_v11 = vpop.f32.mrb[111].mxu0 }
 0x9b1   :  { %v3595_v5 = vpop.f32.mrb[124].mxu1 }
 0x9b2   :  { %v7531_v61 = vadd.f32 %v3620_v4, %v7944_v15  ;;  %v3621_v59 = vmul.f32 %v7939_v23, %v3595_v5  ;;  %v5405_v35 = vpop.f32.mrb[125].mxu1 }
 0x9b3   :  { %v3598_v34 = vpop.f32.mrb[126].mxu1 }
 0x9b4   :  { %v7535_v62 = vadd.f32 %v3621_v59, %v7945_v32  ;;  %v3622_v44 = vmul.f32 %v7939_v23, %v3598_v34  ;;  %v5406_v56 = vpop.f32.mrb[127].mxu1 }
 0x9b6   :  { %v7544_v20 = vadd.f32 %v3622_v44, %v7946_v18  ;;  %v3693_v48 = vpop.f32.mrb[112].mxu0 }
 0x9b7   :  { %v7552_v60 = vadd.f32 %v7541_v38, %v3693_v48  ;;  %v5411_v2 = vpop.f32.mrb[113].mxu0 }
 0x9b8   :  { %v3696_v23 = vpop.f32.mrb[114].mxu0 }
 0x9b9   :  { %v7555_v12 = vadd.f32 %v7549_v17, %v3696_v23  ;;  %v5412_v41 = vpop.f32.mrb[115].mxu0  ;;  %v4027_v43 = vsel %vm1143_vm2, %v7552_v60, -inf }
 0x9ba   :  { %4028 = vmax.xlane.f32.xlu0 %v4027_v43  ;;  %v3737_v50 = vpop.f32.mrb[128].mxu1 }
 0x9bb   :  { %v7560_v57 = vadd.f32 %v7541_v38, %v3737_v50  ;;  %v5417_v47 = vpop.f32.mrb[129].mxu1  ;;  %v4030_v52 = vsel %vm1143_vm2, %v7555_v12, -inf }
 0x9bc   :  { %4031 = vmax.xlane.f32.xlu1 %v4030_v52  ;;  %v3740_v63 = vpop.f32.mrb[130].mxu1 }
 0x9bd   :  { %v7565_v42 = vadd.f32 %v7549_v17, %v3740_v63  ;;  %v5418_v14 = vpop.f32.mrb[131].mxu1  ;;  %v4033_v39 = vsel %vm1143_vm2, %v7560_v57, -inf }
 0x9be   :  { %v3781_v21 = vpop.f32.mrb[116].mxu0  ;;  %4034 = vmax.xlane.f32.xlu0 %v4033_v39 }
 0x9bf   :  { %v7570_v3 = vadd.f32 %v7541_v38, %v3781_v21  ;;  %v5423_v24 = vpop.f32.mrb[117].mxu0  ;;  %v4036_v0 = vsel %vm1143_vm2, %v7565_v42, -inf }
 0x9c0   :  { %v3784_v16 = vpop.f32.mrb[118].mxu0  ;;  %4037 = vmax.xlane.f32.xlu1 %v4036_v0 }
 0x9c1   :  { %v7575_v40 = vadd.f32 %v7549_v17, %v3784_v16  ;;  %v5424_v53 = vpop.f32.mrb[119].mxu0  ;;  %v4039_v27 = vsel %vm1143_vm2, %v7570_v3, -inf }
 0x9c2   :  { %4040 = vmax.xlane.f32.xlu0 %v4039_v27  ;;  %v3825_v58 = vpop.f32.mrb[132].mxu1 }
 0x9c3   :  { %v7580_v33 = vadd.f32 %v7541_v38, %v3825_v58  ;;  %v5429_v25 = vpop.f32.mrb[133].mxu1  ;;  %v4042_v46 = vsel %vm1143_vm2, %v7575_v40, -inf }
 0x9c4   :  { %4043 = vmax.xlane.f32.xlu1 %v4042_v46  ;;  %v3828_v10 = vpop.f32.mrb[134].mxu1 }
 0x9c5   :  { %v7585_v4 = vadd.f32 %v7549_v17, %v3828_v10  ;;  %v5430_v11 = vpop.f32.mrb[135].mxu1  ;;  %v4045_v5 = vsel %vm1143_vm2, %v7580_v33, -inf }
 0x9c6   :  { %v3869_v15 = vpop.f32.mrb[120].mxu0  ;;  %4046 = vmax.xlane.f32.xlu0 %v4045_v5 }
 0x9c7   :  { %v7590_v59 = vadd.f32 %v7541_v38, %v3869_v15  ;;  %v5435_v35 = vpop.f32.mrb[121].mxu0  ;;  %v4048_v34 = vsel %vm1143_vm2, %v7585_v4, -inf }
 0x9c8   :  { %v3872_v32 = vpop.f32.mrb[122].mxu0  ;;  %4049 = vmax.xlane.f32.xlu1 %v4048_v34 }
 0x9c9   :  { %v7595_v44 = vadd.f32 %v7549_v17, %v3872_v32  ;;  %v5436_v56 = vpop.f32.mrb[123].mxu0  ;;  %v4051_v18 = vsel %vm1143_vm2, %v7590_v59, -inf }
 0x9ca   :  { %4052 = vmax.xlane.f32.xlu0 %v4051_v18  ;;  %v3913_v48 = vpop.f32.mrb[136].mxu1 }
 0x9cb   :  { %v7600_v2 = vadd.f32 %v7541_v38, %v3913_v48  ;;  %v5441_v23 = vpop.f32.mrb[137].mxu1  ;;  %v4054_v41 = vsel %vm1143_vm2, %v7595_v44, -inf }
 0x9cc   :  { %4055 = vmax.xlane.f32.xlu1 %v4054_v41  ;;  %v3916_v43 = vpop.f32.mrb[138].mxu1 }
 0x9cd   :  { %v7605_v50 = vadd.f32 %v7549_v17, %v3916_v43  ;;  %v5442_v47 = vpop.f32.mrb[139].mxu1  ;;  %v4057_v52 = vsel %vm1143_vm2, %v7600_v2, -inf }
 0x9ce   :  { %v3957_v63 = vpop.f32.mrb[124].mxu0  ;;  %4058 = vmax.xlane.f32.xlu0 %v4057_v52 }
 0x9cf   :  { %v7610_v14 = vadd.f32 %v7541_v38, %v3957_v63  ;;  %v5447_v39 = vpop.f32.mrb[125].mxu0  ;;  %v4060_v21 = vsel %vm1143_vm2, %v7605_v50, -inf }
 0x9d0   :  { %v3960_v24 = vpop.f32.mrb[126].mxu0  ;;  %4061 = vmax.xlane.f32.xlu1 %v4060_v21 }
 0x9d1   :  { %v7615_v0 = vadd.f32 %v7549_v17, %v3960_v24  ;;  %v5448_v16 = vpop.f32.mrb[127].mxu0  ;;  %v4063_v53 = vsel %vm1143_vm2, %v7610_v14, -inf }
 0x9d2   :  { %4064 = vmax.xlane.f32.xlu0 %v4063_v53  ;;  %v4001_v27 = vpop.f32.mrb[140].mxu1 }
 0x9d3   :  { %v7620_v58 = vadd.f32 %v7541_v38, %v4001_v27  ;;  %v5453_v25 = vpop.f32.mrb[141].mxu1  ;;  %v4066_v46 = vsel %vm1143_vm2, %v7615_v0, -inf }
 0x9d4   :  { %4067 = vmax.xlane.f32.xlu1 %v4066_v46  ;;  %v4004_v10 = vpop.f32.mrb[142].mxu1 }
 0x9d5   :  { %v7625_v11 = vadd.f32 %v7549_v17, %v4004_v10  ;;  %v5454_v5 = vpop.f32.mrb[143].mxu1  ;;  %v4069_v15 = vsel %vm1143_vm2, %v7620_v58, -inf }
 0x9d6   :  { %4070 = vmax.xlane.f32.xlu0 %v4069_v15 }
 0x9d7   :  { %v4072_v35 = vsel %vm1143_vm2, %v7625_v11, -inf }
 0x9d8   :  { %4073 = vmax.xlane.f32.xlu1 %v4072_v35 }
 0xa47   :  { %v4029_v38 = vpop.xlane.xlu0 %4028 }
 0xa48   :  { %v4075_v34 = vsub.f32 %v7552_v60, %v4029_v38 }
 0xa49   :  { %v4032_v32 = vpop.xlane.xlu1 %4031 }
 0xa4a   :  { %v4091_v56 = vmul.f32 1.442695, %v4075_v34  ;;  %v4076_v18 = vsub.f32 %v7555_v12, %v4032_v32 }
 0xa4b   :  { %v4035_v48 = vpop.xlane.xlu0 %4034 }
 0xa4c   :  { %5761 = vpow2.f32 %v4091_v56  ;;  %v4093_v17 = vmul.f32 1.442695, %v4076_v18  ;;  %v4077_v23 = vsub.f32 %v7560_v57, %v4035_v48 }
 0xa4d   :  { %v4038_v41 = vpop.xlane.xlu1 %4037 }
 0xa4e   :  { %5763 = vpow2.f32 %v4093_v17  ;;  %v4095_v43 = vmul.f32 1.442695, %v4077_v23  ;;  %v4078_v47 = vsub.f32 %v7565_v42, %v4038_v41 }
 0xa4f   :  { %v4041_v52 = vpop.xlane.xlu0 %4040 }
 0xa50   :  { %5765 = vpow2.f32 %v4095_v43  ;;  %v4097_v63 = vmul.f32 1.442695, %v4078_v47  ;;  %v4079_v39 = vsub.f32 %v7570_v3, %v4041_v52 }
 0xa51   :  { %v4044_v60 = vpop.xlane.xlu1 %4043 }
 0xa52   :  { %5767 = vpow2.f32 %v4097_v63  ;;  %v4099_v21 = vmul.f32 1.442695, %v4079_v39  ;;  %v4080_v12 = vsub.f32 %v7575_v40, %v4044_v60 }
 0xa53   :  { %v4047_v24 = vpop.xlane.xlu0 %4046 }
 0xa54   :  { %5769 = vpow2.f32 %v4099_v21  ;;  %v4101_v16 = vmul.f32 1.442695, %v4080_v12  ;;  %v4081_v57 = vsub.f32 %v7580_v33, %v4047_v24 }
 0xa55   :  { %v4050_v53 = vpop.xlane.xlu1 %4049 }
 0xa56   :  { %v7638_v27 = vpop.eup %5761  ;;  %5771 = vpow2.f32 %v4101_v16  ;;  %v4103_v42 = vmul.f32 1.442695, %v4081_v57  ;;  %v4082_v25 = vsub.f32 %v7585_v4, %v4050_v53 }
 0xa57   :  { %v4053_v46 = vpop.xlane.xlu0 %4052  ;;  %v4123_v3 = vsel %vm1143_vm2, %v7638_v27, 0.0 }
 0xa58   :  { %v7643_v10 = vpop.eup %5763  ;;  %5773 = vpow2.f32 %v4103_v42  ;;  %v4105_v40 = vmul.f32 1.442695, %v4082_v25  ;;  %v4083_v5 = vsub.f32 %v7590_v59, %v4053_v46  ;;  %4124 = vadd.xlane.f32.xlu0 %v4123_v3 }
 0xa59   :  { %v4056_v15 = vpop.xlane.xlu1 %4055  ;;  %v4126_v33 = vsel %vm1143_vm2, %v7643_v10, 0.0 }
 0xa5a   :  { %v7648_v35 = vpop.eup %5765  ;;  %5775 = vpow2.f32 %v4105_v40  ;;  %v4107_v38 = vmul.f32 1.442695, %v4083_v5  ;;  %v4084_v4 = vsub.f32 %v7595_v44, %v4056_v15  ;;  %4127 = vadd.xlane.f32.xlu1 %v4126_v33 }
 0xa5b   :  { %v4059_v34 = vpop.xlane.xlu0 %4058  ;;  %v4129_v32 = vsel %vm1143_vm2, %v7648_v35, 0.0 }
 0xa5c   :  { %v7653_v56 = vpop.eup %5767  ;;  %5777 = vpow2.f32 %v4107_v38  ;;  %v4109_v59 = vmul.f32 1.442695, %v4084_v4  ;;  %v4085_v18 = vsub.f32 %v7600_v2, %v4059_v34  ;;  %4130 = vadd.xlane.f32.xlu0 %v4129_v32 }
 0xa5d   :  { %v4062_v48 = vpop.xlane.xlu1 %4061  ;;  %v4132_v17 = vsel %vm1143_vm2, %v7653_v56, 0.0 }
 0xa5e   :  { %v7658_v23 = vpop.eup %5769  ;;  %5779 = vpow2.f32 %v4109_v59  ;;  %v4111_v44 = vmul.f32 1.442695, %v4085_v18  ;;  %v4086_v41 = vsub.f32 %v7605_v50, %v4062_v48  ;;  %4133 = vadd.xlane.f32.xlu1 %v4132_v17 }
 0xa5f   :  { %v4065_v43 = vpop.xlane.xlu0 %4064  ;;  %v4135_v47 = vsel %vm1143_vm2, %v7658_v23, 0.0 }
 0xa60   :  { %v7663_v52 = vpop.eup %5771  ;;  %5781 = vpow2.f32 %v4111_v44  ;;  %v4113_v2 = vmul.f32 1.442695, %v4086_v41  ;;  %v4087_v63 = vsub.f32 %v7610_v14, %v4065_v43  ;;  %4136 = vadd.xlane.f32.xlu0 %v4135_v47 }
 0xa61   :  { %v4068_v39 = vpop.xlane.xlu1 %4067  ;;  %v4138_v60 = vsel %vm1143_vm2, %v7663_v52, 0.0 }
 0xa62   :  { %v7668_v21 = vpop.eup %5773  ;;  %5783 = vpow2.f32 %v4113_v2  ;;  %v4115_v50 = vmul.f32 1.442695, %v4087_v63  ;;  %v4088_v12 = vsub.f32 %v7615_v0, %v4068_v39  ;;  %4139 = vadd.xlane.f32.xlu1 %v4138_v60 }
 0xa63   :  { %v4071_v24 = vpop.xlane.xlu0 %4070  ;;  %v4141_v16 = vsel %vm1143_vm2, %v7668_v21, 0.0 }
 0xa64   :  { %v7673_v57 = vpop.eup %5775  ;;  %5785 = vpow2.f32 %v4115_v50  ;;  %v4117_v14 = vmul.f32 1.442695, %v4088_v12  ;;  %v4089_v53 = vsub.f32 %v7620_v58, %v4071_v24  ;;  %4142 = vadd.xlane.f32.xlu0 %v4141_v16 }
 0xa65   :  { %v4074_v42 = vpop.xlane.xlu1 %4073  ;;  %v4144_v25 = vsel %vm1143_vm2, %v7673_v57, 0.0 }
 0xa66   :  { %v7678_v46 = vpop.eup %5777  ;;  %5787 = vpow2.f32 %v4117_v14  ;;  %v4119_v0 = vmul.f32 1.442695, %v4089_v53  ;;  %v4090_v3 = vsub.f32 %v7625_v11, %v4074_v42  ;;  %4145 = vadd.xlane.f32.xlu1 %v4144_v25 }
 0xa67   :  { %v4147_v40 = vsel %vm1143_vm2, %v7678_v46, 0.0 }
 0xa68   :  { %v7683_v5 = vpop.eup %5779  ;;  %5789 = vpow2.f32 %v4119_v0  ;;  %v4121_v15 = vmul.f32 1.442695, %v4090_v3  ;;  %4148 = vadd.xlane.f32.xlu0 %v4147_v40 }
 0xa69   :  { %v4150_v58 = vsel %vm1143_vm2, %v7683_v5, 0.0 }
 0xa6a   :  { %v7687_v33 = vpop.eup %5781  ;;  %5791 = vpow2.f32 %v4121_v15  ;;  %4151 = vadd.xlane.f32.xlu1 %v4150_v58 }
 0xa6b   :  { %v4153_v38 = vsel %vm1143_vm2, %v7687_v33, 0.0 }
 0xa6c   :  { %v7691_v11 = vpop.eup %5783  ;;  %4154 = vadd.xlane.f32.xlu0 %v4153_v38 }
 0xa6d   :  { %v4156_v4 = vsel %vm1143_vm2, %v7691_v11, 0.0 }
 0xa6e   :  { %v7695_v34 = vpop.eup %5785  ;;  %4157 = vadd.xlane.f32.xlu1 %v4156_v4 }
 0xa6f   :  { %v4159_v32 = vsel %vm1143_vm2, %v7695_v34, 0.0 }
 0xa70   :  { %v7699_v59 = vpop.eup %5787  ;;  %4160 = vadd.xlane.f32.xlu0 %v4159_v32 }
 0xa71   :  { %v4162_v18 = vsel %vm1143_vm2, %v7699_v59, 0.0 }
 0xa72   :  { %v7703_v48 = vpop.eup %5789  ;;  %4163 = vadd.xlane.f32.xlu1 %v4162_v18 }
 0xa73   :  { %v4165_v17 = vsel %vm1143_vm2, %v7703_v48, 0.0 }
 0xa74   :  { %v7707_v44 = vpop.eup %5791  ;;  %4166 = vadd.xlane.f32.xlu0 %v4165_v17 }
 0xa75   :  { %v4168_v41 = vsel %vm1143_vm2, %v7707_v44, 0.0 }
 0xa76   :  { %4169 = vadd.xlane.f32.xlu1 %v4168_v41 }
 0xae5   :  { %v4125_v43 = vpop.xlane.xlu0 %4124 }
 0xae6   :  { %5793 = vrcp.f32 %v4125_v43 }
 0xae7   :  { %v4128_v47 = vpop.xlane.xlu1 %4127 }
 0xae8   :  { %5795 = vrcp.f32 %v4128_v47 }
 0xae9   :  { %v4131_v2 = vpop.xlane.xlu0 %4130 }
 0xaea   :  { %5797 = vrcp.f32 %v4131_v2 }
 0xaeb   :  { %v4134_v63 = vpop.xlane.xlu1 %4133 }
 0xaec   :  { %5799 = vrcp.f32 %v4134_v63 }
 0xaed   :  { %v4137_v39 = vpop.xlane.xlu0 %4136 }
 0xaee   :  { %5801 = vrcp.f32 %v4137_v39 }
 0xaef   :  { %v4140_v60 = vpop.xlane.xlu1 %4139 }
 0xaf0   :  { %v5794_v50 = vpop.eup %5793  ;;  %5803 = vrcp.f32 %v4140_v60 }
 0xaf1   :  { %v4143_v12 = vpop.xlane.xlu0 %4142  ;;  %v4187_v16 = vmul.f32 %v5794_v50, %v7638_v27 }
 0xaf2   :  { %v5796_v24 = vpop.eup %5795  ;;  %5805 = vrcp.f32 %v4143_v12 }
 0xaf3   :  { %v4188_v14 = vmul.f32 %v5796_v24, %v7643_v10  ;;  %v4146_v53 = vpop.xlane.xlu1 %4145 }
 0xaf4   :  { %v5798_v42 = vpop.eup %5797  ;;  %5807 = vrcp.f32 %v4146_v53 }
 0xaf5   :  { %v4149_v25 = vpop.xlane.xlu0 %4148  ;;  %v4203_v0 = vpack.c.bf16 %v4188_v14, %v4187_v16  ;;  %v4189_v40 = vmul.f32 %v5798_v42, %v7648_v35 }
 0xaf6   :  { %v5800_v3 = vpop.eup %5799  ;;  %5809 = vrcp.f32 %v4149_v25 }
 0xaf7   :  { %v4190_v15 = vmul.f32 %v5800_v3, %v7653_v56  ;;  %5458 = vmatmul.mubr.msk.bf16.vlgmr.msra.gmra.mrb[128].mxu0 %vm1143_vm2, %v4203_v0  ;;  %v4152_v58 = vpop.xlane.xlu1 %4151 }
 0xaf8   :  { %v5802_v38 = vpop.eup %5801  ;;  %5468 = vmatpush3.bf16.msra.mxu0 %v6422_v7  ;;  %5811 = vrcp.f32 %v4152_v58  ;;  %5469 = vmatprep.mubr.msk.bf16.mxu0 %vm5826_vm1, %v7906_v55 }
 0xaf9   :  { %v4155_v27 = vpop.xlane.xlu0 %4154  ;;  %v4204_v10 = vpack.c.bf16 %v4190_v15, %v4189_v40  ;;  %5479 = vmatprep.subr.bf16.mxu0 %v7906_v55  ;;  %v4191_v35 = vmul.f32 %v5802_v38, %v7658_v23 }
 0xafa   :  { %v5804_v4 = vpop.eup %5803  ;;  %5813 = vrcp.f32 %v4155_v27 }
 0xafb   :  { %v4192_v56 = vmul.f32 %v5804_v4, %v7663_v52  ;;  %5464 = vmatmul.mubr.msk.bf16.vlgmr.msra.gmra.mrb[144].mxu1 %vm1143_vm2, %v4204_v10  ;;  %v4158_v32 = vpop.xlane.xlu1 %4157 }
 0xafc   :  { %v5806_v18 = vpop.eup %5805  ;;  %5474 = vmatpush3.bf16.msra.mxu1 %v6418_v13  ;;  %5815 = vrcp.f32 %v4158_v32  ;;  %5475 = vmatprep.mubr.msk.bf16.mxu1 %vm5826_vm1, %v7906_v55 }
 0xafd   :  { %v4161_v7 = vpop.xlane.xlu0 %4160  ;;  %v4205_v17 = vpack.c.bf16 %v4192_v56, %v4191_v35  ;;  %5485 = vmatprep.subr.bf16.mxu1 %v7906_v55  ;;  %v4193_v23 = vmul.f32 %v5806_v18, %v7668_v21 }
 0xafe   :  { %v5808_v41 = vpop.eup %5807  ;;  %5817 = vrcp.f32 %v4161_v7 }
 0xaff   :  { %v4194_v52 = vmul.f32 %v5808_v41, %v7673_v57  ;;  %5470 = vmatmul.mubr.msk.bf16.vlgmr.msra.gmra.mrb[132].mxu0 %vm1143_vm2, %v4205_v17  ;;  %v4164_v43 = vpop.xlane.xlu1 %4163 }
 0xb00   :  { %v5810_v47 = vpop.eup %5809  ;;  %5480 = vmatpush3.bf16.msra.mxu0 %v6453_v9  ;;  %5819 = vrcp.f32 %v4164_v43  ;;  %5481 = vmatprep.mubr.msk.bf16.mxu0 %vm5826_vm1, %v7906_v55 }
 0xb01   :  { %v4167_v13 = vpop.xlane.xlu0 %4166  ;;  %v4206_v2 = vpack.c.bf16 %v4194_v52, %v4193_v23  ;;  %5491 = vmatprep.subr.bf16.mxu0 %v7906_v55  ;;  %v4195_v21 = vmul.f32 %v5810_v47, %v7678_v46 }
 0xb02   :  { %v5812_v63 = vpop.eup %5811  ;;  %5821 = vrcp.f32 %v4167_v13 }
 0xb03   :  { %v4196_v57 = vmul.f32 %v5812_v63, %v7683_v5  ;;  %5476 = vmatmul.mubr.msk.bf16.vlgmr.msra.gmra.mrb[148].mxu1 %vm1143_vm2, %v4206_v2  ;;  %v4170_v39 = vpop.xlane.xlu1 %4169 }
 0xb04   :  { %v5814_v60 = vpop.eup %5813  ;;  %5486 = vmatpush3.bf16.msra.mxu1 %v6449_v6  ;;  %5823 = vrcp.f32 %v4170_v39  ;;  %5487 = vmatprep.mubr.msk.bf16.mxu1 %vm5826_vm1, %v7906_v55 }
 0xb05   :  { %v4207_v9 = vpack.c.bf16 %v4196_v57, %v4195_v21  ;;  %5497 = vmatprep.subr.bf16.mxu1 %v7906_v55  ;;  %v4197_v12 = vmul.f32 %v5814_v60, %v7687_v33 }
 0xb06   :  { %v5816_v50 = vpop.eup %5815 }
 0xb07   :  { %v4198_v46 = vmul.f32 %v5816_v50, %v7691_v11  ;;  %5482 = vmatmul.mubr.msk.bf16.vlgmr.msra.gmra.mrb[136].mxu0 %vm1143_vm2, %v4207_v9 }
 0xb08   :  { %v5818_v5 = vpop.eup %5817  ;;  %5492 = vmatpush3.bf16.msra.mxu0 %v6476_v8  ;;  %5493 = vmatprep.mubr.msk.bf16.mxu0 %vm5826_vm1, %v7906_v55 }
 0xb09   :  { %v4208_v6 = vpack.c.bf16 %v4198_v46, %v4197_v12  ;;  %v4199_v16 = vmul.f32 %v5818_v5, %v7695_v34  ;;  %v5535_v34 = vld [vmem:[%s7881_s11] sm:$0xff]  }
 0xb0a   :  { %v5820_v24 = vpop.eup %5819  ;;  %5503 = vmatprep.subr.bf16.mxu0 %v5535_v34 }
 0xb0b   :  { %v4200_v14 = vmul.f32 %v5820_v24, %v7699_v59  ;;  %5488 = vmatmul.mubr.msk.bf16.vlgmr.msra.gmra.mrb[152].mxu1 %vm1143_vm2, %v4208_v6  ;;  %v7947_v59 = vld [vmem:[#allocation4_spill] sm:$0xff] }
 0xb0c   :  { %v5822_v53 = vpop.eup %5821  ;;  %5498 = vmatpush3.bf16.msra.mxu1 %v6474_v28  ;;  %5499 = vmatprep.mubr.msk.bf16.mxu1 %vm5826_vm1, %v7906_v55  ;;  %v5536_v28 = vld [vmem:[%s7881_s11 + $0x8] sm:$0xff]  }
 0xb0d   :  { %v4209_v33 = vpack.c.bf16 %v4200_v14, %v4199_v16  ;;  %v4201_v8 = vmul.f32 %v5822_v53, %v7703_v48 }
 0xb0e   :  { %v5824_v11 = vpop.eup %5823 }
 0xb0f   :  { %v4202_v42 = vmul.f32 %v5824_v11, %v7707_v44  ;;  %5494 = vmatmul.mubr.msk.bf16.vlgmr.msra.gmra.mrb[140].mxu0 %vm1143_vm2, %v4209_v33 }
 0xb10   :  { %5504 = vmatpush3.bf16.msra.mxu0 %v5535_v34 }
 0xb11   :  { %v4210_v25 = vpack.c.bf16 %v4202_v42, %v4201_v8  ;;  %5505 = vmatprep.subr.bf16.mxu0 %v5536_v28 }
 0xb13   :  { %5500 = vmatmul.mubr.msk.bf16.vlgmr.msra.gmra.mrb[156].mxu1 %vm1143_vm2, %v4210_v25 }
 0xb14   :  { %5506 = vmatpush3.bf16.msra.mxu0 %v5536_v28 }
 0xbca   :  { %v4248_v55 = vpop.f32.mrb[128].mxu0 }
 0xbcb   :  { %v4568_v48 = vmul.f32 %v7947_v59, %v4248_v55  ;;  %v5459_v44 = vpop.f32.mrb[129].mxu0 }
 0xbcc   :  { %v4251_v0 = vpop.f32.mrb[130].mxu0 }
 0xbcd   :  { %v4584_v3 = vadd.f32 %v4568_v48, %v7479_v45  ;;  %v4569_v40 = vmul.f32 %v7947_v59, %v4251_v0  ;;  %v5460_v15 = vpop.f32.mrb[131].mxu0 }
 0xbce   :  { %v4292_v58 = vpop.f32.mrb[144].mxu1 }
 0xbcf   :  { %v4585_v38 = vadd.f32 %v4569_v40, %v7483_v30  ;;  %v4570_v27 = vmul.f32 %v7947_v59, %v4292_v58  ;;  %v5465_v10 = vpop.f32.mrb[145].mxu1 }
 0xbd0   :  { %v4295_v4 = vpop.f32.mrb[146].mxu1 }
 0xbd1   :  { %v4600_v35 = vpack.c.bf16 %v4585_v38, %v4584_v3  ;;  %v4586_v56 = vadd.f32 %v4570_v27, %v7487_v54  ;;  %v4571_v32 = vmul.f32 %v7947_v59, %v4295_v4  ;;  %v5466_v18 = vpop.f32.mrb[147].mxu1 }
 0xbd2   :  { %v4336_v7 = vpop.f32.mrb[132].mxu0 }
 0xbd3   :  { %v4587_v17 = vadd.f32 %v4571_v32, %v7491_v31  ;;  %v4572_v45 = vmul.f32 %v7947_v59, %v4336_v7  ;;  %v5471_v41 = vpop.f32.mrb[133].mxu0  ;;  %5507 = vmatprep.mubr.msk.bf16.mxu0 %vm61_vm0, %v4600_v35 }
 0xbd4   :  { %v4339_v23 = vpop.f32.mrb[134].mxu0 }
 0xbd5   :  { %v4601_v30 = vpack.c.bf16 %v4587_v17, %v4586_v56  ;;  %v4588_v52 = vadd.f32 %v4572_v45, %v7495_v51  ;;  %v4573_v43 = vmul.f32 %v7947_v59, %v4339_v23  ;;  %v5472_v47 = vpop.f32.mrb[135].mxu0 }
 0xbd6   :  { %v4380_v13 = vpop.f32.mrb[148].mxu1 }
 0xbd7   :  { %v4589_v54 = vadd.f32 %v4573_v43, %v7499_v29  ;;  %v4574_v2 = vmul.f32 %v7947_v59, %v4380_v13  ;;  %v5477_v63 = vpop.f32.mrb[149].mxu1  ;;  %5508 = vmatmul.mubr.msk.bf16.vlgmr.msra.gmra.mrb[144].mxu0 %vm61_vm0, %v4601_v30 }
 0xbd8   :  { %v4383_v31 = vpop.f32.mrb[150].mxu1 }
 0xbd9   :  { %v4602_v21 = vpack.c.bf16 %v4589_v54, %v4588_v52  ;;  %v4590_v57 = vadd.f32 %v4574_v2, %v7503_v49  ;;  %v4575_v39 = vmul.f32 %v7947_v59, %v4383_v31  ;;  %v5478_v60 = vpop.f32.mrb[151].mxu1 }
 0xbda   :  { %v4424_v9 = vpop.f32.mrb[136].mxu0 }
 0xbdb   :  { %v4591_v51 = vadd.f32 %v4575_v39, %v7507_v36  ;;  %v4576_v50 = vmul.f32 %v7947_v59, %v4424_v9  ;;  %v5483_v12 = vpop.f32.mrb[137].mxu0  ;;  %5511 = vmatprep.mubr.msk.bf16.mxu0 %vm61_vm0, %v4602_v21 }
 0xbdc   :  { %v4427_v29 = vpop.f32.mrb[138].mxu0 }
 0xbdd   :  { %v4603_v46 = vpack.c.bf16 %v4591_v51, %v4590_v57  ;;  %v4592_v5 = vadd.f32 %v4576_v50, %v7511_v1  ;;  %v4577_v6 = vmul.f32 %v7947_v59, %v4427_v29  ;;  %v5484_v24 = vpop.f32.mrb[139].mxu0 }
 0xbde   :  { %v4468_v16 = vpop.f32.mrb[152].mxu1 }
 0xbdf   :  { %v4593_v49 = vadd.f32 %v4577_v6, %v7515_v22  ;;  %v4578_v14 = vmul.f32 %v7947_v59, %v4468_v16  ;;  %v5489_v53 = vpop.f32.mrb[153].mxu1  ;;  %5512 = vmatmul.mubr.msk.bf16.gmra.mrb[148].mxu0 %vm61_vm0, %v4603_v46 }
 0xbe0   :  { %v4471_v36 = vpop.f32.mrb[154].mxu1 }
 0xbe1   :  { %v4604_v33 = vpack.c.bf16 %v4593_v49, %v4592_v5  ;;  %v4594_v11 = vadd.f32 %v4578_v14, %v7519_v26  ;;  %v4579_v8 = vmul.f32 %v7947_v59, %v4471_v36  ;;  %v5490_v42 = vpop.f32.mrb[155].mxu1 }
 0xbe2   :  { %v4512_v25 = vpop.f32.mrb[140].mxu0 }
 0xbe3   :  { %v4595_v1 = vadd.f32 %v4579_v8, %v7523_v19  ;;  %v4580_v34 = vmul.f32 %v7947_v59, %v4512_v25  ;;  %v5495_v28 = vpop.f32.mrb[141].mxu0  ;;  %5515 = vmatprep.mubr.msk.bf16.mxu0 %vm61_vm0, %v4604_v33 }
 0xbe4   :  { %v4515_v22 = vpop.f32.mrb[142].mxu0 }
 0xbe5   :  { %v4605_v55 = vpack.c.bf16 %v4595_v1, %v4594_v11  ;;  %v4596_v48 = vadd.f32 %v4580_v34, %v7527_v37  ;;  %v4581_v44 = vmul.f32 %v7947_v59, %v4515_v22  ;;  %v5496_v0 = vpop.f32.mrb[143].mxu0 }
 0xbe6   :  { %v4556_v3 = vpop.f32.mrb[156].mxu1 }
 0xbe7   :  { %v4597_v26 = vadd.f32 %v4581_v44, %v7531_v61  ;;  %v4582_v40 = vmul.f32 %v7947_v59, %v4556_v3  ;;  %v5501_v15 = vpop.f32.mrb[157].mxu1  ;;  %5516 = vmatmul.mubr.msk.bf16.gmra.mrb[152].mxu0 %vm61_vm0, %v4605_v55  ;;  %v4880_v61 = vld [vmem:[%s7882_s12] ss:$0 sm:$0xff] }
 0xbe8   :  { %v4559_v19 = vpop.f32.mrb[158].mxu1 }
 0xbe9   :  { %v4606_v58 = vpack.c.bf16 %v4597_v26, %v4596_v48  ;;  %v4598_v38 = vadd.f32 %v4582_v40, %v7535_v62  ;;  %v4583_v27 = vmul.f32 %v7947_v59, %v4559_v19  ;;  %v5502_v10 = vpop.f32.mrb[159].mxu1 }
 0xbeb   :  { %v4599_v37 = vadd.f32 %v4583_v27, %v7544_v20  ;;  %5519 = vmatprep.mubr.msk.bf16.mxu0 %vm61_vm0, %v4606_v58 }
 0xbed   :  { %v4607_v4 = vpack.c.bf16 %v4599_v37, %v4598_v38 }
 0xbef   :  { %5520 = vmatmul.mubr.msk.bf16.gmra.mrb[156].mxu0 %vm61_vm0, %v4607_v4 }
 0xcaa   :  { %v5509_v35 = vpop.f32.mrb[144].mxu0 }
 0xcab   :  { %v4698_v56 = vadd.f32 %v5509_v35, %v4880_v61  ;;  %v4689_v32 = vpop.f32.mrb[145].mxu0 }
 0xcac   :  { %v4690_v18 = vadd.f32 %v4880_v61, %v4689_v32  ;;  %v5510_v7 = vpop.f32.mrb[146].mxu0 }
 0xcad   :  { %4754 = vst.msk [vmem:[%s7883_s13 + $0x10] sm:$0xff] %vm61_vm0, %v4698_v56  ;;  %v4701_v62 = vadd.f32 %v5510_v7, %v4880_v61  ;;  %v4692_v20 = vpop.f32.mrb[147].mxu0 }
 0xcae   :  { %4752 = vst.msk [vmem:[%s7883_s13] sm:$0xff] %vm61_vm0, %v4690_v18  ;;  %v4693_v59 = vadd.f32 %v4880_v61, %v4692_v20 }
 0xcaf   :  { %4755 = vst.msk [vmem:[%s7883_s13 + $0x18] sm:$0xff] %vm61_vm0, %v4701_v62 }
 0xcb0   :  { %4753 = vst.msk [vmem:[%s7883_s13 + $0x8] sm:$0xff] %vm61_vm0, %v4693_v59 }
 0xcb2   :  { %v5513_v17 = vpop.f32.mrb[148].mxu0 }
 0xcb3   :  { %v4714_v45 = vadd.f32 %v5513_v17, %v4880_v61  ;;  %v4705_v41 = vpop.f32.mrb[149].mxu0 }
 0xcb4   :  { %v4706_v23 = vadd.f32 %v4880_v61, %v4705_v41  ;;  %v5514_v30 = vpop.f32.mrb[150].mxu0 }
 0xcb5   :  { %4758 = vst.msk [vmem:[%s7883_s13 + $0x30] sm:$0xff] %vm61_vm0, %v4714_v45  ;;  %v4717_v52 = vadd.f32 %v5514_v30, %v4880_v61  ;;  %v4708_v43 = vpop.f32.mrb[151].mxu0 }
 0xcb6   :  { %4756 = vst.msk [vmem:[%s7883_s13 + $0x20] sm:$0xff] %vm61_vm0, %v4706_v23  ;;  %v4709_v47 = vadd.f32 %v4880_v61, %v4708_v43 }
 0xcb7   :  { %4759 = vst.msk [vmem:[%s7883_s13 + $0x38] sm:$0xff] %vm61_vm0, %v4717_v52 }
 0xcb8   :  { %4757 = vst.msk [vmem:[%s7883_s13 + $0x28] sm:$0xff] %vm61_vm0, %v4709_v47 }
 0xcba   :  { %v5517_v13 = vpop.f32.mrb[152].mxu0 }
 0xcbb   :  { %v4730_v54 = vadd.f32 %v5517_v13, %v4880_v61  ;;  %v4721_v2 = vpop.f32.mrb[153].mxu0 }
 0xcbc   :  { %v4722_v63 = vadd.f32 %v4880_v61, %v4721_v2  ;;  %v5518_v31 = vpop.f32.mrb[154].mxu0 }
 0xcbd   :  { %4762 = vst.msk [vmem:[%s7883_s13 + $0x50] sm:$0xff] %vm61_vm0, %v4730_v54  ;;  %v4733_v21 = vadd.f32 %v5518_v31, %v4880_v61  ;;  %v4724_v57 = vpop.f32.mrb[155].mxu0 }
 0xcbe   :  { %4760 = vst.msk [vmem:[%s7883_s13 + $0x40] sm:$0xff] %vm61_vm0, %v4722_v63  ;;  %v4725_v39 = vadd.f32 %v4880_v61, %v4724_v57 }
 0xcbf   :  { %4763 = vst.msk [vmem:[%s7883_s13 + $0x58] sm:$0xff] %vm61_vm0, %v4733_v21 }
 0xcc0   :  { %4761 = vst.msk [vmem:[%s7883_s13 + $0x48] sm:$0xff] %vm61_vm0, %v4725_v39 }
 0xcc2   :  { %v5521_v60 = vpop.f32.mrb[156].mxu0 }
 0xcc3   :  { %v4746_v9 = vadd.f32 %v5521_v60, %v4880_v61  ;;  %v4737_v51 = vpop.f32.mrb[157].mxu0 }
 0xcc4   :  { %v4738_v50 = vadd.f32 %v4880_v61, %v4737_v51  ;;  %v5522_v12 = vpop.f32.mrb[158].mxu0 }
 0xcc5   :  { %4766 = vst.msk [vmem:[%s7883_s13 + $0x70] sm:$0xff] %vm61_vm0, %v4746_v9  ;;  %v4749_v29 = vadd.f32 %v5522_v12, %v4880_v61  ;;  %v4740_v46 = vpop.f32.mrb[159].mxu0 }
 0xcc6   :  { %4764 = vst.msk [vmem:[%s7883_s13 + $0x60] sm:$0xff] %vm61_vm0, %v4738_v50  ;;  %v4741_v5 = vadd.f32 %v4880_v61, %v4740_v46 }
 0xcc7   :  { %4767 = vst.msk [vmem:[%s7883_s13 + $0x78] sm:$0xff] %vm61_vm0, %v4749_v29 }
 0xcc8   :  { %4765 = vst.msk [vmem:[%s7883_s13 + $0x68] sm:$0xff] %vm61_vm0, %v4741_v5 }

</bundles_post_ra>
